<compile_context>
chip_gen: v6e
topology: v6e:2x2x1
jax: 0.10.0
libtpu: 0.0.40
codegen_flags: <defaults>
</compile_context>

<pallas_src>
import math
from functools import partial

import jax
import jax.numpy as jnp
from jax.experimental import pallas as pl
from jax.experimental.pallas import tpu as pltpu


_VMEM_LIMIT = 48 * 1024 * 1024   # below v7x's 64 MiB physical VMEM, > scoped default


def _prod(xs):
    p = 1
    for s in xs:
        p *= s
    return p


def _pick_tile(dim, preferred):
    """Largest tile <= preferred that divides `dim` (128-aligned when possible)."""
    if dim <= preferred:
        return dim
    if dim % 128 == 0:
        t = (preferred // 128) * 128
        while t >= 128:
            if dim % t == 0:
                return t
            t -= 128
    t = (preferred // 8) * 8
    while t >= 8:
        if dim % t == 0:
            return t
        t -= 8
    return dim


# ----------------------------------------------------------------------------
# Tiled matmul with fused bias / activation / residual epilogue
# ----------------------------------------------------------------------------
def _linear_kernel(x_ref, w_ref, b_ref, *rest, activation, has_residual):
    if has_residual:
        r_ref, o_ref, acc_ref = rest
    else:
        r_ref = None
        o_ref, acc_ref = rest

    k = pl.program_id(2)

    @pl.when(k == 0)
    def _():
        acc_ref[...] = jnp.zeros_like(acc_ref)

    acc_ref[...] += jnp.dot(x_ref[...], w_ref[...],
                            preferred_element_type=jnp.float32)

    @pl.when(k == pl.num_programs(2) - 1)
    def _():
        y = acc_ref[...] + b_ref[...].astype(jnp.float32)
        if activation == "relu":
            y = jnp.maximum(y, 0.0)
        if has_residual:
            y = y + r_ref[...].astype(jnp.float32)
        o_ref[...] = y.astype(o_ref.dtype)


def linear(x, w, b, *, activation="none", residual=None, out_dtype=None,
           tm=256, tn=256, tk=512):
    """(..., K) @ (K, N) + b [+ residual], bf16 in / f32 accumulate."""
    lead = x.shape[:-1]
    K = x.shape[-1]
    N = w.shape[-1]
    M = _prod(lead)
    out_dtype = out_dtype or x.dtype

    tm = _pick_tile(M, tm)
    tn = _pick_tile(N, tn)
    tk = _pick_tile(K, tk)
    grid = (M // tm, N // tn, K // tk)

    x2 = x.reshape(M, K)
    args = [x2, w, b.reshape(1, N)]
    in_specs = [
        pl.BlockSpec((tm, tk), lambda i, j, k: (i, k)),
        pl.BlockSpec((tk, tn), lambda i, j, k: (k, j)),
        pl.BlockSpec((1, tn), lambda i, j, k: (0, j)),
    ]
    if residual is not None:
        args.append(residual.reshape(M, N))
        in_specs.append(pl.BlockSpec((tm, tn), lambda i, j, k: (i, j)))

    out = pl.pallas_call(
        partial(_linear_kernel, activation=activation,
                has_residual=residual is not None),
        out_shape=jax.ShapeDtypeStruct((M, N), out_dtype),
        grid=grid,
        in_specs=in_specs,
        out_specs=pl.BlockSpec((tm, tn), lambda i, j, k: (i, j)),
        scratch_shapes=[pltpu.VMEM((tm, tn), jnp.float32)],
        compiler_params=pltpu.CompilerParams(
            dimension_semantics=("parallel", "parallel", "arbitrary"),
            vmem_limit_bytes=_VMEM_LIMIT),
    )(*args)
    return out.reshape(*lead, N)


# ----------------------------------------------------------------------------
# Fused LayerNorm + projection  (pre-LN blocks, QKV, FFN-1, final projection)
# ----------------------------------------------------------------------------
def _ln_linear_kernel(x_ref, g_ref, be_ref, w_ref, bw_ref, o_ref,
                      *, activation, eps):
    x = x_ref[...].astype(jnp.float32)
    mean = jnp.mean(x, axis=-1, keepdims=True)
    var = jnp.mean(jnp.square(x - mean), axis=-1, keepdims=True)
    xn = (x - mean) * jax.lax.rsqrt(var + eps)
    xn = xn * g_ref[...].astype(jnp.float32) + be_ref[...].astype(jnp.float32)
    y = jnp.dot(xn.astype(w_ref.dtype), w_ref[...],
                preferred_element_type=jnp.float32)
    y = y + bw_ref[...].astype(jnp.float32)
    if activation == "relu":
        y = jnp.maximum(y, 0.0)
    o_ref[...] = y.astype(o_ref.dtype)


def ln_linear(x, gamma, beta, w, b, *, activation="none", out_dtype=None,
              tm=256, tn=256, eps=1e-5):
    """LayerNorm(x) @ w + b, K (= d_model) kept fully resident."""
    lead = x.shape[:-1]
    D = x.shape[-1]
    N = w.shape[-1]
    M = _prod(lead)
    out_dtype = out_dtype or x.dtype

    tm = _pick_tile(M, tm)
    tn = _pick_tile(N, tn)
    grid = (M // tm, N // tn)

    out = pl.pallas_call(
        partial(_ln_linear_kernel, activation=activation, eps=eps),
        out_shape=jax.ShapeDtypeStruct((M, N), out_dtype),
        grid=grid,
        in_specs=[
            pl.BlockSpec((tm, D), lambda i, j: (i, 0)),
            pl.BlockSpec((1, D), lambda i, j: (0, 0)),
            pl.BlockSpec((1, D), lambda i, j: (0, 0)),
            pl.BlockSpec((D, tn), lambda i, j: (0, j)),
            pl.BlockSpec((1, tn), lambda i, j: (0, j)),
        ],
        out_specs=pl.BlockSpec((tm, tn), lambda i, j: (i, j)),
        compiler_params=pltpu.CompilerParams(
            dimension_semantics=("parallel", "parallel"),
            vmem_limit_bytes=_VMEM_LIMIT),
    )(x.reshape(M, D), gamma.reshape(1, D), beta.reshape(1, D),
      w, b.reshape(1, N))
    return out.reshape(*lead, N)


# ----------------------------------------------------------------------------
# Standalone LayerNorm (encoder output norm feeding the decoder cross-attn)
# ----------------------------------------------------------------------------
def _layernorm_kernel(x_ref, g_ref, b_ref, o_ref, *, eps):
    x = x_ref[...].astype(jnp.float32)
    mean = jnp.mean(x, axis=-1, keepdims=True)
    var = jnp.mean(jnp.square(x - mean), axis=-1, keepdims=True)
    xn = (x - mean) * jax.lax.rsqrt(var + eps)
    o_ref[...] = (xn * g_ref[...].astype(jnp.float32)
                  + b_ref[...].astype(jnp.float32)).astype(o_ref.dtype)


def layernorm(x, gamma, beta, *, eps=1e-5, tm=256):
    lead = x.shape[:-1]
    D = x.shape[-1]
    M = _prod(lead)
    tm = _pick_tile(M, tm)
    out = pl.pallas_call(
        partial(_layernorm_kernel, eps=eps),
        out_shape=jax.ShapeDtypeStruct((M, D), x.dtype),
        grid=(M // tm,),
        in_specs=[
            pl.BlockSpec((tm, D), lambda i: (i, 0)),
            pl.BlockSpec((1, D), lambda i: (0, 0)),
            pl.BlockSpec((1, D), lambda i: (0, 0)),
        ],
        out_specs=pl.BlockSpec((tm, D), lambda i: (i, 0)),
        compiler_params=pltpu.CompilerParams(
            dimension_semantics=("parallel",),
            vmem_limit_bytes=_VMEM_LIMIT),
    )(x.reshape(M, D), gamma.reshape(1, D), beta.reshape(1, D))
    return out.reshape(*lead, D)


# ----------------------------------------------------------------------------
# Flash-style multi-head attention, heads folded into the lane axis (H*dh)
# ----------------------------------------------------------------------------
def _flash_attn_kernel(q_ref, k_ref, v_ref, o_ref, m_sc, l_sc, acc_sc,
                       *, n_heads, scale, causal):
    j = pl.program_id(1)
    Tq = q_ref.shape[1]
    D = q_ref.shape[2]
    tkv = k_ref.shape[1]
    dh = D // n_heads

    @pl.when(j == 0)
    def _():
        m_sc[...] = jnp.full_like(m_sc, -jnp.inf)
        l_sc[...] = jnp.zeros_like(l_sc)
        acc_sc[...] = jnp.zeros_like(acc_sc)

    q = q_ref[0] * scale          # fold 1/sqrt(dh) into q (bf16, lane-dense)
    k = k_ref[0]
    v = v_ref[0]

    if causal:
        row = jax.lax.broadcasted_iota(jnp.int32, (Tq, tkv), 0)
        col = jax.lax.broadcasted_iota(jnp.int32, (Tq, tkv), 1) + j * tkv
        mask = col <= row

    # Static (unrolled) loop over heads: all matmuls stay 2-D on the
    # lane-dense activations; softmax statistics live in f32 VMEM scratch.
    for h in range(n_heads):
        sl = slice(h * dh, (h + 1) * dh)
        s = jax.lax.dot_general(q[:, sl], k[:, sl],
                                (((1,), (1,)), ((), ())),
                                preferred_element_type=jnp.float32)   # (Tq,tkv)
        if causal:
            s = jnp.where(mask, s, jnp.float32(-1e30))
        m_prev = m_sc[h]
        m_new = jnp.maximum(m_prev, jnp.max(s, axis=-1, keepdims=True))
        alpha = jnp.exp(m_prev - m_new)
        p = jnp.exp(s - m_new)
        l_sc[h] = alpha * l_sc[h] + jnp.sum(p, axis=-1, keepdims=True)
        acc_sc[h] = alpha * acc_sc[h] + jnp.dot(
            p.astype(v.dtype), v[:, sl], preferred_element_type=jnp.float32)
        m_sc[h] = m_new

    @pl.when(j == pl.num_programs(1) - 1)
    def _():
        parts = []
        for h in range(n_heads):
            inv = pl.reciprocal(l_sc[h], approx=True)
            parts.append(acc_sc[h] * inv)
        # single lane-dense (Tq, H*dh) store
        o_ref[0] = jnp.concatenate(parts, axis=-1).astype(o_ref.dtype)


def mha_attention(qsrc, kvsrc, *, d_model, n_heads, causal=False,
                  q_col_block=0, k_col_block=0, v_col_block=1, tkv=512):
    """qsrc: (B, Tq, *) / kvsrc: (B, Tk, *); the *_col_block indices pick which
    D-wide column block of the (possibly fused) activations is q / k / v, so
    fused QKV projections are consumed without any HBM split or transpose."""
    B, Tq = qsrc.shape[0], qsrc.shape[1]
    Tk = kvsrc.shape[1]
    D = d_model
    dh = D // n_heads
    scale = 1.0 / math.sqrt(dh)
    tkv = _pick_tile(Tk, tkv)
    grid = (B, Tk // tkv)

    return pl.pallas_call(
        partial(_flash_attn_kernel, n_heads=n_heads, scale=scale, causal=causal),
        out_shape=jax.ShapeDtypeStruct((B, Tq, D), qsrc.dtype),
        grid=grid,
        in_specs=[
            pl.BlockSpec((1, Tq, D), lambda b, j: (b, 0, q_col_block)),
            pl.BlockSpec((1, tkv, D), lambda b, j: (b, j, k_col_block)),
            pl.BlockSpec((1, tkv, D), lambda b, j: (b, j, v_col_block)),
        ],
        out_specs=pl.BlockSpec((1, Tq, D), lambda b, j: (b, 0, 0)),
        scratch_shapes=[
            pltpu.VMEM((n_heads, Tq, 1), jnp.float32),   # running max
            pltpu.VMEM((n_heads, Tq, 1), jnp.float32),   # running sum
            pltpu.VMEM((n_heads, Tq, dh), jnp.float32),  # output accumulator
        ],
        compiler_params=pltpu.CompilerParams(
            dimension_semantics=("parallel", "arbitrary"),
            vmem_limit_bytes=_VMEM_LIMIT),
    )(qsrc, kvsrc, kvsrc)


# ----------------------------------------------------------------------------
# Visual frontend: unsqueeze(1) + Conv2d(1, d_model, (3, D_in), pad=(1,0)) + ReLU,
# im2col built inside the kernel from three shifted slices (no HBM concat).
# ----------------------------------------------------------------------------
def _frontend_kernel(x_ref, w_ref, b_ref, o_ref, *, t_out, d_in):
    w = w_ref[...]
    acc = jnp.dot(x_ref[0, 0:t_out, :].astype(w.dtype), w[0:d_in],
                  preferred_element_type=jnp.float32)
    acc += jnp.dot(x_ref[0, 1:t_out + 1, :].astype(w.dtype), w[d_in:2 * d_in],
                   preferred_element_type=jnp.float32)
    acc += jnp.dot(x_ref[0, 2:t_out + 2, :].astype(w.dtype), w[2 * d_in:3 * d_in],
                   preferred_element_type=jnp.float32)
    y = jnp.maximum(acc + b_ref[...].astype(jnp.float32), 0.0)
    o_ref[0] = y.astype(o_ref.dtype)


def visual_frontend(x, p):
    """x: (N, Ti, D_in) float32 -> (N, Ti, d_model) bfloat16."""
    N, Ti, D_in = x.shape
    d_model = p["w"].shape[-1]
    xpad = jnp.pad(x, ((0, 0), (1, 1), (0, 0)))
    return pl.pallas_call(
        partial(_frontend_kernel, t_out=Ti, d_in=D_in),
        out_shape=jax.ShapeDtypeStruct((N, Ti, d_model), jnp.bfloat16),
        grid=(N,),
        in_specs=[
            pl.BlockSpec((1, Ti + 2, D_in), lambda n: (n, 0, 0)),
            pl.BlockSpec((3 * D_in, d_model), lambda n: (0, 0)),
            pl.BlockSpec((1, d_model), lambda n: (0, 0)),
        ],
        out_specs=pl.BlockSpec((1, Ti, d_model), lambda n: (n, 0, 0)),
        compiler_params=pltpu.CompilerParams(
            dimension_semantics=("parallel",),
            vmem_limit_bytes=_VMEM_LIMIT),
    )(xpad, p["w"], p["b"].reshape(1, d_model))


# ----------------------------------------------------------------------------
# Model pieces (pure glue around the kernels)
# ----------------------------------------------------------------------------
def encoder_layer(x, p, n_heads):
    D = x.shape[-1]
    qkv = ln_linear(x, p["ln1_g"], p["ln1_b"], p["w_qkv"], p["b_qkv"])
    ctx = mha_attention(qkv, qkv, d_model=D, n_heads=n_heads,
                        q_col_block=0, k_col_block=1, v_col_block=2)
    x = linear(ctx, p["wo"], p["bo"], residual=x)
    h = ln_linear(x, p["ln2_g"], p["ln2_b"], p["ff_w1"], p["ff_b1"],
                  activation="relu")
    x = linear(h, p["ff_w2"], p["ff_b2"], residual=x)
    return x


def decoder_layer(y, enc, p, n_heads):
    D = y.shape[-1]
    # masked (causal) self-attention
    qkv = ln_linear(y, p["ln1_g"], p["ln1_b"], p["w_qkv"], p["b_qkv"])
    ctx = mha_attention(qkv, qkv, d_model=D, n_heads=n_heads, causal=True,
                        q_col_block=0, k_col_block=1, v_col_block=2)
    y = linear(ctx, p["wo_self"], p["bo_self"], residual=y)
    # cross-attention over encoder output (fused K|V projection)
    q = ln_linear(y, p["ln2_g"], p["ln2_b"], p["wq_x"], p["bq_x"])
    kv = linear(enc, p["w_kv"], p["b_kv"])
    ctx = mha_attention(q, kv, d_model=D, n_heads=n_heads,
                        q_col_block=0, k_col_block=0, v_col_block=1)
    y = linear(ctx, p["wo_x"], p["bo_x"], residual=y)
    # feed-forward
    h = ln_linear(y, p["ln3_g"], p["ln3_b"], p["ff_w1"], p["ff_b1"],
                  activation="relu")
    y = linear(h, p["ff_w2"], p["ff_b2"], residual=y)
    return y


def sinusoid_pos_enc(T, D):
    pos = jnp.arange(T, dtype=jnp.float32)[:, None]
    i = jnp.arange(D)[None, :]
    angle = pos / jnp.power(10000.0, (2 * (i // 2)).astype(jnp.float32) / D)
    return jnp.where(i % 2 == 0, jnp.sin(angle), jnp.cos(angle))


def transformer_forward(params, padded_input, padded_target, *, n_heads):
    # visual frontend (the unsqueeze(1) + conv path)
    x = visual_frontend(padded_input, params["vf"])                 # (N,Ti,D) bf16
    N, Ti, D = x.shape
    # encoder
    h = (x.astype(jnp.float32) + sinusoid_pos_enc(Ti, D)).astype(jnp.bfloat16)
    for lp in params["enc_layers"]:
        h = encoder_layer(h, lp, n_heads)
    enc_out = layernorm(h, params["enc_ln_g"], params["enc_ln_b"])
    # decoder
    To = padded_target.shape[1]
    emb = jnp.take(params["dec_emb"], padded_target, axis=0)        # (N,To,D)
    y = (emb.astype(jnp.float32) * math.sqrt(D)
         + sinusoid_pos_enc(To, D)).astype(jnp.bfloat16)
    for lp in params["dec_layers"]:
        y = decoder_layer(y, enc_out, lp, n_heads)
    # fused final LayerNorm + output projection -> f32 logits
    pred = ln_linear(y, params["dec_ln_g"], params["dec_ln_b"],
                     params["out_w"], params["out_b"], out_dtype=jnp.float32)
    gold = padded_target
    return pred, gold


# ----------------------------------------------------------------------------
# Deterministic parameter init (xavier_uniform for dim>1, like the module).
# Weights stored in bf16 (MXU inputs); biases / LN params in f32.
# ----------------------------------------------------------------------------
def init_params(key, d_in, d_model, d_ff, vocab, n_enc_layers=2, n_dec_layers=2):
    keys = iter(jax.random.split(key, 256))

    def xav(shape):
        lim = math.sqrt(6.0 / (shape[0] + shape[1]))
        w = jax.random.uniform(next(keys), shape, jnp.float32, -lim, lim)
        return w.astype(jnp.bfloat16)

    def zeros(n): return jnp.zeros((n,), jnp.float32)
    def ones(n): return jnp.ones((n,), jnp.float32)

    def enc_layer():
        return {"ln1_g": ones(d_model), "ln1_b": zeros(d_model),
                "w_qkv": xav((d_model, 3 * d_model)), "b_qkv": zeros(3 * d_model),
                "wo": xav((d_model, d_model)), "bo": zeros(d_model),
                "ln2_g": ones(d_model), "ln2_b": zeros(d_model),
                "ff_w1": xav((d_model, d_ff)), "ff_b1": zeros(d_ff),
                "ff_w2": xav((d_ff, d_model)), "ff_b2": zeros(d_model)}

    def dec_layer():
        return {"ln1_g": ones(d_model), "ln1_b": zeros(d_model),
                "w_qkv": xav((d_model, 3 * d_model)), "b_qkv": zeros(3 * d_model),
                "wo_self": xav((d_model, d_model)), "bo_self": zeros(d_model),
                "ln2_g": ones(d_model), "ln2_b": zeros(d_model),
                "wq_x": xav((d_model, d_model)), "bq_x": zeros(d_model),
                "w_kv": xav((d_model, 2 * d_model)), "b_kv": zeros(2 * d_model),
                "wo_x": xav((d_model, d_model)), "bo_x": zeros(d_model),
                "ln3_g": ones(d_model), "ln3_b": zeros(d_model),
                "ff_w1": xav((d_model, d_ff)), "ff_b1": zeros(d_ff),
                "ff_w2": xav((d_ff, d_model)), "ff_b2": zeros(d_model)}

    return {
        "vf": {"w": xav((3 * d_in, d_model)), "b": zeros(d_model)},
        "enc_layers": [enc_layer() for _ in range(n_enc_layers)],
        "enc_ln_g": ones(d_model), "enc_ln_b": zeros(d_model),
        "dec_emb": xav((vocab, d_model)),
        "dec_layers": [dec_layer() for _ in range(n_dec_layers)],
        "dec_ln_g": ones(d_model), "dec_ln_b": zeros(d_model),
        "out_w": xav((d_model, vocab)), "out_b": zeros(vocab),
    }


# ----------------------------------------------------------------------------
if __name__ == "__main__":
    # Small, lane-aligned demo sizes (d_model / d_ff / vocab multiples of 128
    # per the (8,128) tiling guidance; production sizes should stay 128/256
    # aligned too).
    N, Ti, D_in = 2, 16, 64        # batch, input frames, per-frame feature
    d_model, n_heads, d_ff = 128, 4, 256
    vocab, To = 128, 8             # target vocabulary, target length

    key = jax.random.PRNGKey(0)
    k_in, k_tgt, k_par = jax.random.split(key, 3)
    padded_input = jax.random.normal(k_in, (N, Ti, D_in), jnp.float32)
    padded_target = jax.random.randint(k_tgt, (N, To), 0, vocab)

    params = init_params(k_par, D_in, d_model, d_ff, vocab,
                         n_enc_layers=2, n_dec_layers=2)

    fwd = jax.jit(partial(transformer_forward, n_heads=n_heads))
    pred, gold = fwd(params, padded_input, padded_target)
    jax.block_until_ready((pred, gold))

    assert pred.shape == (N, To, vocab)
    assert gold.shape == (N, To)
    assert bool(jnp.all(jnp.isfinite(pred)))
    print("KERNEL_OK")
</pallas_src>

<mosaic_0001>
module attributes {stable_mosaic.version = 11 : i64} {
  func.func @_frontend_kernel(%arg0: i32, %arg1: memref<1x18x64xf32, #tpu.memory_space<vmem>>, %arg2: memref<192x128xbf16, #tpu.memory_space<vmem>>, %arg3: memref<1x128xf32, #tpu.memory_space<vmem>>, %arg4: memref<1x16x128xbf16, #tpu.memory_space<vmem>>) attributes {dimension_semantics = [#tpu.dimension_semantics<parallel>], iteration_bounds = array<i64: 2>, scalar_prefetch = 0 : i64, scratch_operands = 0 : i64, tpu.core_type = #tpu.core_type<tc>, window_params = [{transform_indices = @transform_0, window_bounds = array<i64: 1, 18, 64>}, {pipeline_mode = #tpu.pipeline_mode<synchronous>, transform_indices = @transform_1, window_bounds = array<i64: 192, 128>}, {pipeline_mode = #tpu.pipeline_mode<synchronous>, transform_indices = @transform_2, window_bounds = array<i64: 1, 128>}, {transform_indices = @transform_3, window_bounds = array<i64: 1, 16, 128>}]} {
    %c0 = arith.constant 0 : index
    %c0_0 = arith.constant 0 : index
    %0 = vector.load %arg2[%c0, %c0_0] : memref<192x128xbf16, #tpu.memory_space<vmem>>, vector<192x128xbf16>
    %c0_1 = arith.constant 0 : index
    %c0_2 = arith.constant 0 : index
    %c0_3 = arith.constant 0 : index
    %1 = vector.load %arg1[%c0_1, %c0_2, %c0_3] : memref<1x18x64xf32, #tpu.memory_space<vmem>>, vector<1x16x64xf32>
    %2 = vector.shape_cast %1 : vector<1x16x64xf32> to vector<16x64xf32>
    %3 = arith.truncf %2 : vector<16x64xf32> to vector<16x64xbf16>
    %4 = vector.extract_strided_slice %0 {offsets = [0, 0], sizes = [64, 128], strides = [1, 1]} : vector<192x128xbf16> to vector<64x128xbf16>
    %cst = arith.constant dense<0.000000e+00> : vector<16x128xf32>
    %5 = tpu.matmul %3, %4, %cst {dimension_numbers = #tpu.dot_dimension_numbers<[1], [0], [0], [1], [0, 0, 1, 1], [], []>} : vector<16x64xbf16>, vector<64x128xbf16>, vector<16x128xf32> -> vector<16x128xf32>
    %c0_4 = arith.constant 0 : index
    %c1 = arith.constant 1 : index
    %c0_5 = arith.constant 0 : index
    %6 = vector.load %arg1[%c0_4, %c1, %c0_5] : memref<1x18x64xf32, #tpu.memory_space<vmem>>, vector<1x16x64xf32>
    %7 = vector.shape_cast %6 : vector<1x16x64xf32> to vector<16x64xf32>
    %8 = arith.truncf %7 : vector<16x64xf32> to vector<16x64xbf16>
    %9 = vector.extract_strided_slice %0 {offsets = [64, 0], sizes = [64, 128], strides = [1, 1]} : vector<192x128xbf16> to vector<64x128xbf16>
    %cst_6 = arith.constant dense<0.000000e+00> : vector<16x128xf32>
    %10 = tpu.matmul %8, %9, %cst_6 {dimension_numbers = #tpu.dot_dimension_numbers<[1], [0], [0], [1], [0, 0, 1, 1], [], []>} : vector<16x64xbf16>, vector<64x128xbf16>, vector<16x128xf32> -> vector<16x128xf32>
    %11 = arith.addf %5, %10 : vector<16x128xf32>
    %c0_7 = arith.constant 0 : index
    %c2 = arith.constant 2 : index
    %c0_8 = arith.constant 0 : index
    %12 = vector.load %arg1[%c0_7, %c2, %c0_8] : memref<1x18x64xf32, #tpu.memory_space<vmem>>, vector<1x16x64xf32>
    %13 = vector.shape_cast %12 : vector<1x16x64xf32> to vector<16x64xf32>
    %14 = arith.truncf %13 : vector<16x64xf32> to vector<16x64xbf16>
    %15 = vector.extract_strided_slice %0 {offsets = [128, 0], sizes = [64, 128], strides = [1, 1]} : vector<192x128xbf16> to vector<64x128xbf16>
    %cst_9 = arith.constant dense<0.000000e+00> : vector<16x128xf32>
    %16 = tpu.matmul %14, %15, %cst_9 {dimension_numbers = #tpu.dot_dimension_numbers<[1], [0], [0], [1], [0, 0, 1, 1], [], []>} : vector<16x64xbf16>, vector<64x128xbf16>, vector<16x128xf32> -> vector<16x128xf32>
    %17 = arith.addf %11, %16 : vector<16x128xf32>
    %c0_10 = arith.constant 0 : index
    %c0_11 = arith.constant 0 : index
    %18 = vector.load %arg3[%c0_10, %c0_11] : memref<1x128xf32, #tpu.memory_space<vmem>>, vector<1x128xf32>
    %19 = vector.broadcast %18 : vector<1x128xf32> to vector<16x128xf32>
    %20 = arith.addf %17, %19 : vector<16x128xf32>
    %cst_12 = arith.constant 0.000000e+00 : f32
    %21 = vector.broadcast %cst_12 : f32 to vector<16x128xf32>
    %22 = arith.maximumf %20, %21 : vector<16x128xf32>
    %23 = arith.truncf %22 : vector<16x128xf32> to vector<16x128xbf16>
    %c0_13 = arith.constant 0 : index
    %c0_14 = arith.constant 0 : index
    %c0_15 = arith.constant 0 : index
    %24 = vector.load %arg4[%c0_13, %c0_14, %c0_15] : memref<1x16x128xbf16, #tpu.memory_space<vmem>>, vector<1x16x128xbf16>
    %25 = vector.shape_cast %24 : vector<1x16x128xbf16> to vector<16x128xbf16>
    %26 = vector.shape_cast %23 : vector<16x128xbf16> to vector<1x16x128xbf16>
    tpu.vector_store %arg4[%c0_13, %c0_14, %c0_15], %26 {strides = array<i32>} : memref<1x16x128xbf16, #tpu.memory_space<vmem>>, vector<1x16x128xbf16>,
    return
  }
  func.func @transform_0(%arg0: i32) -> (i32, i32, i32) {
    %c0_i32 = arith.constant 0 : i32
    %c0_i32_0 = arith.constant 0 : i32
    %c0_i32_1 = arith.constant 0 : i32
    return %arg0, %c0_i32, %c0_i32_0 : i32, i32, i32
  }
  func.func @transform_1(%arg0: i32) -> (i32, i32) {
    %c0_i32 = arith.constant 0 : i32
    %c0_i32_0 = arith.constant 0 : i32
    %c0_i32_1 = arith.constant 0 : i32
    return %c0_i32, %c0_i32_0 : i32, i32
  }
  func.func @transform_2(%arg0: i32) -> (i32, i32) {
    %c0_i32 = arith.constant 0 : i32
    %c0_i32_0 = arith.constant 0 : i32
    %c0_i32_1 = arith.constant 0 : i32
    return %c0_i32, %c0_i32_0 : i32, i32
  }
  func.func @transform_3(%arg0: i32) -> (i32, i32, i32) {
    %c0_i32 = arith.constant 0 : i32
    %c0_i32_0 = arith.constant 0 : i32
    %c0_i32_1 = arith.constant 0 : i32
    return %arg0, %c0_i32, %c0_i32_0 : i32, i32, i32
  }
}

module attributes {stable_mosaic.version = 11 : i64} {
  func.func @_ln_linear_kernel(%arg0: i32, %arg1: i32, %arg2: memref<32x128xbf16, #tpu.memory_space<vmem>>, %arg3: memref<1x128xf32, #tpu.memory_space<vmem>>, %arg4: memref<1x128xf32, #tpu.memory_space<vmem>>, %arg5: memref<128x128xbf16, #tpu.memory_space<vmem>>, %arg6: memref<1x128xf32, #tpu.memory_space<vmem>>, %arg7: memref<32x128xbf16, #tpu.memory_space<vmem>>) attributes {dimension_semantics = [#tpu.dimension_semantics<parallel>, #tpu.dimension_semantics<parallel>], iteration_bounds = array<i64: 1, 3>, scalar_prefetch = 0 : i64, scratch_operands = 0 : i64, tpu.core_type = #tpu.core_type<tc>, window_params = [{transform_indices = @transform_0, window_bounds = array<i64: 32, 128>}, {pipeline_mode = #tpu.pipeline_mode<synchronous>, transform_indices = @transform_1, window_bounds = array<i64: 1, 128>}, {pipeline_mode = #tpu.pipeline_mode<synchronous>, transform_indices = @transform_2, window_bounds = array<i64: 1, 128>}, {transform_indices = @transform_3, window_bounds = array<i64: 128, 128>}, {transform_indices = @transform_4, window_bounds = array<i64: 1, 128>}, {transform_indices = @transform_5, window_bounds = array<i64: 32, 128>}]} {
    %c0 = arith.constant 0 : index
    %c0_0 = arith.constant 0 : index
    %0 = vector.load %arg2[%c0, %c0_0] : memref<32x128xbf16, #tpu.memory_space<vmem>>, vector<32x128xbf16>
    %1 = arith.extf %0 : vector<32x128xbf16> to vector<32x128xf32>
    %cst = arith.constant dense<0.000000e+00> : vector<32xf32>
    %2 = vector.multi_reduction <add>, %1, %cst [1] : vector<32x128xf32> to vector<32xf32>
    %3 = vector.shape_cast %2 : vector<32xf32> to vector<32x1xf32>
    %cst_1 = arith.constant 1.280000e+02 : f32
    %4 = vector.broadcast %cst_1 : f32 to vector<32x1xf32>
    %5 = arith.divf %3, %4 : vector<32x1xf32>
    %6 = vector.broadcast %5 : vector<32x1xf32> to vector<32x128xf32>
    %7 = arith.subf %1, %6 : vector<32x128xf32>
    %8 = arith.mulf %7, %7 : vector<32x128xf32>
    %cst_2 = arith.constant dense<0.000000e+00> : vector<32xf32>
    %9 = vector.multi_reduction <add>, %8, %cst_2 [1] : vector<32x128xf32> to vector<32xf32>
    %10 = vector.shape_cast %9 : vector<32xf32> to vector<32x1xf32>
    %cst_3 = arith.constant 1.280000e+02 : f32
    %11 = vector.broadcast %cst_3 : f32 to vector<32x1xf32>
    %12 = arith.divf %10, %11 : vector<32x1xf32>
    %13 = vector.broadcast %5 : vector<32x1xf32> to vector<32x128xf32>
    %14 = arith.subf %1, %13 : vector<32x128xf32>
    %cst_4 = arith.constant 9.99999974E-6 : f32
    %15 = vector.broadcast %cst_4 : f32 to vector<32x1xf32>
    %16 = arith.addf %12, %15 : vector<32x1xf32>
    %17 = math.rsqrt %16 : vector<32x1xf32>
    %18 = vector.broadcast %17 : vector<32x1xf32> to vector<32x128xf32>
    %19 = arith.mulf %14, %18 : vector<32x128xf32>
    %c0_5 = arith.constant 0 : index
    %c0_6 = arith.constant 0 : index
    %20 = vector.load %arg3[%c0_5, %c0_6] : memref<1x128xf32, #tpu.memory_space<vmem>>, vector<1x128xf32>
    %21 = vector.broadcast %20 : vector<1x128xf32> to vector<32x128xf32>
    %22 = arith.mulf %19, %21 : vector<32x128xf32>
    %c0_7 = arith.constant 0 : index
    %c0_8 = arith.constant 0 : index
    %23 = vector.load %arg4[%c0_7, %c0_8] : memref<1x128xf32, #tpu.memory_space<vmem>>, vector<1x128xf32>
    %24 = vector.broadcast %23 : vector<1x128xf32> to vector<32x128xf32>
    %25 = arith.addf %22, %24 : vector<32x128xf32>
    %26 = arith.truncf %25 : vector<32x128xf32> to vector<32x128xbf16>
    %c0_9 = arith.constant 0 : index
    %c0_10 = arith.constant 0 : index
    %27 = vector.load %arg5[%c0_9, %c0_10] : memref<128x128xbf16, #tpu.memory_space<vmem>>, vector<128x128xbf16>
    %cst_11 = arith.constant dense<0.000000e+00> : vector<32x128xf32>
    %28 = tpu.matmul %26, %27, %cst_11 {dimension_numbers = #tpu.dot_dimension_numbers<[1], [0], [0], [1], [0, 0, 1, 1], [], []>} : vector<32x128xbf16>, vector<128x128xbf16>, vector<32x128xf32> -> vector<32x128xf32>
    %c0_12 = arith.constant 0 : index
    %c0_13 = arith.constant 0 : index
    %29 = vector.load %arg6[%c0_12, %c0_13] : memref<1x128xf32, #tpu.memory_space<vmem>>, vector<1x128xf32>
    %30 = vector.broadcast %29 : vector<1x128xf32> to vector<32x128xf32>
    %31 = arith.addf %28, %30 : vector<32x128xf32>
    %32 = arith.truncf %31 : vector<32x128xf32> to vector<32x128xbf16>
    %c0_14 = arith.constant 0 : index
    %c0_15 = arith.constant 0 : index
    %33 = vector.load %arg7[%c0_14, %c0_15] : memref<32x128xbf16, #tpu.memory_space<vmem>>, vector<32x128xbf16>
    tpu.vector_store %arg7[%c0_14, %c0_15], %32 {strides = array<i32>} : memref<32x128xbf16, #tpu.memory_space<vmem>>, vector<32x128xbf16>,
    return
  }
  func.func @transform_0(%arg0: i32, %arg1: i32) -> (i32, i32) {
    %c0_i32 = arith.constant 0 : i32
    %c0_i32_0 = arith.constant 0 : i32
    return %arg0, %c0_i32 : i32, i32
  }
  func.func @transform_1(%arg0: i32, %arg1: i32) -> (i32, i32) {
    %c0_i32 = arith.constant 0 : i32
    %c0_i32_0 = arith.constant 0 : i32
    %c0_i32_1 = arith.constant 0 : i32
    return %c0_i32, %c0_i32_0 : i32, i32
  }
  func.func @transform_2(%arg0: i32, %arg1: i32) -> (i32, i32) {
    %c0_i32 = arith.constant 0 : i32
    %c0_i32_0 = arith.constant 0 : i32
    %c0_i32_1 = arith.constant 0 : i32
    return %c0_i32, %c0_i32_0 : i32, i32
  }
  func.func @transform_3(%arg0: i32, %arg1: i32) -> (i32, i32) {
    %c0_i32 = arith.constant 0 : i32
    %c0_i32_0 = arith.constant 0 : i32
    return %c0_i32, %arg1 : i32, i32
  }
  func.func @transform_4(%arg0: i32, %arg1: i32) -> (i32, i32) {
    %c0_i32 = arith.constant 0 : i32
    %c0_i32_0 = arith.constant 0 : i32
    return %c0_i32, %arg1 : i32, i32
  }
  func.func @transform_5(%arg0: i32, %arg1: i32) -> (i32, i32) {
    %c0_i32 = arith.constant 0 : i32
    return %arg0, %arg1 : i32, i32
  }
}

module attributes {stable_mosaic.version = 11 : i64} {
  func.func @_linear_kernel(%arg0: i32, %arg1: i32, %arg2: i32, %arg3: memref<32x128xbf16, #tpu.memory_space<vmem>>, %arg4: memref<128x128xbf16, #tpu.memory_space<vmem>>, %arg5: memref<1x128xf32, #tpu.memory_space<vmem>>, %arg6: memref<32x128xbf16, #tpu.memory_space<vmem>>, %arg7: memref<32x128xbf16, #tpu.memory_space<vmem>>, %arg8: memref<32x128xf32, #tpu.memory_space<vmem>>) attributes {dimension_semantics = [#tpu.dimension_semantics<parallel>, #tpu.dimension_semantics<parallel>, #tpu.dimension_semantics<arbitrary>], iteration_bounds = array<i64: 1, 1, 1>, scalar_prefetch = 0 : i64, scratch_operands = 1 : i64, tpu.core_type = #tpu.core_type<tc>, window_params = [{transform_indices = @transform_0, window_bounds = array<i64: 32, 128>}, {transform_indices = @transform_1, window_bounds = array<i64: 128, 128>}, {transform_indices = @transform_2, window_bounds = array<i64: 1, 128>}, {transform_indices = @transform_3, window_bounds = array<i64: 32, 128>}, {transform_indices = @transform_4, window_bounds = array<i64: 32, 128>}]} {
    %c0_i32 = arith.constant 0 : i32
    %0 = arith.cmpi eq, %arg2, %c0_i32 : i32
    %1 = arith.extui %0 : i1 to i32
    %c0_i32_0 = arith.constant 0 : i32
    %2 = arith.cmpi ne, %1, %c0_i32_0 : i32
    scf.if %2 {
      %cst_10 = arith.constant 0.000000e+00 : f32
      %12 = vector.broadcast %cst_10 : f32 to vector<32x128xf32>
      %c0_11 = arith.constant 0 : index
      %c0_12 = arith.constant 0 : index
      %13 = vector.load %arg8[%c0_11, %c0_12] : memref<32x128xf32, #tpu.memory_space<vmem>>, vector<32x128xf32>
      tpu.vector_store %arg8[%c0_11, %c0_12], %12 {strides = array<i32>} : memref<32x128xf32, #tpu.memory_space<vmem>>, vector<32x128xf32>,
    } else {
    }
    %c0 = arith.constant 0 : index
    %c0_1 = arith.constant 0 : index
    %3 = vector.load %arg8[%c0, %c0_1] : memref<32x128xf32, #tpu.memory_space<vmem>>, vector<32x128xf32>
    %c0_2 = arith.constant 0 : index
    %c0_3 = arith.constant 0 : index
    %4 = vector.load %arg3[%c0_2, %c0_3] : memref<32x128xbf16, #tpu.memory_space<vmem>>, vector<32x128xbf16>
    %c0_4 = arith.constant 0 : index
    %c0_5 = arith.constant 0 : index
    %5 = vector.load %arg4[%c0_4, %c0_5] : memref<128x128xbf16, #tpu.memory_space<vmem>>, vector<128x128xbf16>
    %cst = arith.constant dense<0.000000e+00> : vector<32x128xf32>
    %6 = tpu.matmul %4, %5, %cst {dimension_numbers = #tpu.dot_dimension_numbers<[1], [0], [0], [1], [0, 0, 1, 1], [], []>} : vector<32x128xbf16>, vector<128x128xbf16>, vector<32x128xf32> -> vector<32x128xf32>
    %7 = arith.addf %3, %6 : vector<32x128xf32>
    %c0_6 = arith.constant 0 : index
    %c0_7 = arith.constant 0 : index
    %8 = vector.load %arg8[%c0_6, %c0_7] : memref<32x128xf32, #tpu.memory_space<vmem>>, vector<32x128xf32>
    tpu.vector_store %arg8[%c0_6, %c0_7], %7 {strides = array<i32>} : memref<32x128xf32, #tpu.memory_space<vmem>>, vector<32x128xf32>,
    %c0_i32_8 = arith.constant 0 : i32
    %9 = arith.cmpi eq, %arg2, %c0_i32_8 : i32
    %10 = arith.extui %9 : i1 to i32
    %c0_i32_9 = arith.constant 0 : i32
    %11 = arith.cmpi ne, %10, %c0_i32_9 : i32
    scf.if %11 {
      %c0_10 = arith.constant 0 : index
      %c0_11 = arith.constant 0 : index
      %12 = vector.load %arg8[%c0_10, %c0_11] : memref<32x128xf32, #tpu.memory_space<vmem>>, vector<32x128xf32>
      %c0_12 = arith.constant 0 : index
      %c0_13 = arith.constant 0 : index
      %13 = vector.load %arg5[%c0_12, %c0_13] : memref<1x128xf32, #tpu.memory_space<vmem>>, vector<1x128xf32>
      %14 = vector.broadcast %13 : vector<1x128xf32> to vector<32x128xf32>
      %15 = arith.addf %12, %14 : vector<32x128xf32>
      %c0_14 = arith.constant 0 : index
      %c0_15 = arith.constant 0 : index
      %16 = vector.load %arg6[%c0_14, %c0_15] : memref<32x128xbf16, #tpu.memory_space<vmem>>, vector<32x128xbf16>
      %17 = arith.extf %16 : vector<32x128xbf16> to vector<32x128xf32>
      %18 = arith.addf %15, %17 : vector<32x128xf32>
      %19 = arith.truncf %18 : vector<32x128xf32> to vector<32x128xbf16>
      %c0_16 = arith.constant 0 : index
      %c0_17 = arith.constant 0 : index
      %20 = vector.load %arg7[%c0_16, %c0_17] : memref<32x128xbf16, #tpu.memory_space<vmem>>, vector<32x128xbf16>
      tpu.vector_store %arg7[%c0_16, %c0_17], %19 {strides = array<i32>} : memref<32x128xbf16, #tpu.memory_space<vmem>>, vector<32x128xbf16>,
    } else {
    }
    return
  }
  func.func @transform_0(%arg0: i32, %arg1: i32, %arg2: i32) -> (i32, i32) {
    %c0_i32 = arith.constant 0 : i32
    return %arg0, %arg2 : i32, i32
  }
  func.func @transform_1(%arg0: i32, %arg1: i32, %arg2: i32) -> (i32, i32) {
    %c0_i32 = arith.constant 0 : i32
    return %arg2, %arg1 : i32, i32
  }
  func.func @transform_2(%arg0: i32, %arg1: i32, %arg2: i32) -> (i32, i32) {
    %c0_i32 = arith.constant 0 : i32
    %c0_i32_0 = arith.constant 0 : i32
    return %c0_i32, %arg1 : i32, i32
  }
  func.func @transform_3(%arg0: i32, %arg1: i32, %arg2: i32) -> (i32, i32) {
    %c0_i32 = arith.constant 0 : i32
    return %arg0, %arg1 : i32, i32
  }
  func.func @transform_4(%arg0: i32, %arg1: i32, %arg2: i32) -> (i32, i32) {
    %c0_i32 = arith.constant 0 : i32
    return %arg0, %arg1 : i32, i32
  }
}

module attributes {stable_mosaic.version = 11 : i64} {
  func.func @_flash_attn_kernel(%arg0: i32, %arg1: i32, %arg2: memref<1x16x128xbf16, #tpu.memory_space<vmem>>, %arg3: memref<1x16x128xbf16, #tpu.memory_space<vmem>>, %arg4: memref<1x16x128xbf16, #tpu.memory_space<vmem>>, %arg5: memref<1x16x128xbf16, #tpu.memory_space<vmem>>, %arg6: memref<4x16x1xf32, #tpu.memory_space<vmem>>, %arg7: memref<4x16x1xf32, #tpu.memory_space<vmem>>, %arg8: memref<4x16x32xf32, #tpu.memory_space<vmem>>) attributes {dimension_semantics = [#tpu.dimension_semantics<parallel>, #tpu.dimension_semantics<arbitrary>], iteration_bounds = array<i64: 2, 1>, scalar_prefetch = 0 : i64, scratch_operands = 3 : i64, tpu.core_type = #tpu.core_type<tc>, window_params = [{transform_indices = @transform_0, window_bounds = array<i64: 1, 16, 128>}, {transform_indices = @transform_1, window_bounds = array<i64: 1, 16, 128>}, {transform_indices = @transform_2, window_bounds = array<i64: 1, 16, 128>}, {transform_indices = @transform_3, window_bounds = array<i64: 1, 16, 128>}]} {
    %c0_i32 = arith.constant 0 : i32
    %0 = arith.cmpi eq, %arg1, %c0_i32 : i32
    %1 = arith.extui %0 : i1 to i32
    %c0_i32_0 = arith.constant 0 : i32
    %2 = arith.cmpi ne, %1, %c0_i32_0 : i32
    scf.if %2 {
      %cst_96 = arith.constant 0xFF800000 : f32
      %158 = vector.broadcast %cst_96 : f32 to vector<4x16x1xf32>
      %c0_97 = arith.constant 0 : index
      %c0_98 = arith.constant 0 : index
      %c0_99 = arith.constant 0 : index
      %159 = vector.load %arg6[%c0_97, %c0_98, %c0_99] : memref<4x16x1xf32, #tpu.memory_space<vmem>>, vector<4x16x1xf32>
      tpu.vector_store %arg6[%c0_97, %c0_98, %c0_99], %158 {strides = array<i32>} : memref<4x16x1xf32, #tpu.memory_space<vmem>>, vector<4x16x1xf32>,
      %cst_100 = arith.constant 0.000000e+00 : f32
      %160 = vector.broadcast %cst_100 : f32 to vector<4x16x1xf32>
      %c0_101 = arith.constant 0 : index
      %c0_102 = arith.constant 0 : index
      %c0_103 = arith.constant 0 : index
      %161 = vector.load %arg7[%c0_101, %c0_102, %c0_103] : memref<4x16x1xf32, #tpu.memory_space<vmem>>, vector<4x16x1xf32>
      tpu.vector_store %arg7[%c0_101, %c0_102, %c0_103], %160 {strides = array<i32>} : memref<4x16x1xf32, #tpu.memory_space<vmem>>, vector<4x16x1xf32>,
      %cst_104 = arith.constant 0.000000e+00 : f32
      %162 = vector.broadcast %cst_104 : f32 to vector<4x16x32xf32>
      %c0_105 = arith.constant 0 : index
      %c0_106 = arith.constant 0 : index
      %c0_107 = arith.constant 0 : index
      %163 = vector.load %arg8[%c0_105, %c0_106, %c0_107] : memref<4x16x32xf32, #tpu.memory_space<vmem>>, vector<4x16x32xf32>
      tpu.vector_store %arg8[%c0_105, %c0_106, %c0_107], %162 {strides = array<i32>} : memref<4x16x32xf32, #tpu.memory_space<vmem>>, vector<4x16x32xf32>,
    } else {
    }
    %c0 = arith.constant 0 : index
    %c0_1 = arith.constant 0 : index
    %c0_2 = arith.constant 0 : index
    %3 = vector.load %arg2[%c0, %c0_1, %c0_2] : memref<1x16x128xbf16, #tpu.memory_space<vmem>>, vector<1x16x128xbf16>
    %4 = vector.shape_cast %3 : vector<1x16x128xbf16> to vector<16x128xbf16>
    %cst = arith.constant 1.767580e-01 : bf16
    %5 = vector.broadcast %cst : bf16 to vector<16x128xbf16>
    %6 = arith.mulf %4, %5 : vector<16x128xbf16>
    %c0_3 = arith.constant 0 : index
    %c0_4 = arith.constant 0 : index
    %c0_5 = arith.constant 0 : index
    %7 = vector.load %arg3[%c0_3, %c0_4, %c0_5] : memref<1x16x128xbf16, #tpu.memory_space<vmem>>, vector<1x16x128xbf16>
    %8 = vector.shape_cast %7 : vector<1x16x128xbf16> to vector<16x128xbf16>
    %c0_6 = arith.constant 0 : index
    %c0_7 = arith.constant 0 : index
    %c0_8 = arith.constant 0 : index
    %9 = vector.load %arg4[%c0_6, %c0_7, %c0_8] : memref<1x16x128xbf16, #tpu.memory_space<vmem>>, vector<1x16x128xbf16>
    %10 = vector.shape_cast %9 : vector<1x16x128xbf16> to vector<16x128xbf16>
    %11 = vector.extract_strided_slice %6 {offsets = [0, 0], sizes = [16, 32], strides = [1, 1]} : vector<16x128xbf16> to vector<16x32xbf16>
    %12 = vector.extract_strided_slice %8 {offsets = [0, 0], sizes = [16, 32], strides = [1, 1]} : vector<16x128xbf16> to vector<16x32xbf16>
    %cst_9 = arith.constant dense<0.000000e+00> : vector<16x16xf32>
    %13 = tpu.matmul %11, %12, %cst_9 {dimension_numbers = #tpu.dot_dimension_numbers<[1], [1], [0], [0], [0, 0, 1, 0], [], []>} : vector<16x32xbf16>, vector<16x32xbf16>, vector<16x16xf32> -> vector<16x16xf32>
    %c0_10 = arith.constant 0 : index
    %c0_11 = arith.constant 0 : index
    %c0_12 = arith.constant 0 : index
    %14 = vector.load %arg6[%c0_10, %c0_11, %c0_12] : memref<4x16x1xf32, #tpu.memory_space<vmem>>, vector<1x16x1xf32>
    %15 = vector.shape_cast %14 : vector<1x16x1xf32> to vector<16x1xf32>
    %cst_13 = arith.constant dense<0xFF800000> : vector<16xf32>
    %16 = vector.multi_reduction <maximumf>, %13, %cst_13 [1] : vector<16x16xf32> to vector<16xf32>
    %17 = vector.shape_cast %16 : vector<16xf32> to vector<16x1xf32>
    %18 = arith.maximumf %15, %17 : vector<16x1xf32>
    %19 = arith.subf %15, %18 : vector<16x1xf32>
    %20 = math.exp %19 : vector<16x1xf32>
    %21 = vector.broadcast %18 : vector<16x1xf32> to vector<16x16xf32>
    %22 = arith.subf %13, %21 : vector<16x16xf32>
    %23 = math.exp %22 : vector<16x16xf32>
    %c0_14 = arith.constant 0 : index
    %c0_15 = arith.constant 0 : index
    %c0_16 = arith.constant 0 : index
    %24 = vector.load %arg7[%c0_14, %c0_15, %c0_16] : memref<4x16x1xf32, #tpu.memory_space<vmem>>, vector<1x16x1xf32>
    %25 = vector.shape_cast %24 : vector<1x16x1xf32> to vector<16x1xf32>
    %26 = arith.mulf %20, %25 : vector<16x1xf32>
    %cst_17 = arith.constant dense<0.000000e+00> : vector<16xf32>
    %27 = vector.multi_reduction <add>, %23, %cst_17 [1] : vector<16x16xf32> to vector<16xf32>
    %28 = vector.shape_cast %27 : vector<16xf32> to vector<16x1xf32>
    %29 = arith.addf %26, %28 : vector<16x1xf32>
    %c0_18 = arith.constant 0 : index
    %c0_19 = arith.constant 0 : index
    %c0_20 = arith.constant 0 : index
    %30 = vector.load %arg7[%c0_18, %c0_19, %c0_20] : memref<4x16x1xf32, #tpu.memory_space<vmem>>, vector<1x16x1xf32>
    %31 = vector.shape_cast %30 : vector<1x16x1xf32> to vector<16x1xf32>
    %32 = vector.shape_cast %29 : vector<16x1xf32> to vector<1x16x1xf32>
    tpu.vector_store %arg7[%c0_18, %c0_19, %c0_20], %32 {strides = array<i32>} : memref<4x16x1xf32, #tpu.memory_space<vmem>>, vector<1x16x1xf32>,
    %c0_21 = arith.constant 0 : index
    %c0_22 = arith.constant 0 : index
    %c0_23 = arith.constant 0 : index
    %33 = vector.load %arg8[%c0_21, %c0_22, %c0_23] : memref<4x16x32xf32, #tpu.memory_space<vmem>>, vector<1x16x32xf32>
    %34 = vector.shape_cast %33 : vector<1x16x32xf32> to vector<16x32xf32>
    %35 = vector.broadcast %20 : vector<16x1xf32> to vector<16x32xf32>
    %36 = arith.mulf %35, %34 : vector<16x32xf32>
    %37 = arith.truncf %23 : vector<16x16xf32> to vector<16x16xbf16>
    %38 = vector.extract_strided_slice %10 {offsets = [0, 0], sizes = [16, 32], strides = [1, 1]} : vector<16x128xbf16> to vector<16x32xbf16>
    %cst_24 = arith.constant dense<0.000000e+00> : vector<16x32xf32>
    %39 = tpu.matmul %37, %38, %cst_24 {dimension_numbers = #tpu.dot_dimension_numbers<[1], [0], [0], [1], [0, 0, 1, 1], [], []>} : vector<16x16xbf16>, vector<16x32xbf16>, vector<16x32xf32> -> vector<16x32xf32>
    %40 = arith.addf %36, %39 : vector<16x32xf32>
    %c0_25 = arith.constant 0 : index
    %c0_26 = arith.constant 0 : index
    %c0_27 = arith.constant 0 : index
    %41 = vector.load %arg8[%c0_25, %c0_26, %c0_27] : memref<4x16x32xf32, #tpu.memory_space<vmem>>, vector<1x16x32xf32>
    %42 = vector.shape_cast %41 : vector<1x16x32xf32> to vector<16x32xf32>
    %43 = vector.shape_cast %40 : vector<16x32xf32> to vector<1x16x32xf32>
    tpu.vector_store %arg8[%c0_25, %c0_26, %c0_27], %43 {strides = array<i32>} : memref<4x16x32xf32, #tpu.memory_space<vmem>>, vector<1x16x32xf32>,
    %c0_28 = arith.constant 0 : index
    %c0_29 = arith.constant 0 : index
    %c0_30 = arith.constant 0 : index
    %44 = vector.load %arg6[%c0_28, %c0_29, %c0_30] : memref<4x16x1xf32, #tpu.memory_space<vmem>>, vector<1x16x1xf32>
    %45 = vector.shape_cast %44 : vector<1x16x1xf32> to vector<16x1xf32>
    %46 = vector.shape_cast %18 : vector<16x1xf32> to vector<1x16x1xf32>
    tpu.vector_store %arg6[%c0_28, %c0_29, %c0_30], %46 {strides = array<i32>} : memref<4x16x1xf32, #tpu.memory_space<vmem>>, vector<1x16x1xf32>,
    %47 = vector.extract_strided_slice %6 {offsets = [0, 32], sizes = [16, 32], strides = [1, 1]} : vector<16x128xbf16> to vector<16x32xbf16>
    %48 = vector.extract_strided_slice %8 {offsets = [0, 32], sizes = [16, 32], strides = [1, 1]} : vector<16x128xbf16> to vector<16x32xbf16>
    %cst_31 = arith.constant dense<0.000000e+00> : vector<16x16xf32>
    %49 = tpu.matmul %47, %48, %cst_31 {dimension_numbers = #tpu.dot_dimension_numbers<[1], [1], [0], [0], [0, 0, 1, 0], [], []>} : vector<16x32xbf16>, vector<16x32xbf16>, vector<16x16xf32> -> vector<16x16xf32>
    %c1 = arith.constant 1 : index
    %c0_32 = arith.constant 0 : index
    %c0_33 = arith.constant 0 : index
    %50 = vector.load %arg6[%c1, %c0_32, %c0_33] : memref<4x16x1xf32, #tpu.memory_space<vmem>>, vector<1x16x1xf32>
    %51 = vector.shape_cast %50 : vector<1x16x1xf32> to vector<16x1xf32>
    %cst_34 = arith.constant dense<0xFF800000> : vector<16xf32>
    %52 = vector.multi_reduction <maximumf>, %49, %cst_34 [1] : vector<16x16xf32> to vector<16xf32>
    %53 = vector.shape_cast %52 : vector<16xf32> to vector<16x1xf32>
    %54 = arith.maximumf %51, %53 : vector<16x1xf32>
    %55 = arith.subf %51, %54 : vector<16x1xf32>
    %56 = math.exp %55 : vector<16x1xf32>
    %57 = vector.broadcast %54 : vector<16x1xf32> to vector<16x16xf32>
    %58 = arith.subf %49, %57 : vector<16x16xf32>
    %59 = math.exp %58 : vector<16x16xf32>
    %c1_35 = arith.constant 1 : index
    %c0_36 = arith.constant 0 : index
    %c0_37 = arith.constant 0 : index
    %60 = vector.load %arg7[%c1_35, %c0_36, %c0_37] : memref<4x16x1xf32, #tpu.memory_space<vmem>>, vector<1x16x1xf32>
    %61 = vector.shape_cast %60 : vector<1x16x1xf32> to vector<16x1xf32>
    %62 = arith.mulf %56, %61 : vector<16x1xf32>
    %cst_38 = arith.constant dense<0.000000e+00> : vector<16xf32>
    %63 = vector.multi_reduction <add>, %59, %cst_38 [1] : vector<16x16xf32> to vector<16xf32>
    %64 = vector.shape_cast %63 : vector<16xf32> to vector<16x1xf32>
    %65 = arith.addf %62, %64 : vector<16x1xf32>
    %c1_39 = arith.constant 1 : index
    %c0_40 = arith.constant 0 : index
    %c0_41 = arith.constant 0 : index
    %66 = vector.load %arg7[%c1_39, %c0_40, %c0_41] : memref<4x16x1xf32, #tpu.memory_space<vmem>>, vector<1x16x1xf32>
    %67 = vector.shape_cast %66 : vector<1x16x1xf32> to vector<16x1xf32>
    %68 = vector.shape_cast %65 : vector<16x1xf32> to vector<1x16x1xf32>
    tpu.vector_store %arg7[%c1_39, %c0_40, %c0_41], %68 {strides = array<i32>} : memref<4x16x1xf32, #tpu.memory_space<vmem>>, vector<1x16x1xf32>,
    %c1_42 = arith.constant 1 : index
    %c0_43 = arith.constant 0 : index
    %c0_44 = arith.constant 0 : index
    %69 = vector.load %arg8[%c1_42, %c0_43, %c0_44] : memref<4x16x32xf32, #tpu.memory_space<vmem>>, vector<1x16x32xf32>
    %70 = vector.shape_cast %69 : vector<1x16x32xf32> to vector<16x32xf32>
    %71 = vector.broadcast %56 : vector<16x1xf32> to vector<16x32xf32>
    %72 = arith.mulf %71, %70 : vector<16x32xf32>
    %73 = arith.truncf %59 : vector<16x16xf32> to vector<16x16xbf16>
    %74 = vector.extract_strided_slice %10 {offsets = [0, 32], sizes = [16, 32], strides = [1, 1]} : vector<16x128xbf16> to vector<16x32xbf16>
    %cst_45 = arith.constant dense<0.000000e+00> : vector<16x32xf32>
    %75 = tpu.matmul %73, %74, %cst_45 {dimension_numbers = #tpu.dot_dimension_numbers<[1], [0], [0], [1], [0, 0, 1, 1], [], []>} : vector<16x16xbf16>, vector<16x32xbf16>, vector<16x32xf32> -> vector<16x32xf32>
    %76 = arith.addf %72, %75 : vector<16x32xf32>
    %c1_46 = arith.constant 1 : index
    %c0_47 = arith.constant 0 : index
    %c0_48 = arith.constant 0 : index
    %77 = vector.load %arg8[%c1_46, %c0_47, %c0_48] : memref<4x16x32xf32, #tpu.memory_space<vmem>>, vector<1x16x32xf32>
    %78 = vector.shape_cast %77 : vector<1x16x32xf32> to vector<16x32xf32>
    %79 = vector.shape_cast %76 : vector<16x32xf32> to vector<1x16x32xf32>
    tpu.vector_store %arg8[%c1_46, %c0_47, %c0_48], %79 {strides = array<i32>} : memref<4x16x32xf32, #tpu.memory_space<vmem>>, vector<1x16x32xf32>,
    %c1_49 = arith.constant 1 : index
    %c0_50 = arith.constant 0 : index
    %c0_51 = arith.constant 0 : index
    %80 = vector.load %arg6[%c1_49, %c0_50, %c0_51] : memref<4x16x1xf32, #tpu.memory_space<vmem>>, vector<1x16x1xf32>
    %81 = vector.shape_cast %80 : vector<1x16x1xf32> to vector<16x1xf32>
    %82 = vector.shape_cast %54 : vector<16x1xf32> to vector<1x16x1xf32>
    tpu.vector_store %arg6[%c1_49, %c0_50, %c0_51], %82 {strides = array<i32>} : memref<4x16x1xf32, #tpu.memory_space<vmem>>, vector<1x16x1xf32>,
    %83 = vector.extract_strided_slice %6 {offsets = [0, 64], sizes = [16, 32], strides = [1, 1]} : vector<16x128xbf16> to vector<16x32xbf16>
    %84 = vector.extract_strided_slice %8 {offsets = [0, 64], sizes = [16, 32], strides = [1, 1]} : vector<16x128xbf16> to vector<16x32xbf16>
    %cst_52 = arith.constant dense<0.000000e+00> : vector<16x16xf32>
    %85 = tpu.matmul %83, %84, %cst_52 {dimension_numbers = #tpu.dot_dimension_numbers<[1], [1], [0], [0], [0, 0, 1, 0], [], []>} : vector<16x32xbf16>, vector<16x32xbf16>, vector<16x16xf32> -> vector<16x16xf32>
    %c2 = arith.constant 2 : index
    %c0_53 = arith.constant 0 : index
    %c0_54 = arith.constant 0 : index
    %86 = vector.load %arg6[%c2, %c0_53, %c0_54] : memref<4x16x1xf32, #tpu.memory_space<vmem>>, vector<1x16x1xf32>
    %87 = vector.shape_cast %86 : vector<1x16x1xf32> to vector<16x1xf32>
    %cst_55 = arith.constant dense<0xFF800000> : vector<16xf32>
    %88 = vector.multi_reduction <maximumf>, %85, %cst_55 [1] : vector<16x16xf32> to vector<16xf32>
    %89 = vector.shape_cast %88 : vector<16xf32> to vector<16x1xf32>
    %90 = arith.maximumf %87, %89 : vector<16x1xf32>
    %91 = arith.subf %87, %90 : vector<16x1xf32>
    %92 = math.exp %91 : vector<16x1xf32>
    %93 = vector.broadcast %90 : vector<16x1xf32> to vector<16x16xf32>
    %94 = arith.subf %85, %93 : vector<16x16xf32>
    %95 = math.exp %94 : vector<16x16xf32>
    %c2_56 = arith.constant 2 : index
    %c0_57 = arith.constant 0 : index
    %c0_58 = arith.constant 0 : index
    %96 = vector.load %arg7[%c2_56, %c0_57, %c0_58] : memref<4x16x1xf32, #tpu.memory_space<vmem>>, vector<1x16x1xf32>
    %97 = vector.shape_cast %96 : vector<1x16x1xf32> to vector<16x1xf32>
    %98 = arith.mulf %92, %97 : vector<16x1xf32>
    %cst_59 = arith.constant dense<0.000000e+00> : vector<16xf32>
    %99 = vector.multi_reduction <add>, %95, %cst_59 [1] : vector<16x16xf32> to vector<16xf32>
    %100 = vector.shape_cast %99 : vector<16xf32> to vector<16x1xf32>
    %101 = arith.addf %98, %100 : vector<16x1xf32>
    %c2_60 = arith.constant 2 : index
    %c0_61 = arith.constant 0 : index
    %c0_62 = arith.constant 0 : index
    %102 = vector.load %arg7[%c2_60, %c0_61, %c0_62] : memref<4x16x1xf32, #tpu.memory_space<vmem>>, vector<1x16x1xf32>
    %103 = vector.shape_cast %102 : vector<1x16x1xf32> to vector<16x1xf32>
    %104 = vector.shape_cast %101 : vector<16x1xf32> to vector<1x16x1xf32>
    tpu.vector_store %arg7[%c2_60, %c0_61, %c0_62], %104 {strides = array<i32>} : memref<4x16x1xf32, #tpu.memory_space<vmem>>, vector<1x16x1xf32>,
    %c2_63 = arith.constant 2 : index
    %c0_64 = arith.constant 0 : index
    %c0_65 = arith.constant 0 : index
    %105 = vector.load %arg8[%c2_63, %c0_64, %c0_65] : memref<4x16x32xf32, #tpu.memory_space<vmem>>, vector<1x16x32xf32>
    %106 = vector.shape_cast %105 : vector<1x16x32xf32> to vector<16x32xf32>
    %107 = vector.broadcast %92 : vector<16x1xf32> to vector<16x32xf32>
    %108 = arith.mulf %107, %106 : vector<16x32xf32>
    %109 = arith.truncf %95 : vector<16x16xf32> to vector<16x16xbf16>
    %110 = vector.extract_strided_slice %10 {offsets = [0, 64], sizes = [16, 32], strides = [1, 1]} : vector<16x128xbf16> to vector<16x32xbf16>
    %cst_66 = arith.constant dense<0.000000e+00> : vector<16x32xf32>
    %111 = tpu.matmul %109, %110, %cst_66 {dimension_numbers = #tpu.dot_dimension_numbers<[1], [0], [0], [1], [0, 0, 1, 1], [], []>} : vector<16x16xbf16>, vector<16x32xbf16>, vector<16x32xf32> -> vector<16x32xf32>
    %112 = arith.addf %108, %111 : vector<16x32xf32>
    %c2_67 = arith.constant 2 : index
    %c0_68 = arith.constant 0 : index
    %c0_69 = arith.constant 0 : index
    %113 = vector.load %arg8[%c2_67, %c0_68, %c0_69] : memref<4x16x32xf32, #tpu.memory_space<vmem>>, vector<1x16x32xf32>
    %114 = vector.shape_cast %113 : vector<1x16x32xf32> to vector<16x32xf32>
    %115 = vector.shape_cast %112 : vector<16x32xf32> to vector<1x16x32xf32>
    tpu.vector_store %arg8[%c2_67, %c0_68, %c0_69], %115 {strides = array<i32>} : memref<4x16x32xf32, #tpu.memory_space<vmem>>, vector<1x16x32xf32>,
    %c2_70 = arith.constant 2 : index
    %c0_71 = arith.constant 0 : index
    %c0_72 = arith.constant 0 : index
    %116 = vector.load %arg6[%c2_70, %c0_71, %c0_72] : memref<4x16x1xf32, #tpu.memory_space<vmem>>, vector<1x16x1xf32>
    %117 = vector.shape_cast %116 : vector<1x16x1xf32> to vector<16x1xf32>
    %118 = vector.shape_cast %90 : vector<16x1xf32> to vector<1x16x1xf32>
    tpu.vector_store %arg6[%c2_70, %c0_71, %c0_72], %118 {strides = array<i32>} : memref<4x16x1xf32, #tpu.memory_space<vmem>>, vector<1x16x1xf32>,
    %119 = vector.extract_strided_slice %6 {offsets = [0, 96], sizes = [16, 32], strides = [1, 1]} : vector<16x128xbf16> to vector<16x32xbf16>
    %120 = vector.extract_strided_slice %8 {offsets = [0, 96], sizes = [16, 32], strides = [1, 1]} : vector<16x128xbf16> to vector<16x32xbf16>
    %cst_73 = arith.constant dense<0.000000e+00> : vector<16x16xf32>
    %121 = tpu.matmul %119, %120, %cst_73 {dimension_numbers = #tpu.dot_dimension_numbers<[1], [1], [0], [0], [0, 0, 1, 0], [], []>} : vector<16x32xbf16>, vector<16x32xbf16>, vector<16x16xf32> -> vector<16x16xf32>
    %c3 = arith.constant 3 : index
    %c0_74 = arith.constant 0 : index
    %c0_75 = arith.constant 0 : index
    %122 = vector.load %arg6[%c3, %c0_74, %c0_75] : memref<4x16x1xf32, #tpu.memory_space<vmem>>, vector<1x16x1xf32>
    %123 = vector.shape_cast %122 : vector<1x16x1xf32> to vector<16x1xf32>
    %cst_76 = arith.constant dense<0xFF800000> : vector<16xf32>
    %124 = vector.multi_reduction <maximumf>, %121, %cst_76 [1] : vector<16x16xf32> to vector<16xf32>
    %125 = vector.shape_cast %124 : vector<16xf32> to vector<16x1xf32>
    %126 = arith.maximumf %123, %125 : vector<16x1xf32>
    %127 = arith.subf %123, %126 : vector<16x1xf32>
    %128 = math.exp %127 : vector<16x1xf32>
    %129 = vector.broadcast %126 : vector<16x1xf32> to vector<16x16xf32>
    %130 = arith.subf %121, %129 : vector<16x16xf32>
    %131 = math.exp %130 : vector<16x16xf32>
    %c3_77 = arith.constant 3 : index
    %c0_78 = arith.constant 0 : index
    %c0_79 = arith.constant 0 : index
    %132 = vector.load %arg7[%c3_77, %c0_78, %c0_79] : memref<4x16x1xf32, #tpu.memory_space<vmem>>, vector<1x16x1xf32>
    %133 = vector.shape_cast %132 : vector<1x16x1xf32> to vector<16x1xf32>
    %134 = arith.mulf %128, %133 : vector<16x1xf32>
    %cst_80 = arith.constant dense<0.000000e+00> : vector<16xf32>
    %135 = vector.multi_reduction <add>, %131, %cst_80 [1] : vector<16x16xf32> to vector<16xf32>
    %136 = vector.shape_cast %135 : vector<16xf32> to vector<16x1xf32>
    %137 = arith.addf %134, %136 : vector<16x1xf32>
    %c3_81 = arith.constant 3 : index
    %c0_82 = arith.constant 0 : index
    %c0_83 = arith.constant 0 : index
    %138 = vector.load %arg7[%c3_81, %c0_82, %c0_83] : memref<4x16x1xf32, #tpu.memory_space<vmem>>, vector<1x16x1xf32>
    %139 = vector.shape_cast %138 : vector<1x16x1xf32> to vector<16x1xf32>
    %140 = vector.shape_cast %137 : vector<16x1xf32> to vector<1x16x1xf32>
    tpu.vector_store %arg7[%c3_81, %c0_82, %c0_83], %140 {strides = array<i32>} : memref<4x16x1xf32, #tpu.memory_space<vmem>>, vector<1x16x1xf32>,
    %c3_84 = arith.constant 3 : index
    %c0_85 = arith.constant 0 : index
    %c0_86 = arith.constant 0 : index
    %141 = vector.load %arg8[%c3_84, %c0_85, %c0_86] : memref<4x16x32xf32, #tpu.memory_space<vmem>>, vector<1x16x32xf32>
    %142 = vector.shape_cast %141 : vector<1x16x32xf32> to vector<16x32xf32>
    %143 = vector.broadcast %128 : vector<16x1xf32> to vector<16x32xf32>
    %144 = arith.mulf %143, %142 : vector<16x32xf32>
    %145 = arith.truncf %131 : vector<16x16xf32> to vector<16x16xbf16>
    %146 = vector.extract_strided_slice %10 {offsets = [0, 96], sizes = [16, 32], strides = [1, 1]} : vector<16x128xbf16> to vector<16x32xbf16>
    %cst_87 = arith.constant dense<0.000000e+00> : vector<16x32xf32>
    %147 = tpu.matmul %145, %146, %cst_87 {dimension_numbers = #tpu.dot_dimension_numbers<[1], [0], [0], [1], [0, 0, 1, 1], [], []>} : vector<16x16xbf16>, vector<16x32xbf16>, vector<16x32xf32> -> vector<16x32xf32>
    %148 = arith.addf %144, %147 : vector<16x32xf32>
    %c3_88 = arith.constant 3 : index
    %c0_89 = arith.constant 0 : index
    %c0_90 = arith.constant 0 : index
    %149 = vector.load %arg8[%c3_88, %c0_89, %c0_90] : memref<4x16x32xf32, #tpu.memory_space<vmem>>, vector<1x16x32xf32>
    %150 = vector.shape_cast %149 : vector<1x16x32xf32> to vector<16x32xf32>
    %151 = vector.shape_cast %148 : vector<16x32xf32> to vector<1x16x32xf32>
    tpu.vector_store %arg8[%c3_88, %c0_89, %c0_90], %151 {strides = array<i32>} : memref<4x16x32xf32, #tpu.memory_space<vmem>>, vector<1x16x32xf32>,
    %c3_91 = arith.constant 3 : index
    %c0_92 = arith.constant 0 : index
    %c0_93 = arith.constant 0 : index
    %152 = vector.load %arg6[%c3_91, %c0_92, %c0_93] : memref<4x16x1xf32, #tpu.memory_space<vmem>>, vector<1x16x1xf32>
    %153 = vector.shape_cast %152 : vector<1x16x1xf32> to vector<16x1xf32>
    %154 = vector.shape_cast %126 : vector<16x1xf32> to vector<1x16x1xf32>
    tpu.vector_store %arg6[%c3_91, %c0_92, %c0_93], %154 {strides = array<i32>} : memref<4x16x1xf32, #tpu.memory_space<vmem>>, vector<1x16x1xf32>,
    %c0_i32_94 = arith.constant 0 : i32
    %155 = arith.cmpi eq, %arg1, %c0_i32_94 : i32
    %156 = arith.extui %155 : i1 to i32
    %c0_i32_95 = arith.constant 0 : i32
    %157 = arith.cmpi ne, %156, %c0_i32_95 : i32
    scf.if %157 {
      %c0_96 = arith.constant 0 : index
      %c0_97 = arith.constant 0 : index
      %c0_98 = arith.constant 0 : index
      %158 = vector.load %arg7[%c0_96, %c0_97, %c0_98] : memref<4x16x1xf32, #tpu.memory_space<vmem>>, vector<1x16x1xf32>
      %159 = vector.shape_cast %158 : vector<1x16x1xf32> to vector<16x1xf32>
      %160 = tpu.reciprocal %159 {approx = true} : vector<16x1xf32> -> vector<16x1xf32>
      %c0_99 = arith.constant 0 : index
      %c0_100 = arith.constant 0 : index
      %c0_101 = arith.constant 0 : index
      %161 = vector.load %arg8[%c0_99, %c0_100, %c0_101] : memref<4x16x32xf32, #tpu.memory_space<vmem>>, vector<1x16x32xf32>
      %162 = vector.shape_cast %161 : vector<1x16x32xf32> to vector<16x32xf32>
      %163 = vector.broadcast %160 : vector<16x1xf32> to vector<16x32xf32>
      %164 = arith.mulf %162, %163 : vector<16x32xf32>
      %c1_102 = arith.constant 1 : index
      %c0_103 = arith.constant 0 : index
      %c0_104 = arith.constant 0 : index
      %165 = vector.load %arg7[%c1_102, %c0_103, %c0_104] : memref<4x16x1xf32, #tpu.memory_space<vmem>>, vector<1x16x1xf32>
      %166 = vector.shape_cast %165 : vector<1x16x1xf32> to vector<16x1xf32>
      %167 = tpu.reciprocal %166 {approx = true} : vector<16x1xf32> -> vector<16x1xf32>
      %c1_105 = arith.constant 1 : index
      %c0_106 = arith.constant 0 : index
      %c0_107 = arith.constant 0 : index
      %168 = vector.load %arg8[%c1_105, %c0_106, %c0_107] : memref<4x16x32xf32, #tpu.memory_space<vmem>>, vector<1x16x32xf32>
      %169 = vector.shape_cast %168 : vector<1x16x32xf32> to vector<16x32xf32>
      %170 = vector.broadcast %167 : vector<16x1xf32> to vector<16x32xf32>
      %171 = arith.mulf %169, %170 : vector<16x32xf32>
      %c2_108 = arith.constant 2 : index
      %c0_109 = arith.constant 0 : index
      %c0_110 = arith.constant 0 : index
      %172 = vector.load %arg7[%c2_108, %c0_109, %c0_110] : memref<4x16x1xf32, #tpu.memory_space<vmem>>, vector<1x16x1xf32>
      %173 = vector.shape_cast %172 : vector<1x16x1xf32> to vector<16x1xf32>
      %174 = tpu.reciprocal %173 {approx = true} : vector<16x1xf32> -> vector<16x1xf32>
      %c2_111 = arith.constant 2 : index
      %c0_112 = arith.constant 0 : index
      %c0_113 = arith.constant 0 : index
      %175 = vector.load %arg8[%c2_111, %c0_112, %c0_113] : memref<4x16x32xf32, #tpu.memory_space<vmem>>, vector<1x16x32xf32>
      %176 = vector.shape_cast %175 : vector<1x16x32xf32> to vector<16x32xf32>
      %177 = vector.broadcast %174 : vector<16x1xf32> to vector<16x32xf32>
      %178 = arith.mulf %176, %177 : vector<16x32xf32>
      %c3_114 = arith.constant 3 : index
      %c0_115 = arith.constant 0 : index
      %c0_116 = arith.constant 0 : index
      %179 = vector.load %arg7[%c3_114, %c0_115, %c0_116] : memref<4x16x1xf32, #tpu.memory_space<vmem>>, vector<1x16x1xf32>
      %180 = vector.shape_cast %179 : vector<1x16x1xf32> to vector<16x1xf32>
      %181 = tpu.reciprocal %180 {approx = true} : vector<16x1xf32> -> vector<16x1xf32>
      %c3_117 = arith.constant 3 : index
      %c0_118 = arith.constant 0 : index
      %c0_119 = arith.constant 0 : index
      %182 = vector.load %arg8[%c3_117, %c0_118, %c0_119] : memref<4x16x32xf32, #tpu.memory_space<vmem>>, vector<1x16x32xf32>
      %183 = vector.shape_cast %182 : vector<1x16x32xf32> to vector<16x32xf32>
      %184 = vector.broadcast %181 : vector<16x1xf32> to vector<16x32xf32>
      %185 = arith.mulf %183, %184 : vector<16x32xf32>
      %186 = tpu.concatenate %164, %171, %178, %185 in 1 : vector<16x32xf32>, vector<16x32xf32>, vector<16x32xf32>, vector<16x32xf32> -> vector<16x128xf32>
      %187 = arith.truncf %186 : vector<16x128xf32> to vector<16x128xbf16>
      %c0_120 = arith.constant 0 : index
      %c0_121 = arith.constant 0 : index
      %c0_122 = arith.constant 0 : index
      %188 = vector.load %arg5[%c0_120, %c0_121, %c0_122] : memref<1x16x128xbf16, #tpu.memory_space<vmem>>, vector<1x16x128xbf16>
      %189 = vector.shape_cast %188 : vector<1x16x128xbf16> to vector<16x128xbf16>
      %190 = vector.shape_cast %187 : vector<16x128xbf16> to vector<1x16x128xbf16>
      tpu.vector_store %arg5[%c0_120, %c0_121, %c0_122], %190 {strides = array<i32>} : memref<1x16x128xbf16, #tpu.memory_space<vmem>>, vector<1x16x128xbf16>,
    } else {
    }
    return
  }
  func.func @transform_0(%arg0: i32, %arg1: i32) -> (i32, i32, i32) {
    %c0_i32 = arith.constant 0 : i32
    %c0_i32_0 = arith.constant 0 : i32
    %c0_i32_1 = arith.constant 0 : i32
    return %arg0, %c0_i32, %c0_i32_0 : i32, i32, i32
  }
  func.func @transform_1(%arg0: i32, %arg1: i32) -> (i32, i32, i32) {
    %c1_i32 = arith.constant 1 : i32
    %c0_i32 = arith.constant 0 : i32
    return %arg0, %arg1, %c1_i32 : i32, i32, i32
  }
  func.func @transform_2(%arg0: i32, %arg1: i32) -> (i32, i32, i32) {
    %c2_i32 = arith.constant 2 : i32
    %c0_i32 = arith.constant 0 : i32
    return %arg0, %arg1, %c2_i32 : i32, i32, i32
  }
  func.func @transform_3(%arg0: i32, %arg1: i32) -> (i32, i32, i32) {
    %c0_i32 = arith.constant 0 : i32
    %c0_i32_0 = arith.constant 0 : i32
    %c0_i32_1 = arith.constant 0 : i32
    return %arg0, %c0_i32, %c0_i32_0 : i32, i32, i32
  }
}

module attributes {stable_mosaic.version = 11 : i64} {
  func.func @_ln_linear_kernel(%arg0: i32, %arg1: i32, %arg2: memref<32x128xbf16, #tpu.memory_space<vmem>>, %arg3: memref<1x128xf32, #tpu.memory_space<vmem>>, %arg4: memref<1x128xf32, #tpu.memory_space<vmem>>, %arg5: memref<128x256xbf16, #tpu.memory_space<vmem>>, %arg6: memref<1x256xf32, #tpu.memory_space<vmem>>, %arg7: memref<32x256xbf16, #tpu.memory_space<vmem>>) attributes {dimension_semantics = [#tpu.dimension_semantics<parallel>, #tpu.dimension_semantics<parallel>], iteration_bounds = array<i64: 1, 1>, scalar_prefetch = 0 : i64, scratch_operands = 0 : i64, tpu.core_type = #tpu.core_type<tc>, window_params = [{transform_indices = @transform_0, window_bounds = array<i64: 32, 128>}, {pipeline_mode = #tpu.pipeline_mode<synchronous>, transform_indices = @transform_1, window_bounds = array<i64: 1, 128>}, {pipeline_mode = #tpu.pipeline_mode<synchronous>, transform_indices = @transform_2, window_bounds = array<i64: 1, 128>}, {transform_indices = @transform_3, window_bounds = array<i64: 128, 256>}, {transform_indices = @transform_4, window_bounds = array<i64: 1, 256>}, {transform_indices = @transform_5, window_bounds = array<i64: 32, 256>}]} {
    %c0 = arith.constant 0 : index
    %c0_0 = arith.constant 0 : index
    %0 = vector.load %arg2[%c0, %c0_0] : memref<32x128xbf16, #tpu.memory_space<vmem>>, vector<32x128xbf16>
    %1 = arith.extf %0 : vector<32x128xbf16> to vector<32x128xf32>
    %cst = arith.constant dense<0.000000e+00> : vector<32xf32>
    %2 = vector.multi_reduction <add>, %1, %cst [1] : vector<32x128xf32> to vector<32xf32>
    %3 = vector.shape_cast %2 : vector<32xf32> to vector<32x1xf32>
    %cst_1 = arith.constant 1.280000e+02 : f32
    %4 = vector.broadcast %cst_1 : f32 to vector<32x1xf32>
    %5 = arith.divf %3, %4 : vector<32x1xf32>
    %6 = vector.broadcast %5 : vector<32x1xf32> to vector<32x128xf32>
    %7 = arith.subf %1, %6 : vector<32x128xf32>
    %8 = arith.mulf %7, %7 : vector<32x128xf32>
    %cst_2 = arith.constant dense<0.000000e+00> : vector<32xf32>
    %9 = vector.multi_reduction <add>, %8, %cst_2 [1] : vector<32x128xf32> to vector<32xf32>
    %10 = vector.shape_cast %9 : vector<32xf32> to vector<32x1xf32>
    %cst_3 = arith.constant 1.280000e+02 : f32
    %11 = vector.broadcast %cst_3 : f32 to vector<32x1xf32>
    %12 = arith.divf %10, %11 : vector<32x1xf32>
    %13 = vector.broadcast %5 : vector<32x1xf32> to vector<32x128xf32>
    %14 = arith.subf %1, %13 : vector<32x128xf32>
    %cst_4 = arith.constant 9.99999974E-6 : f32
    %15 = vector.broadcast %cst_4 : f32 to vector<32x1xf32>
    %16 = arith.addf %12, %15 : vector<32x1xf32>
    %17 = math.rsqrt %16 : vector<32x1xf32>
    %18 = vector.broadcast %17 : vector<32x1xf32> to vector<32x128xf32>
    %19 = arith.mulf %14, %18 : vector<32x128xf32>
    %c0_5 = arith.constant 0 : index
    %c0_6 = arith.constant 0 : index
    %20 = vector.load %arg3[%c0_5, %c0_6] : memref<1x128xf32, #tpu.memory_space<vmem>>, vector<1x128xf32>
    %21 = vector.broadcast %20 : vector<1x128xf32> to vector<32x128xf32>
    %22 = arith.mulf %19, %21 : vector<32x128xf32>
    %c0_7 = arith.constant 0 : index
    %c0_8 = arith.constant 0 : index
    %23 = vector.load %arg4[%c0_7, %c0_8] : memref<1x128xf32, #tpu.memory_space<vmem>>, vector<1x128xf32>
    %24 = vector.broadcast %23 : vector<1x128xf32> to vector<32x128xf32>
    %25 = arith.addf %22, %24 : vector<32x128xf32>
    %26 = arith.truncf %25 : vector<32x128xf32> to vector<32x128xbf16>
    %c0_9 = arith.constant 0 : index
    %c0_10 = arith.constant 0 : index
    %27 = vector.load %arg5[%c0_9, %c0_10] : memref<128x256xbf16, #tpu.memory_space<vmem>>, vector<128x256xbf16>
    %cst_11 = arith.constant dense<0.000000e+00> : vector<32x256xf32>
    %28 = tpu.matmul %26, %27, %cst_11 {dimension_numbers = #tpu.dot_dimension_numbers<[1], [0], [0], [1], [0, 0, 1, 1], [], []>} : vector<32x128xbf16>, vector<128x256xbf16>, vector<32x256xf32> -> vector<32x256xf32>
    %c0_12 = arith.constant 0 : index
    %c0_13 = arith.constant 0 : index
    %29 = vector.load %arg6[%c0_12, %c0_13] : memref<1x256xf32, #tpu.memory_space<vmem>>, vector<1x256xf32>
    %30 = vector.broadcast %29 : vector<1x256xf32> to vector<32x256xf32>
    %31 = arith.addf %28, %30 : vector<32x256xf32>
    %cst_14 = arith.constant 0.000000e+00 : f32
    %32 = vector.broadcast %cst_14 : f32 to vector<32x256xf32>
    %33 = arith.maximumf %31, %32 : vector<32x256xf32>
    %34 = arith.truncf %33 : vector<32x256xf32> to vector<32x256xbf16>
    %c0_15 = arith.constant 0 : index
    %c0_16 = arith.constant 0 : index
    %35 = vector.load %arg7[%c0_15, %c0_16] : memref<32x256xbf16, #tpu.memory_space<vmem>>, vector<32x256xbf16>
    tpu.vector_store %arg7[%c0_15, %c0_16], %34 {strides = array<i32>} : memref<32x256xbf16, #tpu.memory_space<vmem>>, vector<32x256xbf16>,
    return
  }
  func.func @transform_0(%arg0: i32, %arg1: i32) -> (i32, i32) {
    %c0_i32 = arith.constant 0 : i32
    %c0_i32_0 = arith.constant 0 : i32
    return %arg0, %c0_i32 : i32, i32
  }
  func.func @transform_1(%arg0: i32, %arg1: i32) -> (i32, i32) {
    %c0_i32 = arith.constant 0 : i32
    %c0_i32_0 = arith.constant 0 : i32
    %c0_i32_1 = arith.constant 0 : i32
    return %c0_i32, %c0_i32_0 : i32, i32
  }
  func.func @transform_2(%arg0: i32, %arg1: i32) -> (i32, i32) {
    %c0_i32 = arith.constant 0 : i32
    %c0_i32_0 = arith.constant 0 : i32
    %c0_i32_1 = arith.constant 0 : i32
    return %c0_i32, %c0_i32_0 : i32, i32
  }
  func.func @transform_3(%arg0: i32, %arg1: i32) -> (i32, i32) {
    %c0_i32 = arith.constant 0 : i32
    %c0_i32_0 = arith.constant 0 : i32
    return %c0_i32, %arg1 : i32, i32
  }
  func.func @transform_4(%arg0: i32, %arg1: i32) -> (i32, i32) {
    %c0_i32 = arith.constant 0 : i32
    %c0_i32_0 = arith.constant 0 : i32
    return %c0_i32, %arg1 : i32, i32
  }
  func.func @transform_5(%arg0: i32, %arg1: i32) -> (i32, i32) {
    %c0_i32 = arith.constant 0 : i32
    return %arg0, %arg1 : i32, i32
  }
}

module attributes {stable_mosaic.version = 11 : i64} {
  func.func @_linear_kernel(%arg0: i32, %arg1: i32, %arg2: i32, %arg3: memref<32x256xbf16, #tpu.memory_space<vmem>>, %arg4: memref<256x128xbf16, #tpu.memory_space<vmem>>, %arg5: memref<1x128xf32, #tpu.memory_space<vmem>>, %arg6: memref<32x128xbf16, #tpu.memory_space<vmem>>, %arg7: memref<32x128xbf16, #tpu.memory_space<vmem>>, %arg8: memref<32x128xf32, #tpu.memory_space<vmem>>) attributes {dimension_semantics = [#tpu.dimension_semantics<parallel>, #tpu.dimension_semantics<parallel>, #tpu.dimension_semantics<arbitrary>], iteration_bounds = array<i64: 1, 1, 1>, scalar_prefetch = 0 : i64, scratch_operands = 1 : i64, tpu.core_type = #tpu.core_type<tc>, window_params = [{transform_indices = @transform_0, window_bounds = array<i64: 32, 256>}, {transform_indices = @transform_1, window_bounds = array<i64: 256, 128>}, {transform_indices = @transform_2, window_bounds = array<i64: 1, 128>}, {transform_indices = @transform_3, window_bounds = array<i64: 32, 128>}, {transform_indices = @transform_4, window_bounds = array<i64: 32, 128>}]} {
    %c0_i32 = arith.constant 0 : i32
    %0 = arith.cmpi eq, %arg2, %c0_i32 : i32
    %1 = arith.extui %0 : i1 to i32
    %c0_i32_0 = arith.constant 0 : i32
    %2 = arith.cmpi ne, %1, %c0_i32_0 : i32
    scf.if %2 {
      %cst_10 = arith.constant 0.000000e+00 : f32
      %12 = vector.broadcast %cst_10 : f32 to vector<32x128xf32>
      %c0_11 = arith.constant 0 : index
      %c0_12 = arith.constant 0 : index
      %13 = vector.load %arg8[%c0_11, %c0_12] : memref<32x128xf32, #tpu.memory_space<vmem>>, vector<32x128xf32>
      tpu.vector_store %arg8[%c0_11, %c0_12], %12 {strides = array<i32>} : memref<32x128xf32, #tpu.memory_space<vmem>>, vector<32x128xf32>,
    } else {
    }
    %c0 = arith.constant 0 : index
    %c0_1 = arith.constant 0 : index
    %3 = vector.load %arg8[%c0, %c0_1] : memref<32x128xf32, #tpu.memory_space<vmem>>, vector<32x128xf32>
    %c0_2 = arith.constant 0 : index
    %c0_3 = arith.constant 0 : index
    %4 = vector.load %arg3[%c0_2, %c0_3] : memref<32x256xbf16, #tpu.memory_space<vmem>>, vector<32x256xbf16>
    %c0_4 = arith.constant 0 : index
    %c0_5 = arith.constant 0 : index
    %5 = vector.load %arg4[%c0_4, %c0_5] : memref<256x128xbf16, #tpu.memory_space<vmem>>, vector<256x128xbf16>
    %cst = arith.constant dense<0.000000e+00> : vector<32x128xf32>
    %6 = tpu.matmul %4, %5, %cst {dimension_numbers = #tpu.dot_dimension_numbers<[1], [0], [0], [1], [0, 0, 1, 1], [], []>} : vector<32x256xbf16>, vector<256x128xbf16>, vector<32x128xf32> -> vector<32x128xf32>
    %7 = arith.addf %3, %6 : vector<32x128xf32>
    %c0_6 = arith.constant 0 : index
    %c0_7 = arith.constant 0 : index
    %8 = vector.load %arg8[%c0_6, %c0_7] : memref<32x128xf32, #tpu.memory_space<vmem>>, vector<32x128xf32>
    tpu.vector_store %arg8[%c0_6, %c0_7], %7 {strides = array<i32>} : memref<32x128xf32, #tpu.memory_space<vmem>>, vector<32x128xf32>,
    %c0_i32_8 = arith.constant 0 : i32
    %9 = arith.cmpi eq, %arg2, %c0_i32_8 : i32
    %10 = arith.extui %9 : i1 to i32
    %c0_i32_9 = arith.constant 0 : i32
    %11 = arith.cmpi ne, %10, %c0_i32_9 : i32
    scf.if %11 {
      %c0_10 = arith.constant 0 : index
      %c0_11 = arith.constant 0 : index
      %12 = vector.load %arg8[%c0_10, %c0_11] : memref<32x128xf32, #tpu.memory_space<vmem>>, vector<32x128xf32>
      %c0_12 = arith.constant 0 : index
      %c0_13 = arith.constant 0 : index
      %13 = vector.load %arg5[%c0_12, %c0_13] : memref<1x128xf32, #tpu.memory_space<vmem>>, vector<1x128xf32>
      %14 = vector.broadcast %13 : vector<1x128xf32> to vector<32x128xf32>
      %15 = arith.addf %12, %14 : vector<32x128xf32>
      %c0_14 = arith.constant 0 : index
      %c0_15 = arith.constant 0 : index
      %16 = vector.load %arg6[%c0_14, %c0_15] : memref<32x128xbf16, #tpu.memory_space<vmem>>, vector<32x128xbf16>
      %17 = arith.extf %16 : vector<32x128xbf16> to vector<32x128xf32>
      %18 = arith.addf %15, %17 : vector<32x128xf32>
      %19 = arith.truncf %18 : vector<32x128xf32> to vector<32x128xbf16>
      %c0_16 = arith.constant 0 : index
      %c0_17 = arith.constant 0 : index
      %20 = vector.load %arg7[%c0_16, %c0_17] : memref<32x128xbf16, #tpu.memory_space<vmem>>, vector<32x128xbf16>
      tpu.vector_store %arg7[%c0_16, %c0_17], %19 {strides = array<i32>} : memref<32x128xbf16, #tpu.memory_space<vmem>>, vector<32x128xbf16>,
    } else {
    }
    return
  }
  func.func @transform_0(%arg0: i32, %arg1: i32, %arg2: i32) -> (i32, i32) {
    %c0_i32 = arith.constant 0 : i32
    return %arg0, %arg2 : i32, i32
  }
  func.func @transform_1(%arg0: i32, %arg1: i32, %arg2: i32) -> (i32, i32) {
    %c0_i32 = arith.constant 0 : i32
    return %arg2, %arg1 : i32, i32
  }
  func.func @transform_2(%arg0: i32, %arg1: i32, %arg2: i32) -> (i32, i32) {
    %c0_i32 = arith.constant 0 : i32
    %c0_i32_0 = arith.constant 0 : i32
    return %c0_i32, %arg1 : i32, i32
  }
  func.func @transform_3(%arg0: i32, %arg1: i32, %arg2: i32) -> (i32, i32) {
    %c0_i32 = arith.constant 0 : i32
    return %arg0, %arg1 : i32, i32
  }
  func.func @transform_4(%arg0: i32, %arg1: i32, %arg2: i32) -> (i32, i32) {
    %c0_i32 = arith.constant 0 : i32
    return %arg0, %arg1 : i32, i32
  }
}

module attributes {stable_mosaic.version = 11 : i64} {
  func.func @_layernorm_kernel(%arg0: i32, %arg1: memref<32x128xbf16, #tpu.memory_space<vmem>>, %arg2: memref<1x128xf32, #tpu.memory_space<vmem>>, %arg3: memref<1x128xf32, #tpu.memory_space<vmem>>, %arg4: memref<32x128xbf16, #tpu.memory_space<vmem>>) attributes {dimension_semantics = [#tpu.dimension_semantics<parallel>], iteration_bounds = array<i64: 1>, scalar_prefetch = 0 : i64, scratch_operands = 0 : i64, tpu.core_type = #tpu.core_type<tc>, window_params = [{transform_indices = @transform_0, window_bounds = array<i64: 32, 128>}, {pipeline_mode = #tpu.pipeline_mode<synchronous>, transform_indices = @transform_1, window_bounds = array<i64: 1, 128>}, {pipeline_mode = #tpu.pipeline_mode<synchronous>, transform_indices = @transform_2, window_bounds = array<i64: 1, 128>}, {transform_indices = @transform_3, window_bounds = array<i64: 32, 128>}]} {
    %c0 = arith.constant 0 : index
    %c0_0 = arith.constant 0 : index
    %0 = vector.load %arg1[%c0, %c0_0] : memref<32x128xbf16, #tpu.memory_space<vmem>>, vector<32x128xbf16>
    %1 = arith.extf %0 : vector<32x128xbf16> to vector<32x128xf32>
    %cst = arith.constant dense<0.000000e+00> : vector<32xf32>
    %2 = vector.multi_reduction <add>, %1, %cst [1] : vector<32x128xf32> to vector<32xf32>
    %3 = vector.shape_cast %2 : vector<32xf32> to vector<32x1xf32>
    %cst_1 = arith.constant 1.280000e+02 : f32
    %4 = vector.broadcast %cst_1 : f32 to vector<32x1xf32>
    %5 = arith.divf %3, %4 : vector<32x1xf32>
    %6 = vector.broadcast %5 : vector<32x1xf32> to vector<32x128xf32>
    %7 = arith.subf %1, %6 : vector<32x128xf32>
    %8 = arith.mulf %7, %7 : vector<32x128xf32>
    %cst_2 = arith.constant dense<0.000000e+00> : vector<32xf32>
    %9 = vector.multi_reduction <add>, %8, %cst_2 [1] : vector<32x128xf32> to vector<32xf32>
    %10 = vector.shape_cast %9 : vector<32xf32> to vector<32x1xf32>
    %cst_3 = arith.constant 1.280000e+02 : f32
    %11 = vector.broadcast %cst_3 : f32 to vector<32x1xf32>
    %12 = arith.divf %10, %11 : vector<32x1xf32>
    %13 = vector.broadcast %5 : vector<32x1xf32> to vector<32x128xf32>
    %14 = arith.subf %1, %13 : vector<32x128xf32>
    %cst_4 = arith.constant 9.99999974E-6 : f32
    %15 = vector.broadcast %cst_4 : f32 to vector<32x1xf32>
    %16 = arith.addf %12, %15 : vector<32x1xf32>
    %17 = math.rsqrt %16 : vector<32x1xf32>
    %18 = vector.broadcast %17 : vector<32x1xf32> to vector<32x128xf32>
    %19 = arith.mulf %14, %18 : vector<32x128xf32>
    %c0_5 = arith.constant 0 : index
    %c0_6 = arith.constant 0 : index
    %20 = vector.load %arg2[%c0_5, %c0_6] : memref<1x128xf32, #tpu.memory_space<vmem>>, vector<1x128xf32>
    %21 = vector.broadcast %20 : vector<1x128xf32> to vector<32x128xf32>
    %22 = arith.mulf %19, %21 : vector<32x128xf32>
    %c0_7 = arith.constant 0 : index
    %c0_8 = arith.constant 0 : index
    %23 = vector.load %arg3[%c0_7, %c0_8] : memref<1x128xf32, #tpu.memory_space<vmem>>, vector<1x128xf32>
    %24 = vector.broadcast %23 : vector<1x128xf32> to vector<32x128xf32>
    %25 = arith.addf %22, %24 : vector<32x128xf32>
    %26 = arith.truncf %25 : vector<32x128xf32> to vector<32x128xbf16>
    %c0_9 = arith.constant 0 : index
    %c0_10 = arith.constant 0 : index
    %27 = vector.load %arg4[%c0_9, %c0_10] : memref<32x128xbf16, #tpu.memory_space<vmem>>, vector<32x128xbf16>
    tpu.vector_store %arg4[%c0_9, %c0_10], %26 {strides = array<i32>} : memref<32x128xbf16, #tpu.memory_space<vmem>>, vector<32x128xbf16>,
    return
  }
  func.func @transform_0(%arg0: i32) -> (i32, i32) {
    %c0_i32 = arith.constant 0 : i32
    %c0_i32_0 = arith.constant 0 : i32
    return %arg0, %c0_i32 : i32, i32
  }
  func.func @transform_1(%arg0: i32) -> (i32, i32) {
    %c0_i32 = arith.constant 0 : i32
    %c0_i32_0 = arith.constant 0 : i32
    %c0_i32_1 = arith.constant 0 : i32
    return %c0_i32, %c0_i32_0 : i32, i32
  }
  func.func @transform_2(%arg0: i32) -> (i32, i32) {
    %c0_i32 = arith.constant 0 : i32
    %c0_i32_0 = arith.constant 0 : i32
    %c0_i32_1 = arith.constant 0 : i32
    return %c0_i32, %c0_i32_0 : i32, i32
  }
  func.func @transform_3(%arg0: i32) -> (i32, i32) {
    %c0_i32 = arith.constant 0 : i32
    %c0_i32_0 = arith.constant 0 : i32
    return %arg0, %c0_i32 : i32, i32
  }
}

module attributes {stable_mosaic.version = 11 : i64} {
  func.func @_linear_kernel(%arg0: i32, %arg1: i32, %arg2: i32, %arg3: memref<32x128xbf16, #tpu.memory_space<vmem>>, %arg4: memref<128x256xbf16, #tpu.memory_space<vmem>>, %arg5: memref<1x256xf32, #tpu.memory_space<vmem>>, %arg6: memref<32x256xbf16, #tpu.memory_space<vmem>>, %arg7: memref<32x256xf32, #tpu.memory_space<vmem>>) attributes {dimension_semantics = [#tpu.dimension_semantics<parallel>, #tpu.dimension_semantics<parallel>, #tpu.dimension_semantics<arbitrary>], iteration_bounds = array<i64: 1, 1, 1>, scalar_prefetch = 0 : i64, scratch_operands = 1 : i64, tpu.core_type = #tpu.core_type<tc>, window_params = [{transform_indices = @transform_0, window_bounds = array<i64: 32, 128>}, {transform_indices = @transform_1, window_bounds = array<i64: 128, 256>}, {transform_indices = @transform_2, window_bounds = array<i64: 1, 256>}, {transform_indices = @transform_3, window_bounds = array<i64: 32, 256>}]} {
    %c0_i32 = arith.constant 0 : i32
    %0 = arith.cmpi eq, %arg2, %c0_i32 : i32
    %1 = arith.extui %0 : i1 to i32
    %c0_i32_0 = arith.constant 0 : i32
    %2 = arith.cmpi ne, %1, %c0_i32_0 : i32
    scf.if %2 {
      %cst_10 = arith.constant 0.000000e+00 : f32
      %12 = vector.broadcast %cst_10 : f32 to vector<32x256xf32>
      %c0_11 = arith.constant 0 : index
      %c0_12 = arith.constant 0 : index
      %13 = vector.load %arg7[%c0_11, %c0_12] : memref<32x256xf32, #tpu.memory_space<vmem>>, vector<32x256xf32>
      tpu.vector_store %arg7[%c0_11, %c0_12], %12 {strides = array<i32>} : memref<32x256xf32, #tpu.memory_space<vmem>>, vector<32x256xf32>,
    } else {
    }
    %c0 = arith.constant 0 : index
    %c0_1 = arith.constant 0 : index
    %3 = vector.load %arg7[%c0, %c0_1] : memref<32x256xf32, #tpu.memory_space<vmem>>, vector<32x256xf32>
    %c0_2 = arith.constant 0 : index
    %c0_3 = arith.constant 0 : index
    %4 = vector.load %arg3[%c0_2, %c0_3] : memref<32x128xbf16, #tpu.memory_space<vmem>>, vector<32x128xbf16>
    %c0_4 = arith.constant 0 : index
    %c0_5 = arith.constant 0 : index
    %5 = vector.load %arg4[%c0_4, %c0_5] : memref<128x256xbf16, #tpu.memory_space<vmem>>, vector<128x256xbf16>
    %cst = arith.constant dense<0.000000e+00> : vector<32x256xf32>
    %6 = tpu.matmul %4, %5, %cst {dimension_numbers = #tpu.dot_dimension_numbers<[1], [0], [0], [1], [0, 0, 1, 1], [], []>} : vector<32x128xbf16>, vector<128x256xbf16>, vector<32x256xf32> -> vector<32x256xf32>
    %7 = arith.addf %3, %6 : vector<32x256xf32>
    %c0_6 = arith.constant 0 : index
    %c0_7 = arith.constant 0 : index
    %8 = vector.load %arg7[%c0_6, %c0_7] : memref<32x256xf32, #tpu.memory_space<vmem>>, vector<32x256xf32>
    tpu.vector_store %arg7[%c0_6, %c0_7], %7 {strides = array<i32>} : memref<32x256xf32, #tpu.memory_space<vmem>>, vector<32x256xf32>,
    %c0_i32_8 = arith.constant 0 : i32
    %9 = arith.cmpi eq, %arg2, %c0_i32_8 : i32
    %10 = arith.extui %9 : i1 to i32
    %c0_i32_9 = arith.constant 0 : i32
    %11 = arith.cmpi ne, %10, %c0_i32_9 : i32
    scf.if %11 {
      %c0_10 = arith.constant 0 : index
      %c0_11 = arith.constant 0 : index
      %12 = vector.load %arg7[%c0_10, %c0_11] : memref<32x256xf32, #tpu.memory_space<vmem>>, vector<32x256xf32>
      %c0_12 = arith.constant 0 : index
      %c0_13 = arith.constant 0 : index
      %13 = vector.load %arg5[%c0_12, %c0_13] : memref<1x256xf32, #tpu.memory_space<vmem>>, vector<1x256xf32>
      %14 = vector.broadcast %13 : vector<1x256xf32> to vector<32x256xf32>
      %15 = arith.addf %12, %14 : vector<32x256xf32>
      %16 = arith.truncf %15 : vector<32x256xf32> to vector<32x256xbf16>
      %c0_14 = arith.constant 0 : index
      %c0_15 = arith.constant 0 : index
      %17 = vector.load %arg6[%c0_14, %c0_15] : memref<32x256xbf16, #tpu.memory_space<vmem>>, vector<32x256xbf16>
      tpu.vector_store %arg6[%c0_14, %c0_15], %16 {strides = array<i32>} : memref<32x256xbf16, #tpu.memory_space<vmem>>, vector<32x256xbf16>,
    } else {
    }
    return
  }
  func.func @transform_0(%arg0: i32, %arg1: i32, %arg2: i32) -> (i32, i32) {
    %c0_i32 = arith.constant 0 : i32
    return %arg0, %arg2 : i32, i32
  }
  func.func @transform_1(%arg0: i32, %arg1: i32, %arg2: i32) -> (i32, i32) {
    %c0_i32 = arith.constant 0 : i32
    return %arg2, %arg1 : i32, i32
  }
  func.func @transform_2(%arg0: i32, %arg1: i32, %arg2: i32) -> (i32, i32) {
    %c0_i32 = arith.constant 0 : i32
    %c0_i32_0 = arith.constant 0 : i32
    return %c0_i32, %arg1 : i32, i32
  }
  func.func @transform_3(%arg0: i32, %arg1: i32, %arg2: i32) -> (i32, i32) {
    %c0_i32 = arith.constant 0 : i32
    return %arg0, %arg1 : i32, i32
  }
}

module attributes {stable_mosaic.version = 11 : i64} {
  func.func @_ln_linear_kernel(%arg0: i32, %arg1: i32, %arg2: memref<16x128xbf16, #tpu.memory_space<vmem>>, %arg3: memref<1x128xf32, #tpu.memory_space<vmem>>, %arg4: memref<1x128xf32, #tpu.memory_space<vmem>>, %arg5: memref<128x128xbf16, #tpu.memory_space<vmem>>, %arg6: memref<1x128xf32, #tpu.memory_space<vmem>>, %arg7: memref<16x128xbf16, #tpu.memory_space<vmem>>) attributes {dimension_semantics = [#tpu.dimension_semantics<parallel>, #tpu.dimension_semantics<parallel>], iteration_bounds = array<i64: 1, 3>, scalar_prefetch = 0 : i64, scratch_operands = 0 : i64, tpu.core_type = #tpu.core_type<tc>, window_params = [{transform_indices = @transform_0, window_bounds = array<i64: 16, 128>}, {pipeline_mode = #tpu.pipeline_mode<synchronous>, transform_indices = @transform_1, window_bounds = array<i64: 1, 128>}, {pipeline_mode = #tpu.pipeline_mode<synchronous>, transform_indices = @transform_2, window_bounds = array<i64: 1, 128>}, {transform_indices = @transform_3, window_bounds = array<i64: 128, 128>}, {transform_indices = @transform_4, window_bounds = array<i64: 1, 128>}, {transform_indices = @transform_5, window_bounds = array<i64: 16, 128>}]} {
    %c0 = arith.constant 0 : index
    %c0_0 = arith.constant 0 : index
    %0 = vector.load %arg2[%c0, %c0_0] : memref<16x128xbf16, #tpu.memory_space<vmem>>, vector<16x128xbf16>
    %1 = arith.extf %0 : vector<16x128xbf16> to vector<16x128xf32>
    %cst = arith.constant dense<0.000000e+00> : vector<16xf32>
    %2 = vector.multi_reduction <add>, %1, %cst [1] : vector<16x128xf32> to vector<16xf32>
    %3 = vector.shape_cast %2 : vector<16xf32> to vector<16x1xf32>
    %cst_1 = arith.constant 1.280000e+02 : f32
    %4 = vector.broadcast %cst_1 : f32 to vector<16x1xf32>
    %5 = arith.divf %3, %4 : vector<16x1xf32>
    %6 = vector.broadcast %5 : vector<16x1xf32> to vector<16x128xf32>
    %7 = arith.subf %1, %6 : vector<16x128xf32>
    %8 = arith.mulf %7, %7 : vector<16x128xf32>
    %cst_2 = arith.constant dense<0.000000e+00> : vector<16xf32>
    %9 = vector.multi_reduction <add>, %8, %cst_2 [1] : vector<16x128xf32> to vector<16xf32>
    %10 = vector.shape_cast %9 : vector<16xf32> to vector<16x1xf32>
    %cst_3 = arith.constant 1.280000e+02 : f32
    %11 = vector.broadcast %cst_3 : f32 to vector<16x1xf32>
    %12 = arith.divf %10, %11 : vector<16x1xf32>
    %13 = vector.broadcast %5 : vector<16x1xf32> to vector<16x128xf32>
    %14 = arith.subf %1, %13 : vector<16x128xf32>
    %cst_4 = arith.constant 9.99999974E-6 : f32
    %15 = vector.broadcast %cst_4 : f32 to vector<16x1xf32>
    %16 = arith.addf %12, %15 : vector<16x1xf32>
    %17 = math.rsqrt %16 : vector<16x1xf32>
    %18 = vector.broadcast %17 : vector<16x1xf32> to vector<16x128xf32>
    %19 = arith.mulf %14, %18 : vector<16x128xf32>
    %c0_5 = arith.constant 0 : index
    %c0_6 = arith.constant 0 : index
    %20 = vector.load %arg3[%c0_5, %c0_6] : memref<1x128xf32, #tpu.memory_space<vmem>>, vector<1x128xf32>
    %21 = vector.broadcast %20 : vector<1x128xf32> to vector<16x128xf32>
    %22 = arith.mulf %19, %21 : vector<16x128xf32>
    %c0_7 = arith.constant 0 : index
    %c0_8 = arith.constant 0 : index
    %23 = vector.load %arg4[%c0_7, %c0_8] : memref<1x128xf32, #tpu.memory_space<vmem>>, vector<1x128xf32>
    %24 = vector.broadcast %23 : vector<1x128xf32> to vector<16x128xf32>
    %25 = arith.addf %22, %24 : vector<16x128xf32>
    %26 = arith.truncf %25 : vector<16x128xf32> to vector<16x128xbf16>
    %c0_9 = arith.constant 0 : index
    %c0_10 = arith.constant 0 : index
    %27 = vector.load %arg5[%c0_9, %c0_10] : memref<128x128xbf16, #tpu.memory_space<vmem>>, vector<128x128xbf16>
    %cst_11 = arith.constant dense<0.000000e+00> : vector<16x128xf32>
    %28 = tpu.matmul %26, %27, %cst_11 {dimension_numbers = #tpu.dot_dimension_numbers<[1], [0], [0], [1], [0, 0, 1, 1], [], []>} : vector<16x128xbf16>, vector<128x128xbf16>, vector<16x128xf32> -> vector<16x128xf32>
    %c0_12 = arith.constant 0 : index
    %c0_13 = arith.constant 0 : index
    %29 = vector.load %arg6[%c0_12, %c0_13] : memref<1x128xf32, #tpu.memory_space<vmem>>, vector<1x128xf32>
    %30 = vector.broadcast %29 : vector<1x128xf32> to vector<16x128xf32>
    %31 = arith.addf %28, %30 : vector<16x128xf32>
    %32 = arith.truncf %31 : vector<16x128xf32> to vector<16x128xbf16>
    %c0_14 = arith.constant 0 : index
    %c0_15 = arith.constant 0 : index
    %33 = vector.load %arg7[%c0_14, %c0_15] : memref<16x128xbf16, #tpu.memory_space<vmem>>, vector<16x128xbf16>
    tpu.vector_store %arg7[%c0_14, %c0_15], %32 {strides = array<i32>} : memref<16x128xbf16, #tpu.memory_space<vmem>>, vector<16x128xbf16>,
    return
  }
  func.func @transform_0(%arg0: i32, %arg1: i32) -> (i32, i32) {
    %c0_i32 = arith.constant 0 : i32
    %c0_i32_0 = arith.constant 0 : i32
    return %arg0, %c0_i32 : i32, i32
  }
  func.func @transform_1(%arg0: i32, %arg1: i32) -> (i32, i32) {
    %c0_i32 = arith.constant 0 : i32
    %c0_i32_0 = arith.constant 0 : i32
    %c0_i32_1 = arith.constant 0 : i32
    return %c0_i32, %c0_i32_0 : i32, i32
  }
  func.func @transform_2(%arg0: i32, %arg1: i32) -> (i32, i32) {
    %c0_i32 = arith.constant 0 : i32
    %c0_i32_0 = arith.constant 0 : i32
    %c0_i32_1 = arith.constant 0 : i32
    return %c0_i32, %c0_i32_0 : i32, i32
  }
  func.func @transform_3(%arg0: i32, %arg1: i32) -> (i32, i32) {
    %c0_i32 = arith.constant 0 : i32
    %c0_i32_0 = arith.constant 0 : i32
    return %c0_i32, %arg1 : i32, i32
  }
  func.func @transform_4(%arg0: i32, %arg1: i32) -> (i32, i32) {
    %c0_i32 = arith.constant 0 : i32
    %c0_i32_0 = arith.constant 0 : i32
    return %c0_i32, %arg1 : i32, i32
  }
  func.func @transform_5(%arg0: i32, %arg1: i32) -> (i32, i32) {
    %c0_i32 = arith.constant 0 : i32
    return %arg0, %arg1 : i32, i32
  }
}

module attributes {stable_mosaic.version = 11 : i64} {
  func.func @_linear_kernel(%arg0: i32, %arg1: i32, %arg2: i32, %arg3: memref<16x128xbf16, #tpu.memory_space<vmem>>, %arg4: memref<128x128xbf16, #tpu.memory_space<vmem>>, %arg5: memref<1x128xf32, #tpu.memory_space<vmem>>, %arg6: memref<16x128xbf16, #tpu.memory_space<vmem>>, %arg7: memref<16x128xbf16, #tpu.memory_space<vmem>>, %arg8: memref<16x128xf32, #tpu.memory_space<vmem>>) attributes {dimension_semantics = [#tpu.dimension_semantics<parallel>, #tpu.dimension_semantics<parallel>, #tpu.dimension_semantics<arbitrary>], iteration_bounds = array<i64: 1, 1, 1>, scalar_prefetch = 0 : i64, scratch_operands = 1 : i64, tpu.core_type = #tpu.core_type<tc>, window_params = [{transform_indices = @transform_0, window_bounds = array<i64: 16, 128>}, {transform_indices = @transform_1, window_bounds = array<i64: 128, 128>}, {transform_indices = @transform_2, window_bounds = array<i64: 1, 128>}, {transform_indices = @transform_3, window_bounds = array<i64: 16, 128>}, {transform_indices = @transform_4, window_bounds = array<i64: 16, 128>}]} {
    %c0_i32 = arith.constant 0 : i32
    %0 = arith.cmpi eq, %arg2, %c0_i32 : i32
    %1 = arith.extui %0 : i1 to i32
    %c0_i32_0 = arith.constant 0 : i32
    %2 = arith.cmpi ne, %1, %c0_i32_0 : i32
    scf.if %2 {
      %cst_10 = arith.constant 0.000000e+00 : f32
      %12 = vector.broadcast %cst_10 : f32 to vector<16x128xf32>
      %c0_11 = arith.constant 0 : index
      %c0_12 = arith.constant 0 : index
      %13 = vector.load %arg8[%c0_11, %c0_12] : memref<16x128xf32, #tpu.memory_space<vmem>>, vector<16x128xf32>
      tpu.vector_store %arg8[%c0_11, %c0_12], %12 {strides = array<i32>} : memref<16x128xf32, #tpu.memory_space<vmem>>, vector<16x128xf32>,
    } else {
    }
    %c0 = arith.constant 0 : index
    %c0_1 = arith.constant 0 : index
    %3 = vector.load %arg8[%c0, %c0_1] : memref<16x128xf32, #tpu.memory_space<vmem>>, vector<16x128xf32>
    %c0_2 = arith.constant 0 : index
    %c0_3 = arith.constant 0 : index
    %4 = vector.load %arg3[%c0_2, %c0_3] : memref<16x128xbf16, #tpu.memory_space<vmem>>, vector<16x128xbf16>
    %c0_4 = arith.constant 0 : index
    %c0_5 = arith.constant 0 : index
    %5 = vector.load %arg4[%c0_4, %c0_5] : memref<128x128xbf16, #tpu.memory_space<vmem>>, vector<128x128xbf16>
    %cst = arith.constant dense<0.000000e+00> : vector<16x128xf32>
    %6 = tpu.matmul %4, %5, %cst {dimension_numbers = #tpu.dot_dimension_numbers<[1], [0], [0], [1], [0, 0, 1, 1], [], []>} : vector<16x128xbf16>, vector<128x128xbf16>, vector<16x128xf32> -> vector<16x128xf32>
    %7 = arith.addf %3, %6 : vector<16x128xf32>
    %c0_6 = arith.constant 0 : index
    %c0_7 = arith.constant 0 : index
    %8 = vector.load %arg8[%c0_6, %c0_7] : memref<16x128xf32, #tpu.memory_space<vmem>>, vector<16x128xf32>
    tpu.vector_store %arg8[%c0_6, %c0_7], %7 {strides = array<i32>} : memref<16x128xf32, #tpu.memory_space<vmem>>, vector<16x128xf32>,
    %c0_i32_8 = arith.constant 0 : i32
    %9 = arith.cmpi eq, %arg2, %c0_i32_8 : i32
    %10 = arith.extui %9 : i1 to i32
    %c0_i32_9 = arith.constant 0 : i32
    %11 = arith.cmpi ne, %10, %c0_i32_9 : i32
    scf.if %11 {
      %c0_10 = arith.constant 0 : index
      %c0_11 = arith.constant 0 : index
      %12 = vector.load %arg8[%c0_10, %c0_11] : memref<16x128xf32, #tpu.memory_space<vmem>>, vector<16x128xf32>
      %c0_12 = arith.constant 0 : index
      %c0_13 = arith.constant 0 : index
      %13 = vector.load %arg5[%c0_12, %c0_13] : memref<1x128xf32, #tpu.memory_space<vmem>>, vector<1x128xf32>
      %14 = vector.broadcast %13 : vector<1x128xf32> to vector<16x128xf32>
      %15 = arith.addf %12, %14 : vector<16x128xf32>
      %c0_14 = arith.constant 0 : index
      %c0_15 = arith.constant 0 : index
      %16 = vector.load %arg6[%c0_14, %c0_15] : memref<16x128xbf16, #tpu.memory_space<vmem>>, vector<16x128xbf16>
      %17 = arith.extf %16 : vector<16x128xbf16> to vector<16x128xf32>
      %18 = arith.addf %15, %17 : vector<16x128xf32>
      %19 = arith.truncf %18 : vector<16x128xf32> to vector<16x128xbf16>
      %c0_16 = arith.constant 0 : index
      %c0_17 = arith.constant 0 : index
      %20 = vector.load %arg7[%c0_16, %c0_17] : memref<16x128xbf16, #tpu.memory_space<vmem>>, vector<16x128xbf16>
      tpu.vector_store %arg7[%c0_16, %c0_17], %19 {strides = array<i32>} : memref<16x128xbf16, #tpu.memory_space<vmem>>, vector<16x128xbf16>,
    } else {
    }
    return
  }
  func.func @transform_0(%arg0: i32, %arg1: i32, %arg2: i32) -> (i32, i32) {
    %c0_i32 = arith.constant 0 : i32
    return %arg0, %arg2 : i32, i32
  }
  func.func @transform_1(%arg0: i32, %arg1: i32, %arg2: i32) -> (i32, i32) {
    %c0_i32 = arith.constant 0 : i32
    return %arg2, %arg1 : i32, i32
  }
  func.func @transform_2(%arg0: i32, %arg1: i32, %arg2: i32) -> (i32, i32) {
    %c0_i32 = arith.constant 0 : i32
    %c0_i32_0 = arith.constant 0 : i32
    return %c0_i32, %arg1 : i32, i32
  }
  func.func @transform_3(%arg0: i32, %arg1: i32, %arg2: i32) -> (i32, i32) {
    %c0_i32 = arith.constant 0 : i32
    return %arg0, %arg1 : i32, i32
  }
  func.func @transform_4(%arg0: i32, %arg1: i32, %arg2: i32) -> (i32, i32) {
    %c0_i32 = arith.constant 0 : i32
    return %arg0, %arg1 : i32, i32
  }
}

module attributes {stable_mosaic.version = 11 : i64} {
  func.func @_ln_linear_kernel(%arg0: i32, %arg1: i32, %arg2: memref<16x128xbf16, #tpu.memory_space<vmem>>, %arg3: memref<1x128xf32, #tpu.memory_space<vmem>>, %arg4: memref<1x128xf32, #tpu.memory_space<vmem>>, %arg5: memref<128x128xbf16, #tpu.memory_space<vmem>>, %arg6: memref<1x128xf32, #tpu.memory_space<vmem>>, %arg7: memref<16x128xbf16, #tpu.memory_space<vmem>>) attributes {dimension_semantics = [#tpu.dimension_semantics<parallel>, #tpu.dimension_semantics<parallel>], iteration_bounds = array<i64: 1, 1>, scalar_prefetch = 0 : i64, scratch_operands = 0 : i64, tpu.core_type = #tpu.core_type<tc>, window_params = [{transform_indices = @transform_0, window_bounds = array<i64: 16, 128>}, {pipeline_mode = #tpu.pipeline_mode<synchronous>, transform_indices = @transform_1, window_bounds = array<i64: 1, 128>}, {pipeline_mode = #tpu.pipeline_mode<synchronous>, transform_indices = @transform_2, window_bounds = array<i64: 1, 128>}, {transform_indices = @transform_3, window_bounds = array<i64: 128, 128>}, {transform_indices = @transform_4, window_bounds = array<i64: 1, 128>}, {transform_indices = @transform_5, window_bounds = array<i64: 16, 128>}]} {
    %c0 = arith.constant 0 : index
    %c0_0 = arith.constant 0 : index
    %0 = vector.load %arg2[%c0, %c0_0] : memref<16x128xbf16, #tpu.memory_space<vmem>>, vector<16x128xbf16>
    %1 = arith.extf %0 : vector<16x128xbf16> to vector<16x128xf32>
    %cst = arith.constant dense<0.000000e+00> : vector<16xf32>
    %2 = vector.multi_reduction <add>, %1, %cst [1] : vector<16x128xf32> to vector<16xf32>
    %3 = vector.shape_cast %2 : vector<16xf32> to vector<16x1xf32>
    %cst_1 = arith.constant 1.280000e+02 : f32
    %4 = vector.broadcast %cst_1 : f32 to vector<16x1xf32>
    %5 = arith.divf %3, %4 : vector<16x1xf32>
    %6 = vector.broadcast %5 : vector<16x1xf32> to vector<16x128xf32>
    %7 = arith.subf %1, %6 : vector<16x128xf32>
    %8 = arith.mulf %7, %7 : vector<16x128xf32>
    %cst_2 = arith.constant dense<0.000000e+00> : vector<16xf32>
    %9 = vector.multi_reduction <add>, %8, %cst_2 [1] : vector<16x128xf32> to vector<16xf32>
    %10 = vector.shape_cast %9 : vector<16xf32> to vector<16x1xf32>
    %cst_3 = arith.constant 1.280000e+02 : f32
    %11 = vector.broadcast %cst_3 : f32 to vector<16x1xf32>
    %12 = arith.divf %10, %11 : vector<16x1xf32>
    %13 = vector.broadcast %5 : vector<16x1xf32> to vector<16x128xf32>
    %14 = arith.subf %1, %13 : vector<16x128xf32>
    %cst_4 = arith.constant 9.99999974E-6 : f32
    %15 = vector.broadcast %cst_4 : f32 to vector<16x1xf32>
    %16 = arith.addf %12, %15 : vector<16x1xf32>
    %17 = math.rsqrt %16 : vector<16x1xf32>
    %18 = vector.broadcast %17 : vector<16x1xf32> to vector<16x128xf32>
    %19 = arith.mulf %14, %18 : vector<16x128xf32>
    %c0_5 = arith.constant 0 : index
    %c0_6 = arith.constant 0 : index
    %20 = vector.load %arg3[%c0_5, %c0_6] : memref<1x128xf32, #tpu.memory_space<vmem>>, vector<1x128xf32>
    %21 = vector.broadcast %20 : vector<1x128xf32> to vector<16x128xf32>
    %22 = arith.mulf %19, %21 : vector<16x128xf32>
    %c0_7 = arith.constant 0 : index
    %c0_8 = arith.constant 0 : index
    %23 = vector.load %arg4[%c0_7, %c0_8] : memref<1x128xf32, #tpu.memory_space<vmem>>, vector<1x128xf32>
    %24 = vector.broadcast %23 : vector<1x128xf32> to vector<16x128xf32>
    %25 = arith.addf %22, %24 : vector<16x128xf32>
    %26 = arith.truncf %25 : vector<16x128xf32> to vector<16x128xbf16>
    %c0_9 = arith.constant 0 : index
    %c0_10 = arith.constant 0 : index
    %27 = vector.load %arg5[%c0_9, %c0_10] : memref<128x128xbf16, #tpu.memory_space<vmem>>, vector<128x128xbf16>
    %cst_11 = arith.constant dense<0.000000e+00> : vector<16x128xf32>
    %28 = tpu.matmul %26, %27, %cst_11 {dimension_numbers = #tpu.dot_dimension_numbers<[1], [0], [0], [1], [0, 0, 1, 1], [], []>} : vector<16x128xbf16>, vector<128x128xbf16>, vector<16x128xf32> -> vector<16x128xf32>
    %c0_12 = arith.constant 0 : index
    %c0_13 = arith.constant 0 : index
    %29 = vector.load %arg6[%c0_12, %c0_13] : memref<1x128xf32, #tpu.memory_space<vmem>>, vector<1x128xf32>
    %30 = vector.broadcast %29 : vector<1x128xf32> to vector<16x128xf32>
    %31 = arith.addf %28, %30 : vector<16x128xf32>
    %32 = arith.truncf %31 : vector<16x128xf32> to vector<16x128xbf16>
    %c0_14 = arith.constant 0 : index
    %c0_15 = arith.constant 0 : index
    %33 = vector.load %arg7[%c0_14, %c0_15] : memref<16x128xbf16, #tpu.memory_space<vmem>>, vector<16x128xbf16>
    tpu.vector_store %arg7[%c0_14, %c0_15], %32 {strides = array<i32>} : memref<16x128xbf16, #tpu.memory_space<vmem>>, vector<16x128xbf16>,
    return
  }
  func.func @transform_0(%arg0: i32, %arg1: i32) -> (i32, i32) {
    %c0_i32 = arith.constant 0 : i32
    %c0_i32_0 = arith.constant 0 : i32
    return %arg0, %c0_i32 : i32, i32
  }
  func.func @transform_1(%arg0: i32, %arg1: i32) -> (i32, i32) {
    %c0_i32 = arith.constant 0 : i32
    %c0_i32_0 = arith.constant 0 : i32
    %c0_i32_1 = arith.constant 0 : i32
    return %c0_i32, %c0_i32_0 : i32, i32
  }
  func.func @transform_2(%arg0: i32, %arg1: i32) -> (i32, i32) {
    %c0_i32 = arith.constant 0 : i32
    %c0_i32_0 = arith.constant 0 : i32
    %c0_i32_1 = arith.constant 0 : i32
    return %c0_i32, %c0_i32_0 : i32, i32
  }
  func.func @transform_3(%arg0: i32, %arg1: i32) -> (i32, i32) {
    %c0_i32 = arith.constant 0 : i32
    %c0_i32_0 = arith.constant 0 : i32
    return %c0_i32, %arg1 : i32, i32
  }
  func.func @transform_4(%arg0: i32, %arg1: i32) -> (i32, i32) {
    %c0_i32 = arith.constant 0 : i32
    %c0_i32_0 = arith.constant 0 : i32
    return %c0_i32, %arg1 : i32, i32
  }
  func.func @transform_5(%arg0: i32, %arg1: i32) -> (i32, i32) {
    %c0_i32 = arith.constant 0 : i32
    return %arg0, %arg1 : i32, i32
  }
}

module attributes {stable_mosaic.version = 11 : i64} {
  func.func @_flash_attn_kernel(%arg0: i32, %arg1: i32, %arg2: memref<1x8x128xbf16, #tpu.memory_space<vmem>>, %arg3: memref<1x8x128xbf16, #tpu.memory_space<vmem>>, %arg4: memref<1x8x128xbf16, #tpu.memory_space<vmem>>, %arg5: memref<1x8x128xbf16, #tpu.memory_space<vmem>>, %arg6: memref<4x8x1xf32, #tpu.memory_space<vmem>>, %arg7: memref<4x8x1xf32, #tpu.memory_space<vmem>>, %arg8: memref<4x8x32xf32, #tpu.memory_space<vmem>>) attributes {dimension_semantics = [#tpu.dimension_semantics<parallel>, #tpu.dimension_semantics<arbitrary>], iteration_bounds = array<i64: 2, 1>, scalar_prefetch = 0 : i64, scratch_operands = 3 : i64, tpu.core_type = #tpu.core_type<tc>, window_params = [{transform_indices = @transform_0, window_bounds = array<i64: 1, 8, 128>}, {transform_indices = @transform_1, window_bounds = array<i64: 1, 8, 128>}, {transform_indices = @transform_2, window_bounds = array<i64: 1, 8, 128>}, {transform_indices = @transform_3, window_bounds = array<i64: 1, 8, 128>}]} {
    %c0_i32 = arith.constant 0 : i32
    %0 = arith.cmpi eq, %arg1, %c0_i32 : i32
    %1 = arith.extui %0 : i1 to i32
    %c0_i32_0 = arith.constant 0 : i32
    %2 = arith.cmpi ne, %1, %c0_i32_0 : i32
    scf.if %2 {
      %cst_100 = arith.constant 0xFF800000 : f32
      %172 = vector.broadcast %cst_100 : f32 to vector<4x8x1xf32>
      %c0_101 = arith.constant 0 : index
      %c0_102 = arith.constant 0 : index
      %c0_103 = arith.constant 0 : index
      %173 = vector.load %arg6[%c0_101, %c0_102, %c0_103] : memref<4x8x1xf32, #tpu.memory_space<vmem>>, vector<4x8x1xf32>
      tpu.vector_store %arg6[%c0_101, %c0_102, %c0_103], %172 {strides = array<i32>} : memref<4x8x1xf32, #tpu.memory_space<vmem>>, vector<4x8x1xf32>,
      %cst_104 = arith.constant 0.000000e+00 : f32
      %174 = vector.broadcast %cst_104 : f32 to vector<4x8x1xf32>
      %c0_105 = arith.constant 0 : index
      %c0_106 = arith.constant 0 : index
      %c0_107 = arith.constant 0 : index
      %175 = vector.load %arg7[%c0_105, %c0_106, %c0_107] : memref<4x8x1xf32, #tpu.memory_space<vmem>>, vector<4x8x1xf32>
      tpu.vector_store %arg7[%c0_105, %c0_106, %c0_107], %174 {strides = array<i32>} : memref<4x8x1xf32, #tpu.memory_space<vmem>>, vector<4x8x1xf32>,
      %cst_108 = arith.constant 0.000000e+00 : f32
      %176 = vector.broadcast %cst_108 : f32 to vector<4x8x32xf32>
      %c0_109 = arith.constant 0 : index
      %c0_110 = arith.constant 0 : index
      %c0_111 = arith.constant 0 : index
      %177 = vector.load %arg8[%c0_109, %c0_110, %c0_111] : memref<4x8x32xf32, #tpu.memory_space<vmem>>, vector<4x8x32xf32>
      tpu.vector_store %arg8[%c0_109, %c0_110, %c0_111], %176 {strides = array<i32>} : memref<4x8x32xf32, #tpu.memory_space<vmem>>, vector<4x8x32xf32>,
    } else {
    }
    %c0 = arith.constant 0 : index
    %c0_1 = arith.constant 0 : index
    %c0_2 = arith.constant 0 : index
    %3 = vector.load %arg2[%c0, %c0_1, %c0_2] : memref<1x8x128xbf16, #tpu.memory_space<vmem>>, vector<1x8x128xbf16>
    %4 = vector.shape_cast %3 : vector<1x8x128xbf16> to vector<8x128xbf16>
    %cst = arith.constant 1.767580e-01 : bf16
    %5 = vector.broadcast %cst : bf16 to vector<8x128xbf16>
    %6 = arith.mulf %4, %5 : vector<8x128xbf16>
    %c0_3 = arith.constant 0 : index
    %c0_4 = arith.constant 0 : index
    %c0_5 = arith.constant 0 : index
    %7 = vector.load %arg3[%c0_3, %c0_4, %c0_5] : memref<1x8x128xbf16, #tpu.memory_space<vmem>>, vector<1x8x128xbf16>
    %8 = vector.shape_cast %7 : vector<1x8x128xbf16> to vector<8x128xbf16>
    %c0_6 = arith.constant 0 : index
    %c0_7 = arith.constant 0 : index
    %c0_8 = arith.constant 0 : index
    %9 = vector.load %arg4[%c0_6, %c0_7, %c0_8] : memref<1x8x128xbf16, #tpu.memory_space<vmem>>, vector<1x8x128xbf16>
    %10 = vector.shape_cast %9 : vector<1x8x128xbf16> to vector<8x128xbf16>
    %11 = tpu.iota {dimensions = array<i32: 0>} : vector<8x8xi32>
    %12 = tpu.iota {dimensions = array<i32: 1>} : vector<8x8xi32>
    %c8_i32 = arith.constant 8 : i32
    %13 = arith.muli %arg1, %c8_i32 : i32
    %14 = vector.broadcast %13 : i32 to vector<8x8xi32>
    %15 = arith.addi %12, %14 : vector<8x8xi32>
    %16 = arith.cmpi sle, %15, %11 : vector<8x8xi32>
    %17 = vector.extract_strided_slice %6 {offsets = [0, 0], sizes = [8, 32], strides = [1, 1]} : vector<8x128xbf16> to vector<8x32xbf16>
    %18 = vector.extract_strided_slice %8 {offsets = [0, 0], sizes = [8, 32], strides = [1, 1]} : vector<8x128xbf16> to vector<8x32xbf16>
    %cst_9 = arith.constant dense<0.000000e+00> : vector<8x8xf32>
    %19 = tpu.matmul %17, %18, %cst_9 {dimension_numbers = #tpu.dot_dimension_numbers<[1], [1], [0], [0], [0, 0, 1, 0], [], []>} : vector<8x32xbf16>, vector<8x32xbf16>, vector<8x8xf32> -> vector<8x8xf32>
    %cst_10 = arith.constant -1.000000e+30 : f32
    %20 = vector.broadcast %cst_10 : f32 to vector<8x8xf32>
    %21 = arith.select %16, %19, %20 : vector<8x8xi1>, vector<8x8xf32>
    %c0_11 = arith.constant 0 : index
    %c0_12 = arith.constant 0 : index
    %c0_13 = arith.constant 0 : index
    %22 = vector.load %arg6[%c0_11, %c0_12, %c0_13] : memref<4x8x1xf32, #tpu.memory_space<vmem>>, vector<1x8x1xf32>
    %23 = vector.shape_cast %22 : vector<1x8x1xf32> to vector<8x1xf32>
    %cst_14 = arith.constant dense<0xFF800000> : vector<8xf32>
    %24 = vector.multi_reduction <maximumf>, %21, %cst_14 [1] : vector<8x8xf32> to vector<8xf32>
    %25 = vector.shape_cast %24 : vector<8xf32> to vector<8x1xf32>
    %26 = arith.maximumf %23, %25 : vector<8x1xf32>
    %27 = arith.subf %23, %26 : vector<8x1xf32>
    %28 = math.exp %27 : vector<8x1xf32>
    %29 = vector.broadcast %26 : vector<8x1xf32> to vector<8x8xf32>
    %30 = arith.subf %21, %29 : vector<8x8xf32>
    %31 = math.exp %30 : vector<8x8xf32>
    %c0_15 = arith.constant 0 : index
    %c0_16 = arith.constant 0 : index
    %c0_17 = arith.constant 0 : index
    %32 = vector.load %arg7[%c0_15, %c0_16, %c0_17] : memref<4x8x1xf32, #tpu.memory_space<vmem>>, vector<1x8x1xf32>
    %33 = vector.shape_cast %32 : vector<1x8x1xf32> to vector<8x1xf32>
    %34 = arith.mulf %28, %33 : vector<8x1xf32>
    %cst_18 = arith.constant dense<0.000000e+00> : vector<8xf32>
    %35 = vector.multi_reduction <add>, %31, %cst_18 [1] : vector<8x8xf32> to vector<8xf32>
    %36 = vector.shape_cast %35 : vector<8xf32> to vector<8x1xf32>
    %37 = arith.addf %34, %36 : vector<8x1xf32>
    %c0_19 = arith.constant 0 : index
    %c0_20 = arith.constant 0 : index
    %c0_21 = arith.constant 0 : index
    %38 = vector.load %arg7[%c0_19, %c0_20, %c0_21] : memref<4x8x1xf32, #tpu.memory_space<vmem>>, vector<1x8x1xf32>
    %39 = vector.shape_cast %38 : vector<1x8x1xf32> to vector<8x1xf32>
    %40 = vector.shape_cast %37 : vector<8x1xf32> to vector<1x8x1xf32>
    tpu.vector_store %arg7[%c0_19, %c0_20, %c0_21], %40 {strides = array<i32>} : memref<4x8x1xf32, #tpu.memory_space<vmem>>, vector<1x8x1xf32>,
    %c0_22 = arith.constant 0 : index
    %c0_23 = arith.constant 0 : index
    %c0_24 = arith.constant 0 : index
    %41 = vector.load %arg8[%c0_22, %c0_23, %c0_24] : memref<4x8x32xf32, #tpu.memory_space<vmem>>, vector<1x8x32xf32>
    %42 = vector.shape_cast %41 : vector<1x8x32xf32> to vector<8x32xf32>
    %43 = vector.broadcast %28 : vector<8x1xf32> to vector<8x32xf32>
    %44 = arith.mulf %43, %42 : vector<8x32xf32>
    %45 = arith.truncf %31 : vector<8x8xf32> to vector<8x8xbf16>
    %46 = vector.extract_strided_slice %10 {offsets = [0, 0], sizes = [8, 32], strides = [1, 1]} : vector<8x128xbf16> to vector<8x32xbf16>
    %cst_25 = arith.constant dense<0.000000e+00> : vector<8x32xf32>
    %47 = tpu.matmul %45, %46, %cst_25 {dimension_numbers = #tpu.dot_dimension_numbers<[1], [0], [0], [1], [0, 0, 1, 1], [], []>} : vector<8x8xbf16>, vector<8x32xbf16>, vector<8x32xf32> -> vector<8x32xf32>
    %48 = arith.addf %44, %47 : vector<8x32xf32>
    %c0_26 = arith.constant 0 : index
    %c0_27 = arith.constant 0 : index
    %c0_28 = arith.constant 0 : index
    %49 = vector.load %arg8[%c0_26, %c0_27, %c0_28] : memref<4x8x32xf32, #tpu.memory_space<vmem>>, vector<1x8x32xf32>
    %50 = vector.shape_cast %49 : vector<1x8x32xf32> to vector<8x32xf32>
    %51 = vector.shape_cast %48 : vector<8x32xf32> to vector<1x8x32xf32>
    tpu.vector_store %arg8[%c0_26, %c0_27, %c0_28], %51 {strides = array<i32>} : memref<4x8x32xf32, #tpu.memory_space<vmem>>, vector<1x8x32xf32>,
    %c0_29 = arith.constant 0 : index
    %c0_30 = arith.constant 0 : index
    %c0_31 = arith.constant 0 : index
    %52 = vector.load %arg6[%c0_29, %c0_30, %c0_31] : memref<4x8x1xf32, #tpu.memory_space<vmem>>, vector<1x8x1xf32>
    %53 = vector.shape_cast %52 : vector<1x8x1xf32> to vector<8x1xf32>
    %54 = vector.shape_cast %26 : vector<8x1xf32> to vector<1x8x1xf32>
    tpu.vector_store %arg6[%c0_29, %c0_30, %c0_31], %54 {strides = array<i32>} : memref<4x8x1xf32, #tpu.memory_space<vmem>>, vector<1x8x1xf32>,
    %55 = vector.extract_strided_slice %6 {offsets = [0, 32], sizes = [8, 32], strides = [1, 1]} : vector<8x128xbf16> to vector<8x32xbf16>
    %56 = vector.extract_strided_slice %8 {offsets = [0, 32], sizes = [8, 32], strides = [1, 1]} : vector<8x128xbf16> to vector<8x32xbf16>
    %cst_32 = arith.constant dense<0.000000e+00> : vector<8x8xf32>
    %57 = tpu.matmul %55, %56, %cst_32 {dimension_numbers = #tpu.dot_dimension_numbers<[1], [1], [0], [0], [0, 0, 1, 0], [], []>} : vector<8x32xbf16>, vector<8x32xbf16>, vector<8x8xf32> -> vector<8x8xf32>
    %cst_33 = arith.constant -1.000000e+30 : f32
    %58 = vector.broadcast %cst_33 : f32 to vector<8x8xf32>
    %59 = arith.select %16, %57, %58 : vector<8x8xi1>, vector<8x8xf32>
    %c1 = arith.constant 1 : index
    %c0_34 = arith.constant 0 : index
    %c0_35 = arith.constant 0 : index
    %60 = vector.load %arg6[%c1, %c0_34, %c0_35] : memref<4x8x1xf32, #tpu.memory_space<vmem>>, vector<1x8x1xf32>
    %61 = vector.shape_cast %60 : vector<1x8x1xf32> to vector<8x1xf32>
    %cst_36 = arith.constant dense<0xFF800000> : vector<8xf32>
    %62 = vector.multi_reduction <maximumf>, %59, %cst_36 [1] : vector<8x8xf32> to vector<8xf32>
    %63 = vector.shape_cast %62 : vector<8xf32> to vector<8x1xf32>
    %64 = arith.maximumf %61, %63 : vector<8x1xf32>
    %65 = arith.subf %61, %64 : vector<8x1xf32>
    %66 = math.exp %65 : vector<8x1xf32>
    %67 = vector.broadcast %64 : vector<8x1xf32> to vector<8x8xf32>
    %68 = arith.subf %59, %67 : vector<8x8xf32>
    %69 = math.exp %68 : vector<8x8xf32>
    %c1_37 = arith.constant 1 : index
    %c0_38 = arith.constant 0 : index
    %c0_39 = arith.constant 0 : index
    %70 = vector.load %arg7[%c1_37, %c0_38, %c0_39] : memref<4x8x1xf32, #tpu.memory_space<vmem>>, vector<1x8x1xf32>
    %71 = vector.shape_cast %70 : vector<1x8x1xf32> to vector<8x1xf32>
    %72 = arith.mulf %66, %71 : vector<8x1xf32>
    %cst_40 = arith.constant dense<0.000000e+00> : vector<8xf32>
    %73 = vector.multi_reduction <add>, %69, %cst_40 [1] : vector<8x8xf32> to vector<8xf32>
    %74 = vector.shape_cast %73 : vector<8xf32> to vector<8x1xf32>
    %75 = arith.addf %72, %74 : vector<8x1xf32>
    %c1_41 = arith.constant 1 : index
    %c0_42 = arith.constant 0 : index
    %c0_43 = arith.constant 0 : index
    %76 = vector.load %arg7[%c1_41, %c0_42, %c0_43] : memref<4x8x1xf32, #tpu.memory_space<vmem>>, vector<1x8x1xf32>
    %77 = vector.shape_cast %76 : vector<1x8x1xf32> to vector<8x1xf32>
    %78 = vector.shape_cast %75 : vector<8x1xf32> to vector<1x8x1xf32>
    tpu.vector_store %arg7[%c1_41, %c0_42, %c0_43], %78 {strides = array<i32>} : memref<4x8x1xf32, #tpu.memory_space<vmem>>, vector<1x8x1xf32>,
    %c1_44 = arith.constant 1 : index
    %c0_45 = arith.constant 0 : index
    %c0_46 = arith.constant 0 : index
    %79 = vector.load %arg8[%c1_44, %c0_45, %c0_46] : memref<4x8x32xf32, #tpu.memory_space<vmem>>, vector<1x8x32xf32>
    %80 = vector.shape_cast %79 : vector<1x8x32xf32> to vector<8x32xf32>
    %81 = vector.broadcast %66 : vector<8x1xf32> to vector<8x32xf32>
    %82 = arith.mulf %81, %80 : vector<8x32xf32>
    %83 = arith.truncf %69 : vector<8x8xf32> to vector<8x8xbf16>
    %84 = vector.extract_strided_slice %10 {offsets = [0, 32], sizes = [8, 32], strides = [1, 1]} : vector<8x128xbf16> to vector<8x32xbf16>
    %cst_47 = arith.constant dense<0.000000e+00> : vector<8x32xf32>
    %85 = tpu.matmul %83, %84, %cst_47 {dimension_numbers = #tpu.dot_dimension_numbers<[1], [0], [0], [1], [0, 0, 1, 1], [], []>} : vector<8x8xbf16>, vector<8x32xbf16>, vector<8x32xf32> -> vector<8x32xf32>
    %86 = arith.addf %82, %85 : vector<8x32xf32>
    %c1_48 = arith.constant 1 : index
    %c0_49 = arith.constant 0 : index
    %c0_50 = arith.constant 0 : index
    %87 = vector.load %arg8[%c1_48, %c0_49, %c0_50] : memref<4x8x32xf32, #tpu.memory_space<vmem>>, vector<1x8x32xf32>
    %88 = vector.shape_cast %87 : vector<1x8x32xf32> to vector<8x32xf32>
    %89 = vector.shape_cast %86 : vector<8x32xf32> to vector<1x8x32xf32>
    tpu.vector_store %arg8[%c1_48, %c0_49, %c0_50], %89 {strides = array<i32>} : memref<4x8x32xf32, #tpu.memory_space<vmem>>, vector<1x8x32xf32>,
    %c1_51 = arith.constant 1 : index
    %c0_52 = arith.constant 0 : index
    %c0_53 = arith.constant 0 : index
    %90 = vector.load %arg6[%c1_51, %c0_52, %c0_53] : memref<4x8x1xf32, #tpu.memory_space<vmem>>, vector<1x8x1xf32>
    %91 = vector.shape_cast %90 : vector<1x8x1xf32> to vector<8x1xf32>
    %92 = vector.shape_cast %64 : vector<8x1xf32> to vector<1x8x1xf32>
    tpu.vector_store %arg6[%c1_51, %c0_52, %c0_53], %92 {strides = array<i32>} : memref<4x8x1xf32, #tpu.memory_space<vmem>>, vector<1x8x1xf32>,
    %93 = vector.extract_strided_slice %6 {offsets = [0, 64], sizes = [8, 32], strides = [1, 1]} : vector<8x128xbf16> to vector<8x32xbf16>
    %94 = vector.extract_strided_slice %8 {offsets = [0, 64], sizes = [8, 32], strides = [1, 1]} : vector<8x128xbf16> to vector<8x32xbf16>
    %cst_54 = arith.constant dense<0.000000e+00> : vector<8x8xf32>
    %95 = tpu.matmul %93, %94, %cst_54 {dimension_numbers = #tpu.dot_dimension_numbers<[1], [1], [0], [0], [0, 0, 1, 0], [], []>} : vector<8x32xbf16>, vector<8x32xbf16>, vector<8x8xf32> -> vector<8x8xf32>
    %cst_55 = arith.constant -1.000000e+30 : f32
    %96 = vector.broadcast %cst_55 : f32 to vector<8x8xf32>
    %97 = arith.select %16, %95, %96 : vector<8x8xi1>, vector<8x8xf32>
    %c2 = arith.constant 2 : index
    %c0_56 = arith.constant 0 : index
    %c0_57 = arith.constant 0 : index
    %98 = vector.load %arg6[%c2, %c0_56, %c0_57] : memref<4x8x1xf32, #tpu.memory_space<vmem>>, vector<1x8x1xf32>
    %99 = vector.shape_cast %98 : vector<1x8x1xf32> to vector<8x1xf32>
    %cst_58 = arith.constant dense<0xFF800000> : vector<8xf32>
    %100 = vector.multi_reduction <maximumf>, %97, %cst_58 [1] : vector<8x8xf32> to vector<8xf32>
    %101 = vector.shape_cast %100 : vector<8xf32> to vector<8x1xf32>
    %102 = arith.maximumf %99, %101 : vector<8x1xf32>
    %103 = arith.subf %99, %102 : vector<8x1xf32>
    %104 = math.exp %103 : vector<8x1xf32>
    %105 = vector.broadcast %102 : vector<8x1xf32> to vector<8x8xf32>
    %106 = arith.subf %97, %105 : vector<8x8xf32>
    %107 = math.exp %106 : vector<8x8xf32>
    %c2_59 = arith.constant 2 : index
    %c0_60 = arith.constant 0 : index
    %c0_61 = arith.constant 0 : index
    %108 = vector.load %arg7[%c2_59, %c0_60, %c0_61] : memref<4x8x1xf32, #tpu.memory_space<vmem>>, vector<1x8x1xf32>
    %109 = vector.shape_cast %108 : vector<1x8x1xf32> to vector<8x1xf32>
    %110 = arith.mulf %104, %109 : vector<8x1xf32>
    %cst_62 = arith.constant dense<0.000000e+00> : vector<8xf32>
    %111 = vector.multi_reduction <add>, %107, %cst_62 [1] : vector<8x8xf32> to vector<8xf32>
    %112 = vector.shape_cast %111 : vector<8xf32> to vector<8x1xf32>
    %113 = arith.addf %110, %112 : vector<8x1xf32>
    %c2_63 = arith.constant 2 : index
    %c0_64 = arith.constant 0 : index
    %c0_65 = arith.constant 0 : index
    %114 = vector.load %arg7[%c2_63, %c0_64, %c0_65] : memref<4x8x1xf32, #tpu.memory_space<vmem>>, vector<1x8x1xf32>
    %115 = vector.shape_cast %114 : vector<1x8x1xf32> to vector<8x1xf32>
    %116 = vector.shape_cast %113 : vector<8x1xf32> to vector<1x8x1xf32>
    tpu.vector_store %arg7[%c2_63, %c0_64, %c0_65], %116 {strides = array<i32>} : memref<4x8x1xf32, #tpu.memory_space<vmem>>, vector<1x8x1xf32>,
    %c2_66 = arith.constant 2 : index
    %c0_67 = arith.constant 0 : index
    %c0_68 = arith.constant 0 : index
    %117 = vector.load %arg8[%c2_66, %c0_67, %c0_68] : memref<4x8x32xf32, #tpu.memory_space<vmem>>, vector<1x8x32xf32>
    %118 = vector.shape_cast %117 : vector<1x8x32xf32> to vector<8x32xf32>
    %119 = vector.broadcast %104 : vector<8x1xf32> to vector<8x32xf32>
    %120 = arith.mulf %119, %118 : vector<8x32xf32>
    %121 = arith.truncf %107 : vector<8x8xf32> to vector<8x8xbf16>
    %122 = vector.extract_strided_slice %10 {offsets = [0, 64], sizes = [8, 32], strides = [1, 1]} : vector<8x128xbf16> to vector<8x32xbf16>
    %cst_69 = arith.constant dense<0.000000e+00> : vector<8x32xf32>
    %123 = tpu.matmul %121, %122, %cst_69 {dimension_numbers = #tpu.dot_dimension_numbers<[1], [0], [0], [1], [0, 0, 1, 1], [], []>} : vector<8x8xbf16>, vector<8x32xbf16>, vector<8x32xf32> -> vector<8x32xf32>
    %124 = arith.addf %120, %123 : vector<8x32xf32>
    %c2_70 = arith.constant 2 : index
    %c0_71 = arith.constant 0 : index
    %c0_72 = arith.constant 0 : index
    %125 = vector.load %arg8[%c2_70, %c0_71, %c0_72] : memref<4x8x32xf32, #tpu.memory_space<vmem>>, vector<1x8x32xf32>
    %126 = vector.shape_cast %125 : vector<1x8x32xf32> to vector<8x32xf32>
    %127 = vector.shape_cast %124 : vector<8x32xf32> to vector<1x8x32xf32>
    tpu.vector_store %arg8[%c2_70, %c0_71, %c0_72], %127 {strides = array<i32>} : memref<4x8x32xf32, #tpu.memory_space<vmem>>, vector<1x8x32xf32>,
    %c2_73 = arith.constant 2 : index
    %c0_74 = arith.constant 0 : index
    %c0_75 = arith.constant 0 : index
    %128 = vector.load %arg6[%c2_73, %c0_74, %c0_75] : memref<4x8x1xf32, #tpu.memory_space<vmem>>, vector<1x8x1xf32>
    %129 = vector.shape_cast %128 : vector<1x8x1xf32> to vector<8x1xf32>
    %130 = vector.shape_cast %102 : vector<8x1xf32> to vector<1x8x1xf32>
    tpu.vector_store %arg6[%c2_73, %c0_74, %c0_75], %130 {strides = array<i32>} : memref<4x8x1xf32, #tpu.memory_space<vmem>>, vector<1x8x1xf32>,
    %131 = vector.extract_strided_slice %6 {offsets = [0, 96], sizes = [8, 32], strides = [1, 1]} : vector<8x128xbf16> to vector<8x32xbf16>
    %132 = vector.extract_strided_slice %8 {offsets = [0, 96], sizes = [8, 32], strides = [1, 1]} : vector<8x128xbf16> to vector<8x32xbf16>
    %cst_76 = arith.constant dense<0.000000e+00> : vector<8x8xf32>
    %133 = tpu.matmul %131, %132, %cst_76 {dimension_numbers = #tpu.dot_dimension_numbers<[1], [1], [0], [0], [0, 0, 1, 0], [], []>} : vector<8x32xbf16>, vector<8x32xbf16>, vector<8x8xf32> -> vector<8x8xf32>
    %cst_77 = arith.constant -1.000000e+30 : f32
    %134 = vector.broadcast %cst_77 : f32 to vector<8x8xf32>
    %135 = arith.select %16, %133, %134 : vector<8x8xi1>, vector<8x8xf32>
    %c3 = arith.constant 3 : index
    %c0_78 = arith.constant 0 : index
    %c0_79 = arith.constant 0 : index
    %136 = vector.load %arg6[%c3, %c0_78, %c0_79] : memref<4x8x1xf32, #tpu.memory_space<vmem>>, vector<1x8x1xf32>
    %137 = vector.shape_cast %136 : vector<1x8x1xf32> to vector<8x1xf32>
    %cst_80 = arith.constant dense<0xFF800000> : vector<8xf32>
    %138 = vector.multi_reduction <maximumf>, %135, %cst_80 [1] : vector<8x8xf32> to vector<8xf32>
    %139 = vector.shape_cast %138 : vector<8xf32> to vector<8x1xf32>
    %140 = arith.maximumf %137, %139 : vector<8x1xf32>
    %141 = arith.subf %137, %140 : vector<8x1xf32>
    %142 = math.exp %141 : vector<8x1xf32>
    %143 = vector.broadcast %140 : vector<8x1xf32> to vector<8x8xf32>
    %144 = arith.subf %135, %143 : vector<8x8xf32>
    %145 = math.exp %144 : vector<8x8xf32>
    %c3_81 = arith.constant 3 : index
    %c0_82 = arith.constant 0 : index
    %c0_83 = arith.constant 0 : index
    %146 = vector.load %arg7[%c3_81, %c0_82, %c0_83] : memref<4x8x1xf32, #tpu.memory_space<vmem>>, vector<1x8x1xf32>
    %147 = vector.shape_cast %146 : vector<1x8x1xf32> to vector<8x1xf32>
    %148 = arith.mulf %142, %147 : vector<8x1xf32>
    %cst_84 = arith.constant dense<0.000000e+00> : vector<8xf32>
    %149 = vector.multi_reduction <add>, %145, %cst_84 [1] : vector<8x8xf32> to vector<8xf32>
    %150 = vector.shape_cast %149 : vector<8xf32> to vector<8x1xf32>
    %151 = arith.addf %148, %150 : vector<8x1xf32>
    %c3_85 = arith.constant 3 : index
    %c0_86 = arith.constant 0 : index
    %c0_87 = arith.constant 0 : index
    %152 = vector.load %arg7[%c3_85, %c0_86, %c0_87] : memref<4x8x1xf32, #tpu.memory_space<vmem>>, vector<1x8x1xf32>
    %153 = vector.shape_cast %152 : vector<1x8x1xf32> to vector<8x1xf32>
    %154 = vector.shape_cast %151 : vector<8x1xf32> to vector<1x8x1xf32>
    tpu.vector_store %arg7[%c3_85, %c0_86, %c0_87], %154 {strides = array<i32>} : memref<4x8x1xf32, #tpu.memory_space<vmem>>, vector<1x8x1xf32>,
    %c3_88 = arith.constant 3 : index
    %c0_89 = arith.constant 0 : index
    %c0_90 = arith.constant 0 : index
    %155 = vector.load %arg8[%c3_88, %c0_89, %c0_90] : memref<4x8x32xf32, #tpu.memory_space<vmem>>, vector<1x8x32xf32>
    %156 = vector.shape_cast %155 : vector<1x8x32xf32> to vector<8x32xf32>
    %157 = vector.broadcast %142 : vector<8x1xf32> to vector<8x32xf32>
    %158 = arith.mulf %157, %156 : vector<8x32xf32>
    %159 = arith.truncf %145 : vector<8x8xf32> to vector<8x8xbf16>
    %160 = vector.extract_strided_slice %10 {offsets = [0, 96], sizes = [8, 32], strides = [1, 1]} : vector<8x128xbf16> to vector<8x32xbf16>
    %cst_91 = arith.constant dense<0.000000e+00> : vector<8x32xf32>
    %161 = tpu.matmul %159, %160, %cst_91 {dimension_numbers = #tpu.dot_dimension_numbers<[1], [0], [0], [1], [0, 0, 1, 1], [], []>} : vector<8x8xbf16>, vector<8x32xbf16>, vector<8x32xf32> -> vector<8x32xf32>
    %162 = arith.addf %158, %161 : vector<8x32xf32>
    %c3_92 = arith.constant 3 : index
    %c0_93 = arith.constant 0 : index
    %c0_94 = arith.constant 0 : index
    %163 = vector.load %arg8[%c3_92, %c0_93, %c0_94] : memref<4x8x32xf32, #tpu.memory_space<vmem>>, vector<1x8x32xf32>
    %164 = vector.shape_cast %163 : vector<1x8x32xf32> to vector<8x32xf32>
    %165 = vector.shape_cast %162 : vector<8x32xf32> to vector<1x8x32xf32>
    tpu.vector_store %arg8[%c3_92, %c0_93, %c0_94], %165 {strides = array<i32>} : memref<4x8x32xf32, #tpu.memory_space<vmem>>, vector<1x8x32xf32>,
    %c3_95 = arith.constant 3 : index
    %c0_96 = arith.constant 0 : index
    %c0_97 = arith.constant 0 : index
    %166 = vector.load %arg6[%c3_95, %c0_96, %c0_97] : memref<4x8x1xf32, #tpu.memory_space<vmem>>, vector<1x8x1xf32>
    %167 = vector.shape_cast %166 : vector<1x8x1xf32> to vector<8x1xf32>
    %168 = vector.shape_cast %140 : vector<8x1xf32> to vector<1x8x1xf32>
    tpu.vector_store %arg6[%c3_95, %c0_96, %c0_97], %168 {strides = array<i32>} : memref<4x8x1xf32, #tpu.memory_space<vmem>>, vector<1x8x1xf32>,
    %c0_i32_98 = arith.constant 0 : i32
    %169 = arith.cmpi eq, %arg1, %c0_i32_98 : i32
    %170 = arith.extui %169 : i1 to i32
    %c0_i32_99 = arith.constant 0 : i32
    %171 = arith.cmpi ne, %170, %c0_i32_99 : i32
    scf.if %171 {
      %c0_100 = arith.constant 0 : index
      %c0_101 = arith.constant 0 : index
      %c0_102 = arith.constant 0 : index
      %172 = vector.load %arg7[%c0_100, %c0_101, %c0_102] : memref<4x8x1xf32, #tpu.memory_space<vmem>>, vector<1x8x1xf32>
      %173 = vector.shape_cast %172 : vector<1x8x1xf32> to vector<8x1xf32>
      %174 = tpu.reciprocal %173 {approx = true} : vector<8x1xf32> -> vector<8x1xf32>
      %c0_103 = arith.constant 0 : index
      %c0_104 = arith.constant 0 : index
      %c0_105 = arith.constant 0 : index
      %175 = vector.load %arg8[%c0_103, %c0_104, %c0_105] : memref<4x8x32xf32, #tpu.memory_space<vmem>>, vector<1x8x32xf32>
      %176 = vector.shape_cast %175 : vector<1x8x32xf32> to vector<8x32xf32>
      %177 = vector.broadcast %174 : vector<8x1xf32> to vector<8x32xf32>
      %178 = arith.mulf %176, %177 : vector<8x32xf32>
      %c1_106 = arith.constant 1 : index
      %c0_107 = arith.constant 0 : index
      %c0_108 = arith.constant 0 : index
      %179 = vector.load %arg7[%c1_106, %c0_107, %c0_108] : memref<4x8x1xf32, #tpu.memory_space<vmem>>, vector<1x8x1xf32>
      %180 = vector.shape_cast %179 : vector<1x8x1xf32> to vector<8x1xf32>
      %181 = tpu.reciprocal %180 {approx = true} : vector<8x1xf32> -> vector<8x1xf32>
      %c1_109 = arith.constant 1 : index
      %c0_110 = arith.constant 0 : index
      %c0_111 = arith.constant 0 : index
      %182 = vector.load %arg8[%c1_109, %c0_110, %c0_111] : memref<4x8x32xf32, #tpu.memory_space<vmem>>, vector<1x8x32xf32>
      %183 = vector.shape_cast %182 : vector<1x8x32xf32> to vector<8x32xf32>
      %184 = vector.broadcast %181 : vector<8x1xf32> to vector<8x32xf32>
      %185 = arith.mulf %183, %184 : vector<8x32xf32>
      %c2_112 = arith.constant 2 : index
      %c0_113 = arith.constant 0 : index
      %c0_114 = arith.constant 0 : index
      %186 = vector.load %arg7[%c2_112, %c0_113, %c0_114] : memref<4x8x1xf32, #tpu.memory_space<vmem>>, vector<1x8x1xf32>
      %187 = vector.shape_cast %186 : vector<1x8x1xf32> to vector<8x1xf32>
      %188 = tpu.reciprocal %187 {approx = true} : vector<8x1xf32> -> vector<8x1xf32>
      %c2_115 = arith.constant 2 : index
      %c0_116 = arith.constant 0 : index
      %c0_117 = arith.constant 0 : index
      %189 = vector.load %arg8[%c2_115, %c0_116, %c0_117] : memref<4x8x32xf32, #tpu.memory_space<vmem>>, vector<1x8x32xf32>
      %190 = vector.shape_cast %189 : vector<1x8x32xf32> to vector<8x32xf32>
      %191 = vector.broadcast %188 : vector<8x1xf32> to vector<8x32xf32>
      %192 = arith.mulf %190, %191 : vector<8x32xf32>
      %c3_118 = arith.constant 3 : index
      %c0_119 = arith.constant 0 : index
      %c0_120 = arith.constant 0 : index
      %193 = vector.load %arg7[%c3_118, %c0_119, %c0_120] : memref<4x8x1xf32, #tpu.memory_space<vmem>>, vector<1x8x1xf32>
      %194 = vector.shape_cast %193 : vector<1x8x1xf32> to vector<8x1xf32>
      %195 = tpu.reciprocal %194 {approx = true} : vector<8x1xf32> -> vector<8x1xf32>
      %c3_121 = arith.constant 3 : index
      %c0_122 = arith.constant 0 : index
      %c0_123 = arith.constant 0 : index
      %196 = vector.load %arg8[%c3_121, %c0_122, %c0_123] : memref<4x8x32xf32, #tpu.memory_space<vmem>>, vector<1x8x32xf32>
      %197 = vector.shape_cast %196 : vector<1x8x32xf32> to vector<8x32xf32>
      %198 = vector.broadcast %195 : vector<8x1xf32> to vector<8x32xf32>
      %199 = arith.mulf %197, %198 : vector<8x32xf32>
      %200 = tpu.concatenate %178, %185, %192, %199 in 1 : vector<8x32xf32>, vector<8x32xf32>, vector<8x32xf32>, vector<8x32xf32> -> vector<8x128xf32>
      %201 = arith.truncf %200 : vector<8x128xf32> to vector<8x128xbf16>
      %c0_124 = arith.constant 0 : index
      %c0_125 = arith.constant 0 : index
      %c0_126 = arith.constant 0 : index
      %202 = vector.load %arg5[%c0_124, %c0_125, %c0_126] : memref<1x8x128xbf16, #tpu.memory_space<vmem>>, vector<1x8x128xbf16>
      %203 = vector.shape_cast %202 : vector<1x8x128xbf16> to vector<8x128xbf16>
      %204 = vector.shape_cast %201 : vector<8x128xbf16> to vector<1x8x128xbf16>
      tpu.vector_store %arg5[%c0_124, %c0_125, %c0_126], %204 {strides = array<i32>} : memref<1x8x128xbf16, #tpu.memory_space<vmem>>, vector<1x8x128xbf16>,
    } else {
    }
    return
  }
  func.func @transform_0(%arg0: i32, %arg1: i32) -> (i32, i32, i32) {
    %c0_i32 = arith.constant 0 : i32
    %c0_i32_0 = arith.constant 0 : i32
    %c0_i32_1 = arith.constant 0 : i32
    return %arg0, %c0_i32, %c0_i32_0 : i32, i32, i32
  }
  func.func @transform_1(%arg0: i32, %arg1: i32) -> (i32, i32, i32) {
    %c1_i32 = arith.constant 1 : i32
    %c0_i32 = arith.constant 0 : i32
    return %arg0, %arg1, %c1_i32 : i32, i32, i32
  }
  func.func @transform_2(%arg0: i32, %arg1: i32) -> (i32, i32, i32) {
    %c2_i32 = arith.constant 2 : i32
    %c0_i32 = arith.constant 0 : i32
    return %arg0, %arg1, %c2_i32 : i32, i32, i32
  }
  func.func @transform_3(%arg0: i32, %arg1: i32) -> (i32, i32, i32) {
    %c0_i32 = arith.constant 0 : i32
    %c0_i32_0 = arith.constant 0 : i32
    %c0_i32_1 = arith.constant 0 : i32
    return %arg0, %c0_i32, %c0_i32_0 : i32, i32, i32
  }
}

module attributes {stable_mosaic.version = 11 : i64} {
  func.func @_ln_linear_kernel(%arg0: i32, %arg1: i32, %arg2: memref<16x128xbf16, #tpu.memory_space<vmem>>, %arg3: memref<1x128xf32, #tpu.memory_space<vmem>>, %arg4: memref<1x128xf32, #tpu.memory_space<vmem>>, %arg5: memref<128x256xbf16, #tpu.memory_space<vmem>>, %arg6: memref<1x256xf32, #tpu.memory_space<vmem>>, %arg7: memref<16x256xbf16, #tpu.memory_space<vmem>>) attributes {dimension_semantics = [#tpu.dimension_semantics<parallel>, #tpu.dimension_semantics<parallel>], iteration_bounds = array<i64: 1, 1>, scalar_prefetch = 0 : i64, scratch_operands = 0 : i64, tpu.core_type = #tpu.core_type<tc>, window_params = [{transform_indices = @transform_0, window_bounds = array<i64: 16, 128>}, {pipeline_mode = #tpu.pipeline_mode<synchronous>, transform_indices = @transform_1, window_bounds = array<i64: 1, 128>}, {pipeline_mode = #tpu.pipeline_mode<synchronous>, transform_indices = @transform_2, window_bounds = array<i64: 1, 128>}, {transform_indices = @transform_3, window_bounds = array<i64: 128, 256>}, {transform_indices = @transform_4, window_bounds = array<i64: 1, 256>}, {transform_indices = @transform_5, window_bounds = array<i64: 16, 256>}]} {
    %c0 = arith.constant 0 : index
    %c0_0 = arith.constant 0 : index
    %0 = vector.load %arg2[%c0, %c0_0] : memref<16x128xbf16, #tpu.memory_space<vmem>>, vector<16x128xbf16>
    %1 = arith.extf %0 : vector<16x128xbf16> to vector<16x128xf32>
    %cst = arith.constant dense<0.000000e+00> : vector<16xf32>
    %2 = vector.multi_reduction <add>, %1, %cst [1] : vector<16x128xf32> to vector<16xf32>
    %3 = vector.shape_cast %2 : vector<16xf32> to vector<16x1xf32>
    %cst_1 = arith.constant 1.280000e+02 : f32
    %4 = vector.broadcast %cst_1 : f32 to vector<16x1xf32>
    %5 = arith.divf %3, %4 : vector<16x1xf32>
    %6 = vector.broadcast %5 : vector<16x1xf32> to vector<16x128xf32>
    %7 = arith.subf %1, %6 : vector<16x128xf32>
    %8 = arith.mulf %7, %7 : vector<16x128xf32>
    %cst_2 = arith.constant dense<0.000000e+00> : vector<16xf32>
    %9 = vector.multi_reduction <add>, %8, %cst_2 [1] : vector<16x128xf32> to vector<16xf32>
    %10 = vector.shape_cast %9 : vector<16xf32> to vector<16x1xf32>
    %cst_3 = arith.constant 1.280000e+02 : f32
    %11 = vector.broadcast %cst_3 : f32 to vector<16x1xf32>
    %12 = arith.divf %10, %11 : vector<16x1xf32>
    %13 = vector.broadcast %5 : vector<16x1xf32> to vector<16x128xf32>
    %14 = arith.subf %1, %13 : vector<16x128xf32>
    %cst_4 = arith.constant 9.99999974E-6 : f32
    %15 = vector.broadcast %cst_4 : f32 to vector<16x1xf32>
    %16 = arith.addf %12, %15 : vector<16x1xf32>
    %17 = math.rsqrt %16 : vector<16x1xf32>
    %18 = vector.broadcast %17 : vector<16x1xf32> to vector<16x128xf32>
    %19 = arith.mulf %14, %18 : vector<16x128xf32>
    %c0_5 = arith.constant 0 : index
    %c0_6 = arith.constant 0 : index
    %20 = vector.load %arg3[%c0_5, %c0_6] : memref<1x128xf32, #tpu.memory_space<vmem>>, vector<1x128xf32>
    %21 = vector.broadcast %20 : vector<1x128xf32> to vector<16x128xf32>
    %22 = arith.mulf %19, %21 : vector<16x128xf32>
    %c0_7 = arith.constant 0 : index
    %c0_8 = arith.constant 0 : index
    %23 = vector.load %arg4[%c0_7, %c0_8] : memref<1x128xf32, #tpu.memory_space<vmem>>, vector<1x128xf32>
    %24 = vector.broadcast %23 : vector<1x128xf32> to vector<16x128xf32>
    %25 = arith.addf %22, %24 : vector<16x128xf32>
    %26 = arith.truncf %25 : vector<16x128xf32> to vector<16x128xbf16>
    %c0_9 = arith.constant 0 : index
    %c0_10 = arith.constant 0 : index
    %27 = vector.load %arg5[%c0_9, %c0_10] : memref<128x256xbf16, #tpu.memory_space<vmem>>, vector<128x256xbf16>
    %cst_11 = arith.constant dense<0.000000e+00> : vector<16x256xf32>
    %28 = tpu.matmul %26, %27, %cst_11 {dimension_numbers = #tpu.dot_dimension_numbers<[1], [0], [0], [1], [0, 0, 1, 1], [], []>} : vector<16x128xbf16>, vector<128x256xbf16>, vector<16x256xf32> -> vector<16x256xf32>
    %c0_12 = arith.constant 0 : index
    %c0_13 = arith.constant 0 : index
    %29 = vector.load %arg6[%c0_12, %c0_13] : memref<1x256xf32, #tpu.memory_space<vmem>>, vector<1x256xf32>
    %30 = vector.broadcast %29 : vector<1x256xf32> to vector<16x256xf32>
    %31 = arith.addf %28, %30 : vector<16x256xf32>
    %cst_14 = arith.constant 0.000000e+00 : f32
    %32 = vector.broadcast %cst_14 : f32 to vector<16x256xf32>
    %33 = arith.maximumf %31, %32 : vector<16x256xf32>
    %34 = arith.truncf %33 : vector<16x256xf32> to vector<16x256xbf16>
    %c0_15 = arith.constant 0 : index
    %c0_16 = arith.constant 0 : index
    %35 = vector.load %arg7[%c0_15, %c0_16] : memref<16x256xbf16, #tpu.memory_space<vmem>>, vector<16x256xbf16>
    tpu.vector_store %arg7[%c0_15, %c0_16], %34 {strides = array<i32>} : memref<16x256xbf16, #tpu.memory_space<vmem>>, vector<16x256xbf16>,
    return
  }
  func.func @transform_0(%arg0: i32, %arg1: i32) -> (i32, i32) {
    %c0_i32 = arith.constant 0 : i32
    %c0_i32_0 = arith.constant 0 : i32
    return %arg0, %c0_i32 : i32, i32
  }
  func.func @transform_1(%arg0: i32, %arg1: i32) -> (i32, i32) {
    %c0_i32 = arith.constant 0 : i32
    %c0_i32_0 = arith.constant 0 : i32
    %c0_i32_1 = arith.constant 0 : i32
    return %c0_i32, %c0_i32_0 : i32, i32
  }
  func.func @transform_2(%arg0: i32, %arg1: i32) -> (i32, i32) {
    %c0_i32 = arith.constant 0 : i32
    %c0_i32_0 = arith.constant 0 : i32
    %c0_i32_1 = arith.constant 0 : i32
    return %c0_i32, %c0_i32_0 : i32, i32
  }
  func.func @transform_3(%arg0: i32, %arg1: i32) -> (i32, i32) {
    %c0_i32 = arith.constant 0 : i32
    %c0_i32_0 = arith.constant 0 : i32
    return %c0_i32, %arg1 : i32, i32
  }
  func.func @transform_4(%arg0: i32, %arg1: i32) -> (i32, i32) {
    %c0_i32 = arith.constant 0 : i32
    %c0_i32_0 = arith.constant 0 : i32
    return %c0_i32, %arg1 : i32, i32
  }
  func.func @transform_5(%arg0: i32, %arg1: i32) -> (i32, i32) {
    %c0_i32 = arith.constant 0 : i32
    return %arg0, %arg1 : i32, i32
  }
}

module attributes {stable_mosaic.version = 11 : i64} {
  func.func @_flash_attn_kernel(%arg0: i32, %arg1: i32, %arg2: memref<1x8x128xbf16, #tpu.memory_space<vmem>>, %arg3: memref<1x16x128xbf16, #tpu.memory_space<vmem>>, %arg4: memref<1x16x128xbf16, #tpu.memory_space<vmem>>, %arg5: memref<1x8x128xbf16, #tpu.memory_space<vmem>>, %arg6: memref<4x8x1xf32, #tpu.memory_space<vmem>>, %arg7: memref<4x8x1xf32, #tpu.memory_space<vmem>>, %arg8: memref<4x8x32xf32, #tpu.memory_space<vmem>>) attributes {dimension_semantics = [#tpu.dimension_semantics<parallel>, #tpu.dimension_semantics<arbitrary>], iteration_bounds = array<i64: 2, 1>, scalar_prefetch = 0 : i64, scratch_operands = 3 : i64, tpu.core_type = #tpu.core_type<tc>, window_params = [{transform_indices = @transform_0, window_bounds = array<i64: 1, 8, 128>}, {transform_indices = @transform_1, window_bounds = array<i64: 1, 16, 128>}, {transform_indices = @transform_2, window_bounds = array<i64: 1, 16, 128>}, {transform_indices = @transform_3, window_bounds = array<i64: 1, 8, 128>}]} {
    %c0_i32 = arith.constant 0 : i32
    %0 = arith.cmpi eq, %arg1, %c0_i32 : i32
    %1 = arith.extui %0 : i1 to i32
    %c0_i32_0 = arith.constant 0 : i32
    %2 = arith.cmpi ne, %1, %c0_i32_0 : i32
    scf.if %2 {
      %cst_96 = arith.constant 0xFF800000 : f32
      %158 = vector.broadcast %cst_96 : f32 to vector<4x8x1xf32>
      %c0_97 = arith.constant 0 : index
      %c0_98 = arith.constant 0 : index
      %c0_99 = arith.constant 0 : index
      %159 = vector.load %arg6[%c0_97, %c0_98, %c0_99] : memref<4x8x1xf32, #tpu.memory_space<vmem>>, vector<4x8x1xf32>
      tpu.vector_store %arg6[%c0_97, %c0_98, %c0_99], %158 {strides = array<i32>} : memref<4x8x1xf32, #tpu.memory_space<vmem>>, vector<4x8x1xf32>,
      %cst_100 = arith.constant 0.000000e+00 : f32
      %160 = vector.broadcast %cst_100 : f32 to vector<4x8x1xf32>
      %c0_101 = arith.constant 0 : index
      %c0_102 = arith.constant 0 : index
      %c0_103 = arith.constant 0 : index
      %161 = vector.load %arg7[%c0_101, %c0_102, %c0_103] : memref<4x8x1xf32, #tpu.memory_space<vmem>>, vector<4x8x1xf32>
      tpu.vector_store %arg7[%c0_101, %c0_102, %c0_103], %160 {strides = array<i32>} : memref<4x8x1xf32, #tpu.memory_space<vmem>>, vector<4x8x1xf32>,
      %cst_104 = arith.constant 0.000000e+00 : f32
      %162 = vector.broadcast %cst_104 : f32 to vector<4x8x32xf32>
      %c0_105 = arith.constant 0 : index
      %c0_106 = arith.constant 0 : index
      %c0_107 = arith.constant 0 : index
      %163 = vector.load %arg8[%c0_105, %c0_106, %c0_107] : memref<4x8x32xf32, #tpu.memory_space<vmem>>, vector<4x8x32xf32>
      tpu.vector_store %arg8[%c0_105, %c0_106, %c0_107], %162 {strides = array<i32>} : memref<4x8x32xf32, #tpu.memory_space<vmem>>, vector<4x8x32xf32>,
    } else {
    }
    %c0 = arith.constant 0 : index
    %c0_1 = arith.constant 0 : index
    %c0_2 = arith.constant 0 : index
    %3 = vector.load %arg2[%c0, %c0_1, %c0_2] : memref<1x8x128xbf16, #tpu.memory_space<vmem>>, vector<1x8x128xbf16>
    %4 = vector.shape_cast %3 : vector<1x8x128xbf16> to vector<8x128xbf16>
    %cst = arith.constant 1.767580e-01 : bf16
    %5 = vector.broadcast %cst : bf16 to vector<8x128xbf16>
    %6 = arith.mulf %4, %5 : vector<8x128xbf16>
    %c0_3 = arith.constant 0 : index
    %c0_4 = arith.constant 0 : index
    %c0_5 = arith.constant 0 : index
    %7 = vector.load %arg3[%c0_3, %c0_4, %c0_5] : memref<1x16x128xbf16, #tpu.memory_space<vmem>>, vector<1x16x128xbf16>
    %8 = vector.shape_cast %7 : vector<1x16x128xbf16> to vector<16x128xbf16>
    %c0_6 = arith.constant 0 : index
    %c0_7 = arith.constant 0 : index
    %c0_8 = arith.constant 0 : index
    %9 = vector.load %arg4[%c0_6, %c0_7, %c0_8] : memref<1x16x128xbf16, #tpu.memory_space<vmem>>, vector<1x16x128xbf16>
    %10 = vector.shape_cast %9 : vector<1x16x128xbf16> to vector<16x128xbf16>
    %11 = vector.extract_strided_slice %6 {offsets = [0, 0], sizes = [8, 32], strides = [1, 1]} : vector<8x128xbf16> to vector<8x32xbf16>
    %12 = vector.extract_strided_slice %8 {offsets = [0, 0], sizes = [16, 32], strides = [1, 1]} : vector<16x128xbf16> to vector<16x32xbf16>
    %cst_9 = arith.constant dense<0.000000e+00> : vector<8x16xf32>
    %13 = tpu.matmul %11, %12, %cst_9 {dimension_numbers = #tpu.dot_dimension_numbers<[1], [1], [0], [0], [0, 0, 1, 0], [], []>} : vector<8x32xbf16>, vector<16x32xbf16>, vector<8x16xf32> -> vector<8x16xf32>
    %c0_10 = arith.constant 0 : index
    %c0_11 = arith.constant 0 : index
    %c0_12 = arith.constant 0 : index
    %14 = vector.load %arg6[%c0_10, %c0_11, %c0_12] : memref<4x8x1xf32, #tpu.memory_space<vmem>>, vector<1x8x1xf32>
    %15 = vector.shape_cast %14 : vector<1x8x1xf32> to vector<8x1xf32>
    %cst_13 = arith.constant dense<0xFF800000> : vector<8xf32>
    %16 = vector.multi_reduction <maximumf>, %13, %cst_13 [1] : vector<8x16xf32> to vector<8xf32>
    %17 = vector.shape_cast %16 : vector<8xf32> to vector<8x1xf32>
    %18 = arith.maximumf %15, %17 : vector<8x1xf32>
    %19 = arith.subf %15, %18 : vector<8x1xf32>
    %20 = math.exp %19 : vector<8x1xf32>
    %21 = vector.broadcast %18 : vector<8x1xf32> to vector<8x16xf32>
    %22 = arith.subf %13, %21 : vector<8x16xf32>
    %23 = math.exp %22 : vector<8x16xf32>
    %c0_14 = arith.constant 0 : index
    %c0_15 = arith.constant 0 : index
    %c0_16 = arith.constant 0 : index
    %24 = vector.load %arg7[%c0_14, %c0_15, %c0_16] : memref<4x8x1xf32, #tpu.memory_space<vmem>>, vector<1x8x1xf32>
    %25 = vector.shape_cast %24 : vector<1x8x1xf32> to vector<8x1xf32>
    %26 = arith.mulf %20, %25 : vector<8x1xf32>
    %cst_17 = arith.constant dense<0.000000e+00> : vector<8xf32>
    %27 = vector.multi_reduction <add>, %23, %cst_17 [1] : vector<8x16xf32> to vector<8xf32>
    %28 = vector.shape_cast %27 : vector<8xf32> to vector<8x1xf32>
    %29 = arith.addf %26, %28 : vector<8x1xf32>
    %c0_18 = arith.constant 0 : index
    %c0_19 = arith.constant 0 : index
    %c0_20 = arith.constant 0 : index
    %30 = vector.load %arg7[%c0_18, %c0_19, %c0_20] : memref<4x8x1xf32, #tpu.memory_space<vmem>>, vector<1x8x1xf32>
    %31 = vector.shape_cast %30 : vector<1x8x1xf32> to vector<8x1xf32>
    %32 = vector.shape_cast %29 : vector<8x1xf32> to vector<1x8x1xf32>
    tpu.vector_store %arg7[%c0_18, %c0_19, %c0_20], %32 {strides = array<i32>} : memref<4x8x1xf32, #tpu.memory_space<vmem>>, vector<1x8x1xf32>,
    %c0_21 = arith.constant 0 : index
    %c0_22 = arith.constant 0 : index
    %c0_23 = arith.constant 0 : index
    %33 = vector.load %arg8[%c0_21, %c0_22, %c0_23] : memref<4x8x32xf32, #tpu.memory_space<vmem>>, vector<1x8x32xf32>
    %34 = vector.shape_cast %33 : vector<1x8x32xf32> to vector<8x32xf32>
    %35 = vector.broadcast %20 : vector<8x1xf32> to vector<8x32xf32>
    %36 = arith.mulf %35, %34 : vector<8x32xf32>
    %37 = arith.truncf %23 : vector<8x16xf32> to vector<8x16xbf16>
    %38 = vector.extract_strided_slice %10 {offsets = [0, 0], sizes = [16, 32], strides = [1, 1]} : vector<16x128xbf16> to vector<16x32xbf16>
    %cst_24 = arith.constant dense<0.000000e+00> : vector<8x32xf32>
    %39 = tpu.matmul %37, %38, %cst_24 {dimension_numbers = #tpu.dot_dimension_numbers<[1], [0], [0], [1], [0, 0, 1, 1], [], []>} : vector<8x16xbf16>, vector<16x32xbf16>, vector<8x32xf32> -> vector<8x32xf32>
    %40 = arith.addf %36, %39 : vector<8x32xf32>
    %c0_25 = arith.constant 0 : index
    %c0_26 = arith.constant 0 : index
    %c0_27 = arith.constant 0 : index
    %41 = vector.load %arg8[%c0_25, %c0_26, %c0_27] : memref<4x8x32xf32, #tpu.memory_space<vmem>>, vector<1x8x32xf32>
    %42 = vector.shape_cast %41 : vector<1x8x32xf32> to vector<8x32xf32>
    %43 = vector.shape_cast %40 : vector<8x32xf32> to vector<1x8x32xf32>
    tpu.vector_store %arg8[%c0_25, %c0_26, %c0_27], %43 {strides = array<i32>} : memref<4x8x32xf32, #tpu.memory_space<vmem>>, vector<1x8x32xf32>,
    %c0_28 = arith.constant 0 : index
    %c0_29 = arith.constant 0 : index
    %c0_30 = arith.constant 0 : index
    %44 = vector.load %arg6[%c0_28, %c0_29, %c0_30] : memref<4x8x1xf32, #tpu.memory_space<vmem>>, vector<1x8x1xf32>
    %45 = vector.shape_cast %44 : vector<1x8x1xf32> to vector<8x1xf32>
    %46 = vector.shape_cast %18 : vector<8x1xf32> to vector<1x8x1xf32>
    tpu.vector_store %arg6[%c0_28, %c0_29, %c0_30], %46 {strides = array<i32>} : memref<4x8x1xf32, #tpu.memory_space<vmem>>, vector<1x8x1xf32>,
    %47 = vector.extract_strided_slice %6 {offsets = [0, 32], sizes = [8, 32], strides = [1, 1]} : vector<8x128xbf16> to vector<8x32xbf16>
    %48 = vector.extract_strided_slice %8 {offsets = [0, 32], sizes = [16, 32], strides = [1, 1]} : vector<16x128xbf16> to vector<16x32xbf16>
    %cst_31 = arith.constant dense<0.000000e+00> : vector<8x16xf32>
    %49 = tpu.matmul %47, %48, %cst_31 {dimension_numbers = #tpu.dot_dimension_numbers<[1], [1], [0], [0], [0, 0, 1, 0], [], []>} : vector<8x32xbf16>, vector<16x32xbf16>, vector<8x16xf32> -> vector<8x16xf32>
    %c1 = arith.constant 1 : index
    %c0_32 = arith.constant 0 : index
    %c0_33 = arith.constant 0 : index
    %50 = vector.load %arg6[%c1, %c0_32, %c0_33] : memref<4x8x1xf32, #tpu.memory_space<vmem>>, vector<1x8x1xf32>
    %51 = vector.shape_cast %50 : vector<1x8x1xf32> to vector<8x1xf32>
    %cst_34 = arith.constant dense<0xFF800000> : vector<8xf32>
    %52 = vector.multi_reduction <maximumf>, %49, %cst_34 [1] : vector<8x16xf32> to vector<8xf32>
    %53 = vector.shape_cast %52 : vector<8xf32> to vector<8x1xf32>
    %54 = arith.maximumf %51, %53 : vector<8x1xf32>
    %55 = arith.subf %51, %54 : vector<8x1xf32>
    %56 = math.exp %55 : vector<8x1xf32>
    %57 = vector.broadcast %54 : vector<8x1xf32> to vector<8x16xf32>
    %58 = arith.subf %49, %57 : vector<8x16xf32>
    %59 = math.exp %58 : vector<8x16xf32>
    %c1_35 = arith.constant 1 : index
    %c0_36 = arith.constant 0 : index
    %c0_37 = arith.constant 0 : index
    %60 = vector.load %arg7[%c1_35, %c0_36, %c0_37] : memref<4x8x1xf32, #tpu.memory_space<vmem>>, vector<1x8x1xf32>
    %61 = vector.shape_cast %60 : vector<1x8x1xf32> to vector<8x1xf32>
    %62 = arith.mulf %56, %61 : vector<8x1xf32>
    %cst_38 = arith.constant dense<0.000000e+00> : vector<8xf32>
    %63 = vector.multi_reduction <add>, %59, %cst_38 [1] : vector<8x16xf32> to vector<8xf32>
    %64 = vector.shape_cast %63 : vector<8xf32> to vector<8x1xf32>
    %65 = arith.addf %62, %64 : vector<8x1xf32>
    %c1_39 = arith.constant 1 : index
    %c0_40 = arith.constant 0 : index
    %c0_41 = arith.constant 0 : index
    %66 = vector.load %arg7[%c1_39, %c0_40, %c0_41] : memref<4x8x1xf32, #tpu.memory_space<vmem>>, vector<1x8x1xf32>
    %67 = vector.shape_cast %66 : vector<1x8x1xf32> to vector<8x1xf32>
    %68 = vector.shape_cast %65 : vector<8x1xf32> to vector<1x8x1xf32>
    tpu.vector_store %arg7[%c1_39, %c0_40, %c0_41], %68 {strides = array<i32>} : memref<4x8x1xf32, #tpu.memory_space<vmem>>, vector<1x8x1xf32>,
    %c1_42 = arith.constant 1 : index
    %c0_43 = arith.constant 0 : index
    %c0_44 = arith.constant 0 : index
    %69 = vector.load %arg8[%c1_42, %c0_43, %c0_44] : memref<4x8x32xf32, #tpu.memory_space<vmem>>, vector<1x8x32xf32>
    %70 = vector.shape_cast %69 : vector<1x8x32xf32> to vector<8x32xf32>
    %71 = vector.broadcast %56 : vector<8x1xf32> to vector<8x32xf32>
    %72 = arith.mulf %71, %70 : vector<8x32xf32>
    %73 = arith.truncf %59 : vector<8x16xf32> to vector<8x16xbf16>
    %74 = vector.extract_strided_slice %10 {offsets = [0, 32], sizes = [16, 32], strides = [1, 1]} : vector<16x128xbf16> to vector<16x32xbf16>
    %cst_45 = arith.constant dense<0.000000e+00> : vector<8x32xf32>
    %75 = tpu.matmul %73, %74, %cst_45 {dimension_numbers = #tpu.dot_dimension_numbers<[1], [0], [0], [1], [0, 0, 1, 1], [], []>} : vector<8x16xbf16>, vector<16x32xbf16>, vector<8x32xf32> -> vector<8x32xf32>
    %76 = arith.addf %72, %75 : vector<8x32xf32>
    %c1_46 = arith.constant 1 : index
    %c0_47 = arith.constant 0 : index
    %c0_48 = arith.constant 0 : index
    %77 = vector.load %arg8[%c1_46, %c0_47, %c0_48] : memref<4x8x32xf32, #tpu.memory_space<vmem>>, vector<1x8x32xf32>
    %78 = vector.shape_cast %77 : vector<1x8x32xf32> to vector<8x32xf32>
    %79 = vector.shape_cast %76 : vector<8x32xf32> to vector<1x8x32xf32>
    tpu.vector_store %arg8[%c1_46, %c0_47, %c0_48], %79 {strides = array<i32>} : memref<4x8x32xf32, #tpu.memory_space<vmem>>, vector<1x8x32xf32>,
    %c1_49 = arith.constant 1 : index
    %c0_50 = arith.constant 0 : index
    %c0_51 = arith.constant 0 : index
    %80 = vector.load %arg6[%c1_49, %c0_50, %c0_51] : memref<4x8x1xf32, #tpu.memory_space<vmem>>, vector<1x8x1xf32>
    %81 = vector.shape_cast %80 : vector<1x8x1xf32> to vector<8x1xf32>
    %82 = vector.shape_cast %54 : vector<8x1xf32> to vector<1x8x1xf32>
    tpu.vector_store %arg6[%c1_49, %c0_50, %c0_51], %82 {strides = array<i32>} : memref<4x8x1xf32, #tpu.memory_space<vmem>>, vector<1x8x1xf32>,
    %83 = vector.extract_strided_slice %6 {offsets = [0, 64], sizes = [8, 32], strides = [1, 1]} : vector<8x128xbf16> to vector<8x32xbf16>
    %84 = vector.extract_strided_slice %8 {offsets = [0, 64], sizes = [16, 32], strides = [1, 1]} : vector<16x128xbf16> to vector<16x32xbf16>
    %cst_52 = arith.constant dense<0.000000e+00> : vector<8x16xf32>
    %85 = tpu.matmul %83, %84, %cst_52 {dimension_numbers = #tpu.dot_dimension_numbers<[1], [1], [0], [0], [0, 0, 1, 0], [], []>} : vector<8x32xbf16>, vector<16x32xbf16>, vector<8x16xf32> -> vector<8x16xf32>
    %c2 = arith.constant 2 : index
    %c0_53 = arith.constant 0 : index
    %c0_54 = arith.constant 0 : index
    %86 = vector.load %arg6[%c2, %c0_53, %c0_54] : memref<4x8x1xf32, #tpu.memory_space<vmem>>, vector<1x8x1xf32>
    %87 = vector.shape_cast %86 : vector<1x8x1xf32> to vector<8x1xf32>
    %cst_55 = arith.constant dense<0xFF800000> : vector<8xf32>
    %88 = vector.multi_reduction <maximumf>, %85, %cst_55 [1] : vector<8x16xf32> to vector<8xf32>
    %89 = vector.shape_cast %88 : vector<8xf32> to vector<8x1xf32>
    %90 = arith.maximumf %87, %89 : vector<8x1xf32>
    %91 = arith.subf %87, %90 : vector<8x1xf32>
    %92 = math.exp %91 : vector<8x1xf32>
    %93 = vector.broadcast %90 : vector<8x1xf32> to vector<8x16xf32>
    %94 = arith.subf %85, %93 : vector<8x16xf32>
    %95 = math.exp %94 : vector<8x16xf32>
    %c2_56 = arith.constant 2 : index
    %c0_57 = arith.constant 0 : index
    %c0_58 = arith.constant 0 : index
    %96 = vector.load %arg7[%c2_56, %c0_57, %c0_58] : memref<4x8x1xf32, #tpu.memory_space<vmem>>, vector<1x8x1xf32>
    %97 = vector.shape_cast %96 : vector<1x8x1xf32> to vector<8x1xf32>
    %98 = arith.mulf %92, %97 : vector<8x1xf32>
    %cst_59 = arith.constant dense<0.000000e+00> : vector<8xf32>
    %99 = vector.multi_reduction <add>, %95, %cst_59 [1] : vector<8x16xf32> to vector<8xf32>
    %100 = vector.shape_cast %99 : vector<8xf32> to vector<8x1xf32>
    %101 = arith.addf %98, %100 : vector<8x1xf32>
    %c2_60 = arith.constant 2 : index
    %c0_61 = arith.constant 0 : index
    %c0_62 = arith.constant 0 : index
    %102 = vector.load %arg7[%c2_60, %c0_61, %c0_62] : memref<4x8x1xf32, #tpu.memory_space<vmem>>, vector<1x8x1xf32>
    %103 = vector.shape_cast %102 : vector<1x8x1xf32> to vector<8x1xf32>
    %104 = vector.shape_cast %101 : vector<8x1xf32> to vector<1x8x1xf32>
    tpu.vector_store %arg7[%c2_60, %c0_61, %c0_62], %104 {strides = array<i32>} : memref<4x8x1xf32, #tpu.memory_space<vmem>>, vector<1x8x1xf32>,
    %c2_63 = arith.constant 2 : index
    %c0_64 = arith.constant 0 : index
    %c0_65 = arith.constant 0 : index
    %105 = vector.load %arg8[%c2_63, %c0_64, %c0_65] : memref<4x8x32xf32, #tpu.memory_space<vmem>>, vector<1x8x32xf32>
    %106 = vector.shape_cast %105 : vector<1x8x32xf32> to vector<8x32xf32>
    %107 = vector.broadcast %92 : vector<8x1xf32> to vector<8x32xf32>
    %108 = arith.mulf %107, %106 : vector<8x32xf32>
    %109 = arith.truncf %95 : vector<8x16xf32> to vector<8x16xbf16>
    %110 = vector.extract_strided_slice %10 {offsets = [0, 64], sizes = [16, 32], strides = [1, 1]} : vector<16x128xbf16> to vector<16x32xbf16>
    %cst_66 = arith.constant dense<0.000000e+00> : vector<8x32xf32>
    %111 = tpu.matmul %109, %110, %cst_66 {dimension_numbers = #tpu.dot_dimension_numbers<[1], [0], [0], [1], [0, 0, 1, 1], [], []>} : vector<8x16xbf16>, vector<16x32xbf16>, vector<8x32xf32> -> vector<8x32xf32>
    %112 = arith.addf %108, %111 : vector<8x32xf32>
    %c2_67 = arith.constant 2 : index
    %c0_68 = arith.constant 0 : index
    %c0_69 = arith.constant 0 : index
    %113 = vector.load %arg8[%c2_67, %c0_68, %c0_69] : memref<4x8x32xf32, #tpu.memory_space<vmem>>, vector<1x8x32xf32>
    %114 = vector.shape_cast %113 : vector<1x8x32xf32> to vector<8x32xf32>
    %115 = vector.shape_cast %112 : vector<8x32xf32> to vector<1x8x32xf32>
    tpu.vector_store %arg8[%c2_67, %c0_68, %c0_69], %115 {strides = array<i32>} : memref<4x8x32xf32, #tpu.memory_space<vmem>>, vector<1x8x32xf32>,
    %c2_70 = arith.constant 2 : index
    %c0_71 = arith.constant 0 : index
    %c0_72 = arith.constant 0 : index
    %116 = vector.load %arg6[%c2_70, %c0_71, %c0_72] : memref<4x8x1xf32, #tpu.memory_space<vmem>>, vector<1x8x1xf32>
    %117 = vector.shape_cast %116 : vector<1x8x1xf32> to vector<8x1xf32>
    %118 = vector.shape_cast %90 : vector<8x1xf32> to vector<1x8x1xf32>
    tpu.vector_store %arg6[%c2_70, %c0_71, %c0_72], %118 {strides = array<i32>} : memref<4x8x1xf32, #tpu.memory_space<vmem>>, vector<1x8x1xf32>,
    %119 = vector.extract_strided_slice %6 {offsets = [0, 96], sizes = [8, 32], strides = [1, 1]} : vector<8x128xbf16> to vector<8x32xbf16>
    %120 = vector.extract_strided_slice %8 {offsets = [0, 96], sizes = [16, 32], strides = [1, 1]} : vector<16x128xbf16> to vector<16x32xbf16>
    %cst_73 = arith.constant dense<0.000000e+00> : vector<8x16xf32>
    %121 = tpu.matmul %119, %120, %cst_73 {dimension_numbers = #tpu.dot_dimension_numbers<[1], [1], [0], [0], [0, 0, 1, 0], [], []>} : vector<8x32xbf16>, vector<16x32xbf16>, vector<8x16xf32> -> vector<8x16xf32>
    %c3 = arith.constant 3 : index
    %c0_74 = arith.constant 0 : index
    %c0_75 = arith.constant 0 : index
    %122 = vector.load %arg6[%c3, %c0_74, %c0_75] : memref<4x8x1xf32, #tpu.memory_space<vmem>>, vector<1x8x1xf32>
    %123 = vector.shape_cast %122 : vector<1x8x1xf32> to vector<8x1xf32>
    %cst_76 = arith.constant dense<0xFF800000> : vector<8xf32>
    %124 = vector.multi_reduction <maximumf>, %121, %cst_76 [1] : vector<8x16xf32> to vector<8xf32>
    %125 = vector.shape_cast %124 : vector<8xf32> to vector<8x1xf32>
    %126 = arith.maximumf %123, %125 : vector<8x1xf32>
    %127 = arith.subf %123, %126 : vector<8x1xf32>
    %128 = math.exp %127 : vector<8x1xf32>
    %129 = vector.broadcast %126 : vector<8x1xf32> to vector<8x16xf32>
    %130 = arith.subf %121, %129 : vector<8x16xf32>
    %131 = math.exp %130 : vector<8x16xf32>
    %c3_77 = arith.constant 3 : index
    %c0_78 = arith.constant 0 : index
    %c0_79 = arith.constant 0 : index
    %132 = vector.load %arg7[%c3_77, %c0_78, %c0_79] : memref<4x8x1xf32, #tpu.memory_space<vmem>>, vector<1x8x1xf32>
    %133 = vector.shape_cast %132 : vector<1x8x1xf32> to vector<8x1xf32>
    %134 = arith.mulf %128, %133 : vector<8x1xf32>
    %cst_80 = arith.constant dense<0.000000e+00> : vector<8xf32>
    %135 = vector.multi_reduction <add>, %131, %cst_80 [1] : vector<8x16xf32> to vector<8xf32>
    %136 = vector.shape_cast %135 : vector<8xf32> to vector<8x1xf32>
    %137 = arith.addf %134, %136 : vector<8x1xf32>
    %c3_81 = arith.constant 3 : index
    %c0_82 = arith.constant 0 : index
    %c0_83 = arith.constant 0 : index
    %138 = vector.load %arg7[%c3_81, %c0_82, %c0_83] : memref<4x8x1xf32, #tpu.memory_space<vmem>>, vector<1x8x1xf32>
    %139 = vector.shape_cast %138 : vector<1x8x1xf32> to vector<8x1xf32>
    %140 = vector.shape_cast %137 : vector<8x1xf32> to vector<1x8x1xf32>
    tpu.vector_store %arg7[%c3_81, %c0_82, %c0_83], %140 {strides = array<i32>} : memref<4x8x1xf32, #tpu.memory_space<vmem>>, vector<1x8x1xf32>,
    %c3_84 = arith.constant 3 : index
    %c0_85 = arith.constant 0 : index
    %c0_86 = arith.constant 0 : index
    %141 = vector.load %arg8[%c3_84, %c0_85, %c0_86] : memref<4x8x32xf32, #tpu.memory_space<vmem>>, vector<1x8x32xf32>
    %142 = vector.shape_cast %141 : vector<1x8x32xf32> to vector<8x32xf32>
    %143 = vector.broadcast %128 : vector<8x1xf32> to vector<8x32xf32>
    %144 = arith.mulf %143, %142 : vector<8x32xf32>
    %145 = arith.truncf %131 : vector<8x16xf32> to vector<8x16xbf16>
    %146 = vector.extract_strided_slice %10 {offsets = [0, 96], sizes = [16, 32], strides = [1, 1]} : vector<16x128xbf16> to vector<16x32xbf16>
    %cst_87 = arith.constant dense<0.000000e+00> : vector<8x32xf32>
    %147 = tpu.matmul %145, %146, %cst_87 {dimension_numbers = #tpu.dot_dimension_numbers<[1], [0], [0], [1], [0, 0, 1, 1], [], []>} : vector<8x16xbf16>, vector<16x32xbf16>, vector<8x32xf32> -> vector<8x32xf32>
    %148 = arith.addf %144, %147 : vector<8x32xf32>
    %c3_88 = arith.constant 3 : index
    %c0_89 = arith.constant 0 : index
    %c0_90 = arith.constant 0 : index
    %149 = vector.load %arg8[%c3_88, %c0_89, %c0_90] : memref<4x8x32xf32, #tpu.memory_space<vmem>>, vector<1x8x32xf32>
    %150 = vector.shape_cast %149 : vector<1x8x32xf32> to vector<8x32xf32>
    %151 = vector.shape_cast %148 : vector<8x32xf32> to vector<1x8x32xf32>
    tpu.vector_store %arg8[%c3_88, %c0_89, %c0_90], %151 {strides = array<i32>} : memref<4x8x32xf32, #tpu.memory_space<vmem>>, vector<1x8x32xf32>,
    %c3_91 = arith.constant 3 : index
    %c0_92 = arith.constant 0 : index
    %c0_93 = arith.constant 0 : index
    %152 = vector.load %arg6[%c3_91, %c0_92, %c0_93] : memref<4x8x1xf32, #tpu.memory_space<vmem>>, vector<1x8x1xf32>
    %153 = vector.shape_cast %152 : vector<1x8x1xf32> to vector<8x1xf32>
    %154 = vector.shape_cast %126 : vector<8x1xf32> to vector<1x8x1xf32>
    tpu.vector_store %arg6[%c3_91, %c0_92, %c0_93], %154 {strides = array<i32>} : memref<4x8x1xf32, #tpu.memory_space<vmem>>, vector<1x8x1xf32>,
    %c0_i32_94 = arith.constant 0 : i32
    %155 = arith.cmpi eq, %arg1, %c0_i32_94 : i32
    %156 = arith.extui %155 : i1 to i32
    %c0_i32_95 = arith.constant 0 : i32
    %157 = arith.cmpi ne, %156, %c0_i32_95 : i32
    scf.if %157 {
      %c0_96 = arith.constant 0 : index
      %c0_97 = arith.constant 0 : index
      %c0_98 = arith.constant 0 : index
      %158 = vector.load %arg7[%c0_96, %c0_97, %c0_98] : memref<4x8x1xf32, #tpu.memory_space<vmem>>, vector<1x8x1xf32>
      %159 = vector.shape_cast %158 : vector<1x8x1xf32> to vector<8x1xf32>
      %160 = tpu.reciprocal %159 {approx = true} : vector<8x1xf32> -> vector<8x1xf32>
      %c0_99 = arith.constant 0 : index
      %c0_100 = arith.constant 0 : index
      %c0_101 = arith.constant 0 : index
      %161 = vector.load %arg8[%c0_99, %c0_100, %c0_101] : memref<4x8x32xf32, #tpu.memory_space<vmem>>, vector<1x8x32xf32>
      %162 = vector.shape_cast %161 : vector<1x8x32xf32> to vector<8x32xf32>
      %163 = vector.broadcast %160 : vector<8x1xf32> to vector<8x32xf32>
      %164 = arith.mulf %162, %163 : vector<8x32xf32>
      %c1_102 = arith.constant 1 : index
      %c0_103 = arith.constant 0 : index
      %c0_104 = arith.constant 0 : index
      %165 = vector.load %arg7[%c1_102, %c0_103, %c0_104] : memref<4x8x1xf32, #tpu.memory_space<vmem>>, vector<1x8x1xf32>
      %166 = vector.shape_cast %165 : vector<1x8x1xf32> to vector<8x1xf32>
      %167 = tpu.reciprocal %166 {approx = true} : vector<8x1xf32> -> vector<8x1xf32>
      %c1_105 = arith.constant 1 : index
      %c0_106 = arith.constant 0 : index
      %c0_107 = arith.constant 0 : index
      %168 = vector.load %arg8[%c1_105, %c0_106, %c0_107] : memref<4x8x32xf32, #tpu.memory_space<vmem>>, vector<1x8x32xf32>
      %169 = vector.shape_cast %168 : vector<1x8x32xf32> to vector<8x32xf32>
      %170 = vector.broadcast %167 : vector<8x1xf32> to vector<8x32xf32>
      %171 = arith.mulf %169, %170 : vector<8x32xf32>
      %c2_108 = arith.constant 2 : index
      %c0_109 = arith.constant 0 : index
      %c0_110 = arith.constant 0 : index
      %172 = vector.load %arg7[%c2_108, %c0_109, %c0_110] : memref<4x8x1xf32, #tpu.memory_space<vmem>>, vector<1x8x1xf32>
      %173 = vector.shape_cast %172 : vector<1x8x1xf32> to vector<8x1xf32>
      %174 = tpu.reciprocal %173 {approx = true} : vector<8x1xf32> -> vector<8x1xf32>
      %c2_111 = arith.constant 2 : index
      %c0_112 = arith.constant 0 : index
      %c0_113 = arith.constant 0 : index
      %175 = vector.load %arg8[%c2_111, %c0_112, %c0_113] : memref<4x8x32xf32, #tpu.memory_space<vmem>>, vector<1x8x32xf32>
      %176 = vector.shape_cast %175 : vector<1x8x32xf32> to vector<8x32xf32>
      %177 = vector.broadcast %174 : vector<8x1xf32> to vector<8x32xf32>
      %178 = arith.mulf %176, %177 : vector<8x32xf32>
      %c3_114 = arith.constant 3 : index
      %c0_115 = arith.constant 0 : index
      %c0_116 = arith.constant 0 : index
      %179 = vector.load %arg7[%c3_114, %c0_115, %c0_116] : memref<4x8x1xf32, #tpu.memory_space<vmem>>, vector<1x8x1xf32>
      %180 = vector.shape_cast %179 : vector<1x8x1xf32> to vector<8x1xf32>
      %181 = tpu.reciprocal %180 {approx = true} : vector<8x1xf32> -> vector<8x1xf32>
      %c3_117 = arith.constant 3 : index
      %c0_118 = arith.constant 0 : index
      %c0_119 = arith.constant 0 : index
      %182 = vector.load %arg8[%c3_117, %c0_118, %c0_119] : memref<4x8x32xf32, #tpu.memory_space<vmem>>, vector<1x8x32xf32>
      %183 = vector.shape_cast %182 : vector<1x8x32xf32> to vector<8x32xf32>
      %184 = vector.broadcast %181 : vector<8x1xf32> to vector<8x32xf32>
      %185 = arith.mulf %183, %184 : vector<8x32xf32>
      %186 = tpu.concatenate %164, %171, %178, %185 in 1 : vector<8x32xf32>, vector<8x32xf32>, vector<8x32xf32>, vector<8x32xf32> -> vector<8x128xf32>
      %187 = arith.truncf %186 : vector<8x128xf32> to vector<8x128xbf16>
      %c0_120 = arith.constant 0 : index
      %c0_121 = arith.constant 0 : index
      %c0_122 = arith.constant 0 : index
      %188 = vector.load %arg5[%c0_120, %c0_121, %c0_122] : memref<1x8x128xbf16, #tpu.memory_space<vmem>>, vector<1x8x128xbf16>
      %189 = vector.shape_cast %188 : vector<1x8x128xbf16> to vector<8x128xbf16>
      %190 = vector.shape_cast %187 : vector<8x128xbf16> to vector<1x8x128xbf16>
      tpu.vector_store %arg5[%c0_120, %c0_121, %c0_122], %190 {strides = array<i32>} : memref<1x8x128xbf16, #tpu.memory_space<vmem>>, vector<1x8x128xbf16>,
    } else {
    }
    return
  }
  func.func @transform_0(%arg0: i32, %arg1: i32) -> (i32, i32, i32) {
    %c0_i32 = arith.constant 0 : i32
    %c0_i32_0 = arith.constant 0 : i32
    %c0_i32_1 = arith.constant 0 : i32
    return %arg0, %c0_i32, %c0_i32_0 : i32, i32, i32
  }
  func.func @transform_1(%arg0: i32, %arg1: i32) -> (i32, i32, i32) {
    %c0_i32 = arith.constant 0 : i32
    %c0_i32_0 = arith.constant 0 : i32
    return %arg0, %arg1, %c0_i32 : i32, i32, i32
  }
  func.func @transform_2(%arg0: i32, %arg1: i32) -> (i32, i32, i32) {
    %c1_i32 = arith.constant 1 : i32
    %c0_i32 = arith.constant 0 : i32
    return %arg0, %arg1, %c1_i32 : i32, i32, i32
  }
  func.func @transform_3(%arg0: i32, %arg1: i32) -> (i32, i32, i32) {
    %c0_i32 = arith.constant 0 : i32
    %c0_i32_0 = arith.constant 0 : i32
    %c0_i32_1 = arith.constant 0 : i32
    return %arg0, %c0_i32, %c0_i32_0 : i32, i32, i32
  }
}

module attributes {stable_mosaic.version = 11 : i64} {
  func.func @_linear_kernel(%arg0: i32, %arg1: i32, %arg2: i32, %arg3: memref<16x256xbf16, #tpu.memory_space<vmem>>, %arg4: memref<256x128xbf16, #tpu.memory_space<vmem>>, %arg5: memref<1x128xf32, #tpu.memory_space<vmem>>, %arg6: memref<16x128xbf16, #tpu.memory_space<vmem>>, %arg7: memref<16x128xbf16, #tpu.memory_space<vmem>>, %arg8: memref<16x128xf32, #tpu.memory_space<vmem>>) attributes {dimension_semantics = [#tpu.dimension_semantics<parallel>, #tpu.dimension_semantics<parallel>, #tpu.dimension_semantics<arbitrary>], iteration_bounds = array<i64: 1, 1, 1>, scalar_prefetch = 0 : i64, scratch_operands = 1 : i64, tpu.core_type = #tpu.core_type<tc>, window_params = [{transform_indices = @transform_0, window_bounds = array<i64: 16, 256>}, {transform_indices = @transform_1, window_bounds = array<i64: 256, 128>}, {transform_indices = @transform_2, window_bounds = array<i64: 1, 128>}, {transform_indices = @transform_3, window_bounds = array<i64: 16, 128>}, {transform_indices = @transform_4, window_bounds = array<i64: 16, 128>}]} {
    %c0_i32 = arith.constant 0 : i32
    %0 = arith.cmpi eq, %arg2, %c0_i32 : i32
    %1 = arith.extui %0 : i1 to i32
    %c0_i32_0 = arith.constant 0 : i32
    %2 = arith.cmpi ne, %1, %c0_i32_0 : i32
    scf.if %2 {
      %cst_10 = arith.constant 0.000000e+00 : f32
      %12 = vector.broadcast %cst_10 : f32 to vector<16x128xf32>
      %c0_11 = arith.constant 0 : index
      %c0_12 = arith.constant 0 : index
      %13 = vector.load %arg8[%c0_11, %c0_12] : memref<16x128xf32, #tpu.memory_space<vmem>>, vector<16x128xf32>
      tpu.vector_store %arg8[%c0_11, %c0_12], %12 {strides = array<i32>} : memref<16x128xf32, #tpu.memory_space<vmem>>, vector<16x128xf32>,
    } else {
    }
    %c0 = arith.constant 0 : index
    %c0_1 = arith.constant 0 : index
    %3 = vector.load %arg8[%c0, %c0_1] : memref<16x128xf32, #tpu.memory_space<vmem>>, vector<16x128xf32>
    %c0_2 = arith.constant 0 : index
    %c0_3 = arith.constant 0 : index
    %4 = vector.load %arg3[%c0_2, %c0_3] : memref<16x256xbf16, #tpu.memory_space<vmem>>, vector<16x256xbf16>
    %c0_4 = arith.constant 0 : index
    %c0_5 = arith.constant 0 : index
    %5 = vector.load %arg4[%c0_4, %c0_5] : memref<256x128xbf16, #tpu.memory_space<vmem>>, vector<256x128xbf16>
    %cst = arith.constant dense<0.000000e+00> : vector<16x128xf32>
    %6 = tpu.matmul %4, %5, %cst {dimension_numbers = #tpu.dot_dimension_numbers<[1], [0], [0], [1], [0, 0, 1, 1], [], []>} : vector<16x256xbf16>, vector<256x128xbf16>, vector<16x128xf32> -> vector<16x128xf32>
    %7 = arith.addf %3, %6 : vector<16x128xf32>
    %c0_6 = arith.constant 0 : index
    %c0_7 = arith.constant 0 : index
    %8 = vector.load %arg8[%c0_6, %c0_7] : memref<16x128xf32, #tpu.memory_space<vmem>>, vector<16x128xf32>
    tpu.vector_store %arg8[%c0_6, %c0_7], %7 {strides = array<i32>} : memref<16x128xf32, #tpu.memory_space<vmem>>, vector<16x128xf32>,
    %c0_i32_8 = arith.constant 0 : i32
    %9 = arith.cmpi eq, %arg2, %c0_i32_8 : i32
    %10 = arith.extui %9 : i1 to i32
    %c0_i32_9 = arith.constant 0 : i32
    %11 = arith.cmpi ne, %10, %c0_i32_9 : i32
    scf.if %11 {
      %c0_10 = arith.constant 0 : index
      %c0_11 = arith.constant 0 : index
      %12 = vector.load %arg8[%c0_10, %c0_11] : memref<16x128xf32, #tpu.memory_space<vmem>>, vector<16x128xf32>
      %c0_12 = arith.constant 0 : index
      %c0_13 = arith.constant 0 : index
      %13 = vector.load %arg5[%c0_12, %c0_13] : memref<1x128xf32, #tpu.memory_space<vmem>>, vector<1x128xf32>
      %14 = vector.broadcast %13 : vector<1x128xf32> to vector<16x128xf32>
      %15 = arith.addf %12, %14 : vector<16x128xf32>
      %c0_14 = arith.constant 0 : index
      %c0_15 = arith.constant 0 : index
      %16 = vector.load %arg6[%c0_14, %c0_15] : memref<16x128xbf16, #tpu.memory_space<vmem>>, vector<16x128xbf16>
      %17 = arith.extf %16 : vector<16x128xbf16> to vector<16x128xf32>
      %18 = arith.addf %15, %17 : vector<16x128xf32>
      %19 = arith.truncf %18 : vector<16x128xf32> to vector<16x128xbf16>
      %c0_16 = arith.constant 0 : index
      %c0_17 = arith.constant 0 : index
      %20 = vector.load %arg7[%c0_16, %c0_17] : memref<16x128xbf16, #tpu.memory_space<vmem>>, vector<16x128xbf16>
      tpu.vector_store %arg7[%c0_16, %c0_17], %19 {strides = array<i32>} : memref<16x128xbf16, #tpu.memory_space<vmem>>, vector<16x128xbf16>,
    } else {
    }
    return
  }
  func.func @transform_0(%arg0: i32, %arg1: i32, %arg2: i32) -> (i32, i32) {
    %c0_i32 = arith.constant 0 : i32
    return %arg0, %arg2 : i32, i32
  }
  func.func @transform_1(%arg0: i32, %arg1: i32, %arg2: i32) -> (i32, i32) {
    %c0_i32 = arith.constant 0 : i32
    return %arg2, %arg1 : i32, i32
  }
  func.func @transform_2(%arg0: i32, %arg1: i32, %arg2: i32) -> (i32, i32) {
    %c0_i32 = arith.constant 0 : i32
    %c0_i32_0 = arith.constant 0 : i32
    return %c0_i32, %arg1 : i32, i32
  }
  func.func @transform_3(%arg0: i32, %arg1: i32, %arg2: i32) -> (i32, i32) {
    %c0_i32 = arith.constant 0 : i32
    return %arg0, %arg1 : i32, i32
  }
  func.func @transform_4(%arg0: i32, %arg1: i32, %arg2: i32) -> (i32, i32) {
    %c0_i32 = arith.constant 0 : i32
    return %arg0, %arg1 : i32, i32
  }
}

module attributes {stable_mosaic.version = 11 : i64} {
  func.func @_ln_linear_kernel(%arg0: i32, %arg1: i32, %arg2: memref<16x128xbf16, #tpu.memory_space<vmem>>, %arg3: memref<1x128xf32, #tpu.memory_space<vmem>>, %arg4: memref<1x128xf32, #tpu.memory_space<vmem>>, %arg5: memref<128x128xbf16, #tpu.memory_space<vmem>>, %arg6: memref<1x128xf32, #tpu.memory_space<vmem>>, %arg7: memref<16x128xf32, #tpu.memory_space<vmem>>) attributes {dimension_semantics = [#tpu.dimension_semantics<parallel>, #tpu.dimension_semantics<parallel>], iteration_bounds = array<i64: 1, 1>, scalar_prefetch = 0 : i64, scratch_operands = 0 : i64, tpu.core_type = #tpu.core_type<tc>, window_params = [{transform_indices = @transform_0, window_bounds = array<i64: 16, 128>}, {pipeline_mode = #tpu.pipeline_mode<synchronous>, transform_indices = @transform_1, window_bounds = array<i64: 1, 128>}, {pipeline_mode = #tpu.pipeline_mode<synchronous>, transform_indices = @transform_2, window_bounds = array<i64: 1, 128>}, {transform_indices = @transform_3, window_bounds = array<i64: 128, 128>}, {transform_indices = @transform_4, window_bounds = array<i64: 1, 128>}, {transform_indices = @transform_5, window_bounds = array<i64: 16, 128>}]} {
    %c0 = arith.constant 0 : index
    %c0_0 = arith.constant 0 : index
    %0 = vector.load %arg2[%c0, %c0_0] : memref<16x128xbf16, #tpu.memory_space<vmem>>, vector<16x128xbf16>
    %1 = arith.extf %0 : vector<16x128xbf16> to vector<16x128xf32>
    %cst = arith.constant dense<0.000000e+00> : vector<16xf32>
    %2 = vector.multi_reduction <add>, %1, %cst [1] : vector<16x128xf32> to vector<16xf32>
    %3 = vector.shape_cast %2 : vector<16xf32> to vector<16x1xf32>
    %cst_1 = arith.constant 1.280000e+02 : f32
    %4 = vector.broadcast %cst_1 : f32 to vector<16x1xf32>
    %5 = arith.divf %3, %4 : vector<16x1xf32>
    %6 = vector.broadcast %5 : vector<16x1xf32> to vector<16x128xf32>
    %7 = arith.subf %1, %6 : vector<16x128xf32>
    %8 = arith.mulf %7, %7 : vector<16x128xf32>
    %cst_2 = arith.constant dense<0.000000e+00> : vector<16xf32>
    %9 = vector.multi_reduction <add>, %8, %cst_2 [1] : vector<16x128xf32> to vector<16xf32>
    %10 = vector.shape_cast %9 : vector<16xf32> to vector<16x1xf32>
    %cst_3 = arith.constant 1.280000e+02 : f32
    %11 = vector.broadcast %cst_3 : f32 to vector<16x1xf32>
    %12 = arith.divf %10, %11 : vector<16x1xf32>
    %13 = vector.broadcast %5 : vector<16x1xf32> to vector<16x128xf32>
    %14 = arith.subf %1, %13 : vector<16x128xf32>
    %cst_4 = arith.constant 9.99999974E-6 : f32
    %15 = vector.broadcast %cst_4 : f32 to vector<16x1xf32>
    %16 = arith.addf %12, %15 : vector<16x1xf32>
    %17 = math.rsqrt %16 : vector<16x1xf32>
    %18 = vector.broadcast %17 : vector<16x1xf32> to vector<16x128xf32>
    %19 = arith.mulf %14, %18 : vector<16x128xf32>
    %c0_5 = arith.constant 0 : index
    %c0_6 = arith.constant 0 : index
    %20 = vector.load %arg3[%c0_5, %c0_6] : memref<1x128xf32, #tpu.memory_space<vmem>>, vector<1x128xf32>
    %21 = vector.broadcast %20 : vector<1x128xf32> to vector<16x128xf32>
    %22 = arith.mulf %19, %21 : vector<16x128xf32>
    %c0_7 = arith.constant 0 : index
    %c0_8 = arith.constant 0 : index
    %23 = vector.load %arg4[%c0_7, %c0_8] : memref<1x128xf32, #tpu.memory_space<vmem>>, vector<1x128xf32>
    %24 = vector.broadcast %23 : vector<1x128xf32> to vector<16x128xf32>
    %25 = arith.addf %22, %24 : vector<16x128xf32>
    %26 = arith.truncf %25 : vector<16x128xf32> to vector<16x128xbf16>
    %c0_9 = arith.constant 0 : index
    %c0_10 = arith.constant 0 : index
    %27 = vector.load %arg5[%c0_9, %c0_10] : memref<128x128xbf16, #tpu.memory_space<vmem>>, vector<128x128xbf16>
    %cst_11 = arith.constant dense<0.000000e+00> : vector<16x128xf32>
    %28 = tpu.matmul %26, %27, %cst_11 {dimension_numbers = #tpu.dot_dimension_numbers<[1], [0], [0], [1], [0, 0, 1, 1], [], []>} : vector<16x128xbf16>, vector<128x128xbf16>, vector<16x128xf32> -> vector<16x128xf32>
    %c0_12 = arith.constant 0 : index
    %c0_13 = arith.constant 0 : index
    %29 = vector.load %arg6[%c0_12, %c0_13] : memref<1x128xf32, #tpu.memory_space<vmem>>, vector<1x128xf32>
    %30 = vector.broadcast %29 : vector<1x128xf32> to vector<16x128xf32>
    %31 = arith.addf %28, %30 : vector<16x128xf32>
    %c0_14 = arith.constant 0 : index
    %c0_15 = arith.constant 0 : index
    %32 = vector.load %arg7[%c0_14, %c0_15] : memref<16x128xf32, #tpu.memory_space<vmem>>, vector<16x128xf32>
    tpu.vector_store %arg7[%c0_14, %c0_15], %31 {strides = array<i32>} : memref<16x128xf32, #tpu.memory_space<vmem>>, vector<16x128xf32>,
    return
  }
  func.func @transform_0(%arg0: i32, %arg1: i32) -> (i32, i32) {
    %c0_i32 = arith.constant 0 : i32
    %c0_i32_0 = arith.constant 0 : i32
    return %arg0, %c0_i32 : i32, i32
  }
  func.func @transform_1(%arg0: i32, %arg1: i32) -> (i32, i32) {
    %c0_i32 = arith.constant 0 : i32
    %c0_i32_0 = arith.constant 0 : i32
    %c0_i32_1 = arith.constant 0 : i32
    return %c0_i32, %c0_i32_0 : i32, i32
  }
  func.func @transform_2(%arg0: i32, %arg1: i32) -> (i32, i32) {
    %c0_i32 = arith.constant 0 : i32
    %c0_i32_0 = arith.constant 0 : i32
    %c0_i32_1 = arith.constant 0 : i32
    return %c0_i32, %c0_i32_0 : i32, i32
  }
  func.func @transform_3(%arg0: i32, %arg1: i32) -> (i32, i32) {
    %c0_i32 = arith.constant 0 : i32
    %c0_i32_0 = arith.constant 0 : i32
    return %c0_i32, %arg1 : i32, i32
  }
  func.func @transform_4(%arg0: i32, %arg1: i32) -> (i32, i32) {
    %c0_i32 = arith.constant 0 : i32
    %c0_i32_0 = arith.constant 0 : i32
    return %c0_i32, %arg1 : i32, i32
  }
  func.func @transform_5(%arg0: i32, %arg1: i32) -> (i32, i32) {
    %c0_i32 = arith.constant 0 : i32
    return %arg0, %arg1 : i32, i32
  }
}

</mosaic_0001>

<bundles_post_ra>
// kernel: transformer_forward.32
= control target key start
LH: loop header
LB: loop body
LE: loop exit
PB: predicated region body
PF: predicated region fallthrough
CT: control target
= control target key end

     0   :  { %s956_s18 = smov 0   ;;  %s958_s19 = smov 0   ;;  %s1077_s0 = inlined_call_operand.vmem [shape: bf16[32,128], index: 0, kind: input, shape index: {}]   ;;  %s1078_s1 = inlined_call_operand.vmem [shape: f32[1,128], index: 1, kind: input, shape index: {}]   ;;  %s1079_s2 = inlined_call_operand.vmem [shape: f32[1,128], index: 2, kind: input, shape index: {}]   ;;  %s1080_s3 = inlined_call_operand.vmem [shape: bf16[128,384], index: 3, kind: input, shape index: {}]   ;;  %s1081_s4 = inlined_call_operand.vmem [shape: f32[1,384], index: 4, kind: input, shape index: {}]   ;;  %s1082_s5 = inlined_call_operand.vmem [shape: bf16[32,384], index: 5, kind: output, shape index: {}]  }
   0x1   :  { %s960_s20 = smov 0   ;;  %s962_s21 = smov 0  }
   0x2   :  { %s964_s22 = smov 0  }
   0x3 LB: > { %s24_s23 = sadd.s32 1, %s920_s21  ;;  %s747_s24 = sadd.s32 4294967295, %s924_s22   ;;  %s924_s22 = sphi %s964_s22, %s15_s22   ;;  %s920_s21 = sphi %s962_s21, %s1087_s21   ;;  %s916_s20 = sphi %s960_s20, %s1086_s20   ;;  %s912_s19 = sphi %s958_s19, %s1085_s19   ;;  %s908_s18 = sphi %s956_s18, %s1084_s18  }
   0x4   : > { %p25_p0 = scmp.ge.s32.totalorder %s24_s23, 3  ;;  %p109_p1 = scmp.ne.s32.totalorder %s912_s19, %s908_s18 }
   0x5   : > { %p110_p2 = scmp.eq.s32.totalorder %s924_s22, 0  ;;  %p167_p4 = scmp.eq.s32.totalorder %s747_s24, 2 }
   0x6   : > { %s1089_s23 = smov (%p25_p0, %s24_s23), 0  ;;  %s102_s26 = sadd.s32 1, %s912_s19 }
   0x7   : > { %p111_p3 = por %p110_p2, %p109_p1  ;;  %s99_s25 = ssub.s32 %s920_s21, %s1089_s23 }
   0x8   : > { %p100_p5 = scmp.eq.s32.totalorder %s99_s25, 0  ;;  %p991_p6 = por %p167_p4, %p109_p1 }
   0x9   : > { %p751_p7 = scmp.ge.s32.totalorder %s924_s22, 3 }
   0xa   : > { %s996_s28 = scalar_select %p100_p5, %s912_s19, %s102_s26  }
   0xb   : > { %204 = sbr.rel (%p751_p7) target bundleno = 30 (0x1e), region = 28 }
  0x10   : > { %207 = sbr.rel (!%p111_p3) target bundleno = 30 (0x1e), region = 32  ;;  %s209_s29 = sand.u32 (%p111_p3), 1, %s912_s19  }
  0x11   : > { %s753_s30 = sshll.u32 (%p111_p3), %s920_s21, 2  ;;  %s752_s6 = sshll.u32 (%p111_p3), %s209_s29, 6 }
  0x12   : > { %s1004_s9 = scalar_lea.vmem (%p111_p3), %s1080_s3, %s753_s30  ;;  %s211_s10 = scalar_lea.vmem (%p111_p3), [#allocation2], %s752_s6 }
  0x13   : > { %v230_v0 = vld [vmem:[%s1004_s9] sm:$0xf] (%p111_p3)  ;;  %v232_v1 = vld [vmem:[%s1004_s9 + $0xc] sm:$0xf] (%p111_p3)  ;;  %v234_v2 = vld [vmem:[%s1004_s9 + $0x18] sm:$0xf] (%p111_p3) }
  0x14   : > { %231 = vst [vmem:[%s211_s10] sm:$0xf] (%p111_p3), %v230_v0  ;;  %233 = vst [vmem:[%s211_s10 + $0x4] sm:$0xf] (%p111_p3), %v232_v1  ;;  %v236_v3 = vld [vmem:[%s1004_s9 + $0x24] sm:$0xf] (%p111_p3) }
  0x15   : > { %v238_v4 = vld [vmem:[%s1004_s9 + $0x30] sm:$0xf]  ;;  %235 = vst [vmem:[%s211_s10 + $0x8] sm:$0xf] %v234_v2  ;;  %237 = vst [vmem:[%s211_s10 + $0xc] sm:$0xf] %v236_v3 }
  0x16   : > { %239 = vst [vmem:[%s211_s10 + $0x10] sm:$0xf] %v238_v4  ;;  %v240_v5 = vld [vmem:[%s1004_s9 + $0x3c] sm:$0xf]  ;;  %v242_v6 = vld [vmem:[%s1004_s9 + $0x48] sm:$0xf] }
  0x17   : > { %v244_v7 = vld [vmem:[%s1004_s9 + $0x54] sm:$0xf]  ;;  %241 = vst [vmem:[%s211_s10 + $0x14] sm:$0xf] %v240_v5  ;;  %243 = vst [vmem:[%s211_s10 + $0x18] sm:$0xf] %v242_v6 }
  0x18   : > { %245 = vst [vmem:[%s211_s10 + $0x1c] sm:$0xf] %v244_v7  ;;  %v246_v8 = vld [vmem:[%s1004_s9 + $0x60] sm:$0xf]  ;;  %v248_v9 = vld [vmem:[%s1004_s9 + $0x6c] sm:$0xf] }
  0x19   : > { %v250_v10 = vld [vmem:[%s1004_s9 + $0x78] sm:$0xf]  ;;  %247 = vst [vmem:[%s211_s10 + $0x20] sm:$0xf] %v246_v8  ;;  %249 = vst [vmem:[%s211_s10 + $0x24] sm:$0xf] %v248_v9 }
  0x1a   : > { %251 = vst [vmem:[%s211_s10 + $0x28] sm:$0xf] %v250_v10  ;;  %v252_v11 = vld [vmem:[%s1004_s9 + $0x84] sm:$0xf]  ;;  %v254_v12 = vld [vmem:[%s1004_s9 + $0x90] sm:$0xf] }
  0x1b   : > { %v256_v13 = vld [vmem:[%s1004_s9 + $0x9c] sm:$0xf]  ;;  %253 = vst [vmem:[%s211_s10 + $0x2c] sm:$0xf] %v252_v11  ;;  %255 = vst [vmem:[%s211_s10 + $0x30] sm:$0xf] %v254_v12 }
  0x1c   : > { %257 = vst [vmem:[%s211_s10 + $0x34] sm:$0xf] %v256_v13  ;;  %v258_v14 = vld [vmem:[%s1004_s9 + $0xa8] sm:$0xf]  ;;  %v260_v15 = vld [vmem:[%s1004_s9 + $0xb4] sm:$0xf] }
  0x1d   : > { %259 = vst [vmem:[%s211_s10 + $0x38] sm:$0xf] %v258_v14  ;;  %261 = vst [vmem:[%s211_s10 + $0x3c] sm:$0xf] %v260_v15 }
  0x1e PF: > { %p754_p8 = scmp.ge.s32.totalorder %s924_s22, 1  ;;  %p322_p9 = scmp.lt.s32.totalorder %s924_s22, 4 }
  0x20   : > { %p323_p10 = pnand %p754_p8, %p322_p9 }
  0x21   : > { %s329_s15 = sand.u32 (!%p323_p10), 1, %s908_s18   ;;  %p369_p11 = scmp.lt.s32.totalorder (!%p323_p10), %s916_s20, 2 }
  0x22   : > { %326 = sbr.rel (%p323_p10) target bundleno = 570 (0x23a), region = 77  ;;  %s755_s16 = sshll.u32 (!%p323_p10), %s329_s15, 6 }
  0x23   : > { %s331_s17 = scalar_lea.vmem (!%p323_p10), [#allocation2], %s755_s16  ;;  %s756_s9 = sshll.u32 (!%p323_p10), %s329_s15, 4 }
  0x24   : > { %s362_s10 = scalar_lea.vmem (!%p323_p10), [#allocation3], %s756_s9 }
  0x27   : > { %v781_v16 = vld [vmem:[%s1077_s0] sm:$0xff]   ;;  %v798_v17 = vld [vmem:[%s1077_s0 + $0x8] sm:$0xff]   ;;  %v870_v38 = vld [vmem:[%s331_s17 + $0x38] sm:$0xff]   ;;  %s370_s30 = scalar_select %p369_p11, %s916_s20, 2 }
  0x28   : > { %v782_v18 = vunpack.c.l.bf16 %v781_v16  ;;  %v786_v19 = vunpack.c.l.bf16 %v798_v17  ;;  %v783_v20 = vunpack.c.h.bf16 %v781_v16  ;;  %v787_v21 = vunpack.c.h.bf16 %v798_v17  ;;  %810 = vmatprep.subr.bf16.mxu0 %v870_v38  ;;  %v871_v39 = vld [vmem:[%s331_s17 + $0x30] sm:$0xff]   ;;  %v872_v40 = vld [vmem:[%s331_s17 + $0x28] sm:$0xff]   ;;  %v873_v41 = vld [vmem:[%s331_s17 + $0x20] sm:$0xff]   ;;  %s773_s11 = sshll.u32 (%p991_p6), %s916_s20, 2 }
  0x29   : > { %811 = vmatpush3.bf16.msra.mxu0 %v870_v38  ;;  %v874_v42 = vld [vmem:[%s331_s17 + $0x18] sm:$0xff]   ;;  %v875_v43 = vld [vmem:[%s331_s17 + $0x10] sm:$0xff]   ;;  %v876_v44 = vld [vmem:[%s331_s17 + $0x8] sm:$0xff]   ;;  %s371_s8 = scalar_lea.vmem %s1081_s4, %s370_s30  ;;  %s602_s13 = scalar_lea.vmem (%p991_p6), %s1082_s5, %s773_s11 }
  0x2a   : > { %382 = vadd.xlane.f32.xlu0 %v782_v18  ;;  %386 = vadd.xlane.f32.xlu1 %v786_v19  ;;  %v877_v45 = vld [vmem:[%s331_s17] sm:$0xff]  }
  0x2b   : > { %812 = vmatprep.subr.bf16.mxu0 %v871_v39  ;;  %v757_v60 = vld [vmem:[%s1078_s1] ss:$0 sm:$0xff] }
  0x2c   : > { %v758_v1 = vld [vmem:[%s1079_s2] ss:$0 sm:$0xff] }
  0x2d   : > { %813 = vmatpush3.bf16.msra.mxu0 %v871_v39  ;;  %v759_v15 = vld [vmem:[%s371_s8] ss:$0 sm:$0xff] }
  0x2e   : > { %384 = vadd.xlane.f32.xlu0 %v783_v20  ;;  %388 = vadd.xlane.f32.xlu1 %v787_v21 }
  0x2f   : > { %814 = vmatprep.subr.bf16.mxu0 %v872_v40 }
  0x31   : > { %815 = vmatpush3.bf16.msra.mxu0 %v872_v40 }
  0x32   : > { %816 = vmatprep.subr.bf16.mxu0 %v873_v41 }
  0x35   : > { %817 = vmatpush3.bf16.msra.mxu0 %v873_v41 }
  0x36   : > { %818 = vmatprep.subr.bf16.mxu0 %v874_v42 }
  0x39   : > { %819 = vmatpush3.bf16.msra.mxu0 %v874_v42 }
  0x3a   : > { %820 = vmatprep.subr.bf16.mxu0 %v875_v43 }
  0x3d   : > { %821 = vmatpush3.bf16.msra.mxu0 %v875_v43 }
  0x3e   : > { %822 = vmatprep.subr.bf16.mxu0 %v876_v44 }
  0x41   : > { %823 = vmatpush3.bf16.msra.mxu0 %v876_v44 }
  0x42   : > { %824 = vmatprep.subr.bf16.mxu0 %v877_v45 }
  0x45   : > { %825 = vmatpush3.bf16.msra.mxu0 %v877_v45 }
  0xb3   : > { %v383_v22 = vpop.xlane.xlu0 %382  ;;  %v387_v23 = vpop.xlane.xlu1 %386 }
  0xb4   : > { %v391_v24 = vmul.f32 0.0078125, %v383_v22  ;;  %v393_v25 = vmul.f32 0.0078125, %v387_v23 }
  0xb6   : > { %v395_v26 = vsub.f32 %v782_v18, %v391_v24  ;;  %v1030_v27 = vsub.f32 %v786_v19, %v393_v25 }
  0xb7   : > { %v385_v28 = vpop.xlane.xlu0 %384  ;;  %v389_v29 = vpop.xlane.xlu1 %388 }
  0xb8   : > { %v392_v30 = vmul.f32 0.0078125, %v385_v28  ;;  %v399_v31 = vmul.f32 %v395_v26, %v395_v26  ;;  %v394_v32 = vmul.f32 0.0078125, %v389_v29  ;;  %v401_v35 = vmul.f32 %v1030_v27, %v1030_v27 }
  0xba   : > { %v396_v33 = vsub.f32 %v783_v20, %v392_v30  ;;  %403 = vadd.xlane.f32.xlu0 %v399_v31  ;;  %v1032_v34 = vsub.f32 %v787_v21, %v394_v32 }
  0xbc   : > { %v400_v36 = vmul.f32 %v396_v33, %v396_v33  ;;  %v402_v37 = vmul.f32 %v1032_v34, %v1032_v34 }
  0xbe   : > { %407 = vadd.xlane.f32.xlu0 %v401_v35  ;;  %405 = vadd.xlane.f32.xlu1 %v400_v36 }
  0xc2   : > { %409 = vadd.xlane.f32.xlu1 %v402_v37 }
 0x143   : > { %v404_v46 = vpop.xlane.xlu0 %403 }
 0x144   : > { %v411_v47 = vmul.f32 0.0078125, %v404_v46 }
 0x146   : > { %v415_v48 = vadd.f32 1e-05, %v411_v47 }
 0x147   : > { %v406_v49 = vpop.xlane.xlu1 %405  ;;  %v408_v50 = vpop.xlane.xlu0 %407 }
 0x148   : > { %878 = vrsqrt.f32 %v415_v48  ;;  %v412_v51 = vmul.f32 0.0078125, %v406_v49  ;;  %v413_v52 = vmul.f32 0.0078125, %v408_v50 }
 0x14a   : > { %v416_v53 = vadd.f32 1e-05, %v412_v51  ;;  %v417_v54 = vadd.f32 1e-05, %v413_v52 }
 0x14b   : > { %v410_v55 = vpop.xlane.xlu1 %409 }
 0x14c   : > { %880 = vrsqrt.f32 %v416_v53  ;;  %v414_v56 = vmul.f32 0.0078125, %v410_v55 }
 0x14d   : > { %882 = vrsqrt.f32 %v417_v54 }
 0x14e   : > { %v418_v57 = vadd.f32 1e-05, %v414_v56 }
 0x150   : > { %884 = vrsqrt.f32 %v418_v57 }
 0x155   : > { %v879_v58 = vpop.eup %878 }
 0x156   : > { %v423_v59 = vmul.f32 %v879_v58, %v395_v26 }
 0x158   : > { %v434_v0 = vmul.f32 %v757_v60, %v423_v59 }
 0x159   : > { %v881_v61 = vpop.eup %880 }
 0x15a   : > { %v883_v62 = vpop.eup %882  ;;  %v424_v63 = vmul.f32 %v881_v61, %v396_v33  ;;  %v445_v5 = vadd.f32 %v758_v1, %v434_v0 }
 0x15b   : > { %v425_v2 = vmul.f32 %v883_v62, %v1030_v27 }
 0x15c   : > { %v435_v3 = vmul.f32 %v757_v60, %v424_v63 }
 0x15d   : > { %v885_v4 = vpop.eup %884  ;;  %v436_v8 = vmul.f32 %v757_v60, %v425_v2 }
 0x15e   : > { %v446_v6 = vadd.f32 %v758_v1, %v435_v3  ;;  %v426_v7 = vmul.f32 %v885_v4, %v1032_v34 }
 0x15f   : > { %v447_v11 = vadd.f32 %v758_v1, %v436_v8 }
 0x160   : > { %v449_v9 = vpack.c.bf16 %v446_v6, %v445_v5  ;;  %v437_v10 = vmul.f32 %v757_v60, %v426_v7 }
 0x162   : > { %826 = vmatprep.mubr.bf16.mxu0 %v449_v9  ;;  %v448_v12 = vadd.f32 %v758_v1, %v437_v10 }
 0x164   : > { %v450_v13 = vpack.c.bf16 %v448_v12, %v447_v11 }
 0x166   : > { %827 = vmatmul.mubr.bf16.vlgmr.msra.gmra.mxu0 %v450_v13 }
 0x226   : > { %v828_v14 = vpop.f32.mrf.mxu0 }
 0x227   : > { %v565_v18 = vadd.f32 %v828_v14, %v759_v15 }
 0x228   : > { %v556_v16 = vpop.f32.mrf.mxu0 }
 0x229   : > { %v557_v21 = vadd.f32 %v759_v15, %v556_v16 }
 0x22a   : > { %v829_v17 = vpop.f32.mrf.mxu0 }
 0x22b   : > { %v568_v19 = vadd.f32 %v829_v17, %v759_v15 }
 0x22c   : > { %v559_v20 = vpop.f32.mrf.mxu0 }
 0x22d   : > { %v796_v22 = vpack.c.bf16 %v568_v19, %v565_v18  ;;  %v560_v23 = vadd.f32 %v759_v15, %v559_v20  ;;  %597 = sbr.rel (!%p991_p6) target bundleno = 570 (0x23a), region = 85 }
 0x22f   : > { %799 = vst [vmem:[%s362_s10 + $0x8] sm:$0xff] %v796_v22   ;;  %v791_v24 = vpack.c.bf16 %v560_v23, %v557_v21 }
 0x231   : > { %792 = vst [vmem:[%s362_s10] sm:$0xff] %v791_v24  }
 0x236   : > { %v623_v27 = vld [vmem:[%s362_s10 + $0x8] sm:$0xf]  ;;  %v625_v28 = vld [vmem:[%s362_s10 + $0xc] sm:$0xf] }
 0x237   : > { %624 = vst [vmem:[%s602_s13 + $0x18] sm:$0xf] %v623_v27  ;;  %626 = vst [vmem:[%s602_s13 + $0x24] sm:$0xf] %v625_v28 }
 0x238   : > { %v619_v25 = vld [vmem:[%s362_s10] sm:$0xf]  ;;  %v621_v26 = vld [vmem:[%s362_s10 + $0x4] sm:$0xf] }
 0x239   : > { %620 = vst [vmem:[%s602_s13] sm:$0xf] %v619_v25  ;;  %622 = vst [vmem:[%s602_s13 + $0xc] sm:$0xf] %v621_v26 }
 0x23a PF: > { %s15_s22 = sadd.s32 1, %s924_s22   ;;  %s1084_s18 = smov %s912_s19 }
 0x23b   : > { %p12_p12 = scmp.ge.s32.totalorder %s15_s22, 5   ;;  %s1085_s19 = smov %s996_s28 }
 0x23c   : > { %s1086_s20 = smov %s920_s21  ;;  %s1087_s21 = smov %s1089_s23 }
 0x23d   :  { %14 = sbr.rel (!%p12_p12) target bundleno = 3 (0x3), region = 163 }

// kernel: transformer_forward.31
= control target key start
LH: loop header
LB: loop body
LE: loop exit
PB: predicated region body
PF: predicated region fallthrough
CT: control target
= control target key end

     0   :  { %s628_s12 = smov 0   ;;  %s694_s0 = inlined_call_operand.vmem [shape: f32[2,18,64], index: 0, kind: input, shape index: {}]   ;;  %s695_s1 = inlined_call_operand.vmem [shape: bf16[192,128], index: 1, kind: input, shape index: {}]   ;;  %s696_s2 = inlined_call_operand.vmem [shape: f32[1,128], index: 2, kind: input, shape index: {}]   ;;  %s697_s3 = inlined_call_operand.vmem [shape: bf16[2,16,128], index: 3, kind: output, shape index: {}]  }
   0x1 LB: > { %s488_s13 = sadd.s32 4294967295, %s604_s12   ;;  %p492_p0 = scmp.ge.s32.totalorder %s604_s12, 1  ;;  %s604_s12 = sphi %s628_s12, %s13_s12  }
   0x2   : > { %p137_p1 = scmp.lt.s32.totalorder %s604_s12, 3 }
   0x4   : > { %p138_p2 = pnand %p492_p0, %p137_p1 }
   0x5   : > { %p161_p3 = scmp.lt.s32.totalorder (!%p138_p2), %s488_s13, 1 }
   0x6   : > { %141 = sbr.rel (%p138_p2) target bundleno = 250 (0xfa), region = 32 }
   0xb   : > { %v586_v0 = vld [vmem:[%s695_s1 + $0x38] sm:$0xff]   ;;  %v606_v1 = vmov 0.0   ;;  %v588_v3 = vld [vmem:[%s695_s1 + $0x30] sm:$0xff]   ;;  %vm607_vm0 = vmmov 0   ;;  %s699_s13 = smov (!%p161_p3, %s488_s13), 1  ;;  %v590_v5 = vld [vmem:[%s695_s1 + $0x28] sm:$0xff]  }
   0xc   : > { %539 = vmatprep.subr.bf16.mxu0 %v606_v1  ;;  %551 = vmatprep.subr.bf16.mxu1 %v606_v1  ;;  %v587_v2 = vld [vmem:[%s695_s1 + $0x18] sm:$0xff]   ;;  %v589_v4 = vld [vmem:[%s695_s1 + $0x10] sm:$0xff]   ;;  %s575_s24 = smul.u32 24, %s699_s13  ;;  %v591_v6 = vld [vmem:[%s695_s1 + $0x8] sm:$0xff]   ;;  %vm226_vm1 = vcmask 523264   ;;  %s516_s19 = sshll.u32 %s699_s13, 3 }
   0xd   : > { %540 = vmatpush3.bf16.msra.mxu0 %v586_v0  ;;  %547 = vmatprep.mubr.msk.bf16.mxu0 %vm607_vm0, %v606_v1  ;;  %v592_v7 = vld [vmem:[%s695_s1 + $0x20] sm:$0xff]   ;;  %v594_v15 = vld [vmem:[%s695_s1 + $0x58] sm:$0xff]   ;;  %v595_v16 = vld [vmem:[%s695_s1 + $0x50] sm:$0xff]   ;;  %s170_s22 = scalar_lea.vmem %s697_s3, %s516_s19 }
   0xe   : > { %552 = vmatpush3.bf16.msra.mxu1 %v587_v2  ;;  %541 = vmatprep.subr.bf16.mxu0 %v606_v1  ;;  %s165_s4 = scalar_lea.vmem %s694_s0, %s575_s24  ;;  %v593_v8 = vld [vmem:[%s695_s1] sm:$0xff]   ;;  %v596_v17 = vld [vmem:[%s695_s1 + $0x48] sm:$0xff]  }
   0xf   : > { %553 = vmatprep.subr.bf16.mxu1 %v606_v1  ;;  %559 = vmatprep.mubr.msk.bf16.mxu1 %vm607_vm0, %v606_v1  ;;  %v199_v9 = vld [vmem:[%s165_s4 + $0x1] sm:$0xff]  ;;  %v200_v10 = vld [vmem:[%s165_s4 + $0x9] sm:$0xff]  ;;  %v511_v33 = vld [vmem:[%s696_s2] ss:$0 sm:$0xff] }
  0x10   : > { %v196_v11 = vld [vmem:[%s165_s4] sm:$0xff]  ;;  %v197_v12 = vld [vmem:[%s165_s4 + $0x8] sm:$0xff]  ;;  %v201_v13 = vpack.c.bf16 %v200_v10, %v199_v9 }
  0x11   : > { %542 = vmatpush3.bf16.msra.mxu0 %v588_v3  ;;  %v198_v14 = vpack.c.bf16 %v197_v12, %v196_v11  ;;  %v597_v18 = vld [vmem:[%s695_s1 + $0x40] sm:$0xff]   ;;  %v340_v20 = vld [vmem:[%s165_s4 + $0xa] sm:$0xff] }
  0x12   : > { %554 = vmatpush3.bf16.msra.mxu1 %v589_v4  ;;  %543 = vmatprep.subr.bf16.mxu0 %v606_v1  ;;  %v339_v19 = vld [vmem:[%s165_s4 + $0x2] sm:$0xff] }
  0x13   : > { %555 = vmatprep.subr.bf16.mxu1 %v606_v1  ;;  %v341_v21 = vpack.c.bf16 %v340_v20, %v339_v19 }
  0x15   : > { %544 = vmatpush3.bf16.msra.mxu0 %v590_v5 }
  0x16   : > { %556 = vmatpush3.bf16.msra.mxu1 %v591_v6  ;;  %545 = vmatprep.subr.bf16.mxu0 %v606_v1 }
  0x17   : > { %557 = vmatprep.subr.bf16.mxu1 %v606_v1 }
  0x19   : > { %546 = vmatpush3.bf16.msra.mxu0 %v592_v7 }
  0x1a   : > { %558 = vmatpush3.bf16.msra.mxu1 %v593_v8  ;;  %563 = vmatprep.subr.bf16.mxu0 %v606_v1 }
  0x1c   : > { %548 = vmatmul.mubr.msk.bf16.vlgmr.msra.gmra.mxu0 %vm226_vm1, %v201_v13 }
  0x1d   : > { %560 = vmatmul.mubr.msk.bf16.vlgmr.msra.gmra.mxu1 %vm226_vm1, %v198_v14  ;;  %564 = vmatpush3.bf16.msra.mxu0 %v594_v15 }
  0x1e   : > { %565 = vmatprep.subr.bf16.mxu0 %v606_v1  ;;  %571 = vmatprep.mubr.msk.bf16.mxu0 %vm607_vm0, %v606_v1 }
  0x21   : > { %566 = vmatpush3.bf16.msra.mxu0 %v595_v16 }
  0x22   : > { %567 = vmatprep.subr.bf16.mxu0 %v606_v1 }
  0x25   : > { %568 = vmatpush3.bf16.msra.mxu0 %v596_v17 }
  0x26   : > { %569 = vmatprep.subr.bf16.mxu0 %v606_v1 }
  0x29   : > { %570 = vmatpush3.bf16.msra.mxu0 %v597_v18 }
  0x2c   : > { %572 = vmatmul.mubr.msk.bf16.vlgmr.msra.gmra.mxu0 %vm226_vm1, %v341_v21 }
  0xdc   : > { %v264_v22 = vpop.f32.mrf.mxu0 }
  0xdd   : > { %v332_v23 = vpop.f32.mrf.mxu1 }
  0xde   : > { %v549_v24 = vpop.f32.mrf.mxu0  ;;  %v333_v30 = vadd.f32 %v332_v23, %v264_v22 }
  0xdf   : > { %v561_v25 = vpop.f32.mrf.mxu1 }
  0xe0   : > { %v267_v26 = vpop.f32.mrf.mxu0 }
  0xe1   : > { %v335_v27 = vpop.f32.mrf.mxu1 }
  0xe2   : > { %v550_v28 = vpop.f32.mrf.mxu0  ;;  %v336_v35 = vadd.f32 %v335_v27, %v267_v26 }
  0xe3   : > { %v562_v29 = vpop.f32.mrf.mxu1 }
  0xec   : > { %v403_v31 = vpop.f32.mrf.mxu0 }
  0xed   : > { %v410_v32 = vadd.f32 %v403_v31, %v333_v30 }
  0xee   : > { %v573_v34 = vpop.f32.mrf.mxu0 }
  0xef   : > { %v419_v37 = vadd.f32 %v511_v33, %v410_v32 }
  0xf0   : > { %v406_v36 = vpop.f32.mrf.mxu0 }
  0xf1   : > { %v411_v38 = vadd.f32 %v406_v36, %v336_v35  ;;  %v421_v41 = vmax.f32 %v419_v37, 0.0 }
  0xf2   : > { %v574_v39 = vpop.f32.mrf.mxu0 }
  0xf3   : > { %v420_v40 = vadd.f32 %v511_v33, %v411_v38 }
  0xf5   : > { %v422_v42 = vmax.f32 %v420_v40, 0.0 }
  0xf7   : > { %v522_v43 = vpack.c.bf16 %v422_v42, %v421_v41 }
  0xf9   : > { %523 = vst [vmem:[%s170_s22] sm:$0xff] %v522_v43  }
  0xfa PF: > { %s13_s12 = sadd.s32 1, %s604_s12  }
  0xfb   : > { %p10_p4 = scmp.ge.s32.totalorder %s13_s12, 4  }
  0xfd   :  { %12 = sbr.rel (!%p10_p4) target bundleno = 1 (0x1), region = 62 }

// kernel: transformer_forward.34
= control target key start
LH: loop header
LB: loop body
LE: loop exit
PB: predicated region body
PF: predicated region fallthrough
CT: control target
= control target key end

     0   :  { %s370_s1 = inlined_call_operand.vmem [shape: bf16[128,128], index: 1, kind: input, shape index: {}]   ;;  %s371_s0 = inlined_call_operand.vmem [shape: bf16[32,128], index: 0, kind: input, shape index: {}]   ;;  %s372_s2 = inlined_call_operand.vmem [shape: f32[1,128], index: 2, kind: input, shape index: {}]   ;;  %s373_s3 = inlined_call_operand.vmem [shape: bf16[32,128], index: 3, kind: input, shape index: {}]   ;;  %s374_s4 = inlined_call_operand.vmem [shape: bf16[32,128], index: 4, kind: output, shape index: {}]  }
   0x1   :  { %v290_v0 = vld [vmem:[%s370_s1 + $0x38] sm:$0xff]   ;;  %v291_v1 = vld [vmem:[%s370_s1 + $0x30] sm:$0xff]   ;;  %v292_v2 = vld [vmem:[%s370_s1 + $0x28] sm:$0xff]  }
   0x2   :  { %270 = vmatprep.subr.bf16.mxu0 %v290_v0  ;;  %v293_v3 = vld [vmem:[%s370_s1 + $0x20] sm:$0xff]   ;;  %v294_v5 = vld [vmem:[%s370_s1 + $0x18] sm:$0xff]   ;;  %v295_v6 = vld [vmem:[%s370_s1 + $0x10] sm:$0xff]  }
   0x3   :  { %271 = vmatpush3.bf16.msra.mxu0 %v290_v0  ;;  %v298_v4 = vld [vmem:[%s371_s0] sm:$0xff]   ;;  %v296_v7 = vld [vmem:[%s370_s1 + $0x8] sm:$0xff]  }
   0x4   :  { %272 = vmatprep.subr.bf16.mxu0 %v291_v1  ;;  %286 = vmatprep.mubr.bf16.mxu0 %v298_v4  ;;  %v297_v8 = vld [vmem:[%s370_s1] sm:$0xff]   ;;  %v299_v9 = vld [vmem:[%s371_s0 + $0x8] sm:$0xff]  }
   0x5   :  { %v231_v11 = vld [vmem:[%s372_s2] ss:$0 sm:$0xff]  ;;  %v258_v12 = vld [vmem:[%s373_s3 + $0x8] sm:$0xff]  }
   0x6   :  { %v241_v14 = vld [vmem:[%s373_s3] sm:$0xff]   ;;  %v246_v16 = vunpack.c.l.bf16 %v258_v12  ;;  %v247_v17 = vunpack.c.h.bf16 %v258_v12 }
   0x7   :  { %273 = vmatpush3.bf16.msra.mxu0 %v291_v1  ;;  %v242_v20 = vunpack.c.l.bf16 %v241_v14  ;;  %v243_v22 = vunpack.c.h.bf16 %v241_v14 }
   0x8   :  { %274 = vmatprep.subr.bf16.mxu0 %v292_v2 }
   0xb   :  { %275 = vmatpush3.bf16.msra.mxu0 %v292_v2 }
   0xc   :  { %276 = vmatprep.subr.bf16.mxu0 %v293_v3 }
   0xf   :  { %277 = vmatpush3.bf16.msra.mxu0 %v293_v3 }
  0x10   :  { %278 = vmatprep.subr.bf16.mxu0 %v294_v5 }
  0x13   :  { %279 = vmatpush3.bf16.msra.mxu0 %v294_v5 }
  0x14   :  { %280 = vmatprep.subr.bf16.mxu0 %v295_v6 }
  0x17   :  { %281 = vmatpush3.bf16.msra.mxu0 %v295_v6 }
  0x18   :  { %282 = vmatprep.subr.bf16.mxu0 %v296_v7 }
  0x1b   :  { %283 = vmatpush3.bf16.msra.mxu0 %v296_v7 }
  0x1c   :  { %284 = vmatprep.subr.bf16.mxu0 %v297_v8 }
  0x1f   :  { %285 = vmatpush3.bf16.msra.mxu0 %v297_v8 }
  0x22   :  { %287 = vmatmul.mubr.bf16.vlgmr.msra.gmra.mxu0 %v299_v9 }
  0xe2   :  { %v288_v10 = vpop.f32.mrf.mxu0 }
  0xe3   :  { %v183_v15 = vadd.f32 %v288_v10, %v231_v11 }
  0xe4   :  { %v144_v13 = vpop.f32.mrf.mxu0 }
  0xe5   :  { %v181_v19 = vadd.f32 %v231_v11, %v144_v13  ;;  %v195_v24 = vadd.f32 %v246_v16, %v183_v15 }
  0xe6   :  { %v289_v18 = vpop.f32.mrf.mxu0 }
  0xe7   :  { %v184_v21 = vadd.f32 %v289_v18, %v231_v11  ;;  %v193_v27 = vadd.f32 %v242_v20, %v181_v19 }
  0xe8   :  { %v147_v23 = vpop.f32.mrf.mxu0 }
  0xe9   :  { %v196_v25 = vadd.f32 %v247_v17, %v184_v21  ;;  %v182_v26 = vadd.f32 %v231_v11, %v147_v23 }
  0xeb   :  { %v256_v28 = vpack.c.bf16 %v196_v25, %v195_v24  ;;  %v194_v29 = vadd.f32 %v243_v22, %v182_v26 }
  0xed   :  { %259 = vst [vmem:[%s374_s4 + $0x8] sm:$0xff] %v256_v28   ;;  %v251_v30 = vpack.c.bf16 %v194_v29, %v193_v27 }
  0xef   :  { %252 = vst [vmem:[%s374_s4] sm:$0xff] %v251_v30  }

// kernel: transformer_forward.33
= control target key start
LH: loop header
LB: loop body
LE: loop exit
PB: predicated region body
PF: predicated region fallthrough
CT: control target
= control target key end

     0   :  { %s1621_s12 = smov 0   ;;  %s1623_s13 = smov 0   ;;  %s1988_s0 = inlined_call_operand.vmem [shape: bf16[2,16,384], index: 0, kind: input, shape index: {}, may-alias: {0,1,2}]   ;;  %s1989_s1 = inlined_call_operand.vmem [shape: bf16[2,16,384], index: 1, kind: input, shape index: {}, may-alias: {0,1,2}]   ;;  %s1990_s2 = inlined_call_operand.vmem [shape: bf16[2,16,384], index: 2, kind: input, shape index: {}, may-alias: {0,1,2}]   ;;  %s1991_s3 = inlined_call_operand.vmem [shape: bf16[2,16,128], index: 3, kind: output, shape index: {}]  }
   0x1   :  { %s1625_s14 = smov 0   ;;  %s1627_s15 = smov 0  }
   0x2   :  { %s1629_s16 = smov 0  }
   0x3 LB: > { %s25_s17 = sadd.s32 1, %s1588_s15  ;;  %p39_p1 = scmp.ne.s32.totalorder %s1580_s13, %s1576_s12  ;;  %s1592_s16 = sphi %s1629_s16, %s13_s16   ;;  %s1588_s15 = sphi %s1627_s15, %s1996_s15   ;;  %s1584_s14 = sphi %s1625_s14, %s1995_s14   ;;  %s1580_s13 = sphi %s1623_s13, %s1994_s13   ;;  %s1576_s12 = sphi %s1621_s12, %s1993_s12  }
   0x4   : > { %p27_p0 = scmp.ge.s32.totalorder %s25_s17, 2  ;;  %p40_p2 = scmp.eq.s32.totalorder %s1592_s16, 0 }
   0x5   : > { %s32_s20 = sadd.s32 1, %s1580_s13  ;;  %p1335_p5 = scmp.ge.s32.totalorder %s1592_s16, 2 }
   0x6   : > { %s1998_s17 = smov (%p27_p0, %s25_s17), 0  ;;  %p1652_p3 = por %p40_p2, %p39_p1 }
   0x7   : > { %s29_s19 = ssub.s32 %s1588_s15, %s1998_s17  ;;  %147 = sbr.rel (%p1335_p5) target bundleno = 30 (0x1e), region = 16 }
   0x8   : > { %p30_p4 = scmp.eq.s32.totalorder %s29_s19, 0 }
   0xa   : > { %s1660_s21 = scalar_select %p30_p4, %s1580_s13, %s32_s20  }
   0xc   : > { %150 = sbr.rel (!%p1652_p3) target bundleno = 18 (0x12), region = 20  ;;  %s152_s22 = sand.u32 (%p1652_p3), 1, %s1580_s13  }
   0xd   : > { %s1439_s23 = smul.u32 (%p1652_p3), 24, %s1588_s15  ;;  %s1336_s24 = sshll.u32 (%p1652_p3), %s152_s22, 3 }
   0xe   : > { %s154_s28 = scalar_lea.vmem (%p1652_p3), [#allocation5], %s1336_s24 }
   0xf   : > { %s157_s27 = scalar_lea.vmem (%p1652_p3), %s1988_s0, %s1439_s23 }
  0x10   : > { %v174_v0 = vld [vmem:[%s157_s27] sm:$0xf] (%p1652_p3)  ;;  %v176_v1 = vld [vmem:[%s157_s27 + $0xc] sm:$0xf] (%p1652_p3) }
  0x11   : > { %175 = vst [vmem:[%s154_s28] sm:$0xf] %v174_v0  ;;  %177 = vst [vmem:[%s154_s28 + $0x4] sm:$0xf] %v176_v1 }
  0x12 PF: > { %205 = sbr.rel (!%p1652_p3) target bundleno = 24 (0x18), region = 61  ;;  %s207_s29 = sand.u32 (%p1652_p3), 1, %s1580_s13  }
  0x13   : > { %s1339_s30 = smul.u32 (%p1652_p3), 24, %s1588_s15  ;;  %s1338_s4 = sshll.u32 (%p1652_p3), %s207_s29, 3 }
  0x14   : > { %s209_s8 = scalar_lea.vmem (%p1652_p3), [#allocation6], %s1338_s4 }
  0x15   : > { %s1250_s7 = scalar_lea.vmem (%p1652_p3), %s1989_s1, %s1339_s30 }
  0x16   : > { %v1340_v2 = vld [vmem:[%s1250_s7 + $0x4] sm:$0xf] (%p1652_p3)  ;;  %v1341_v3 = vld [vmem:[%s1250_s7 + $0x10] sm:$0xf] (%p1652_p3) }
  0x17   : > { %234 = vst [vmem:[%s209_s8] sm:$0xf] %v1340_v2  ;;  %236 = vst [vmem:[%s209_s8 + $0x4] sm:$0xf] %v1341_v3 }
  0x18 PF: > { %264 = sbr.rel (!%p1652_p3) target bundleno = 30 (0x1e), region = 102  ;;  %s266_s9 = sand.u32 (%p1652_p3), 1, %s1580_s13  }
  0x19   : > { %s1343_s10 = smul.u32 (%p1652_p3), 24, %s1588_s15  ;;  %s1342_s11 = sshll.u32 (%p1652_p3), %s266_s9, 3 }
  0x1a   : > { %s268_s23 = scalar_lea.vmem (%p1652_p3), [#allocation7], %s1342_s11 }
  0x1b   : > { %s1258_s22 = scalar_lea.vmem (%p1652_p3), %s1990_s2, %s1343_s10 }
  0x1c   : > { %v1344_v4 = vld [vmem:[%s1258_s22 + $0x8] sm:$0xf] (%p1652_p3)  ;;  %v1345_v5 = vld [vmem:[%s1258_s22 + $0x14] sm:$0xf] (%p1652_p3) }
  0x1d   : > { %293 = vst [vmem:[%s268_s23] sm:$0xf] %v1344_v4  ;;  %295 = vst [vmem:[%s268_s23 + $0x4] sm:$0xf] %v1345_v5 }
  0x1e PF: > { %p1346_p6 = scmp.ge.s32.totalorder %s1592_s16, 1  ;;  %p322_p7 = scmp.lt.s32.totalorder %s1592_s16, 3 }
  0x20   : > { %p323_p8 = pnand %p1346_p6, %p322_p7 }
  0x21   : > { %s329_s18 = sand.u32 (!%p323_p8), 1, %s1576_s12   ;;  %s1598_s26 = smov (!%p323_p8), 96  }
  0x22   : > { %326 = sbr.rel (%p323_p8) target bundleno = 1447 (0x5a7), region = 143  ;;  %s1688_s24 = sshll.u32 (!%p323_p8), %s329_s18, 3 }
  0x23   : > { %s338_s12 = scalar_lea.vmem (!%p323_p8), [#allocation6], %s1688_s24  ;;  %s331_s25 = scalar_lea.vmem (!%p323_p8), [#allocation5], %s1688_s24 }
  0x24   : > { %s345_s27 = scalar_lea.vmem (!%p323_p8), [#allocation7], %s1688_s24  ;;  %s1599_s28 = smov (!%p323_p8), 64  }
  0x25   : > { %s1600_s29 = smov (!%p323_p8), 32   ;;  %p376_p9 = scmp.lt.s32.totalorder (!%p323_p8), %s1584_s14, 1 }
  0x27   : > { %vm404_vm0 = vcmask 261120   ;;  %v1594_v6 = vmov 0.0   ;;  %vm1595_vm1 = vmmov 0   ;;  %v1712_v7 = vld [vmem:[%s338_s12] sm:$0xff]   ;;  %v413_v8 = vld [vmem:[%s331_s25] sm:$0xf] }
  0x28   : > { %1391 = vmatprep.subr.bf16.mxu0 %v1594_v6  ;;  %405 = vst.msk [vmem:[#allocation4] sm:$0xff] %vm404_vm0, %v1594_v6  ;;  %406 = vst.msk [vmem:[#allocation4 + $0x8] sm:$0xff] %vm404_vm0, %v1594_v6  ;;  %1393 = vmatprep.mubr.msk.bf16.mxu0 %vm1595_vm1, %v1594_v6  ;;  %v414_v9 = vld [vmem:[%s331_s25 + $0x4] sm:$0xf]  ;;  %v436_v10 = vsel %vm404_vm0, %v1712_v7, 0  ;;  %vm387_vm2 = vcmask 7168  }
  0x29   : > { %407 = vst.msk [vmem:[#allocation4 + $0x10] sm:$0xff] %vm404_vm0, %v1594_v6  ;;  %408 = vst.msk [vmem:[#allocation4 + $0x18] sm:$0xff] %vm404_vm0, %v1594_v6  ;;  %1397 = vmatprep.subr.bf16.mxu1 %v1594_v6  ;;  %1399 = vmatprep.mubr.msk.bf16.mxu1 %vm1595_vm1, %v1594_v6  ;;  %v415_v11 = vmul.bf16 1043676725, %v413_v8  ;;  %v416_v12 = vmul.bf16 1043676725, %v414_v9 }
  0x2a   : > { %409 = vst.msk [vmem:[#allocation4 + $0x20] sm:$0xff] %vm404_vm0, %v1594_v6  ;;  %410 = vst.msk [vmem:[#allocation4 + $0x28] sm:$0xff] %vm404_vm0, %v1594_v6  ;;  %1392 = vmatpush3.bf16.xpose.msra.mxu0 %v436_v10  ;;  %v1596_v14 = vmov -inf   ;;  %vm481_vm3 = vcmask 130048   ;;  %v1597_v21 = vmov 0   ;;  %v1770_v30 = vld [vmem:[%s345_s27] sm:$0xff]  }
  0x2b   : > { %411 = vst.msk [vmem:[#allocation4 + $0x30] sm:$0xff] %vm404_vm0, %v1594_v6  ;;  %412 = vst.msk [vmem:[#allocation4 + $0x38] sm:$0xff] %vm404_vm0, %v1594_v6  ;;  %1409 = vmatprep.subr.bf16.mxu0 %v1594_v6  ;;  %v1352_v13 = vcombine.low %v415_v11, %v416_v12  ;;  %1487 = vset.pattern.permute.xlu1 %v1597_v21  ;;  %s2000_s14 = smov (!%p376_p9, %s1584_s14), 1  ;;  %vm1203_vm4 = vcmask 523264   ;;  %vm1206_vm5 = vcmask 785408  }
  0x2c   : > { %388 = vst.msk [vmem:[#allocation2] sm:$0xff] %vm387_vm2, %v1596_v14  ;;  %389 = vst.msk [vmem:[#allocation2 + $0x8] sm:$0xff] %vm387_vm2, %v1596_v14  ;;  %1488 = vset.pattern.permute.xlu0 %v1597_v21  ;;  %1398 = vmatpush3.bf16.msra.mxu1 %v1770_v30  ;;  %s1367_s30 = sshll.u32 %s2000_s14, 3 }
  0x2d   : > { %390 = vst.msk [vmem:[#allocation2 + $0x10] sm:$0xff] %vm387_vm2, %v1596_v14  ;;  %391 = vst.msk [vmem:[#allocation2 + $0x18] sm:$0xff] %vm387_vm2, %v1596_v14  ;;  %1403 = vmatprep.subr.bf16.mxu1 %v1594_v6  ;;  %s380_s6 = scalar_lea.vmem %s1991_s3, %s1367_s30 }
  0x2e   : > { %392 = vst.msk [vmem:[#allocation2 + $0x20] sm:$0xff] %vm387_vm2, %v1596_v14  ;;  %393 = vst.msk [vmem:[#allocation2 + $0x28] sm:$0xff] %vm387_vm2, %v1596_v14 }
  0x2f   : > { %394 = vst.msk [vmem:[#allocation2 + $0x30] sm:$0xff] %vm387_vm2, %v1596_v14  ;;  %395 = vst.msk [vmem:[#allocation2 + $0x38] sm:$0xff] %vm387_vm2, %v1596_v14 }
  0x30   : > { %396 = vst.msk [vmem:[#allocation3] sm:$0xff] %vm387_vm2, %v1594_v6  ;;  %397 = vst.msk [vmem:[#allocation3 + $0x8] sm:$0xff] %vm387_vm2, %v1594_v6 }
  0x31   : > { %1394 = vmatmul.mubr.msk.bf16.vlgmr.msra.gmra.mxu0 %vm404_vm0, %v1352_v13  ;;  %398 = vst.msk [vmem:[#allocation3 + $0x10] sm:$0xff] %vm387_vm2, %v1594_v6  ;;  %399 = vst.msk [vmem:[#allocation3 + $0x18] sm:$0xff] %vm387_vm2, %v1594_v6 }
  0x32   : > { %1411 = vmatprep.mubr.msk.bf16.mxu0 %vm1595_vm1, %v1594_v6  ;;  %400 = vst.msk [vmem:[#allocation3 + $0x20] sm:$0xff] %vm387_vm2, %v1594_v6  ;;  %401 = vst.msk [vmem:[#allocation3 + $0x28] sm:$0xff] %vm387_vm2, %v1594_v6 }
  0x33   : > { %402 = vst.msk [vmem:[#allocation3 + $0x30] sm:$0xff] %vm387_vm2, %v1594_v6  ;;  %403 = vst.msk [vmem:[#allocation3 + $0x38] sm:$0xff] %vm387_vm2, %v1594_v6  ;;  %v1749_v22 = vld [vmem:[#allocation2] sm:$0xff]  ;;  %v1754_v25 = vld [vmem:[#allocation2 + $0x8] sm:$0xff] }
  0x34   : > { %v1830_v8 = vld [vmem:[#allocation2 + $0x10] sm:$0xff]  ;;  %v1835_v11 = vld [vmem:[#allocation2 + $0x18] sm:$0xff] }
  0xf1   : > { %v472_v15 = vpop.f32.mrf.mxu0 }
  0xf2   : > { %v482_v16 = vsel %vm481_vm3, %v472_v15, -inf }
  0xf3   : > { %483 = vmax.xlane.f32.xlu0 %v482_v16  ;;  %v1395_v17 = vpop.f32.mrf.mxu0 }
  0xf5   : > { %v475_v18 = vpop.f32.mrf.mxu0 }
  0xf6   : > { %v485_v19 = vsel %vm481_vm3, %v475_v18, -inf }
  0xf7   : > { %486 = vmax.xlane.f32.xlu0 %v485_v19  ;;  %v1396_v20 = vpop.f32.mrf.mxu0  ;;  %v1857_v19 = vld [vmem:[#allocation2 + $0x28] sm:$0xff] }
 0x10d   : > { %600 = vrot.lane.b32.xlu0 %v1712_v7, %s1598_s26 }
 0x17c   : > { %v484_v23 = vpop.xlane.xlu0 %483 }
 0x17d   : > { %v1752_v24 = vmax.f32 %v1749_v22, %v484_v23 }
 0x17f   : > { %v490_v26 = vsub.f32 %v1749_v22, %v1752_v24  ;;  %596 = vst.msk [vmem:[#allocation2] sm:$0xff] %vm387_vm2, %v1752_v24  ;;  %498 = vperm.xlu1 %1487, %v1752_v24  }
 0x180   : > { %v487_v27 = vpop.xlane.xlu0 %486 }
 0x181   : > { %v1762_v28 = vmax.f32 %v1754_v25, %v487_v27  ;;  %v1867_v27 = vld [vmem:[#allocation2 + $0x30] sm:$0xff] }
 0x183   : > { %v491_v29 = vsub.f32 %v1754_v25, %v1762_v28  ;;  %597 = vst.msk [vmem:[#allocation2 + $0x8] sm:$0xff] %vm387_vm2, %v1762_v28  ;;  %503 = vperm.xlu1 %1487, %v1762_v28  }
 0x184   : > { %v601_v38 = vpop.permute.xlu0 %600 }
 0x185   : > { %v606_v41 = vsel %vm404_vm0, %v601_v38, 0 }
 0x187   : > { %598 = vrot.lane.b32.xlu1 %v1352_v13, %s1598_s26 }
 0x18b   : > { %768 = vrot.lane.b32.xlu1 %v1712_v7, %s1599_s28 }
 0x18f   : > { %766 = vrot.lane.b32.xlu1 %v1352_v13, %s1599_s28 }
 0x193   : > { %936 = vrot.lane.b32.xlu1 %v1712_v7, %s1600_s29 }
 0x197   : > { %934 = vrot.lane.b32.xlu1 %v1352_v13, %s1600_s29 }
 0x1fa   : > { %v499_v31 = vpop.permute.xlu1 %498 }
 0x1fb   : > { %v506_v32 = vsub.f32 %v472_v15, %v499_v31  ;;  %v1845_v15 = vld [vmem:[#allocation2 + $0x20] sm:$0xff] }
 0x1fd   : > { %v508_v33 = vmul.f32 1.442695, %v506_v32 }
 0x1fe   : > { %v504_v34 = vpop.permute.xlu1 %503 }
 0x1ff   : > { %v507_v35 = vsub.f32 %v475_v18, %v504_v34  ;;  %1506 = vpow2.f32 %v508_v33  ;;  %v1877_v34 = vld [vmem:[#allocation2 + $0x38] sm:$0xff] }
 0x201   : > { %v510_v36 = vmul.f32 1.442695, %v507_v35 }
 0x202   : > { %v599_v37 = vpop.permute.xlu1 %598 }
 0x203   : > { %1508 = vpow2.f32 %v510_v36 }
 0x206   : > { %v769_v43 = vpop.permute.xlu1 %768 }
 0x207   : > { %v774_v45 = vsel %vm404_vm0, %v769_v43, 0 }
 0x20a   : > { %v767_v44 = vpop.permute.xlu1 %766 }
 0x20c   : > { %v1781_v39 = vpop.eup %1506 }
 0x20e   : > { %v937_v46 = vpop.permute.xlu1 %936 }
 0x20f   : > { %v942_v47 = vsel %vm404_vm0, %v937_v46, 0 }
 0x210   : > { %v1783_v40 = vpop.eup %1508 }
 0x211   : > { %v541_v42 = vpack.c.bf16 %v1783_v40, %v1781_v39 }
 0x212   : > { %v935_v48 = vpop.permute.xlu1 %934 }
 0x213   : > { %1400 = vmatmul.mubr.msk.bf16.vlgmr.msra.gmra.mxu1 %vm481_vm3, %v541_v42  ;;  %v516_v42 = vsel %vm481_vm3, %v1781_v39, 0.0 }
 0x214   : > { %1404 = vmatpush3.bf16.xpose.msra.mxu1 %v606_v41  ;;  %1405 = vmatprep.mubr.msk.bf16.mxu1 %vm1595_vm1, %v1594_v6  ;;  %v519_v41 = vsel %vm481_vm3, %v1783_v40, 0.0 }
 0x215   : > { %1415 = vmatprep.subr.bf16.mxu1 %v1594_v6 }
 0x21b   : > { %1406 = vmatmul.mubr.msk.bf16.vlgmr.msra.gmra.mxu1 %vm404_vm0, %v599_v37 }
 0x21c   : > { %1416 = vmatpush3.bf16.xpose.msra.mxu1 %v774_v45  ;;  %1417 = vmatprep.mubr.msk.bf16.mxu1 %vm1595_vm1, %v1594_v6 }
 0x21d   : > { %1427 = vmatprep.subr.bf16.mxu1 %v1594_v6 }
 0x223   : > { %1418 = vmatmul.mubr.msk.bf16.vlgmr.msra.gmra.mxu1 %vm404_vm0, %v767_v44 }
 0x224   : > { %1428 = vmatpush3.bf16.xpose.msra.mxu1 %v942_v47  ;;  %1429 = vmatprep.mubr.msk.bf16.mxu1 %vm1595_vm1, %v1594_v6 }
 0x22b   : > { %1430 = vmatmul.mubr.msk.bf16.vlgmr.msra.gmra.mxu1 %vm404_vm0, %v935_v48 }
 0x2d3   : > { %v1802_v49 = vpop.f32.mrf.mxu1 }
 0x2d5   : > { %v1401_v50 = vpop.f32.mrf.mxu1 }
 0x2d7   : > { %v1804_v51 = vpop.f32.mrf.mxu1 }
 0x2d9   : > { %v1402_v52 = vpop.f32.mrf.mxu1 }
 0x2db   : > { %v1806_v53 = vpop.f32.mrf.mxu1 }
 0x2dc   : > { %v652_v54 = vsel %vm481_vm3, %v1806_v53, -inf }
 0x2dd   : > { %653 = vmax.xlane.f32.xlu1 %v652_v54  ;;  %v1407_v55 = vpop.f32.mrf.mxu1 }
 0x2df   : > { %v1810_v56 = vpop.f32.mrf.mxu1 }
 0x2e0   : > { %v655_v57 = vsel %vm481_vm3, %v1810_v56, -inf }
 0x2e1   : > { %656 = vmax.xlane.f32.xlu0 %v655_v57  ;;  %v1408_v58 = vpop.f32.mrf.mxu1 }
 0x2e3   : > { %v1814_v59 = vpop.f32.mrf.mxu1 }
 0x2e4   : > { %v820_v60 = vsel %vm481_vm3, %v1814_v59, -inf }
 0x2e5   : > { %821 = vmax.xlane.f32.xlu0 %v820_v60  ;;  %v1419_v61 = vpop.f32.mrf.mxu1 }
 0x2e7   : > { %v1818_v62 = vpop.f32.mrf.mxu1 }
 0x2e8   : > { %v823_v63 = vsel %vm481_vm3, %v1818_v62, -inf }
 0x2e9   : > { %824 = vmax.xlane.f32.xlu1 %v823_v63  ;;  %v1420_v0 = vpop.f32.mrf.mxu1 }
 0x2eb   : > { %v1822_v1 = vpop.f32.mrf.mxu1 }
 0x2ec   : > { %v988_v2 = vsel %vm481_vm3, %v1822_v1, -inf }
 0x2ed   : > { %989 = vmax.xlane.f32.xlu0 %v988_v2  ;;  %v1431_v3 = vpop.f32.mrf.mxu1 }
 0x2ef   : > { %v1826_v4 = vpop.f32.mrf.mxu1 }
 0x2f0   : > { %v991_v5 = vsel %vm481_vm3, %v1826_v4, -inf }
 0x2f1   : > { %992 = vmax.xlane.f32.xlu1 %v991_v5  ;;  %v1432_v7 = vpop.f32.mrf.mxu1 }
 0x366   : > { %v654_v9 = vpop.xlane.xlu1 %653 }
 0x367   : > { %v1833_v10 = vmax.f32 %v1830_v8, %v654_v9 }
 0x369   : > { %v660_v12 = vsub.f32 %v1830_v8, %v1833_v10  ;;  %764 = vst.msk [vmem:[#allocation2 + $0x10] sm:$0xff] %vm387_vm2, %v1833_v10  ;;  %668 = vperm.xlu0 %1488, %v1833_v10  }
 0x36a   : > { %v657_v13 = vpop.xlane.xlu0 %656 }
 0x36b   : > { %v1843_v14 = vmax.f32 %v1835_v11, %v657_v13  ;;  %v662_v24 = vmul.f32 1.442695, %v660_v12 }
 0x36d   : > { %v661_v16 = vsub.f32 %v1835_v11, %v1843_v14  ;;  %765 = vst.msk [vmem:[#allocation2 + $0x18] sm:$0xff] %vm387_vm2, %v1843_v14  ;;  %1049 = vrot.lane.b32.xlu0 %v1770_v30, %s1600_s29  ;;  %673 = vperm.xlu1 %1487, %v1843_v14  }
 0x36e   : > { %v822_v17 = vpop.xlane.xlu0 %821 }
 0x36f   : > { %v1855_v18 = vmax.f32 %v1845_v15, %v822_v17 }
 0x371   : > { %v828_v20 = vsub.f32 %v1845_v15, %v1855_v18  ;;  %932 = vst.msk [vmem:[#allocation2 + $0x20] sm:$0xff] %vm387_vm2, %v1855_v18  ;;  %836 = vperm.xlu1 %1487, %v1855_v18   ;;  %v664_v15 = vmul.f32 1.442695, %v661_v16 }
 0x372   : > { %v825_v21 = vpop.xlane.xlu1 %824 }
 0x373   : > { %v1865_v23 = vmax.f32 %v1857_v19, %v825_v21  ;;  %v830_v13 = vmul.f32 1.442695, %v828_v20  ;;  %v513_v21 = vld [vmem:[#allocation3 + $0x8] sm:$0xff] }
 0x375   : > { %v829_v31 = vsub.f32 %v1857_v19, %v1865_v23  ;;  %933 = vst.msk [vmem:[#allocation2 + $0x28] sm:$0xff] %vm387_vm2, %v1865_v23  ;;  %841 = vperm.xlu1 %1487, %v1865_v23  }
 0x376   : > { %v990_v32 = vpop.xlane.xlu0 %989 }
 0x377   : > { %v1875_v33 = vmax.f32 %v1867_v27, %v990_v32  ;;  %v832_v12 = vmul.f32 1.442695, %v829_v31 }
 0x379   : > { %v996_v35 = vsub.f32 %v1867_v27, %v1875_v33  ;;  %1100 = vst.msk [vmem:[#allocation2 + $0x30] sm:$0xff] %vm387_vm2, %v1875_v33  ;;  %1004 = vperm.xlu1 %1487, %v1875_v33  }
 0x37a   : > { %v993_v36 = vpop.xlane.xlu1 %992 }
 0x37b   : > { %v1885_v37 = vmax.f32 %v1877_v34, %v993_v36 }
 0x37d   : > { %v997_v38 = vsub.f32 %v1877_v34, %v1885_v37  ;;  %1101 = vst.msk [vmem:[#allocation2 + $0x38] sm:$0xff] %vm387_vm2, %v1885_v37  ;;  %1009 = vperm.xlu1 %1487, %v1885_v37   ;;  %v512_v37 = vld [vmem:[#allocation3] sm:$0xff] }
 0x37f   : > { %v1000_v19 = vmul.f32 1.442695, %v997_v38 }
 0x381   : > { %713 = vrot.lane.b32.xlu1 %v1770_v30, %s1598_s26 }
 0x385   : > { %881 = vrot.lane.b32.xlu1 %v1770_v30, %s1599_s28 }
 0x38c   : > { %520 = vadd.xlane.f32.xlu0 %v519_v41 }
 0x3a9   : > { %517 = vadd.xlane.f32.xlu1 %v516_v42 }
 0x3e4   : > { %v669_v43 = vpop.permute.xlu0 %668 }
 0x3e5   : > { %v676_v44 = vsub.f32 %v1806_v53, %v669_v43 }
 0x3e7   : > { %v678_v45 = vmul.f32 1.442695, %v676_v44 }
 0x3e8   : > { %v674_v46 = vpop.permute.xlu1 %673  ;;  %v1050_v28 = vpop.permute.xlu0 %1049 }
 0x3e9   : > { %1510 = vpow2.f32 %v678_v45  ;;  %v677_v47 = vsub.f32 %v1810_v56, %v674_v46  ;;  %v683_v45 = vld [vmem:[#allocation3 + $0x10] sm:$0xff] }
 0x3eb   : > { %v680_v48 = vmul.f32 1.442695, %v677_v47 }
 0x3ec   : > { %v837_v50 = vpop.permute.xlu1 %836 }
 0x3ed   : > { %1512 = vpow2.f32 %v680_v48  ;;  %v844_v30 = vsub.f32 %v1814_v59, %v837_v50  ;;  %v684_v48 = vld [vmem:[#allocation3 + $0x18] sm:$0xff] }
 0x3ef   : > { %v846_v52 = vmul.f32 1.442695, %v844_v30 }
 0x3f0   : > { %v842_v40 = vpop.permute.xlu1 %841 }
 0x3f1   : > { %1514 = vpow2.f32 %v846_v52  ;;  %v845_v54 = vsub.f32 %v1818_v62, %v842_v40  ;;  %v851_v40 = vld [vmem:[#allocation3 + $0x20] sm:$0xff] }
 0x3f3   : > { %v848_v39 = vmul.f32 1.442695, %v845_v54 }
 0x3f4   : > { %v1005_v55 = vpop.permute.xlu1 %1004 }
 0x3f5   : > { %1516 = vpow2.f32 %v848_v39  ;;  %v1012_v53 = vsub.f32 %v1822_v1, %v1005_v55  ;;  %v492_v1 = vmul.f32 1.442695, %v490_v26 }
 0x3f6   : > { %v1511_v57 = vpop.eup %1510 }
 0x3f7   : > { %v1014_v58 = vmul.f32 1.442695, %v1012_v53  ;;  %v687_v60 = vsel %vm481_vm3, %v1511_v57, 0.0  ;;  %v852_v53 = vld [vmem:[#allocation3 + $0x28] sm:$0xff] }
 0x3f8   : > { %688 = vadd.xlane.f32.xlu1 %v687_v60  ;;  %v1010_v56 = vpop.permute.xlu1 %1009 }
 0x3f9   : > { %1518 = vpow2.f32 %v1014_v58  ;;  %v1013_v61 = vsub.f32 %v1826_v4, %v1010_v56  ;;  %v494_v4 = vmul.f32 1.442695, %v491_v29  ;;  %v527_v58 = vld [vmem:[#allocation4] sm:$0xff] }
 0x3fa   : > { %v1513_v59 = vpop.eup %1512 }
 0x3fb   : > { %v1016_v63 = vmul.f32 1.442695, %v1013_v61  ;;  %v690_v0 = vsel %vm481_vm3, %v1513_v59, 0.0  ;;  %v712_v3 = vpack.c.bf16 %v1513_v59, %v1511_v57 }
 0x3fc   : > { %691 = vadd.xlane.f32.xlu0 %v690_v0  ;;  %v714_v62 = vpop.permute.xlu1 %713 }
 0x3fd   : > { %1520 = vpow2.f32 %v1016_v63  ;;  %1410 = vmatpush3.bf16.msra.mxu0 %v714_v62  ;;  %v1019_v63 = vld [vmem:[#allocation3 + $0x30] sm:$0xff] }
 0x3fe   : > { %v1515_v2 = vpop.eup %1514  ;;  %1421 = vmatprep.subr.bf16.mxu0 %v1594_v6  ;;  %1522 = vpow2.f32 %v492_v1 }
 0x3ff   : > { %v855_v5 = vsel %vm481_vm3, %v1515_v2, 0.0  ;;  %1524 = vpow2.f32 %v494_v4  ;;  %v1020_v4 = vld [vmem:[#allocation3 + $0x38] sm:$0xff] }
 0x400   : > { %856 = vadd.xlane.f32.xlu1 %v855_v5  ;;  %1412 = vmatmul.mubr.msk.bf16.vlgmr.msra.gmra.mxu0 %vm481_vm3, %v712_v3  ;;  %v882_v7 = vpop.permute.xlu1 %881  ;;  %1526 = vpow2.f32 %v662_v24 }
 0x401   : > { %1422 = vmatpush3.bf16.msra.mxu0 %v882_v7  ;;  %1423 = vmatprep.mubr.msk.bf16.mxu0 %vm1595_vm1, %v1594_v6  ;;  %1528 = vpow2.f32 %v830_v13 }
 0x402   : > { %v1517_v9 = vpop.eup %1516  ;;  %1433 = vmatprep.subr.bf16.mxu0 %v1594_v6  ;;  %1530 = vpow2.f32 %v832_v12 }
 0x403   : > { %v858_v22 = vsel %vm481_vm3, %v1517_v9, 0.0  ;;  %v880_v26 = vpack.c.bf16 %v1517_v9, %v1515_v2  ;;  %1532 = vpow2.f32 %v664_v15 }
 0x404   : > { %859 = vadd.xlane.f32.xlu1 %v858_v22 }
 0x406   : > { %v1519_v25 = vpop.eup %1518 }
 0x407   : > { %v1023_v29 = vsel %vm481_vm3, %v1519_v25, 0.0 }
 0x408   : > { %1024 = vadd.xlane.f32.xlu1 %v1023_v29  ;;  %1424 = vmatmul.mubr.msk.bf16.vlgmr.msra.gmra.mxu0 %vm481_vm3, %v880_v26  ;;  %v528_v26 = vld [vmem:[#allocation4 + $0x8] sm:$0xff] }
 0x409   : > { %1434 = vmatpush3.bf16.msra.mxu0 %v1050_v28  ;;  %1435 = vmatprep.mubr.msk.bf16.mxu0 %vm1595_vm1, %v1594_v6  ;;  %v998_v6 = vmul.f32 1.442695, %v996_v35 }
 0x40a   : > { %v1521_v8 = vpop.eup %1520 }
 0x40b   : > { %v1026_v10 = vsel %vm481_vm3, %v1521_v8, 0.0  ;;  %v1048_v17 = vpack.c.bf16 %v1521_v8, %v1519_v25  ;;  %v1523_v18 = vpop.eup %1522  ;;  %1534 = vpow2.f32 %v998_v6 }
 0x40c   : > { %1027 = vadd.xlane.f32.xlu1 %v1026_v10  ;;  %v1525_v20 = vpop.eup %1524  ;;  %1536 = vpow2.f32 %v1000_v19  ;;  %v514_v38 = vmul.f32 %v1523_v18, %v512_v37  ;;  %v698_v19 = vld [vmem:[#allocation4 + $0x10] sm:$0xff] }
 0x40d   : > { %v515_v23 = vmul.f32 %v1525_v20, %v513_v21  ;;  %v1527_v11 = vpop.eup %1526 }
 0x40e   : > { %v1529_v27 = vpop.eup %1528  ;;  %v685_v46 = vmul.f32 %v1527_v11, %v683_v45 }
 0x40f   : > { %v1531_v31 = vpop.eup %1530  ;;  %v853_v39 = vmul.f32 %v1529_v27, %v851_v40  ;;  %v1035_v40 = vld [vmem:[#allocation4 + $0x38] sm:$0xff] }
 0x410   : > { %1436 = vmatmul.mubr.msk.bf16.vlgmr.msra.gmra.mxu0 %vm481_vm3, %v1048_v17  ;;  %v1533_v33 = vpop.eup %1532  ;;  %v854_v56 = vmul.f32 %v1531_v31, %v852_v53 }
 0x411   : > { %v686_v30 = vmul.f32 %v1533_v33, %v684_v48 }
 0x412   : > { %531 = vperm.xlu0 %1488, %v1523_v18  }
 0x415   : > { %v521_v14 = vpop.xlane.xlu0 %520 }
 0x416   : > { %v523_v16 = vadd.f32 %v521_v14, %v515_v23  ;;  %702 = vperm.xlu0 %1488, %v1527_v11  }
 0x418   : > { %526 = vst.msk [vmem:[#allocation3 + $0x8] sm:$0xff] %vm387_vm2, %v523_v16  ;;  %v1535_v35 = vpop.eup %1534 }
 0x419   : > { %v1537_v34 = vpop.eup %1536  ;;  %v1021_v1 = vmul.f32 %v1535_v35, %v1019_v63 }
 0x41a   : > { %870 = vperm.xlu0 %1488, %v1529_v27   ;;  %v1022_v22 = vmul.f32 %v1537_v34, %v1020_v4 }
 0x41d   : > { %536 = vperm.xlu1 %1487, %v1525_v20  }
 0x41e   : > { %875 = vperm.xlu0 %1488, %v1531_v31  }
 0x41f   : > { %v1106_v32 = vld [vmem:[#allocation3 + $0x8] sm:$0xff] }
 0x420   : > { %1538 = vrcp.f32 %v1106_v32 }
 0x421   : > { %707 = vperm.xlu1 %1487, %v1533_v33   ;;  %v866_v33 = vld [vmem:[#allocation4 + $0x20] sm:$0xff] }
 0x422   : > { %1038 = vperm.xlu0 %1488, %v1535_v35  }
 0x426   : > { %1043 = vperm.xlu0 %1488, %v1537_v34  }
 0x42d   : > { %v1539_v36 = vpop.eup %1538 }
 0x42e   : > { %1118 = vperm.xlu0 %1488, %v1539_v36  }
 0x432   : > { %v518_v41 = vpop.xlane.xlu1 %517 }
 0x433   : > { %v522_v42 = vadd.f32 %v518_v41, %v514_v38  ;;  %v867_v41 = vld [vmem:[#allocation4 + $0x28] sm:$0xff] }
 0x435   : > { %525 = vst.msk [vmem:[#allocation3] sm:$0xff] %vm387_vm2, %v522_v42 }
 0x43c   : > { %v1105_v43 = vld [vmem:[#allocation3] sm:$0xff] }
 0x43d   : > { %1540 = vrcp.f32 %v1105_v43 }
 0x44a   : > { %v1541_v44 = vpop.eup %1540 }
 0x44b   : > { %1113 = vperm.xlu1 %1487, %v1541_v44  }
 0x481   : > { %v689_v47 = vpop.xlane.xlu1 %688 }
 0x482   : > { %v693_v50 = vadd.f32 %v689_v47, %v685_v46  ;;  %v1034_v47 = vld [vmem:[#allocation4 + $0x30] sm:$0xff] }
 0x484   : > { %695 = vst.msk [vmem:[#allocation3 + $0x10] sm:$0xff] %vm387_vm2, %v693_v50 }
 0x485   : > { %v692_v52 = vpop.xlane.xlu0 %691 }
 0x486   : > { %v694_v54 = vadd.f32 %v692_v52, %v686_v30 }
 0x488   : > { %696 = vst.msk [vmem:[#allocation3 + $0x18] sm:$0xff] %vm387_vm2, %v694_v54 }
 0x489   : > { %v857_v55 = vpop.xlane.xlu1 %856 }
 0x48a   : > { %v861_v57 = vadd.f32 %v857_v55, %v853_v39 }
 0x48b   : > { %v1123_v60 = vld [vmem:[#allocation3 + $0x10] sm:$0xff] }
 0x48c   : > { %863 = vst.msk [vmem:[#allocation3 + $0x20] sm:$0xff] %vm387_vm2, %v861_v57  ;;  %1542 = vrcp.f32 %v1123_v60 }
 0x48d   : > { %v532_v61 = vpop.permute.xlu0 %531  ;;  %v860_v59 = vpop.xlane.xlu1 %859 }
 0x48e   : > { %v539_v0 = vmul.f32 %v532_v61, %v527_v58  ;;  %v862_v62 = vadd.f32 %v860_v59, %v854_v56 }
 0x48f   : > { %v1124_v2 = vld [vmem:[#allocation3 + $0x18] sm:$0xff] }
 0x490   : > { %v592_v3 = vadd.f32 %v1802_v49, %v539_v0  ;;  %864 = vst.msk [vmem:[#allocation3 + $0x28] sm:$0xff] %vm387_vm2, %v862_v62  ;;  %1544 = vrcp.f32 %v1124_v2 }
 0x491   : > { %v1025_v5 = vpop.xlane.xlu1 %1024  ;;  %v703_v21 = vpop.permute.xlu0 %702 }
 0x492   : > { %594 = vst.msk [vmem:[#allocation4] sm:$0xff] %vm404_vm0, %v592_v3  ;;  %v1029_v7 = vadd.f32 %v1025_v5, %v1021_v1  ;;  %v710_v11 = vmul.f32 %v703_v21, %v698_v19 }
 0x493   : > { %v1141_v9 = vld [vmem:[#allocation3 + $0x20] sm:$0xff] }
 0x494   : > { %1031 = vst.msk [vmem:[#allocation3 + $0x30] sm:$0xff] %vm387_vm2, %v1029_v7  ;;  %1546 = vrcp.f32 %v1141_v9 }
 0x495   : > { %v1028_v24 = vpop.xlane.xlu1 %1027  ;;  %v871_v23 = vpop.permute.xlu0 %870 }
 0x496   : > { %v1030_v25 = vadd.f32 %v1028_v24, %v1022_v22  ;;  %v878_v38 = vmul.f32 %v871_v23, %v866_v33 }
 0x497   : > { %v1142_v28 = vld [vmem:[#allocation3 + $0x28] sm:$0xff] }
 0x498   : > { %1032 = vst.msk [vmem:[#allocation3 + $0x38] sm:$0xff] %vm387_vm2, %v1030_v25  ;;  %1548 = vrcp.f32 %v1142_v28 }
 0x499   : > { %v1543_v49 = vpop.eup %1542  ;;  %v537_v29 = vpop.permute.xlu1 %536  ;;  %v1109_v21 = vld [vmem:[#allocation4] sm:$0xff] }
 0x49a   : > { %v540_v13 = vmul.f32 %v537_v29, %v528_v26  ;;  %1131 = vperm.xlu1 %1487, %v1543_v49   ;;  %v876_v35 = vpop.permute.xlu0 %875 }
 0x49b   : > { %v1159_v8 = vld [vmem:[#allocation3 + $0x30] sm:$0xff]  ;;  %v879_v46 = vmul.f32 %v876_v35, %v867_v41 }
 0x49c   : > { %v593_v10 = vadd.f32 %v1804_v51, %v540_v13  ;;  %1550 = vrcp.f32 %v1159_v8  ;;  %v699_v51 = vld [vmem:[#allocation4 + $0x18] sm:$0xff] }
 0x49d   : > { %v1545_v12 = vpop.eup %1544  ;;  %v708_v14 = vpop.permute.xlu1 %707 }
 0x49e   : > { %595 = vst.msk [vmem:[#allocation4 + $0x8] sm:$0xff] %vm404_vm0, %v593_v10  ;;  %1136 = vperm.xlu0 %1488, %v1545_v12   ;;  %v711_v32 = vmul.f32 %v708_v14, %v699_v51  ;;  %v1039_v44 = vpop.permute.xlu0 %1038 }
 0x49f   : > { %v1160_v17 = vld [vmem:[#allocation3 + $0x38] sm:$0xff]  ;;  %v1046_v52 = vmul.f32 %v1039_v44, %v1034_v47 }
 0x4a0   : > { %1552 = vrcp.f32 %v1160_v17 }
 0x4a1   : > { %v1547_v15 = vpop.eup %1546 }
 0x4a2   : > { %1149 = vperm.xlu1 %1487, %v1547_v15   ;;  %v1044_v54 = vpop.permute.xlu0 %1043 }
 0x4a3   : > { %v1047_v57 = vmul.f32 %v1044_v54, %v1035_v40 }
 0x4a5   : > { %v1549_v18 = vpop.eup %1548 }
 0x4a6   : > { %1154 = vperm.xlu0 %1488, %v1549_v18  }
 0x4a9   : > { %v1551_v6 = vpop.eup %1550  ;;  %v1119_v59 = vpop.permute.xlu0 %1118 }
 0x4aa   : > { %1167 = vperm.xlu1 %1487, %v1551_v6  }
 0x4ad   : > { %v1553_v20 = vpop.eup %1552 }
 0x4ae   : > { %1172 = vperm.xlu0 %1488, %v1553_v20   ;;  %v1110_v20 = vld [vmem:[#allocation4 + $0x8] sm:$0xff] }
 0x4c0   : > { %v753_v16 = vpop.f32.mrf.mxu0 }
 0x4c1   : > { %v760_v27 = vadd.f32 %v753_v16, %v710_v11  ;;  %v1122_v11 = vmul.f32 %v1119_v59, %v1110_v20 }
 0x4c2   : > { %v1413_v31 = vpop.f32.mrf.mxu0 }
 0x4c3   : > { %762 = vst.msk [vmem:[#allocation4 + $0x10] sm:$0xff] %vm404_vm0, %v760_v27 }
 0x4c4   : > { %v756_v34 = vpop.f32.mrf.mxu0 }
 0x4c5   : > { %v761_v36 = vadd.f32 %v756_v34, %v711_v32 }
 0x4c6   : > { %v1414_v37 = vpop.f32.mrf.mxu0  ;;  %v1114_v61 = vpop.permute.xlu1 %1113 }
 0x4c7   : > { %763 = vst.msk [vmem:[#allocation4 + $0x18] sm:$0xff] %vm404_vm0, %v761_v36  ;;  %v1121_v51 = vmul.f32 %v1114_v61, %v1109_v21 }
 0x4c8   : > { %v921_v42 = vpop.f32.mrf.mxu0 }
 0x4c9   : > { %v928_v43 = vadd.f32 %v921_v42, %v878_v38 }
 0x4ca   : > { %v1425_v45 = vpop.f32.mrf.mxu0  ;;  %v1127_v0 = vld [vmem:[#allocation4 + $0x10] sm:$0xff] }
 0x4cb   : > { %930 = vst.msk [vmem:[#allocation4 + $0x20] sm:$0xff] %vm404_vm0, %v928_v43 }
 0x4cc   : > { %v924_v48 = vpop.f32.mrf.mxu0 }
 0x4cd   : > { %v929_v50 = vadd.f32 %v924_v48, %v879_v46 }
 0x4ce   : > { %v1426_v30 = vpop.f32.mrf.mxu0  ;;  %v1128_v2 = vld [vmem:[#allocation4 + $0x18] sm:$0xff] }
 0x4cf   : > { %931 = vst.msk [vmem:[#allocation4 + $0x28] sm:$0xff] %vm404_vm0, %v929_v50 }
 0x4d0   : > { %v1089_v39 = vpop.f32.mrf.mxu0 }
 0x4d1   : > { %v1096_v55 = vadd.f32 %v1089_v39, %v1046_v52 }
 0x4d2   : > { %v1437_v53 = vpop.f32.mrf.mxu0  ;;  %v1145_v7 = vld [vmem:[#allocation4 + $0x20] sm:$0xff] }
 0x4d3   : > { %1098 = vst.msk [vmem:[#allocation4 + $0x30] sm:$0xff] %vm404_vm0, %v1096_v55 }
 0x4d4   : > { %v1092_v58 = vpop.f32.mrf.mxu0 }
 0x4d5   : > { %v1097_v60 = vadd.f32 %v1092_v58, %v1047_v57 }
 0x4d6   : > { %v1438_v56 = vpop.f32.mrf.mxu0  ;;  %v1146_v22 = vld [vmem:[#allocation4 + $0x28] sm:$0xff] }
 0x4d7   : > { %1099 = vst.msk [vmem:[#allocation4 + $0x38] sm:$0xff] %vm404_vm0, %v1097_v60 }
 0x4da   : > { %v1163_v49 = vld [vmem:[#allocation4 + $0x30] sm:$0xff] }
 0x4de   : > { %v1164_v13 = vld [vmem:[#allocation4 + $0x38] sm:$0xff] }
 0x515   : > { %v1132_v63 = vpop.permute.xlu1 %1131 }
 0x516   : > { %v1139_v3 = vmul.f32 %v1132_v63, %v1127_v0 }
 0x519   : > { %v1137_v62 = vpop.permute.xlu0 %1136 }
 0x51a   : > { %v1140_v1 = vmul.f32 %v1137_v62, %v1128_v2 }
 0x51c   : > { %v1489_v5 = vpack.i.bf16 %v1140_v1, %v1139_v3 }
 0x51d   : > { %v1150_v4 = vpop.permute.xlu1 %1149 }
 0x51e   : > { %1490 = vrot.lane.b32.xlu1 %v1489_v5, %s1600_s29  ;;  %v1157_v24 = vmul.f32 %v1150_v4, %v1145_v7 }
 0x521   : > { %v1155_v9 = vpop.permute.xlu0 %1154 }
 0x522   : > { %v1158_v25 = vmul.f32 %v1155_v9, %v1146_v22 }
 0x524   : > { %v1494_v26 = vpack.i.bf16 %v1158_v25, %v1157_v24 }
 0x525   : > { %v1168_v28 = vpop.permute.xlu1 %1167 }
 0x526   : > { %1495 = vrot.lane.b32.xlu0 %v1494_v26, %s1599_s28  ;;  %v1175_v8 = vmul.f32 %v1168_v28, %v1163_v49 }
 0x529   : > { %v1173_v29 = vpop.permute.xlu0 %1172 }
 0x52a   : > { %v1176_v10 = vmul.f32 %v1173_v29, %v1164_v13 }
 0x52c   : > { %v1499_v12 = vpack.i.bf16 %v1176_v10, %v1175_v8 }
 0x52e   : > { %1500 = vrot.lane.b32.xlu1 %v1499_v12, %s1598_s26 }
 0x590   : > { %v1491_v17 = vpop.permute.xlu1 %1490 }
 0x591   : > { %v1493_v18 = vunpack.i.h.bf16 %v1491_v17  ;;  %v1492_v6 = vunpack.i.l.bf16 %v1491_v17 }
 0x593   : > { %v1202_v16 = vsel %vm404_vm0, %v1122_v11, %v1493_v18  ;;  %v1201_v27 = vsel %vm404_vm0, %v1121_v51, %v1492_v6 }
 0x598   : > { %v1496_v15 = vpop.permute.xlu0 %1495 }
 0x599   : > { %v1498_v19 = vunpack.i.h.bf16 %v1496_v15  ;;  %v1497_v23 = vunpack.i.l.bf16 %v1496_v15 }
 0x59b   : > { %v1205_v33 = vsel %vm1203_vm4, %v1202_v16, %v1498_v19  ;;  %v1204_v35 = vsel %vm1203_vm4, %v1201_v27, %v1497_v23 }
 0x5a0   : > { %v1501_v14 = vpop.permute.xlu1 %1500 }
 0x5a1   : > { %v1503_v31 = vunpack.i.h.bf16 %v1501_v14  ;;  %v1502_v32 = vunpack.i.l.bf16 %v1501_v14 }
 0x5a3   : > { %v1208_v34 = vsel %vm1206_vm5, %v1205_v33, %v1503_v31  ;;  %v1207_v36 = vsel %vm1206_vm5, %v1204_v35, %v1502_v32 }
 0x5a4   : > { %v1373_v37 = vpack.c.bf16 %v1208_v34, %v1207_v36 }
 0x5a6   : > { %1374 = vst [vmem:[%s380_s6] sm:$0xff] %v1373_v37  }
 0x5a7 PF: > { %s13_s16 = sadd.s32 1, %s1592_s16   ;;  %s1993_s12 = smov %s1580_s13 }
 0x5a8   : > { %p10_p10 = scmp.ge.s32.totalorder %s13_s16, 4   ;;  %s1994_s13 = smov %s1660_s21 }
 0x5a9   : > { %s1995_s14 = smov %s1588_s15  ;;  %s1996_s15 = smov %s1998_s17 }
 0x5aa   :  { %12 = sbr.rel (!%p10_p10) target bundleno = 3 (0x3), region = 223 }

// kernel: transformer_forward.42
= control target key start
LH: loop header
LB: loop body
LE: loop exit
PB: predicated region body
PF: predicated region fallthrough
CT: control target
= control target key end

     0   :  { %s189_s0 = inlined_call_operand.vmem [shape: bf16[32,128], index: 0, kind: input, shape index: {}]   ;;  %s190_s1 = inlined_call_operand.vmem [shape: f32[1,128], index: 1, kind: input, shape index: {}]   ;;  %s191_s2 = inlined_call_operand.vmem [shape: f32[1,128], index: 2, kind: input, shape index: {}]   ;;  %s192_s3 = inlined_call_operand.vmem [shape: bf16[32,128], index: 3, kind: output, shape index: {}]  }
   0x1   :  { %v124_v0 = vld [vmem:[%s189_s0] sm:$0xff]   ;;  %v141_v1 = vld [vmem:[%s189_s0 + $0x8] sm:$0xff]  }
   0x2   :  { %v125_v2 = vunpack.c.l.bf16 %v124_v0  ;;  %v129_v3 = vunpack.c.l.bf16 %v141_v1  ;;  %v126_v4 = vunpack.c.h.bf16 %v124_v0  ;;  %v130_v5 = vunpack.c.h.bf16 %v141_v1  ;;  %v113_v36 = vld [vmem:[%s190_s1] ss:$0 sm:$0xff] }
   0x3   :  { %v114_v41 = vld [vmem:[%s191_s2] ss:$0 sm:$0xff] }
   0x4   :  { %22 = vadd.xlane.f32.xlu0 %v125_v2  ;;  %26 = vadd.xlane.f32.xlu1 %v129_v3 }
   0x8   :  { %24 = vadd.xlane.f32.xlu0 %v126_v4  ;;  %28 = vadd.xlane.f32.xlu1 %v130_v5 }
  0x8d   :  { %v23_v6 = vpop.xlane.xlu0 %22  ;;  %v27_v7 = vpop.xlane.xlu1 %26 }
  0x8e   :  { %v31_v8 = vmul.f32 0.0078125, %v23_v6  ;;  %v33_v9 = vmul.f32 0.0078125, %v27_v7 }
  0x90   :  { %v35_v10 = vsub.f32 %v125_v2, %v31_v8  ;;  %v37_v11 = vsub.f32 %v129_v3, %v33_v9 }
  0x91   :  { %v25_v12 = vpop.xlane.xlu0 %24  ;;  %v29_v13 = vpop.xlane.xlu1 %28 }
  0x92   :  { %v32_v14 = vmul.f32 0.0078125, %v25_v12  ;;  %v39_v15 = vmul.f32 %v35_v10, %v35_v10  ;;  %v34_v16 = vmul.f32 0.0078125, %v29_v13  ;;  %v41_v19 = vmul.f32 %v37_v11, %v37_v11 }
  0x94   :  { %v36_v17 = vsub.f32 %v126_v4, %v32_v14  ;;  %43 = vadd.xlane.f32.xlu0 %v39_v15  ;;  %v38_v18 = vsub.f32 %v130_v5, %v34_v16 }
  0x96   :  { %v40_v20 = vmul.f32 %v36_v17, %v36_v17  ;;  %v42_v21 = vmul.f32 %v38_v18, %v38_v18 }
  0x98   :  { %47 = vadd.xlane.f32.xlu0 %v41_v19  ;;  %45 = vadd.xlane.f32.xlu1 %v40_v20 }
  0x9c   :  { %49 = vadd.xlane.f32.xlu1 %v42_v21 }
 0x11d   :  { %v44_v22 = vpop.xlane.xlu0 %43 }
 0x11e   :  { %v51_v23 = vmul.f32 0.0078125, %v44_v22 }
 0x120   :  { %v55_v24 = vadd.f32 1e-05, %v51_v23 }
 0x121   :  { %v46_v25 = vpop.xlane.xlu1 %45  ;;  %v48_v26 = vpop.xlane.xlu0 %47 }
 0x122   :  { %143 = vrsqrt.f32 %v55_v24  ;;  %v52_v27 = vmul.f32 0.0078125, %v46_v25  ;;  %v53_v28 = vmul.f32 0.0078125, %v48_v26 }
 0x124   :  { %v56_v29 = vadd.f32 1e-05, %v52_v27  ;;  %v57_v30 = vadd.f32 1e-05, %v53_v28 }
 0x125   :  { %v50_v31 = vpop.xlane.xlu1 %49 }
 0x126   :  { %145 = vrsqrt.f32 %v56_v29  ;;  %v54_v32 = vmul.f32 0.0078125, %v50_v31 }
 0x127   :  { %147 = vrsqrt.f32 %v57_v30 }
 0x128   :  { %v58_v33 = vadd.f32 1e-05, %v54_v32 }
 0x12a   :  { %149 = vrsqrt.f32 %v58_v33 }
 0x12f   :  { %v144_v34 = vpop.eup %143 }
 0x130   :  { %v63_v35 = vmul.f32 %v144_v34, %v35_v10 }
 0x132   :  { %v74_v39 = vmul.f32 %v113_v36, %v63_v35 }
 0x133   :  { %v146_v37 = vpop.eup %145 }
 0x134   :  { %v148_v38 = vpop.eup %147  ;;  %v64_v40 = vmul.f32 %v146_v37, %v36_v17  ;;  %v85_v45 = vadd.f32 %v114_v41, %v74_v39 }
 0x135   :  { %v65_v42 = vmul.f32 %v148_v38, %v37_v11 }
 0x136   :  { %v75_v43 = vmul.f32 %v113_v36, %v64_v40 }
 0x137   :  { %v150_v44 = vpop.eup %149  ;;  %v76_v47 = vmul.f32 %v113_v36, %v65_v42 }
 0x138   :  { %v86_v46 = vadd.f32 %v114_v41, %v75_v43  ;;  %v66_v48 = vmul.f32 %v150_v44, %v38_v18 }
 0x139   :  { %v87_v51 = vadd.f32 %v114_v41, %v76_v47 }
 0x13a   :  { %v134_v49 = vpack.c.bf16 %v86_v46, %v85_v45  ;;  %v77_v50 = vmul.f32 %v113_v36, %v66_v48 }
 0x13c   :  { %135 = vst [vmem:[%s192_s3] sm:$0xff] %v134_v49   ;;  %v88_v52 = vadd.f32 %v114_v41, %v77_v50 }
 0x13e   :  { %v139_v53 = vpack.c.bf16 %v88_v52, %v87_v51 }
 0x140   :  { %142 = vst [vmem:[%s192_s3 + $0x8] sm:$0xff] %v139_v53  }

// kernel: transformer_forward.35
= control target key start
LH: loop header
LB: loop body
LE: loop exit
PB: predicated region body
PF: predicated region fallthrough
CT: control target
= control target key end

     0   :  { %v383_v33 = vmov 0   ;;  %s509_s0 = inlined_call_operand.vmem [shape: bf16[32,128], index: 0, kind: input, shape index: {}]   ;;  %s510_s3 = inlined_call_operand.vmem [shape: bf16[128,256], index: 3, kind: input, shape index: {}]   ;;  %s511_s1 = inlined_call_operand.vmem [shape: f32[1,128], index: 1, kind: input, shape index: {}]   ;;  %s512_s2 = inlined_call_operand.vmem [shape: f32[1,128], index: 2, kind: input, shape index: {}]   ;;  %s513_s4 = inlined_call_operand.vmem [shape: f32[1,256], index: 4, kind: input, shape index: {}]   ;;  %s514_s5 = inlined_call_operand.vmem [shape: bf16[32,256], index: 5, kind: output, shape index: {}]  }
   0x1   :  { %v326_v0 = vld [vmem:[%s509_s0] sm:$0xff]   ;;  %v333_v1 = vld [vmem:[%s509_s0 + $0x8] sm:$0xff]   ;;  %v351_v6 = vld [vmem:[%s510_s3 + $0x74] ss:$8 sps:$4 sm:$0xff]   ;;  %238 = vmatprep.mubr.bf16.mxu0 %v383_v33  ;;  %248 = vmatprep.mubr.bf16.mxu1 %v383_v33 }
   0x2   :  { %v327_v2 = vunpack.c.l.bf16 %v326_v0  ;;  %v331_v3 = vunpack.c.l.bf16 %v333_v1  ;;  %v328_v4 = vunpack.c.h.bf16 %v326_v0  ;;  %v332_v5 = vunpack.c.h.bf16 %v333_v1  ;;  %v353_v7 = vld [vmem:[%s510_s3 + $0x70] ss:$8 sps:$4 sm:$0xff]   ;;  %206 = vmatprep.subr.bf16.mxu0 %v351_v6  ;;  %334 = vmatprep.subr.bf16.mxu1 %v351_v6  ;;  %v354_v24 = vld [vmem:[%s510_s3 + $0x64] ss:$8 sps:$4 sm:$0xff]   ;;  %v356_v25 = vld [vmem:[%s510_s3 + $0x60] ss:$8 sps:$4 sm:$0xff]  }
   0x3   :  { %207 = vmatpush1.bf16.msra.mxu0 %v353_v7  ;;  %342 = vmatpush1.bf16.msra.mxu1 %v353_v7  ;;  %v357_v26 = vld [vmem:[%s510_s3 + $0x54] ss:$8 sps:$4 sm:$0xff]   ;;  %v359_v27 = vld [vmem:[%s510_s3 + $0x50] ss:$8 sps:$4 sm:$0xff]   ;;  %v360_v28 = vld [vmem:[%s510_s3 + $0x44] ss:$8 sps:$4 sm:$0xff]   ;;  %v116_v7 = vlaneseq }
   0x4   :  { %29 = vadd.xlane.f32.xlu0 %v327_v2  ;;  %33 = vadd.xlane.f32.xlu1 %v331_v3  ;;  %v362_v29 = vld [vmem:[%s510_s3 + $0x40] ss:$8 sps:$4 sm:$0xff]   ;;  %v363_v30 = vld [vmem:[%s510_s3 + $0x34] ss:$8 sps:$4 sm:$0xff]   ;;  %v365_v31 = vld [vmem:[%s510_s3 + $0x30] ss:$8 sps:$4 sm:$0xff]  }
   0x5   :  { %208 = vmatprep.subr.bf16.mxu0 %v354_v24  ;;  %335 = vmatprep.subr.bf16.mxu1 %v354_v24  ;;  %v366_v32 = vld [vmem:[%s510_s3 + $0x24] ss:$8 sps:$4 sm:$0xff]   ;;  %v368_v34 = vld [vmem:[%s510_s3 + $0x20] ss:$8 sps:$4 sm:$0xff]   ;;  %v369_v35 = vld [vmem:[%s510_s3 + $0x14] ss:$8 sps:$4 sm:$0xff]  }
   0x6   :  { %v371_v36 = vld [vmem:[%s510_s3 + $0x10] ss:$8 sps:$4 sm:$0xff]   ;;  %v372_v37 = vld [vmem:[%s510_s3 + $0x4] ss:$8 sps:$4 sm:$0xff]   ;;  %v374_v38 = vld [vmem:[%s510_s3] ss:$8 sps:$4 sm:$0xff]  }
   0x7   :  { %209 = vmatpush1.bf16.msra.mxu0 %v356_v25  ;;  %343 = vmatpush1.bf16.msra.mxu1 %v356_v25  ;;  %v299_v53 = vld [vmem:[%s511_s1] ss:$0 sm:$0xff] }
   0x8   :  { %31 = vadd.xlane.f32.xlu0 %v328_v4  ;;  %35 = vadd.xlane.f32.xlu1 %v332_v5  ;;  %v300_v58 = vld [vmem:[%s512_s2] ss:$0 sm:$0xff] }
   0x9   :  { %210 = vmatprep.subr.bf16.mxu0 %v357_v26  ;;  %336 = vmatprep.subr.bf16.mxu1 %v357_v26 }
   0xb   :  { %211 = vmatpush1.bf16.msra.mxu0 %v359_v27  ;;  %344 = vmatpush1.bf16.msra.mxu1 %v359_v27 }
   0xc   :  { %212 = vmatprep.subr.bf16.mxu0 %v360_v28  ;;  %337 = vmatprep.subr.bf16.mxu1 %v360_v28 }
   0xf   :  { %213 = vmatpush1.bf16.msra.mxu0 %v362_v29  ;;  %345 = vmatpush1.bf16.msra.mxu1 %v362_v29 }
  0x10   :  { %214 = vmatprep.subr.bf16.mxu0 %v363_v30  ;;  %338 = vmatprep.subr.bf16.mxu1 %v363_v30 }
  0x13   :  { %215 = vmatpush1.bf16.msra.mxu0 %v365_v31  ;;  %346 = vmatpush1.bf16.msra.mxu1 %v365_v31 }
  0x14   :  { %216 = vmatprep.subr.bf16.mxu0 %v366_v32  ;;  %339 = vmatprep.subr.bf16.mxu1 %v366_v32 }
  0x17   :  { %217 = vmatpush1.bf16.msra.mxu0 %v368_v34  ;;  %347 = vmatpush1.bf16.msra.mxu1 %v368_v34 }
  0x18   :  { %218 = vmatprep.subr.bf16.mxu0 %v369_v35  ;;  %340 = vmatprep.subr.bf16.mxu1 %v369_v35 }
  0x1b   :  { %219 = vmatpush1.bf16.msra.mxu0 %v371_v36  ;;  %348 = vmatpush1.bf16.msra.mxu1 %v371_v36 }
  0x1c   :  { %220 = vmatprep.subr.bf16.mxu0 %v372_v37  ;;  %341 = vmatprep.subr.bf16.mxu1 %v372_v37 }
  0x1f   :  { %221 = vmatpush1.bf16.msra.mxu0 %v374_v38  ;;  %349 = vmatpush1.bf16.msra.mxu1 %v374_v38 }
  0x8d   :  { %v30_v8 = vpop.xlane.xlu0 %29  ;;  %v34_v9 = vpop.xlane.xlu1 %33 }
  0x8e   :  { %v38_v10 = vmul.f32 0.0078125, %v30_v8  ;;  %v40_v11 = vmul.f32 0.0078125, %v34_v9  ;;  %v117_v8 = vshrl.u32 %v116_v7, 7 }
  0x90   :  { %v426_v12 = vsub.f32 %v327_v2, %v38_v10  ;;  %v428_v13 = vsub.f32 %v331_v3, %v40_v11  ;;  %v118_v9 = vsub.s32 0, %v117_v8  ;;  %v114_v10 = vld [vmem:[%s513_s4] sm:$0x3]  ;;  %v122_v11 = vsub.s32 1, %v117_v8 }
  0x91   :  { %v32_v14 = vpop.xlane.xlu0 %31  ;;  %v36_v15 = vpop.xlane.xlu1 %35 }
  0x92   :  { %v39_v16 = vmul.f32 0.0078125, %v32_v14  ;;  %v46_v17 = vmul.f32 %v426_v12, %v426_v12  ;;  %v41_v18 = vmul.f32 0.0078125, %v36_v15  ;;  %v48_v21 = vmul.f32 %v428_v13, %v428_v13 }
  0x94   :  { %v432_v19 = vsub.f32 %v328_v4, %v39_v16  ;;  %50 = vadd.xlane.f32.xlu0 %v46_v17  ;;  %v434_v20 = vsub.f32 %v332_v5, %v41_v18 }
  0x96   :  { %v47_v22 = vmul.f32 %v432_v19, %v432_v19  ;;  %v49_v23 = vmul.f32 %v434_v20, %v434_v20 }
  0x98   :  { %54 = vadd.xlane.f32.xlu0 %v48_v21  ;;  %52 = vadd.xlane.f32.xlu1 %v47_v22 }
  0x9c   :  { %56 = vadd.xlane.f32.xlu1 %v49_v23 }
 0x11d   :  { %v51_v39 = vpop.xlane.xlu0 %50 }
 0x11e   :  { %v58_v40 = vmul.f32 0.0078125, %v51_v39 }
 0x120   :  { %v62_v41 = vadd.f32 1e-05, %v58_v40 }
 0x121   :  { %v53_v42 = vpop.xlane.xlu1 %52  ;;  %v55_v43 = vpop.xlane.xlu0 %54 }
 0x122   :  { %375 = vrsqrt.f32 %v62_v41  ;;  %v59_v44 = vmul.f32 0.0078125, %v53_v42  ;;  %v60_v45 = vmul.f32 0.0078125, %v55_v43 }
 0x124   :  { %v63_v46 = vadd.f32 1e-05, %v59_v44  ;;  %v64_v47 = vadd.f32 1e-05, %v60_v45 }
 0x125   :  { %v57_v48 = vpop.xlane.xlu1 %56 }
 0x126   :  { %377 = vrsqrt.f32 %v63_v46  ;;  %v61_v49 = vmul.f32 0.0078125, %v57_v48 }
 0x127   :  { %379 = vrsqrt.f32 %v64_v47 }
 0x128   :  { %v65_v50 = vadd.f32 1e-05, %v61_v49 }
 0x12a   :  { %381 = vrsqrt.f32 %v65_v50 }
 0x12f   :  { %v376_v51 = vpop.eup %375 }
 0x130   :  { %v70_v52 = vmul.f32 %v376_v51, %v426_v12  ;;  %v119_v12 = vrot.slane %v114_v10, %v118_v9 }
 0x132   :  { %v81_v57 = vmul.f32 %v299_v53, %v70_v52 }
 0x133   :  { %v378_v54 = vpop.eup %377 }
 0x134   :  { %v380_v55 = vpop.eup %379  ;;  %v71_v56 = vmul.f32 %v378_v54, %v432_v19  ;;  %v92_v62 = vadd.f32 %v300_v58, %v81_v57 }
 0x135   :  { %v72_v59 = vmul.f32 %v380_v55, %v428_v13  ;;  %v123_v13 = vrot.slane %v114_v10, %v122_v11 }
 0x136   :  { %v82_v60 = vmul.f32 %v299_v53, %v71_v56 }
 0x137   :  { %v382_v61 = vpop.eup %381  ;;  %v83_v1 = vmul.f32 %v299_v53, %v72_v59 }
 0x138   :  { %v93_v63 = vadd.f32 %v300_v58, %v82_v60  ;;  %v73_v0 = vmul.f32 %v382_v61, %v434_v20 }
 0x139   :  { %v94_v4 = vadd.f32 %v300_v58, %v83_v1 }
 0x13a   :  { %v96_v2 = vpack.c.bf16 %v93_v63, %v92_v62  ;;  %v84_v3 = vmul.f32 %v299_v53, %v73_v0 }
 0x13c   :  { %239 = vmatmul.mubr.bf16.vlgmr.msra.gmra.mxu0 %v96_v2  ;;  %v95_v5 = vadd.f32 %v300_v58, %v84_v3 }
 0x13e   :  { %v97_v6 = vpack.c.bf16 %v95_v5, %v94_v4 }
 0x140   :  { %249 = vmatmul.mubr.bf16.vlgmr.msra.gmra.mxu1 %v97_v6 }
 0x1fc   :  { %v240_v14 = vpop.f32.mrf.mxu0 }
 0x1fd   :  { %v241_v15 = vadd.f32 %v240_v14, %v119_v12 }
 0x1fe   :  { %v242_v16 = vpop.f32.mrf.mxu0 }
 0x1ff   :  { %v243_v17 = vadd.f32 %v242_v16, %v123_v13  ;;  %v259_v20 = vmax.f32 %v241_v15, 0.0 }
 0x200   :  { %v244_v18 = vpop.f32.mrf.mxu0  ;;  %v250_v19 = vpop.f32.mrf.mxu1 }
 0x201   :  { %v260_v21 = vmax.f32 %v243_v17, 0.0  ;;  %v245_v22 = vadd.f32 %v244_v18, %v119_v12  ;;  %v251_v23 = vadd.f32 %v250_v19, %v119_v12 }
 0x202   :  { %v246_v24 = vpop.f32.mrf.mxu0  ;;  %v252_v25 = vpop.f32.mrf.mxu1 }
 0x203   :  { %v321_v26 = vpack.c.bf16 %v260_v21, %v259_v20  ;;  %v247_v27 = vadd.f32 %v246_v24, %v123_v13  ;;  %v253_v28 = vadd.f32 %v252_v25, %v123_v13  ;;  %v261_v30 = vmax.f32 %v245_v22, 0.0 }
 0x204   :  { %v254_v29 = vpop.f32.mrf.mxu1  ;;  %v263_v33 = vmax.f32 %v251_v23, 0.0 }
 0x205   :  { %291 = vst [vmem:[%s514_s5] sm:$0xff] %v321_v26  ;;  %v262_v31 = vmax.f32 %v247_v27, 0.0  ;;  %v255_v32 = vadd.f32 %v254_v29, %v119_v12  ;;  %v264_v34 = vmax.f32 %v253_v28, 0.0 }
 0x206   :  { %v256_v35 = vpop.f32.mrf.mxu1 }
 0x207   :  { %v322_v36 = vpack.c.bf16 %v262_v31, %v261_v30  ;;  %v257_v37 = vadd.f32 %v256_v35, %v123_v13  ;;  %v323_v38 = vpack.c.bf16 %v264_v34, %v263_v33  ;;  %v265_v39 = vmax.f32 %v255_v32, 0.0 }
 0x209   :  { %292 = vst [vmem:[%s514_s5 + $0x8] sm:$0xff] %v322_v36  ;;  %v266_v40 = vmax.f32 %v257_v37, 0.0  ;;  %293 = vst [vmem:[%s514_s5 + $0x10] sm:$0xff] %v323_v38 }
 0x20b   :  { %v324_v41 = vpack.c.bf16 %v266_v40, %v265_v39 }
 0x20d   :  { %294 = vst [vmem:[%s514_s5 + $0x18] sm:$0xff] %v324_v41 }

// kernel: transformer_forward.36
= control target key start
LH: loop header
LB: loop body
LE: loop exit
PB: predicated region body
PF: predicated region fallthrough
CT: control target
= control target key end

     0   :  { %s508_s1 = inlined_call_operand.vmem [shape: bf16[256,128], index: 1, kind: input, shape index: {}]   ;;  %s509_s0 = inlined_call_operand.vmem [shape: bf16[32,256], index: 0, kind: input, shape index: {}]   ;;  %s510_s3 = inlined_call_operand.vmem [shape: bf16[32,128], index: 3, kind: input, shape index: {}]   ;;  %s511_s2 = inlined_call_operand.vmem [shape: f32[1,128], index: 2, kind: input, shape index: {}]   ;;  %s512_s4 = inlined_call_operand.vmem [shape: bf16[32,128], index: 4, kind: output, shape index: {}]  }
   0x1   :  { %v386_v0 = vld [vmem:[%s508_s1 + $0x78] sm:$0xff]   ;;  %v388_v2 = vld [vmem:[%s508_s1 + $0x70] sm:$0xff]   ;;  %v390_v4 = vld [vmem:[%s508_s1 + $0x68] sm:$0xff]  }
   0x2   :  { %v387_v1 = vld [vmem:[%s508_s1 + $0x38] sm:$0xff]   ;;  %342 = vmatprep.subr.bf16.mxu0 %v386_v0  ;;  %370 = vmatprep.subr.bf16.mxu1 %v386_v0  ;;  %v389_v3 = vld [vmem:[%s508_s1 + $0x30] sm:$0xff]   ;;  %v391_v5 = vld [vmem:[%s508_s1 + $0x28] sm:$0xff]  }
   0x3   :  { %343 = vmatpush3.bf16.msra.mxu0 %v387_v1  ;;  %378 = vmatpush3.bf16.msra.mxu1 %v387_v1  ;;  %v392_v6 = vld [vmem:[%s508_s1 + $0x60] sm:$0xff]   ;;  %v394_v8 = vld [vmem:[%s508_s1 + $0x58] sm:$0xff]   ;;  %v396_v10 = vld [vmem:[%s508_s1 + $0x50] sm:$0xff]  }
   0x4   :  { %344 = vmatprep.subr.bf16.mxu0 %v388_v2  ;;  %371 = vmatprep.subr.bf16.mxu1 %v388_v2  ;;  %v393_v7 = vld [vmem:[%s508_s1 + $0x20] sm:$0xff]   ;;  %v395_v9 = vld [vmem:[%s508_s1 + $0x18] sm:$0xff]   ;;  %v397_v13 = vld [vmem:[%s508_s1 + $0x10] sm:$0xff]  }
   0x5   :  { %v404_v11 = vld [vmem:[%s509_s0 + $0x4] ss:$8 sps:$4 sm:$0xff]   ;;  %v407_v12 = vld [vmem:[%s509_s0 + $0x14] ss:$8 sps:$4 sm:$0xff]   ;;  %v402_v18 = vld [vmem:[%s509_s0] ss:$8 sps:$4 sm:$0xff]  }
   0x6   :  { %v398_v14 = vld [vmem:[%s508_s1 + $0x48] sm:$0xff]   ;;  %214 = vmatprep.mubr.bf16.mxu0 %v404_v11  ;;  %222 = vmatprep.mubr.bf16.mxu1 %v407_v12  ;;  %v400_v16 = vld [vmem:[%s508_s1 + $0x40] sm:$0xff]   ;;  %v405_v19 = vld [vmem:[%s509_s0 + $0x10] ss:$8 sps:$4 sm:$0xff]  }
   0x7   :  { %345 = vmatpush3.bf16.msra.mxu0 %v389_v3  ;;  %379 = vmatpush3.bf16.msra.mxu1 %v389_v3  ;;  %v399_v15 = vld [vmem:[%s508_s1 + $0x8] sm:$0xff]   ;;  %v401_v17 = vld [vmem:[%s508_s1] sm:$0xff]  }
   0x8   :  { %346 = vmatprep.subr.bf16.mxu0 %v390_v4  ;;  %372 = vmatprep.subr.bf16.mxu1 %v390_v4  ;;  %v323_v25 = vld [vmem:[%s510_s3] sm:$0xff]   ;;  %v340_v27 = vld [vmem:[%s510_s3 + $0x8] sm:$0xff]  }
   0x9   :  { %v313_v28 = vld [vmem:[%s511_s2] ss:$0 sm:$0xff]  ;;  %v324_v31 = vunpack.c.l.bf16 %v323_v25  ;;  %v328_v32 = vunpack.c.l.bf16 %v340_v27  ;;  %v325_v34 = vunpack.c.h.bf16 %v323_v25  ;;  %v329_v36 = vunpack.c.h.bf16 %v340_v27 }
   0xb   :  { %347 = vmatpush3.bf16.msra.mxu0 %v391_v5  ;;  %380 = vmatpush3.bf16.msra.mxu1 %v391_v5 }
   0xc   :  { %348 = vmatprep.subr.bf16.mxu0 %v392_v6  ;;  %373 = vmatprep.subr.bf16.mxu1 %v392_v6 }
   0xf   :  { %349 = vmatpush3.bf16.msra.mxu0 %v393_v7  ;;  %381 = vmatpush3.bf16.msra.mxu1 %v393_v7 }
  0x10   :  { %350 = vmatprep.subr.bf16.mxu0 %v394_v8  ;;  %374 = vmatprep.subr.bf16.mxu1 %v394_v8 }
  0x13   :  { %351 = vmatpush3.bf16.msra.mxu0 %v395_v9  ;;  %382 = vmatpush3.bf16.msra.mxu1 %v395_v9 }
  0x14   :  { %352 = vmatprep.subr.bf16.mxu0 %v396_v10  ;;  %375 = vmatprep.subr.bf16.mxu1 %v396_v10 }
  0x17   :  { %353 = vmatpush3.bf16.msra.mxu0 %v397_v13  ;;  %383 = vmatpush3.bf16.msra.mxu1 %v397_v13 }
  0x18   :  { %354 = vmatprep.subr.bf16.mxu0 %v398_v14  ;;  %376 = vmatprep.subr.bf16.mxu1 %v398_v14 }
  0x1b   :  { %355 = vmatpush3.bf16.msra.mxu0 %v399_v15  ;;  %384 = vmatpush3.bf16.msra.mxu1 %v399_v15 }
  0x1c   :  { %356 = vmatprep.subr.bf16.mxu0 %v400_v16  ;;  %377 = vmatprep.subr.bf16.mxu1 %v400_v16 }
  0x1f   :  { %357 = vmatpush3.bf16.msra.mxu0 %v401_v17  ;;  %385 = vmatpush3.bf16.msra.mxu1 %v401_v17 }
  0x22   :  { %215 = vmatmul.mubr.bf16.vlgmr.msra.gmra.mxu0 %v402_v18  ;;  %223 = vmatmul.mubr.bf16.vlgmr.msra.gmra.mxu1 %v405_v19 }
  0xe2   :  { %v358_v20 = vpop.f32.mrf.mxu0  ;;  %v364_v21 = vpop.f32.mrf.mxu1 }
  0xe4   :  { %v359_v22 = vpop.f32.mrf.mxu0  ;;  %v365_v23 = vpop.f32.mrf.mxu1 }
  0xe5   :  { %v360_v24 = vadd.f32 %v359_v22, %v358_v20  ;;  %v366_v26 = vadd.f32 %v365_v23, %v364_v21 }
  0xe6   :  { %v361_v29 = vpop.f32.mrf.mxu0  ;;  %v367_v30 = vpop.f32.mrf.mxu1 }
  0xe7   :  { %v253_v37 = vadd.f32 %v360_v24, %v313_v28  ;;  %v255_v38 = vadd.f32 %v366_v26, %v313_v28 }
  0xe8   :  { %v362_v33 = vpop.f32.mrf.mxu0  ;;  %v368_v35 = vpop.f32.mrf.mxu1 }
  0xe9   :  { %v363_v39 = vadd.f32 %v362_v33, %v361_v29  ;;  %v369_v40 = vadd.f32 %v368_v35, %v367_v30  ;;  %v265_v43 = vadd.f32 %v324_v31, %v253_v37  ;;  %v267_v44 = vadd.f32 %v328_v32, %v255_v38 }
  0xeb   :  { %v254_v41 = vadd.f32 %v363_v39, %v313_v28  ;;  %v256_v42 = vadd.f32 %v369_v40, %v313_v28 }
  0xed   :  { %v266_v45 = vadd.f32 %v325_v34, %v254_v41  ;;  %v268_v46 = vadd.f32 %v329_v36, %v256_v42 }
  0xef   :  { %v333_v47 = vpack.c.bf16 %v266_v45, %v265_v43  ;;  %v338_v48 = vpack.c.bf16 %v268_v46, %v267_v44 }
  0xf1   :  { %334 = vst [vmem:[%s512_s4] sm:$0xff] %v333_v47   ;;  %341 = vst [vmem:[%s512_s4 + $0x8] sm:$0xff] %v338_v48  }

// kernel: transformer_forward.47
= control target key start
LH: loop header
LB: loop body
LE: loop exit
PB: predicated region body
PF: predicated region fallthrough
CT: control target
= control target key end

     0   :  { %v348_v1 = vmov 0   ;;  %v229_v19 = vlaneseq  ;;  %s438_s1 = inlined_call_operand.vmem [shape: bf16[128,256], index: 1, kind: input, shape index: {}]   ;;  %s439_s0 = inlined_call_operand.vmem [shape: bf16[32,128], index: 0, kind: input, shape index: {}]   ;;  %s440_s2 = inlined_call_operand.vmem [shape: f32[1,256], index: 2, kind: input, shape index: {}]   ;;  %s441_s3 = inlined_call_operand.vmem [shape: bf16[32,256], index: 3, kind: output, shape index: {}]  }
   0x1   :  { %v322_v0 = vld [vmem:[%s438_s1 + $0x74] ss:$8 sps:$4 sm:$0xff]   ;;  %179 = vmatprep.mubr.bf16.mxu0 %v348_v1  ;;  %189 = vmatprep.mubr.bf16.mxu1 %v348_v1  ;;  %v324_v2 = vld [vmem:[%s438_s1 + $0x70] ss:$8 sps:$4 sm:$0xff]   ;;  %v325_v3 = vld [vmem:[%s438_s1 + $0x64] ss:$8 sps:$4 sm:$0xff]  }
   0x2   :  { %147 = vmatprep.subr.bf16.mxu0 %v322_v0  ;;  %305 = vmatprep.subr.bf16.mxu1 %v322_v0  ;;  %v327_v4 = vld [vmem:[%s438_s1 + $0x60] ss:$8 sps:$4 sm:$0xff]   ;;  %v328_v5 = vld [vmem:[%s438_s1 + $0x54] ss:$8 sps:$4 sm:$0xff]   ;;  %v330_v6 = vld [vmem:[%s438_s1 + $0x50] ss:$8 sps:$4 sm:$0xff]  }
   0x3   :  { %148 = vmatpush1.bf16.msra.mxu0 %v324_v2  ;;  %313 = vmatpush1.bf16.msra.mxu1 %v324_v2  ;;  %v331_v7 = vld [vmem:[%s438_s1 + $0x44] ss:$8 sps:$4 sm:$0xff]   ;;  %v333_v8 = vld [vmem:[%s438_s1 + $0x40] ss:$8 sps:$4 sm:$0xff]   ;;  %v334_v9 = vld [vmem:[%s438_s1 + $0x34] ss:$8 sps:$4 sm:$0xff]  }
   0x4   :  { %149 = vmatprep.subr.bf16.mxu0 %v325_v3  ;;  %306 = vmatprep.subr.bf16.mxu1 %v325_v3  ;;  %v336_v10 = vld [vmem:[%s438_s1 + $0x30] ss:$8 sps:$4 sm:$0xff]   ;;  %v337_v11 = vld [vmem:[%s438_s1 + $0x24] ss:$8 sps:$4 sm:$0xff]   ;;  %v339_v12 = vld [vmem:[%s438_s1 + $0x20] ss:$8 sps:$4 sm:$0xff]  }
   0x5   :  { %v340_v13 = vld [vmem:[%s438_s1 + $0x14] ss:$8 sps:$4 sm:$0xff]   ;;  %v342_v14 = vld [vmem:[%s438_s1 + $0x10] ss:$8 sps:$4 sm:$0xff]   ;;  %v343_v15 = vld [vmem:[%s438_s1 + $0x4] ss:$8 sps:$4 sm:$0xff]  }
   0x6   :  { %v345_v16 = vld [vmem:[%s438_s1] ss:$8 sps:$4 sm:$0xff]   ;;  %v230_v20 = vshrl.u32 %v229_v19, 7 }
   0x7   :  { %150 = vmatpush1.bf16.msra.mxu0 %v327_v4  ;;  %314 = vmatpush1.bf16.msra.mxu1 %v327_v4  ;;  %v346_v17 = vld [vmem:[%s439_s0] sm:$0xff]   ;;  %v347_v18 = vld [vmem:[%s439_s0 + $0x8] sm:$0xff]  }
   0x8   :  { %151 = vmatprep.subr.bf16.mxu0 %v328_v5  ;;  %307 = vmatprep.subr.bf16.mxu1 %v328_v5  ;;  %v231_v21 = vsub.s32 0, %v230_v20  ;;  %v235_v22 = vsub.s32 1, %v230_v20  ;;  %v227_v23 = vld [vmem:[%s440_s2] sm:$0x3] }
   0xa   :  { %v232_v24 = vrot.slane %v227_v23, %v231_v21  ;;  %v236_v25 = vrot.slane %v227_v23, %v235_v22 }
   0xb   :  { %152 = vmatpush1.bf16.msra.mxu0 %v330_v6  ;;  %315 = vmatpush1.bf16.msra.mxu1 %v330_v6 }
   0xc   :  { %153 = vmatprep.subr.bf16.mxu0 %v331_v7  ;;  %308 = vmatprep.subr.bf16.mxu1 %v331_v7 }
   0xf   :  { %154 = vmatpush1.bf16.msra.mxu0 %v333_v8  ;;  %316 = vmatpush1.bf16.msra.mxu1 %v333_v8 }
  0x10   :  { %155 = vmatprep.subr.bf16.mxu0 %v334_v9  ;;  %309 = vmatprep.subr.bf16.mxu1 %v334_v9 }
  0x13   :  { %156 = vmatpush1.bf16.msra.mxu0 %v336_v10  ;;  %317 = vmatpush1.bf16.msra.mxu1 %v336_v10 }
  0x14   :  { %157 = vmatprep.subr.bf16.mxu0 %v337_v11  ;;  %310 = vmatprep.subr.bf16.mxu1 %v337_v11 }
  0x17   :  { %158 = vmatpush1.bf16.msra.mxu0 %v339_v12  ;;  %318 = vmatpush1.bf16.msra.mxu1 %v339_v12 }
  0x18   :  { %159 = vmatprep.subr.bf16.mxu0 %v340_v13  ;;  %311 = vmatprep.subr.bf16.mxu1 %v340_v13 }
  0x1b   :  { %160 = vmatpush1.bf16.msra.mxu0 %v342_v14  ;;  %319 = vmatpush1.bf16.msra.mxu1 %v342_v14 }
  0x1c   :  { %161 = vmatprep.subr.bf16.mxu0 %v343_v15  ;;  %312 = vmatprep.subr.bf16.mxu1 %v343_v15 }
  0x1f   :  { %162 = vmatpush1.bf16.msra.mxu0 %v345_v16  ;;  %320 = vmatpush1.bf16.msra.mxu1 %v345_v16 }
  0x22   :  { %180 = vmatmul.mubr.bf16.vlgmr.msra.gmra.mxu0 %v346_v17  ;;  %190 = vmatmul.mubr.bf16.vlgmr.msra.gmra.mxu1 %v347_v18 }
  0xe2   :  { %v181_v26 = vpop.f32.mrf.mxu0  ;;  %v191_v27 = vpop.f32.mrf.mxu1 }
  0xe3   :  { %v239_v30 = vadd.f32 %v232_v24, %v181_v26  ;;  %v243_v31 = vadd.f32 %v232_v24, %v191_v27 }
  0xe4   :  { %v183_v28 = vpop.f32.mrf.mxu0  ;;  %v193_v29 = vpop.f32.mrf.mxu1 }
  0xe5   :  { %v240_v32 = vadd.f32 %v236_v25, %v183_v28  ;;  %v244_v33 = vadd.f32 %v236_v25, %v193_v29 }
  0xe6   :  { %v185_v34 = vpop.f32.mrf.mxu0  ;;  %v195_v35 = vpop.f32.mrf.mxu1 }
  0xe7   :  { %v301_v36 = vpack.c.bf16 %v240_v32, %v239_v30  ;;  %v303_v37 = vpack.c.bf16 %v244_v33, %v243_v31  ;;  %v241_v40 = vadd.f32 %v232_v24, %v185_v34  ;;  %v245_v41 = vadd.f32 %v232_v24, %v195_v35 }
  0xe8   :  { %v187_v38 = vpop.f32.mrf.mxu0  ;;  %v197_v39 = vpop.f32.mrf.mxu1 }
  0xe9   :  { %271 = vst [vmem:[%s441_s3] sm:$0xff] %v301_v36  ;;  %273 = vst [vmem:[%s441_s3 + $0x10] sm:$0xff] %v303_v37  ;;  %v242_v42 = vadd.f32 %v236_v25, %v187_v38  ;;  %v246_v43 = vadd.f32 %v236_v25, %v197_v39 }
  0xeb   :  { %v302_v44 = vpack.c.bf16 %v242_v42, %v241_v40  ;;  %v304_v45 = vpack.c.bf16 %v246_v43, %v245_v41 }
  0xed   :  { %272 = vst [vmem:[%s441_s3 + $0x8] sm:$0xff] %v302_v44  ;;  %274 = vst [vmem:[%s441_s3 + $0x18] sm:$0xff] %v304_v45 }

// kernel: transformer_forward.45
= control target key start
LH: loop header
LB: loop body
LE: loop exit
PB: predicated region body
PF: predicated region fallthrough
CT: control target
= control target key end

     0   :  { %v240_v0 = vmov 0.0   ;;  %vm241_vm0 = vmmov 0   ;;  %s303_s1 = inlined_call_operand.vmem [shape: bf16[128,128], index: 1, kind: input, shape index: {}]   ;;  %s304_s0 = inlined_call_operand.vmem [shape: bf16[16,128], index: 0, kind: input, shape index: {}]   ;;  %s305_s2 = inlined_call_operand.vmem [shape: f32[1,128], index: 2, kind: input, shape index: {}]   ;;  %s306_s3 = inlined_call_operand.vmem [shape: bf16[16,128], index: 3, kind: input, shape index: {}]   ;;  %s307_s4 = inlined_call_operand.vmem [shape: bf16[16,128], index: 4, kind: output, shape index: {}]  }
   0x1   :  { %209 = vmatprep.subr.bf16.mxu0 %v240_v0  ;;  %v231_v1 = vld [vmem:[%s303_s1 + $0x38] sm:$0xff]   ;;  %225 = vmatprep.mubr.msk.bf16.mxu0 %vm241_vm0, %v240_v0  ;;  %v232_v2 = vld [vmem:[%s303_s1 + $0x30] sm:$0xff]   ;;  %v233_v3 = vld [vmem:[%s303_s1 + $0x28] sm:$0xff]  }
   0x2   :  { %210 = vmatpush3.bf16.msra.mxu0 %v231_v1  ;;  %v234_v4 = vld [vmem:[%s303_s1 + $0x20] sm:$0xff]   ;;  %v235_v5 = vld [vmem:[%s303_s1 + $0x18] sm:$0xff]   ;;  %v236_v6 = vld [vmem:[%s303_s1 + $0x10] sm:$0xff]  }
   0x3   :  { %211 = vmatprep.subr.bf16.mxu0 %v240_v0  ;;  %v237_v7 = vld [vmem:[%s303_s1 + $0x8] sm:$0xff]   ;;  %v238_v8 = vld [vmem:[%s303_s1] sm:$0xff]  }
   0x4   :  { %v239_v9 = vld [vmem:[%s304_s0] sm:$0xff]  }
   0x5   :  { %v186_v11 = vld [vmem:[%s305_s2] ss:$0 sm:$0xff] }
   0x6   :  { %212 = vmatpush3.bf16.msra.mxu0 %v232_v2  ;;  %v192_v12 = vld [vmem:[%s306_s3] sm:$0xff]  }
   0x7   :  { %213 = vmatprep.subr.bf16.mxu0 %v240_v0  ;;  %v193_v15 = vunpack.c.l.bf16 %v192_v12  ;;  %v194_v16 = vunpack.c.h.bf16 %v192_v12 }
   0xa   :  { %214 = vmatpush3.bf16.msra.mxu0 %v233_v3 }
   0xb   :  { %215 = vmatprep.subr.bf16.mxu0 %v240_v0 }
   0xe   :  { %216 = vmatpush3.bf16.msra.mxu0 %v234_v4 }
   0xf   :  { %217 = vmatprep.subr.bf16.mxu0 %v240_v0 }
  0x12   :  { %218 = vmatpush3.bf16.msra.mxu0 %v235_v5 }
  0x13   :  { %219 = vmatprep.subr.bf16.mxu0 %v240_v0 }
  0x16   :  { %220 = vmatpush3.bf16.msra.mxu0 %v236_v6 }
  0x17   :  { %221 = vmatprep.subr.bf16.mxu0 %v240_v0 }
  0x1a   :  { %222 = vmatpush3.bf16.msra.mxu0 %v237_v7 }
  0x1b   :  { %223 = vmatprep.subr.bf16.mxu0 %v240_v0 }
  0x1e   :  { %224 = vmatpush3.bf16.msra.mxu0 %v238_v8 }
  0x21   :  { %226 = vmatmul.mubr.bf16.vlgmr.msra.gmra.mxu0 %v239_v9 }
  0xe1   :  { %v132_v10 = vpop.f32.mrf.mxu0 }
  0xe2   :  { %v155_v14 = vadd.f32 %v186_v11, %v132_v10 }
  0xe3   :  { %v227_v13 = vpop.f32.mrf.mxu0 }
  0xe4   :  { %v161_v20 = vadd.f32 %v193_v15, %v155_v14 }
  0xe5   :  { %v135_v17 = vpop.f32.mrf.mxu0 }
  0xe6   :  { %v156_v18 = vadd.f32 %v186_v11, %v135_v17 }
  0xe7   :  { %v228_v19 = vpop.f32.mrf.mxu0 }
  0xe8   :  { %v162_v21 = vadd.f32 %v194_v16, %v156_v18 }
  0xea   :  { %v198_v22 = vpack.c.bf16 %v162_v21, %v161_v20 }
  0xec   :  { %199 = vst [vmem:[%s307_s4] sm:$0xff] %v198_v22  }

// kernel: transformer_forward.43
= control target key start
LH: loop header
LB: loop body
LE: loop exit
PB: predicated region body
PF: predicated region fallthrough
CT: control target
= control target key end

     0   :  { %s883_s18 = smov 0   ;;  %s885_s19 = smov 0   ;;  %s991_s0 = inlined_call_operand.vmem [shape: bf16[16,128], index: 0, kind: input, shape index: {}]   ;;  %s992_s1 = inlined_call_operand.vmem [shape: f32[1,128], index: 1, kind: input, shape index: {}]   ;;  %s993_s2 = inlined_call_operand.vmem [shape: f32[1,128], index: 2, kind: input, shape index: {}]   ;;  %s994_s3 = inlined_call_operand.vmem [shape: bf16[128,384], index: 3, kind: input, shape index: {}]   ;;  %s995_s4 = inlined_call_operand.vmem [shape: f32[1,384], index: 4, kind: input, shape index: {}]   ;;  %s996_s5 = inlined_call_operand.vmem [shape: bf16[16,384], index: 5, kind: output, shape index: {}]  }
   0x1   :  { %s887_s20 = smov 0   ;;  %s889_s21 = smov 0  }
   0x2   :  { %s891_s22 = smov 0  }
   0x3 LB: > { %s24_s23 = sadd.s32 1, %s845_s21  ;;  %s690_s24 = sadd.s32 4294967295, %s849_s22   ;;  %s849_s22 = sphi %s891_s22, %s15_s22   ;;  %s845_s21 = sphi %s889_s21, %s1001_s21   ;;  %s841_s20 = sphi %s887_s20, %s1000_s20   ;;  %s837_s19 = sphi %s885_s19, %s999_s19   ;;  %s833_s18 = sphi %s883_s18, %s998_s18  }
   0x4   : > { %p25_p0 = scmp.ge.s32.totalorder %s24_s23, 3  ;;  %p109_p1 = scmp.ne.s32.totalorder %s837_s19, %s833_s18 }
   0x5   : > { %p110_p2 = scmp.eq.s32.totalorder %s849_s22, 0  ;;  %p167_p4 = scmp.eq.s32.totalorder %s690_s24, 2 }
   0x6   : > { %s1003_s23 = smov (%p25_p0, %s24_s23), 0  ;;  %s102_s26 = sadd.s32 1, %s837_s19 }
   0x7   : > { %p111_p3 = por %p110_p2, %p109_p1  ;;  %s99_s25 = ssub.s32 %s845_s21, %s1003_s23 }
   0x8   : > { %p100_p5 = scmp.eq.s32.totalorder %s99_s25, 0  ;;  %p918_p6 = por %p167_p4, %p109_p1 }
   0x9   : > { %p694_p7 = scmp.ge.s32.totalorder %s849_s22, 3 }
   0xa   : > { %s923_s28 = scalar_select %p100_p5, %s837_s19, %s102_s26  }
   0xb   : > { %204 = sbr.rel (%p694_p7) target bundleno = 30 (0x1e), region = 28 }
  0x10   : > { %207 = sbr.rel (!%p111_p3) target bundleno = 30 (0x1e), region = 32  ;;  %s209_s29 = sand.u32 (%p111_p3), 1, %s837_s19  }
  0x11   : > { %s696_s30 = sshll.u32 (%p111_p3), %s845_s21, 2  ;;  %s695_s6 = sshll.u32 (%p111_p3), %s209_s29, 6 }
  0x12   : > { %s931_s9 = scalar_lea.vmem (%p111_p3), %s994_s3, %s696_s30  ;;  %s211_s10 = scalar_lea.vmem (%p111_p3), [#allocation2], %s695_s6 }
  0x13   : > { %v230_v0 = vld [vmem:[%s931_s9] sm:$0xf] (%p111_p3)  ;;  %v232_v1 = vld [vmem:[%s931_s9 + $0xc] sm:$0xf] (%p111_p3)  ;;  %v234_v2 = vld [vmem:[%s931_s9 + $0x18] sm:$0xf] (%p111_p3) }
  0x14   : > { %231 = vst [vmem:[%s211_s10] sm:$0xf] (%p111_p3), %v230_v0  ;;  %233 = vst [vmem:[%s211_s10 + $0x4] sm:$0xf] (%p111_p3), %v232_v1  ;;  %v236_v3 = vld [vmem:[%s931_s9 + $0x24] sm:$0xf] (%p111_p3) }
  0x15   : > { %v238_v4 = vld [vmem:[%s931_s9 + $0x30] sm:$0xf]  ;;  %235 = vst [vmem:[%s211_s10 + $0x8] sm:$0xf] %v234_v2  ;;  %237 = vst [vmem:[%s211_s10 + $0xc] sm:$0xf] %v236_v3 }
  0x16   : > { %239 = vst [vmem:[%s211_s10 + $0x10] sm:$0xf] %v238_v4  ;;  %v240_v5 = vld [vmem:[%s931_s9 + $0x3c] sm:$0xf]  ;;  %v242_v6 = vld [vmem:[%s931_s9 + $0x48] sm:$0xf] }
  0x17   : > { %v244_v7 = vld [vmem:[%s931_s9 + $0x54] sm:$0xf]  ;;  %241 = vst [vmem:[%s211_s10 + $0x14] sm:$0xf] %v240_v5  ;;  %243 = vst [vmem:[%s211_s10 + $0x18] sm:$0xf] %v242_v6 }
  0x18   : > { %245 = vst [vmem:[%s211_s10 + $0x1c] sm:$0xf] %v244_v7  ;;  %v246_v8 = vld [vmem:[%s931_s9 + $0x60] sm:$0xf]  ;;  %v248_v9 = vld [vmem:[%s931_s9 + $0x6c] sm:$0xf] }
  0x19   : > { %v250_v10 = vld [vmem:[%s931_s9 + $0x78] sm:$0xf]  ;;  %247 = vst [vmem:[%s211_s10 + $0x20] sm:$0xf] %v246_v8  ;;  %249 = vst [vmem:[%s211_s10 + $0x24] sm:$0xf] %v248_v9 }
  0x1a   : > { %251 = vst [vmem:[%s211_s10 + $0x28] sm:$0xf] %v250_v10  ;;  %v252_v11 = vld [vmem:[%s931_s9 + $0x84] sm:$0xf]  ;;  %v254_v12 = vld [vmem:[%s931_s9 + $0x90] sm:$0xf] }
  0x1b   : > { %v256_v13 = vld [vmem:[%s931_s9 + $0x9c] sm:$0xf]  ;;  %253 = vst [vmem:[%s211_s10 + $0x2c] sm:$0xf] %v252_v11  ;;  %255 = vst [vmem:[%s211_s10 + $0x30] sm:$0xf] %v254_v12 }
  0x1c   : > { %257 = vst [vmem:[%s211_s10 + $0x34] sm:$0xf] %v256_v13  ;;  %v258_v14 = vld [vmem:[%s931_s9 + $0xa8] sm:$0xf]  ;;  %v260_v15 = vld [vmem:[%s931_s9 + $0xb4] sm:$0xf] }
  0x1d   : > { %259 = vst [vmem:[%s211_s10 + $0x38] sm:$0xf] %v258_v14  ;;  %261 = vst [vmem:[%s211_s10 + $0x3c] sm:$0xf] %v260_v15 }
  0x1e PF: > { %p697_p8 = scmp.ge.s32.totalorder %s849_s22, 1  ;;  %p322_p9 = scmp.lt.s32.totalorder %s849_s22, 4 }
  0x20   : > { %p323_p10 = pnand %p697_p8, %p322_p9 }
  0x21   : > { %s329_s13 = sand.u32 (!%p323_p10), 1, %s833_s18   ;;  %p369_p11 = scmp.lt.s32.totalorder (!%p323_p10), %s841_s20, 2 }
  0x22   : > { %326 = sbr.rel (%p323_p10) target bundleno = 564 (0x234), region = 77  ;;  %s698_s14 = sshll.u32 (!%p323_p10), %s329_s13, 6 }
  0x23   : > { %s331_s15 = scalar_lea.vmem (!%p323_p10), [#allocation2], %s698_s14  ;;  %s699_s7 = sshll.u32 (!%p323_p10), %s329_s13, 3 }
  0x24   : > { %s362_s8 = scalar_lea.vmem (!%p323_p10), [#allocation3], %s699_s7 }
  0x27   : > { %v720_v16 = vld [vmem:[%s991_s0] sm:$0xff]   ;;  %v851_v19 = vmov 0.0   ;;  %v799_v28 = vld [vmem:[%s331_s15 + $0x38] sm:$0xff]   ;;  %v800_v29 = vld [vmem:[%s331_s15 + $0x30] sm:$0xff]   ;;  %vm852_vm0 = vmmov 0   ;;  %s370_s26 = scalar_select %p369_p11, %s841_s20, 2 }
  0x28   : > { %v721_v17 = vunpack.c.l.bf16 %v720_v16  ;;  %v722_v18 = vunpack.c.h.bf16 %v720_v16  ;;  %737 = vmatprep.subr.bf16.mxu0 %v851_v19  ;;  %v801_v30 = vld [vmem:[%s331_s15 + $0x28] sm:$0xff]   ;;  %v802_v31 = vld [vmem:[%s331_s15 + $0x20] sm:$0xff]   ;;  %753 = vmatprep.mubr.msk.bf16.mxu0 %vm852_vm0, %v851_v19  ;;  %v803_v32 = vld [vmem:[%s331_s15 + $0x18] sm:$0xff]   ;;  %s714_s9 = sshll.u32 (%p918_p6), %s841_s20, 2 }
  0x29   : > { %738 = vmatpush3.bf16.msra.mxu0 %v799_v28  ;;  %v804_v33 = vld [vmem:[%s331_s15 + $0x10] sm:$0xff]   ;;  %v805_v34 = vld [vmem:[%s331_s15 + $0x8] sm:$0xff]   ;;  %v806_v35 = vld [vmem:[%s331_s15] sm:$0xff]   ;;  %s371_s6 = scalar_lea.vmem %s995_s4, %s370_s26  ;;  %s553_s12 = scalar_lea.vmem (%p918_p6), %s996_s5, %s714_s9 }
  0x2a   : > { %378 = vadd.xlane.f32.xlu0 %v721_v17  ;;  %739 = vmatprep.subr.bf16.mxu0 %v851_v19  ;;  %v700_v44 = vld [vmem:[%s992_s1] ss:$0 sm:$0xff] }
  0x2b   : > { %v701_v48 = vld [vmem:[%s993_s2] ss:$0 sm:$0xff] }
  0x2c   : > { %v702_v54 = vld [vmem:[%s371_s6] ss:$0 sm:$0xff] }
  0x2d   : > { %740 = vmatpush3.bf16.msra.mxu0 %v800_v29 }
  0x2e   : > { %380 = vadd.xlane.f32.xlu0 %v722_v18  ;;  %741 = vmatprep.subr.bf16.mxu0 %v851_v19 }
  0x31   : > { %742 = vmatpush3.bf16.msra.mxu0 %v801_v30 }
  0x32   : > { %743 = vmatprep.subr.bf16.mxu0 %v851_v19 }
  0x35   : > { %744 = vmatpush3.bf16.msra.mxu0 %v802_v31 }
  0x36   : > { %745 = vmatprep.subr.bf16.mxu0 %v851_v19 }
  0x39   : > { %746 = vmatpush3.bf16.msra.mxu0 %v803_v32 }
  0x3a   : > { %747 = vmatprep.subr.bf16.mxu0 %v851_v19 }
  0x3d   : > { %748 = vmatpush3.bf16.msra.mxu0 %v804_v33 }
  0x3e   : > { %749 = vmatprep.subr.bf16.mxu0 %v851_v19 }
  0x41   : > { %750 = vmatpush3.bf16.msra.mxu0 %v805_v34 }
  0x42   : > { %751 = vmatprep.subr.bf16.mxu0 %v851_v19 }
  0x45   : > { %752 = vmatpush3.bf16.msra.mxu0 %v806_v35 }
  0xb3   : > { %v379_v20 = vpop.xlane.xlu0 %378 }
  0xb4   : > { %v383_v21 = vmul.f32 0.0078125, %v379_v20 }
  0xb6   : > { %v385_v22 = vsub.f32 %v721_v17, %v383_v21 }
  0xb7   : > { %v381_v23 = vpop.xlane.xlu0 %380 }
  0xb8   : > { %v384_v24 = vmul.f32 0.0078125, %v381_v23  ;;  %v387_v25 = vmul.f32 %v385_v22, %v385_v22 }
  0xba   : > { %v386_v26 = vsub.f32 %v722_v18, %v384_v24  ;;  %389 = vadd.xlane.f32.xlu1 %v387_v25 }
  0xbc   : > { %v388_v27 = vmul.f32 %v386_v26, %v386_v26 }
  0xbe   : > { %391 = vadd.xlane.f32.xlu1 %v388_v27 }
 0x143   : > { %v390_v36 = vpop.xlane.xlu1 %389 }
 0x144   : > { %v393_v37 = vmul.f32 0.0078125, %v390_v36 }
 0x146   : > { %v395_v38 = vadd.f32 1e-05, %v393_v37 }
 0x147   : > { %v392_v39 = vpop.xlane.xlu1 %391 }
 0x148   : > { %807 = vrsqrt.f32 %v395_v38  ;;  %v394_v40 = vmul.f32 0.0078125, %v392_v39 }
 0x14a   : > { %v396_v41 = vadd.f32 1e-05, %v394_v40 }
 0x14c   : > { %809 = vrsqrt.f32 %v396_v41 }
 0x155   : > { %v808_v42 = vpop.eup %807 }
 0x156   : > { %v399_v43 = vmul.f32 %v808_v42, %v385_v22 }
 0x158   : > { %v408_v47 = vmul.f32 %v700_v44, %v399_v43 }
 0x159   : > { %v810_v45 = vpop.eup %809 }
 0x15a   : > { %v400_v46 = vmul.f32 %v810_v45, %v386_v26  ;;  %v417_v50 = vadd.f32 %v701_v48, %v408_v47 }
 0x15c   : > { %v409_v49 = vmul.f32 %v700_v44, %v400_v46 }
 0x15e   : > { %v418_v51 = vadd.f32 %v701_v48, %v409_v49 }
 0x160   : > { %v419_v52 = vpack.c.bf16 %v418_v51, %v417_v50 }
 0x162   : > { %754 = vmatmul.mubr.bf16.vlgmr.msra.gmra.mxu0 %v419_v52 }
 0x222   : > { %v525_v53 = vpop.f32.mrf.mxu0 }
 0x223   : > { %v526_v57 = vadd.f32 %v702_v54, %v525_v53 }
 0x224   : > { %v755_v55 = vpop.f32.mrf.mxu0 }
 0x226   : > { %v528_v56 = vpop.f32.mrf.mxu0 }
 0x227   : > { %v529_v58 = vadd.f32 %v702_v54, %v528_v56  ;;  %548 = sbr.rel (!%p918_p6) target bundleno = 564 (0x234), region = 85 }
 0x228   : > { %v756_v59 = vpop.f32.mrf.mxu0 }
 0x229   : > { %v726_v60 = vpack.c.bf16 %v529_v58, %v526_v57 }
 0x22b   : > { %727 = vst [vmem:[%s362_s8] sm:$0xff] %v726_v60  }
 0x232   : > { %v570_v61 = vld [vmem:[%s362_s8] sm:$0xf]  ;;  %v572_v62 = vld [vmem:[%s362_s8 + $0x4] sm:$0xf] }
 0x233   : > { %571 = vst [vmem:[%s553_s12] sm:$0xf] %v570_v61  ;;  %573 = vst [vmem:[%s553_s12 + $0xc] sm:$0xf] %v572_v62 }
 0x234 PF: > { %s15_s22 = sadd.s32 1, %s849_s22   ;;  %s998_s18 = smov %s837_s19 }
 0x235   : > { %p12_p12 = scmp.ge.s32.totalorder %s15_s22, 5   ;;  %s999_s19 = smov %s923_s28 }
 0x236   : > { %s1000_s20 = smov %s845_s21  ;;  %s1001_s21 = smov %s1003_s23 }
 0x237   :  { %14 = sbr.rel (!%p12_p12) target bundleno = 3 (0x3), region = 163 }

// kernel: transformer_forward.46
= control target key start
LH: loop header
LB: loop body
LE: loop exit
PB: predicated region body
PF: predicated region fallthrough
CT: control target
= control target key end

     0   :  { %v260_v3 = vmov 0.0   ;;  %vm261_vm0 = vmmov 0   ;;  %s331_s0 = inlined_call_operand.vmem [shape: bf16[16,128], index: 0, kind: input, shape index: {}]   ;;  %s332_s3 = inlined_call_operand.vmem [shape: bf16[128,128], index: 3, kind: input, shape index: {}]   ;;  %s333_s1 = inlined_call_operand.vmem [shape: f32[1,128], index: 1, kind: input, shape index: {}]   ;;  %s334_s2 = inlined_call_operand.vmem [shape: f32[1,128], index: 2, kind: input, shape index: {}]   ;;  %s335_s4 = inlined_call_operand.vmem [shape: f32[1,128], index: 4, kind: input, shape index: {}]   ;;  %s336_s5 = inlined_call_operand.vmem [shape: bf16[16,128], index: 5, kind: output, shape index: {}]  }
   0x1   :  { %v209_v0 = vld [vmem:[%s331_s0] sm:$0xff]   ;;  %226 = vmatprep.subr.bf16.mxu0 %v260_v3  ;;  %v248_v4 = vld [vmem:[%s332_s3 + $0x38] sm:$0xff]   ;;  %v249_v13 = vld [vmem:[%s332_s3 + $0x30] sm:$0xff]   ;;  %242 = vmatprep.mubr.msk.bf16.mxu0 %vm261_vm0, %v260_v3 }
   0x2   :  { %v210_v1 = vunpack.c.l.bf16 %v209_v0  ;;  %v211_v2 = vunpack.c.h.bf16 %v209_v0  ;;  %227 = vmatpush3.bf16.msra.mxu0 %v248_v4  ;;  %v250_v14 = vld [vmem:[%s332_s3 + $0x28] sm:$0xff]   ;;  %v251_v15 = vld [vmem:[%s332_s3 + $0x20] sm:$0xff]   ;;  %v252_v16 = vld [vmem:[%s332_s3 + $0x18] sm:$0xff]  }
   0x3   :  { %228 = vmatprep.subr.bf16.mxu0 %v260_v3  ;;  %v253_v17 = vld [vmem:[%s332_s3 + $0x10] sm:$0xff]   ;;  %v254_v18 = vld [vmem:[%s332_s3 + $0x8] sm:$0xff]   ;;  %v255_v19 = vld [vmem:[%s332_s3] sm:$0xff]  }
   0x4   :  { %25 = vadd.xlane.f32.xlu0 %v210_v1  ;;  %v193_v28 = vld [vmem:[%s333_s1] ss:$0 sm:$0xff] }
   0x5   :  { %v194_v32 = vld [vmem:[%s334_s2] ss:$0 sm:$0xff] }
   0x6   :  { %229 = vmatpush3.bf16.msra.mxu0 %v249_v13  ;;  %v195_v38 = vld [vmem:[%s335_s4] ss:$0 sm:$0xff] }
   0x7   :  { %230 = vmatprep.subr.bf16.mxu0 %v260_v3 }
   0x8   :  { %27 = vadd.xlane.f32.xlu0 %v211_v2 }
   0xa   :  { %231 = vmatpush3.bf16.msra.mxu0 %v250_v14 }
   0xb   :  { %232 = vmatprep.subr.bf16.mxu0 %v260_v3 }
   0xe   :  { %233 = vmatpush3.bf16.msra.mxu0 %v251_v15 }
   0xf   :  { %234 = vmatprep.subr.bf16.mxu0 %v260_v3 }
  0x12   :  { %235 = vmatpush3.bf16.msra.mxu0 %v252_v16 }
  0x13   :  { %236 = vmatprep.subr.bf16.mxu0 %v260_v3 }
  0x16   :  { %237 = vmatpush3.bf16.msra.mxu0 %v253_v17 }
  0x17   :  { %238 = vmatprep.subr.bf16.mxu0 %v260_v3 }
  0x1a   :  { %239 = vmatpush3.bf16.msra.mxu0 %v254_v18 }
  0x1b   :  { %240 = vmatprep.subr.bf16.mxu0 %v260_v3 }
  0x1e   :  { %241 = vmatpush3.bf16.msra.mxu0 %v255_v19 }
  0x8d   :  { %v26_v5 = vpop.xlane.xlu0 %25 }
  0x8e   :  { %v30_v6 = vmul.f32 0.0078125, %v26_v5 }
  0x90   :  { %v32_v7 = vsub.f32 %v210_v1, %v30_v6 }
  0x91   :  { %v28_v8 = vpop.xlane.xlu0 %27 }
  0x92   :  { %v31_v9 = vmul.f32 0.0078125, %v28_v8  ;;  %v34_v10 = vmul.f32 %v32_v7, %v32_v7 }
  0x94   :  { %v33_v11 = vsub.f32 %v211_v2, %v31_v9  ;;  %36 = vadd.xlane.f32.xlu1 %v34_v10 }
  0x96   :  { %v35_v12 = vmul.f32 %v33_v11, %v33_v11 }
  0x98   :  { %38 = vadd.xlane.f32.xlu1 %v35_v12 }
 0x11d   :  { %v37_v20 = vpop.xlane.xlu1 %36 }
 0x11e   :  { %v40_v21 = vmul.f32 0.0078125, %v37_v20 }
 0x120   :  { %v42_v22 = vadd.f32 1e-05, %v40_v21 }
 0x121   :  { %v39_v23 = vpop.xlane.xlu1 %38 }
 0x122   :  { %256 = vrsqrt.f32 %v42_v22  ;;  %v41_v24 = vmul.f32 0.0078125, %v39_v23 }
 0x124   :  { %v43_v25 = vadd.f32 1e-05, %v41_v24 }
 0x126   :  { %258 = vrsqrt.f32 %v43_v25 }
 0x12f   :  { %v257_v26 = vpop.eup %256 }
 0x130   :  { %v46_v27 = vmul.f32 %v257_v26, %v32_v7 }
 0x132   :  { %v55_v31 = vmul.f32 %v193_v28, %v46_v27 }
 0x133   :  { %v259_v29 = vpop.eup %258 }
 0x134   :  { %v47_v30 = vmul.f32 %v259_v29, %v33_v11  ;;  %v64_v34 = vadd.f32 %v194_v32, %v55_v31 }
 0x136   :  { %v56_v33 = vmul.f32 %v193_v28, %v47_v30 }
 0x138   :  { %v65_v35 = vadd.f32 %v194_v32, %v56_v33 }
 0x13a   :  { %v66_v36 = vpack.c.bf16 %v65_v35, %v64_v34 }
 0x13c   :  { %243 = vmatmul.mubr.bf16.vlgmr.msra.gmra.mxu0 %v66_v36 }
 0x1fc   :  { %v172_v37 = vpop.f32.mrf.mxu0 }
 0x1fd   :  { %v173_v41 = vadd.f32 %v195_v38, %v172_v37 }
 0x1fe   :  { %v244_v39 = vpop.f32.mrf.mxu0 }
 0x200   :  { %v175_v40 = vpop.f32.mrf.mxu0 }
 0x201   :  { %v176_v42 = vadd.f32 %v195_v38, %v175_v40 }
 0x202   :  { %v245_v43 = vpop.f32.mrf.mxu0 }
 0x203   :  { %v215_v44 = vpack.c.bf16 %v176_v42, %v173_v41 }
 0x205   :  { %216 = vst [vmem:[%s336_s5] sm:$0xff] %v215_v44  }

// kernel: transformer_forward.44
= control target key start
LH: loop header
LB: loop body
LE: loop exit
PB: predicated region body
PF: predicated region fallthrough
CT: control target
= control target key end

     0   :  { %s1201_s12 = smov 0   ;;  %s1203_s13 = smov 0   ;;  %s1385_s0 = inlined_call_operand.vmem [shape: bf16[2,8,384], index: 0, kind: input, shape index: {}, may-alias: {0,1,2}]   ;;  %s1386_s1 = inlined_call_operand.vmem [shape: bf16[2,8,384], index: 1, kind: input, shape index: {}, may-alias: {0,1,2}]   ;;  %s1387_s2 = inlined_call_operand.vmem [shape: bf16[2,8,384], index: 2, kind: input, shape index: {}, may-alias: {0,1,2}]   ;;  %s1388_s3 = inlined_call_operand.vmem [shape: bf16[2,8,128], index: 3, kind: output, shape index: {}]  }
   0x1   :  { %s1205_s14 = smov 0  }
   0x2 LB: > { %s25_s15 = sadd.s32 1, %s1168_s13  ;;  %p1006_p0 = scmp.ge.s32.totalorder %s1172_s14, 1  ;;  %s1172_s14 = sphi %s1205_s14, %s13_s14   ;;  %s1168_s13 = sphi %s1203_s13, %s1390_s13   ;;  %s1164_s12 = sphi %s1201_s12, %s1389_s12  }
   0x3   : > { %p27_p1 = scmp.ge.s32.totalorder %s25_s15, 2  ;;  %p183_p2 = scmp.lt.s32.totalorder %s1172_s14, 3 }
   0x5   : > { %s1392_s15 = smov (%p27_p1, %s25_s15), 0  ;;  %p184_p3 = pnand %p1006_p0, %p183_p2 }
   0x6   : > { %p226_p4 = scmp.lt.s32.totalorder (!%p184_p3), %s1164_s12, 1  ;;  %s1178_s23 = smov (!%p184_p3), 96  }
   0x7   : > { %187 = sbr.rel (%p184_p3) target bundleno = 1413 (0x585), region = 32  ;;  %s1179_s24 = smov (!%p184_p3), 64  }
   0x8   : > { %s1180_s25 = smov (!%p184_p3), 32  }
   0xc   : > { %vm270_vm0 = vcmask 261120   ;;  %v1174_v0 = vmov 0.0   ;;  %vm1175_vm1 = vmmov 0   ;;  %s1394_s12 = smov (!%p226_p4, %s1164_s12), 1  ;;  %vm261_vm2 = vcmask 7168  }
   0xd   : > { %1042 = vmatprep.subr.bf16.mxu0 %v1174_v0  ;;  %271 = vst.msk [vmem:[#allocation4] sm:$0xff] %vm270_vm0, %v1174_v0  ;;  %272 = vst.msk [vmem:[#allocation4 + $0x8] sm:$0xff] %vm270_vm0, %v1174_v0  ;;  %1044 = vmatprep.mubr.msk.bf16.mxu0 %vm1175_vm1, %v1174_v0  ;;  %s1236_s16 = smul.u32 12, %s1394_s12  ;;  %v1176_v5 = vmov -inf   ;;  %v279_v6 = vlaneseq  ;;  %vm336_vm4 = vcmask 64512   ;;  %v1177_v15 = vmov 0  }
   0xe   : > { %273 = vst.msk [vmem:[#allocation4 + $0x10] sm:$0xff] %vm270_vm0, %v1174_v0  ;;  %274 = vst.msk [vmem:[#allocation4 + $0x18] sm:$0xff] %vm270_vm0, %v1174_v0  ;;  %1048 = vmatprep.subr.bf16.mxu1 %v1174_v0  ;;  %1050 = vmatprep.mubr.msk.bf16.mxu1 %vm1175_vm1, %v1174_v0  ;;  %vm371_vm5 = vcmask 1043456   ;;  %vm887_vm6 = vcmask 523264   ;;  %s1010_s29 = sshll.u32 %s1394_s12, 2  ;;  %vm889_vm7 = vcmask 785408  }
   0xf   : > { %s948_s19 = scalar_lea.vmem %s1386_s1, %s1236_s16  ;;  %s230_s22 = scalar_lea.vmem %s1385_s0, %s1236_s16  ;;  %262 = vst.msk [vmem:[#allocation2] sm:$0xff] %vm261_vm2, %v1176_v5  ;;  %263 = vst.msk [vmem:[#allocation2 + $0x8] sm:$0xff] %vm261_vm2, %v1176_v5  ;;  %v1263_v7 = vshrl.u32 %v279_v6, 7  ;;  %v1265_v8 = vand.u32 127, %v279_v6  ;;  %1122 = vset.pattern.permute.xlu0 %v1177_v15  ;;  %1123 = vset.pattern.permute.xlu1 %v1177_v15 }
  0x10   : > { %v1011_v1 = vld [vmem:[%s948_s19 + $0x4] sm:$0xf]  ;;  %v275_v3 = vld [vmem:[%s230_s22] sm:$0xf]  ;;  %264 = vst.msk [vmem:[#allocation2 + $0x10] sm:$0xff] %vm261_vm2, %v1176_v5  ;;  %265 = vst.msk [vmem:[#allocation2 + $0x18] sm:$0xff] %vm261_vm2, %v1176_v5  ;;  %s954_s28 = scalar_lea.vmem %s1387_s2, %s1236_s16  ;;  %s254_s5 = scalar_lea.vmem %s1388_s3, %s1010_s29 }
  0x11   : > { %v292_v2 = vsel %vm270_vm0, %v1011_v1, 0  ;;  %v276_v4 = vmul.bf16 1043676725, %v275_v3  ;;  %266 = vst.msk [vmem:[#allocation3] sm:$0xff] %vm261_vm2, %v1174_v0  ;;  %267 = vst.msk [vmem:[#allocation3 + $0x8] sm:$0xff] %vm261_vm2, %v1174_v0  ;;  %vm286_vm3 = vcmp.le.s32.totalorder %v1265_v8, %v1263_v7  ;;  %v1016_v16 = vcombine.low %v1011_v1, %v1011_v1 }
  0x12   : > { %1043 = vmatpush3.bf16.xpose.msra.mxu0 %v292_v2  ;;  %268 = vst.msk [vmem:[#allocation3 + $0x10] sm:$0xff] %vm261_vm2, %v1174_v0  ;;  %269 = vst.msk [vmem:[#allocation3 + $0x18] sm:$0xff] %vm261_vm2, %v1174_v0  ;;  %v1293_v22 = vld [vmem:[%s954_s28 + $0x8] sm:$0xf] }
  0x13   : > { %1060 = vmatprep.subr.bf16.mxu0 %v1174_v0  ;;  %426 = vrot.lane.b32.xlu1 %v1016_v16, %s1178_s23  ;;  %v1015_v17 = vcombine.low %v276_v4, %v276_v4  ;;  %v373_v23 = vsel %vm371_vm5, %v1293_v22, 0  ;;  %v1018_v8 = vcombine.low %v1293_v22, %v1293_v22 }
  0x14   : > { %1049 = vmatpush3.bf16.msra.mxu1 %v373_v23 }
  0x15   : > { %1054 = vmatprep.subr.bf16.mxu1 %v1174_v0 }
  0x16   : > { %v1279_v18 = vld [vmem:[#allocation2] sm:$0xff]  ;;  %v476_v60 = vld [vmem:[#allocation2 + $0x8] sm:$0xff] }
  0x17   : > { %421 = vrot.lane.b32.xlu1 %v1015_v17, %s1178_s23  ;;  %v615_v1 = vld [vmem:[#allocation2 + $0x10] sm:$0xff]  ;;  %v751_v5 = vld [vmem:[#allocation2 + $0x18] sm:$0xff] }
  0x19   : > { %1045 = vmatmul.mubr.msk.bf16.vlgmr.msra.gmra.mxu0 %vm270_vm0, %v276_v4 }
  0x1a   : > { %1062 = vmatprep.mubr.msk.bf16.mxu0 %vm1175_vm1, %v1174_v0 }
  0x1b   : > { %565 = vrot.lane.b32.xlu1 %v1016_v16, %s1179_s24 }
  0x1f   : > { %563 = vrot.lane.b32.xlu1 %v1015_v17, %s1179_s24 }
  0x23   : > { %701 = vrot.lane.b32.xlu1 %v1016_v16, %s1180_s25 }
  0x27   : > { %699 = vrot.lane.b32.xlu1 %v1015_v17, %s1180_s25 }
  0x85   : > { %v427_v27 = vpop.permute.xlu1 %426 }
  0x86   : > { %v432_v30 = vsel %vm270_vm0, %v427_v27, 0 }
  0x89   : > { %v422_v28 = vpop.permute.xlu1 %421 }
  0x8d   : > { %v566_v32 = vpop.permute.xlu1 %565 }
  0x8e   : > { %v571_v34 = vsel %vm270_vm0, %v566_v32, 0 }
  0x91   : > { %v564_v33 = vpop.permute.xlu1 %563 }
  0x95   : > { %v702_v35 = vpop.permute.xlu1 %701 }
  0x96   : > { %v707_v36 = vsel %vm270_vm0, %v702_v35, 0 }
  0x99   : > { %v700_v37 = vpop.permute.xlu1 %699 }
  0xd9   : > { %v328_v9 = vpop.f32.mrf.mxu0 }
  0xda   : > { %v334_v10 = vsel %vm286_vm3, %v328_v9, -1e+30 }
  0xdb   : > { %v1046_v11 = vpop.f32.mrf.mxu0  ;;  %v337_v12 = vsel %vm336_vm4, %v334_v10, -inf }
  0xdc   : > { %338 = vmax.xlane.f32.xlu0 %v337_v12 }
  0xdd   : > { %v331_v13 = vpop.f32.mrf.mxu0 }
  0xdf   : > { %v1047_v14 = vpop.f32.mrf.mxu0 }
 0x165   : > { %v339_v19 = vpop.xlane.xlu0 %338 }
 0x166   : > { %v1282_v20 = vmax.f32 %v1279_v18, %v339_v19 }
 0x168   : > { %v341_v21 = vsub.f32 %v1279_v18, %v1282_v20  ;;  %417 = vst.msk [vmem:[#allocation2] sm:$0xff] %vm261_vm2, %v1282_v20  ;;  %346 = vperm.xlu0 %1122, %v1282_v20  }
 0x16a   : > { %v342_v35 = vmul.f32 1.442695, %v341_v21 }
 0x1e3   : > { %v347_v24 = vpop.permute.xlu0 %346 }
 0x1e4   : > { %v349_v25 = vsub.f32 %v334_v10, %v347_v24 }
 0x1e6   : > { %v350_v26 = vmul.f32 1.442695, %v349_v25 }
 0x1e8   : > { %1126 = vpow2.f32 %v350_v26 }
 0x1f5   : > { %v1298_v29 = vpop.eup %1126 }
 0x1f6   : > { %v367_v31 = vpack.c.bf16 %v1298_v29, %v1298_v29  ;;  %v354_v10 = vsel %vm336_vm4, %v1298_v29, 0.0 }
 0x1f8   : > { %1051 = vmatmul.mubr.msk.bf16.vlgmr.msra.gmra.mxu1 %vm336_vm4, %v367_v31 }
 0x1f9   : > { %1055 = vmatpush3.bf16.xpose.msra.mxu1 %v432_v30  ;;  %1056 = vmatprep.mubr.msk.bf16.mxu1 %vm1175_vm1, %v1174_v0 }
 0x1fa   : > { %1066 = vmatprep.subr.bf16.mxu1 %v1174_v0 }
 0x200   : > { %1057 = vmatmul.mubr.msk.bf16.vlgmr.msra.gmra.mxu1 %vm270_vm0, %v422_v28 }
 0x201   : > { %1067 = vmatpush3.bf16.xpose.msra.mxu1 %v571_v34  ;;  %1068 = vmatprep.mubr.msk.bf16.mxu1 %vm1175_vm1, %v1174_v0 }
 0x202   : > { %1078 = vmatprep.subr.bf16.mxu1 %v1174_v0 }
 0x208   : > { %1069 = vmatmul.mubr.msk.bf16.vlgmr.msra.gmra.mxu1 %vm270_vm0, %v564_v33 }
 0x209   : > { %1079 = vmatpush3.bf16.xpose.msra.mxu1 %v707_v36  ;;  %1080 = vmatprep.mubr.msk.bf16.mxu1 %vm1175_vm1, %v1174_v0 }
 0x210   : > { %1081 = vmatmul.mubr.msk.bf16.vlgmr.msra.gmra.mxu1 %vm270_vm0, %v700_v37 }
 0x2b8   : > { %v1317_v38 = vpop.f32.mrf.mxu1 }
 0x2ba   : > { %v1052_v39 = vpop.f32.mrf.mxu1 }
 0x2bc   : > { %v412_v40 = vpop.f32.mrf.mxu1 }
 0x2be   : > { %v1053_v41 = vpop.f32.mrf.mxu1 }
 0x2c0   : > { %v468_v42 = vpop.f32.mrf.mxu1 }
 0x2c1   : > { %v474_v43 = vsel %vm286_vm3, %v468_v42, -1e+30 }
 0x2c2   : > { %v1058_v44 = vpop.f32.mrf.mxu1  ;;  %v477_v45 = vsel %vm336_vm4, %v474_v43, -inf }
 0x2c3   : > { %478 = vmax.xlane.f32.xlu1 %v477_v45 }
 0x2c4   : > { %v471_v46 = vpop.f32.mrf.mxu1 }
 0x2c6   : > { %v1059_v47 = vpop.f32.mrf.mxu1 }
 0x2c8   : > { %v607_v48 = vpop.f32.mrf.mxu1 }
 0x2c9   : > { %v613_v49 = vsel %vm286_vm3, %v607_v48, -1e+30 }
 0x2ca   : > { %v1070_v50 = vpop.f32.mrf.mxu1  ;;  %v616_v51 = vsel %vm336_vm4, %v613_v49, -inf }
 0x2cb   : > { %617 = vmax.xlane.f32.xlu0 %v616_v51 }
 0x2cc   : > { %v610_v52 = vpop.f32.mrf.mxu1 }
 0x2ce   : > { %v1071_v53 = vpop.f32.mrf.mxu1 }
 0x2cf   : > { %v632_v53 = vld [vmem:[#allocation3 + $0x10] sm:$0xff] }
 0x2d0   : > { %v743_v54 = vpop.f32.mrf.mxu1 }
 0x2d1   : > { %v749_v55 = vsel %vm286_vm3, %v743_v54, -1e+30 }
 0x2d2   : > { %v1082_v56 = vpop.f32.mrf.mxu1  ;;  %v752_v57 = vsel %vm336_vm4, %v749_v55, -inf }
 0x2d3   : > { %753 = vmax.xlane.f32.xlu1 %v752_v57 }
 0x2d4   : > { %v746_v58 = vpop.f32.mrf.mxu1 }
 0x2d5   : > { %v768_v58 = vld [vmem:[#allocation3 + $0x18] sm:$0xff] }
 0x2d6   : > { %v1083_v59 = vpop.f32.mrf.mxu1 }
 0x2d7   : > { %v360_v59 = vld [vmem:[#allocation4] sm:$0xff] }
 0x34c   : > { %v479_v61 = vpop.xlane.xlu1 %478 }
 0x34d   : > { %v480_v62 = vmax.f32 %v476_v60, %v479_v61 }
 0x34f   : > { %v481_v63 = vsub.f32 %v476_v60, %v480_v62  ;;  %562 = vst.msk [vmem:[#allocation2 + $0x8] sm:$0xff] %vm261_vm2, %v480_v62  ;;  %486 = vperm.xlu1 %1123, %v480_v62  }
 0x351   : > { %v482_v37 = vmul.f32 1.442695, %v481_v63 }
 0x354   : > { %v618_v2 = vpop.xlane.xlu0 %617 }
 0x355   : > { %v619_v3 = vmax.f32 %v615_v1, %v618_v2 }
 0x357   : > { %v620_v4 = vsub.f32 %v615_v1, %v619_v3  ;;  %698 = vst.msk [vmem:[#allocation2 + $0x10] sm:$0xff] %vm261_vm2, %v619_v3  ;;  %625 = vperm.xlu0 %1122, %v619_v3  }
 0x359   : > { %v621_v41 = vmul.f32 1.442695, %v620_v4 }
 0x35c   : > { %v754_v6 = vpop.xlane.xlu1 %753 }
 0x35d   : > { %v755_v7 = vmax.f32 %v751_v5, %v754_v6 }
 0x35f   : > { %v756_v9 = vsub.f32 %v751_v5, %v755_v7  ;;  %834 = vst.msk [vmem:[#allocation2 + $0x18] sm:$0xff] %vm261_vm2, %v755_v7  ;;  %761 = vperm.xlu1 %1123, %v755_v7  }
 0x361   : > { %v757_v40 = vmul.f32 1.442695, %v756_v9 }
 0x363   : > { %512 = vrot.lane.b32.xlu1 %v1018_v8, %s1178_s23 }
 0x367   : > { %648 = vrot.lane.b32.xlu1 %v1018_v8, %s1179_s24 }
 0x36b   : > { %784 = vrot.lane.b32.xlu1 %v1018_v8, %s1180_s25  ;;  %v501_v8 = vld [vmem:[#allocation4 + $0x8] sm:$0xff] }
 0x38f   : > { %355 = vadd.xlane.f32.xlu1 %v354_v10 }
 0x3ca   : > { %v487_v11 = vpop.permute.xlu1 %486 }
 0x3cb   : > { %v489_v12 = vsub.f32 %v474_v43, %v487_v11  ;;  %v352_v43 = vld [vmem:[#allocation3] sm:$0xff] }
 0x3cd   : > { %v490_v13 = vmul.f32 1.442695, %v489_v12 }
 0x3cf   : > { %1128 = vpow2.f32 %v490_v13 }
 0x3d2   : > { %v626_v14 = vpop.permute.xlu0 %625 }
 0x3d3   : > { %v628_v15 = vsub.f32 %v613_v49, %v626_v14  ;;  %v493_v49 = vld [vmem:[#allocation3 + $0x8] sm:$0xff] }
 0x3d5   : > { %v629_v16 = vmul.f32 1.442695, %v628_v15 }
 0x3d7   : > { %1130 = vpow2.f32 %v629_v16 }
 0x3da   : > { %v762_v17 = vpop.permute.xlu1 %761 }
 0x3db   : > { %v764_v19 = vsub.f32 %v749_v55, %v762_v17 }
 0x3dc   : > { %v1129_v22 = vpop.eup %1128 }
 0x3dd   : > { %v765_v23 = vmul.f32 1.442695, %v764_v19  ;;  %v495_v24 = vsel %vm336_vm4, %v1129_v22, 0.0  ;;  %v508_v27 = vpack.c.bf16 %v1129_v22, %v1129_v22 }
 0x3de   : > { %496 = vadd.xlane.f32.xlu0 %v495_v24  ;;  %v513_v25 = vpop.permute.xlu1 %512  ;;  %v776_v24 = vld [vmem:[#allocation4 + $0x18] sm:$0xff] }
 0x3df   : > { %1132 = vpow2.f32 %v765_v23  ;;  %v518_v26 = vsel %vm371_vm5, %v513_v25, 0 }
 0x3e0   : > { %1061 = vmatpush3.bf16.msra.mxu0 %v518_v26  ;;  %1134 = vpow2.f32 %v342_v35 }
 0x3e1   : > { %1072 = vmatprep.subr.bf16.mxu0 %v1174_v0  ;;  %1136 = vpow2.f32 %v482_v37 }
 0x3e2   : > { %v649_v28 = vpop.permute.xlu1 %648  ;;  %1138 = vpow2.f32 %v757_v40 }
 0x3e3   : > { %1063 = vmatmul.mubr.msk.bf16.vlgmr.msra.gmra.mxu0 %vm336_vm4, %v508_v27  ;;  %v654_v29 = vsel %vm371_vm5, %v649_v28, 0  ;;  %1140 = vpow2.f32 %v621_v41 }
 0x3e4   : > { %v1131_v30 = vpop.eup %1130  ;;  %1073 = vmatpush3.bf16.msra.mxu0 %v654_v29  ;;  %1074 = vmatprep.mubr.msk.bf16.mxu0 %vm1175_vm1, %v1174_v0 }
 0x3e5   : > { %v634_v31 = vsel %vm336_vm4, %v1131_v30, 0.0  ;;  %1084 = vmatprep.subr.bf16.mxu0 %v1174_v0  ;;  %v647_v33 = vpack.c.bf16 %v1131_v30, %v1131_v30 }
 0x3e6   : > { %635 = vadd.xlane.f32.xlu0 %v634_v31  ;;  %v785_v32 = vpop.permute.xlu1 %784 }
 0x3e7   : > { %v790_v34 = vsel %vm371_vm5, %v785_v32, 0 }
 0x3eb   : > { %1075 = vmatmul.mubr.msk.bf16.vlgmr.msra.gmra.mxu0 %vm336_vm4, %v647_v33 }
 0x3ec   : > { %v1133_v36 = vpop.eup %1132  ;;  %1085 = vmatpush3.bf16.msra.mxu0 %v790_v34  ;;  %1086 = vmatprep.mubr.msk.bf16.mxu0 %vm1175_vm1, %v1174_v0 }
 0x3ed   : > { %v770_v39 = vsel %vm336_vm4, %v1133_v36, 0.0  ;;  %v783_v42 = vpack.c.bf16 %v1133_v36, %v1133_v36  ;;  %v1135_v18 = vpop.eup %1134 }
 0x3ee   : > { %771 = vadd.xlane.f32.xlu1 %v770_v39  ;;  %v1137_v20 = vpop.eup %1136  ;;  %v353_v44 = vmul.f32 %v1135_v18, %v352_v43 }
 0x3ef   : > { %v1139_v21 = vpop.eup %1138  ;;  %v494_v50 = vmul.f32 %v1137_v20, %v493_v49 }
 0x3f0   : > { %v1141_v0 = vpop.eup %1140  ;;  %v769_v60 = vmul.f32 %v1139_v21, %v768_v58 }
 0x3f1   : > { %v633_v54 = vmul.f32 %v1141_v0, %v632_v53 }
 0x3f3   : > { %1087 = vmatmul.mubr.msk.bf16.vlgmr.msra.gmra.mxu0 %vm336_vm4, %v783_v42 }
 0x3fc   : > { %363 = vperm.xlu0 %1122, %v1135_v18  }
 0x3ff   : > { %504 = vperm.xlu1 %1123, %v1137_v20  }
 0x400   : > { %779 = vperm.xlu0 %1122, %v1139_v21  }
 0x403   : > { %643 = vperm.xlu1 %1123, %v1141_v0  }
 0x418   : > { %v356_v45 = vpop.xlane.xlu1 %355 }
 0x419   : > { %v357_v46 = vadd.f32 %v356_v45, %v353_v44 }
 0x41b   : > { %359 = vst.msk [vmem:[#allocation3] sm:$0xff] %vm261_vm2, %v357_v46 }
 0x422   : > { %v838_v47 = vld [vmem:[#allocation3] sm:$0xff] }
 0x423   : > { %1142 = vrcp.f32 %v838_v47 }
 0x430   : > { %v1143_v48 = vpop.eup %1142 }
 0x431   : > { %843 = vperm.xlu1 %1123, %v1143_v48  }
 0x467   : > { %v497_v51 = vpop.xlane.xlu0 %496 }
 0x468   : > { %v498_v52 = vadd.f32 %v497_v51, %v494_v50 }
 0x46a   : > { %499 = vst.msk [vmem:[#allocation3 + $0x8] sm:$0xff] %vm261_vm2, %v498_v52 }
 0x46f   : > { %v636_v55 = vpop.xlane.xlu0 %635 }
 0x470   : > { %v637_v56 = vadd.f32 %v636_v55, %v633_v54 }
 0x471   : > { %v847_v57 = vld [vmem:[#allocation3 + $0x8] sm:$0xff] }
 0x472   : > { %638 = vst.msk [vmem:[#allocation3 + $0x10] sm:$0xff] %vm261_vm2, %v637_v56  ;;  %1144 = vrcp.f32 %v847_v57 }
 0x477   : > { %v772_v61 = vpop.xlane.xlu1 %771  ;;  %v364_v62 = vpop.permute.xlu0 %363 }
 0x478   : > { %v773_v63 = vadd.f32 %v772_v61, %v769_v60  ;;  %v366_v1 = vmul.f32 %v364_v62, %v360_v59 }
 0x479   : > { %v856_v2 = vld [vmem:[#allocation3 + $0x10] sm:$0xff] }
 0x47a   : > { %774 = vst.msk [vmem:[#allocation3 + $0x18] sm:$0xff] %vm261_vm2, %v773_v63  ;;  %v415_v3 = vadd.f32 %v1317_v38, %v366_v1  ;;  %1146 = vrcp.f32 %v856_v2  ;;  %v640_v38 = vld [vmem:[#allocation4 + $0x10] sm:$0xff] }
 0x47b   : > { %v505_v9 = vpop.permute.xlu1 %504  ;;  %v780_v25 = vpop.permute.xlu0 %779 }
 0x47c   : > { %416 = vst.msk [vmem:[#allocation4] sm:$0xff] %vm270_vm0, %v415_v3  ;;  %v507_v10 = vmul.f32 %v505_v9, %v501_v8  ;;  %v782_v28 = vmul.f32 %v780_v25, %v776_v24 }
 0x47f   : > { %v1145_v4 = vpop.eup %1144  ;;  %v644_v14 = vpop.permute.xlu1 %643 }
 0x480   : > { %852 = vperm.xlu0 %1122, %v1145_v4   ;;  %v646_v17 = vmul.f32 %v644_v14, %v640_v38 }
 0x481   : > { %v865_v5 = vld [vmem:[#allocation3 + $0x18] sm:$0xff] }
 0x482   : > { %1148 = vrcp.f32 %v865_v5 }
 0x483   : > { %v840_v21 = vld [vmem:[#allocation4] sm:$0xff] }
 0x487   : > { %v1147_v6 = vpop.eup %1146 }
 0x488   : > { %861 = vperm.xlu1 %1123, %v1147_v6  }
 0x48f   : > { %v1149_v7 = vpop.eup %1148 }
 0x490   : > { %870 = vperm.xlu0 %1122, %v1149_v7  }
 0x4a3   : > { %v554_v11 = vpop.f32.mrf.mxu0 }
 0x4a4   : > { %v560_v12 = vadd.f32 %v554_v11, %v507_v10 }
 0x4a5   : > { %v1064_v13 = vpop.f32.mrf.mxu0 }
 0x4a6   : > { %561 = vst.msk [vmem:[#allocation4 + $0x8] sm:$0xff] %vm270_vm0, %v560_v12 }
 0x4a7   : > { %v557_v15 = vpop.f32.mrf.mxu0 }
 0x4a9   : > { %v1065_v16 = vpop.f32.mrf.mxu0 }
 0x4ab   : > { %v690_v19 = vpop.f32.mrf.mxu0 }
 0x4ac   : > { %v696_v22 = vadd.f32 %v690_v19, %v646_v17  ;;  %v844_v37 = vpop.permute.xlu1 %843 }
 0x4ad   : > { %v1076_v23 = vpop.f32.mrf.mxu0  ;;  %v849_v35 = vld [vmem:[#allocation4 + $0x8] sm:$0xff]  ;;  %v846_v43 = vmul.f32 %v844_v37, %v840_v21 }
 0x4ae   : > { %697 = vst.msk [vmem:[#allocation4 + $0x10] sm:$0xff] %vm270_vm0, %v696_v22 }
 0x4af   : > { %v693_v26 = vpop.f32.mrf.mxu0 }
 0x4b1   : > { %v1077_v27 = vpop.f32.mrf.mxu0 }
 0x4b3   : > { %v826_v29 = vpop.f32.mrf.mxu0 }
 0x4b4   : > { %v832_v30 = vadd.f32 %v826_v29, %v782_v28 }
 0x4b5   : > { %v1088_v31 = vpop.f32.mrf.mxu0  ;;  %v858_v40 = vld [vmem:[#allocation4 + $0x10] sm:$0xff] }
 0x4b6   : > { %833 = vst.msk [vmem:[#allocation4 + $0x18] sm:$0xff] %vm270_vm0, %v832_v30 }
 0x4b7   : > { %v829_v32 = vpop.f32.mrf.mxu0 }
 0x4b9   : > { %v1089_v33 = vpop.f32.mrf.mxu0 }
 0x4bd   : > { %v867_v18 = vld [vmem:[#allocation4 + $0x18] sm:$0xff] }
 0x4fb   : > { %v853_v34 = vpop.permute.xlu0 %852 }
 0x4fc   : > { %v855_v36 = vmul.f32 %v853_v34, %v849_v35 }
 0x4fe   : > { %875 = vrot.lane.b32.xlu1 %v855_v36, %s1180_s25 }
 0x503   : > { %v862_v39 = vpop.permute.xlu1 %861 }
 0x504   : > { %v864_v41 = vmul.f32 %v862_v39, %v858_v40 }
 0x506   : > { %879 = vrot.lane.b32.xlu0 %v864_v41, %s1179_s24 }
 0x50b   : > { %v871_v42 = vpop.permute.xlu0 %870 }
 0x50c   : > { %v873_v20 = vmul.f32 %v871_v42, %v867_v18 }
 0x50e   : > { %883 = vrot.lane.b32.xlu1 %v873_v20, %s1178_s23 }
 0x570   : > { %v876_v0 = vpop.permute.xlu1 %875 }
 0x571   : > { %v886_v45 = vsel %vm270_vm0, %v846_v43, %v876_v0 }
 0x578   : > { %v880_v44 = vpop.permute.xlu0 %879 }
 0x579   : > { %v888_v46 = vsel %vm887_vm6, %v886_v45, %v880_v44 }
 0x580   : > { %v884_v47 = vpop.permute.xlu1 %883 }
 0x581   : > { %v890_v48 = vsel %vm889_vm7, %v888_v46, %v884_v47 }
 0x582   : > { %v891_v49 = vpack.c.bf16 %v890_v48, %v890_v48 }
 0x584   : > { %892 = vst [vmem:[%s254_s5] sm:$0xf] %v891_v49 }
 0x585 PF: > { %s13_s14 = sadd.s32 1, %s1172_s14   ;;  %s1389_s12 = smov %s1168_s13 }
 0x586   : > { %p10_p5 = scmp.ge.s32.totalorder %s13_s14, 4   ;;  %s1390_s13 = smov %s1392_s15 }
 0x588   :  { %12 = sbr.rel (!%p10_p5) target bundleno = 2 (0x2), region = 85 }

// kernel: transformer_forward.50
= control target key start
LH: loop header
LB: loop body
LE: loop exit
PB: predicated region body
PF: predicated region fallthrough
CT: control target
= control target key end

     0   :  { %v295_v22 = vmov 0   ;;  %v85_v45 = vlaneseq  ;;  %s392_s0 = inlined_call_operand.vmem [shape: bf16[16,128], index: 0, kind: input, shape index: {}]   ;;  %s393_s3 = inlined_call_operand.vmem [shape: bf16[128,256], index: 3, kind: input, shape index: {}]   ;;  %s394_s1 = inlined_call_operand.vmem [shape: f32[1,128], index: 1, kind: input, shape index: {}]   ;;  %s395_s2 = inlined_call_operand.vmem [shape: f32[1,128], index: 2, kind: input, shape index: {}]   ;;  %s396_s4 = inlined_call_operand.vmem [shape: f32[1,256], index: 4, kind: input, shape index: {}]   ;;  %s397_s5 = inlined_call_operand.vmem [shape: bf16[16,256], index: 5, kind: output, shape index: {}]  }
   0x1   :  { %v263_v0 = vld [vmem:[%s392_s0] sm:$0xff]   ;;  %v267_v3 = vld [vmem:[%s393_s3 + $0x74] ss:$8 sps:$4 sm:$0xff]   ;;  %v269_v4 = vld [vmem:[%s393_s3 + $0x70] ss:$8 sps:$4 sm:$0xff]   ;;  %207 = vmatprep.mubr.bf16.mxu0 %v295_v22 }
   0x2   :  { %v264_v1 = vunpack.c.l.bf16 %v263_v0  ;;  %v265_v2 = vunpack.c.h.bf16 %v263_v0  ;;  %175 = vmatprep.subr.bf16.mxu0 %v267_v3  ;;  %v270_v13 = vld [vmem:[%s393_s3 + $0x64] ss:$8 sps:$4 sm:$0xff]   ;;  %v272_v14 = vld [vmem:[%s393_s3 + $0x60] ss:$8 sps:$4 sm:$0xff]   ;;  %v273_v15 = vld [vmem:[%s393_s3 + $0x54] ss:$8 sps:$4 sm:$0xff]  }
   0x3   :  { %176 = vmatpush1.bf16.msra.mxu0 %v269_v4  ;;  %v275_v16 = vld [vmem:[%s393_s3 + $0x50] ss:$8 sps:$4 sm:$0xff]   ;;  %v276_v17 = vld [vmem:[%s393_s3 + $0x44] ss:$8 sps:$4 sm:$0xff]   ;;  %v278_v18 = vld [vmem:[%s393_s3 + $0x40] ss:$8 sps:$4 sm:$0xff]  }
   0x4   :  { %25 = vadd.xlane.f32.xlu0 %v264_v1  ;;  %177 = vmatprep.subr.bf16.mxu0 %v270_v13  ;;  %v279_v19 = vld [vmem:[%s393_s3 + $0x34] ss:$8 sps:$4 sm:$0xff]   ;;  %v281_v20 = vld [vmem:[%s393_s3 + $0x30] ss:$8 sps:$4 sm:$0xff]   ;;  %v282_v21 = vld [vmem:[%s393_s3 + $0x24] ss:$8 sps:$4 sm:$0xff]  }
   0x5   :  { %v284_v23 = vld [vmem:[%s393_s3 + $0x20] ss:$8 sps:$4 sm:$0xff]   ;;  %v285_v24 = vld [vmem:[%s393_s3 + $0x14] ss:$8 sps:$4 sm:$0xff]   ;;  %v287_v25 = vld [vmem:[%s393_s3 + $0x10] ss:$8 sps:$4 sm:$0xff]  }
   0x6   :  { %v288_v26 = vld [vmem:[%s393_s3 + $0x4] ss:$8 sps:$4 sm:$0xff]   ;;  %v290_v27 = vld [vmem:[%s393_s3] ss:$8 sps:$4 sm:$0xff]   ;;  %v86_v46 = vshrl.u32 %v85_v45, 7 }
   0x7   :  { %178 = vmatpush1.bf16.msra.mxu0 %v272_v14  ;;  %v240_v36 = vld [vmem:[%s394_s1] ss:$0 sm:$0xff] }
   0x8   :  { %27 = vadd.xlane.f32.xlu0 %v265_v2  ;;  %179 = vmatprep.subr.bf16.mxu0 %v273_v15  ;;  %v241_v40 = vld [vmem:[%s395_s2] ss:$0 sm:$0xff]  ;;  %v87_v47 = vsub.s32 0, %v86_v46  ;;  %v91_v49 = vsub.s32 1, %v86_v46 }
   0x9   :  { %v83_v48 = vld [vmem:[%s396_s4] sm:$0x3] }
   0xa   :  { %v88_v50 = vrot.slane %v83_v48, %v87_v47  ;;  %v92_v51 = vrot.slane %v83_v48, %v91_v49 }
   0xb   :  { %180 = vmatpush1.bf16.msra.mxu0 %v275_v16 }
   0xc   :  { %181 = vmatprep.subr.bf16.mxu0 %v276_v17 }
   0xf   :  { %182 = vmatpush1.bf16.msra.mxu0 %v278_v18 }
  0x10   :  { %183 = vmatprep.subr.bf16.mxu0 %v279_v19 }
  0x13   :  { %184 = vmatpush1.bf16.msra.mxu0 %v281_v20 }
  0x14   :  { %185 = vmatprep.subr.bf16.mxu0 %v282_v21 }
  0x17   :  { %186 = vmatpush1.bf16.msra.mxu0 %v284_v23 }
  0x18   :  { %187 = vmatprep.subr.bf16.mxu0 %v285_v24 }
  0x1b   :  { %188 = vmatpush1.bf16.msra.mxu0 %v287_v25 }
  0x1c   :  { %189 = vmatprep.subr.bf16.mxu0 %v288_v26 }
  0x1f   :  { %190 = vmatpush1.bf16.msra.mxu0 %v290_v27 }
  0x8d   :  { %v26_v5 = vpop.xlane.xlu0 %25 }
  0x8e   :  { %v30_v6 = vmul.f32 0.0078125, %v26_v5 }
  0x90   :  { %v32_v7 = vsub.f32 %v264_v1, %v30_v6 }
  0x91   :  { %v28_v8 = vpop.xlane.xlu0 %27 }
  0x92   :  { %v31_v9 = vmul.f32 0.0078125, %v28_v8  ;;  %v34_v10 = vmul.f32 %v32_v7, %v32_v7 }
  0x94   :  { %v33_v11 = vsub.f32 %v265_v2, %v31_v9  ;;  %36 = vadd.xlane.f32.xlu1 %v34_v10 }
  0x96   :  { %v35_v12 = vmul.f32 %v33_v11, %v33_v11 }
  0x98   :  { %38 = vadd.xlane.f32.xlu1 %v35_v12 }
 0x11d   :  { %v37_v28 = vpop.xlane.xlu1 %36 }
 0x11e   :  { %v40_v29 = vmul.f32 0.0078125, %v37_v28 }
 0x120   :  { %v42_v30 = vadd.f32 1e-05, %v40_v29 }
 0x121   :  { %v39_v31 = vpop.xlane.xlu1 %38 }
 0x122   :  { %291 = vrsqrt.f32 %v42_v30  ;;  %v41_v32 = vmul.f32 0.0078125, %v39_v31 }
 0x124   :  { %v43_v33 = vadd.f32 1e-05, %v41_v32 }
 0x126   :  { %293 = vrsqrt.f32 %v43_v33 }
 0x12f   :  { %v292_v34 = vpop.eup %291 }
 0x130   :  { %v46_v35 = vmul.f32 %v292_v34, %v32_v7 }
 0x132   :  { %v55_v39 = vmul.f32 %v240_v36, %v46_v35 }
 0x133   :  { %v294_v37 = vpop.eup %293 }
 0x134   :  { %v47_v38 = vmul.f32 %v294_v37, %v33_v11  ;;  %v64_v42 = vadd.f32 %v241_v40, %v55_v39 }
 0x136   :  { %v56_v41 = vmul.f32 %v240_v36, %v47_v38 }
 0x138   :  { %v65_v43 = vadd.f32 %v241_v40, %v56_v41 }
 0x13a   :  { %v66_v44 = vpack.c.bf16 %v65_v43, %v64_v42 }
 0x13c   :  { %208 = vmatmul.mubr.bf16.vlgmr.msra.gmra.mxu0 %v66_v44 }
 0x1fc   :  { %v209_v52 = vpop.f32.mrf.mxu0 }
 0x1fd   :  { %v210_v53 = vadd.f32 %v209_v52, %v88_v50 }
 0x1fe   :  { %v211_v54 = vpop.f32.mrf.mxu0 }
 0x1ff   :  { %v212_v55 = vadd.f32 %v211_v54, %v92_v51  ;;  %v218_v57 = vmax.f32 %v210_v53, 0.0 }
 0x200   :  { %v213_v56 = vpop.f32.mrf.mxu0 }
 0x201   :  { %v219_v58 = vmax.f32 %v212_v55, 0.0  ;;  %v214_v59 = vadd.f32 %v213_v56, %v88_v50 }
 0x202   :  { %v215_v60 = vpop.f32.mrf.mxu0 }
 0x203   :  { %v260_v61 = vpack.c.bf16 %v219_v58, %v218_v57  ;;  %v216_v62 = vadd.f32 %v215_v60, %v92_v51  ;;  %v220_v63 = vmax.f32 %v214_v59, 0.0 }
 0x205   :  { %234 = vst [vmem:[%s397_s5] sm:$0xff] %v260_v61  ;;  %v221_v0 = vmax.f32 %v216_v62, 0.0 }
 0x207   :  { %v261_v1 = vpack.c.bf16 %v221_v0, %v220_v63 }
 0x209   :  { %235 = vst [vmem:[%s397_s5 + $0x8] sm:$0xff] %v261_v1 }

// kernel: transformer_forward.51
= control target key start
LH: loop header
LB: loop body
LE: loop exit
PB: predicated region body
PF: predicated region fallthrough
CT: control target
= control target key end

     0   :  { %s406_s1 = inlined_call_operand.vmem [shape: bf16[256,128], index: 1, kind: input, shape index: {}]   ;;  %s407_s0 = inlined_call_operand.vmem [shape: bf16[16,256], index: 0, kind: input, shape index: {}]   ;;  %s408_s2 = inlined_call_operand.vmem [shape: f32[1,128], index: 2, kind: input, shape index: {}]   ;;  %s409_s3 = inlined_call_operand.vmem [shape: bf16[16,128], index: 3, kind: input, shape index: {}]   ;;  %s410_s4 = inlined_call_operand.vmem [shape: bf16[16,128], index: 4, kind: output, shape index: {}]  }
   0x1   :  { %v299_v0 = vld [vmem:[%s406_s1 + $0x78] sm:$0xff]   ;;  %v301_v2 = vld [vmem:[%s406_s1 + $0x70] sm:$0xff]   ;;  %v303_v4 = vld [vmem:[%s406_s1 + $0x68] sm:$0xff]  }
   0x2   :  { %v300_v1 = vld [vmem:[%s406_s1 + $0x38] sm:$0xff]   ;;  %277 = vmatprep.subr.bf16.mxu0 %v299_v0  ;;  %v302_v3 = vld [vmem:[%s406_s1 + $0x30] sm:$0xff]   ;;  %v304_v5 = vld [vmem:[%s406_s1 + $0x28] sm:$0xff]  }
   0x3   :  { %278 = vmatpush3.bf16.msra.mxu0 %v300_v1  ;;  %v305_v6 = vld [vmem:[%s406_s1 + $0x60] sm:$0xff]   ;;  %v307_v8 = vld [vmem:[%s406_s1 + $0x58] sm:$0xff]   ;;  %v309_v10 = vld [vmem:[%s406_s1 + $0x50] sm:$0xff]  }
   0x4   :  { %279 = vmatprep.subr.bf16.mxu0 %v301_v2  ;;  %v306_v7 = vld [vmem:[%s406_s1 + $0x20] sm:$0xff]   ;;  %v308_v9 = vld [vmem:[%s406_s1 + $0x18] sm:$0xff]   ;;  %v310_v12 = vld [vmem:[%s406_s1 + $0x10] sm:$0xff]  }
   0x5   :  { %v317_v11 = vld [vmem:[%s407_s0 + $0x4] ss:$8 sps:$4 sm:$0xff]   ;;  %v315_v17 = vld [vmem:[%s407_s0] ss:$8 sps:$4 sm:$0xff]  }
   0x6   :  { %198 = vmatprep.mubr.bf16.mxu0 %v317_v11  ;;  %v311_v13 = vld [vmem:[%s406_s1 + $0x48] sm:$0xff]   ;;  %v313_v15 = vld [vmem:[%s406_s1 + $0x40] sm:$0xff]  }
   0x7   :  { %280 = vmatpush3.bf16.msra.mxu0 %v302_v3  ;;  %v312_v14 = vld [vmem:[%s406_s1 + $0x8] sm:$0xff]   ;;  %v314_v16 = vld [vmem:[%s406_s1] sm:$0xff]  }
   0x8   :  { %281 = vmatprep.subr.bf16.mxu0 %v303_v4  ;;  %v263_v21 = vld [vmem:[%s408_s2] ss:$0 sm:$0xff] }
   0x9   :  { %v269_v22 = vld [vmem:[%s409_s3] sm:$0xff]  }
   0xa   :  { %v270_v26 = vunpack.c.l.bf16 %v269_v22  ;;  %v271_v28 = vunpack.c.h.bf16 %v269_v22 }
   0xb   :  { %282 = vmatpush3.bf16.msra.mxu0 %v304_v5 }
   0xc   :  { %283 = vmatprep.subr.bf16.mxu0 %v305_v6 }
   0xf   :  { %284 = vmatpush3.bf16.msra.mxu0 %v306_v7 }
  0x10   :  { %285 = vmatprep.subr.bf16.mxu0 %v307_v8 }
  0x13   :  { %286 = vmatpush3.bf16.msra.mxu0 %v308_v9 }
  0x14   :  { %287 = vmatprep.subr.bf16.mxu0 %v309_v10 }
  0x17   :  { %288 = vmatpush3.bf16.msra.mxu0 %v310_v12 }
  0x18   :  { %289 = vmatprep.subr.bf16.mxu0 %v311_v13 }
  0x1b   :  { %290 = vmatpush3.bf16.msra.mxu0 %v312_v14 }
  0x1c   :  { %291 = vmatprep.subr.bf16.mxu0 %v313_v15 }
  0x1f   :  { %292 = vmatpush3.bf16.msra.mxu0 %v314_v16 }
  0x22   :  { %199 = vmatmul.mubr.bf16.vlgmr.msra.gmra.mxu0 %v315_v17 }
  0xe2   :  { %v293_v18 = vpop.f32.mrf.mxu0 }
  0xe4   :  { %v294_v19 = vpop.f32.mrf.mxu0 }
  0xe5   :  { %v295_v20 = vadd.f32 %v294_v19, %v293_v18 }
  0xe6   :  { %v296_v23 = vpop.f32.mrf.mxu0 }
  0xe7   :  { %v223_v25 = vadd.f32 %v295_v20, %v263_v21 }
  0xe8   :  { %v297_v24 = vpop.f32.mrf.mxu0 }
  0xe9   :  { %v298_v27 = vadd.f32 %v297_v24, %v296_v23  ;;  %v229_v30 = vadd.f32 %v270_v26, %v223_v25 }
  0xeb   :  { %v224_v29 = vadd.f32 %v298_v27, %v263_v21 }
  0xed   :  { %v230_v31 = vadd.f32 %v271_v28, %v224_v29 }
  0xef   :  { %v275_v32 = vpack.c.bf16 %v230_v31, %v229_v30 }
  0xf1   :  { %276 = vst [vmem:[%s410_s4] sm:$0xff] %v275_v32  }

// kernel: transformer_forward.48
= control target key start
LH: loop header
LB: loop body
LE: loop exit
PB: predicated region body
PF: predicated region fallthrough
CT: control target
= control target key end

     0   :  { %s1292_s12 = smov 0   ;;  %s1294_s13 = smov 0   ;;  %s1502_s0 = inlined_call_operand.vmem [shape: bf16[2,8,128], index: 0, kind: input, shape index: {}]   ;;  %s1503_s1 = inlined_call_operand.vmem [shape: bf16[2,16,256], index: 1, kind: input, shape index: {}, may-alias: {1,2}]   ;;  %s1504_s2 = inlined_call_operand.vmem [shape: bf16[2,16,256], index: 2, kind: input, shape index: {}, may-alias: {1,2}]   ;;  %s1505_s3 = inlined_call_operand.vmem [shape: bf16[2,8,128], index: 3, kind: output, shape index: {}]  }
   0x1   :  { %s1296_s14 = smov 0   ;;  %s1298_s15 = smov 0  }
   0x2   :  { %s1300_s16 = smov 0  }
   0x3 LB: > { %s25_s17 = sadd.s32 1, %s1259_s15  ;;  %p67_p1 = scmp.ne.s32.totalorder %s1251_s13, %s1247_s12  ;;  %s1263_s16 = sphi %s1300_s16, %s13_s16   ;;  %s1259_s15 = sphi %s1298_s15, %s1510_s15   ;;  %s1255_s14 = sphi %s1296_s14, %s1509_s14   ;;  %s1251_s13 = sphi %s1294_s13, %s1508_s13   ;;  %s1247_s12 = sphi %s1292_s12, %s1507_s12  }
   0x4   : > { %p27_p0 = scmp.ge.s32.totalorder %s25_s17, 2  ;;  %p68_p2 = scmp.eq.s32.totalorder %s1263_s16, 0 }
   0x5   : > { %s60_s20 = sadd.s32 1, %s1251_s13  ;;  %p1057_p5 = scmp.ge.s32.totalorder %s1263_s16, 2 }
   0x6   : > { %s1512_s17 = smov (%p27_p0, %s25_s17), 0  ;;  %p1323_p3 = por %p68_p2, %p67_p1 }
   0x7   : > { %s55_s19 = ssub.s32 %s1259_s15, %s1512_s17  ;;  %147 = sbr.rel (%p1057_p5) target bundleno = 22 (0x16), region = 16 }
   0x8   : > { %p58_p4 = scmp.eq.s32.totalorder %s55_s19, 0 }
   0xa   : > { %s1331_s21 = scalar_select %p58_p4, %s1251_s13, %s60_s20  }
   0xc   : > { %157 = sbr.rel (!%p1323_p3) target bundleno = 17 (0x11), region = 24  ;;  %s159_s22 = sand.u32 (%p1323_p3), 1, %s1251_s13  }
   0xd   : > { %s1084_s23 = sshll.u32 (%p1323_p3), %s1259_s15, 4  ;;  %s1058_s24 = sshll.u32 (%p1323_p3), %s159_s22, 3 }
   0xe   : > { %s167_s27 = scalar_lea.vmem (%p1323_p3), %s1503_s1, %s1084_s23  ;;  %s161_s28 = scalar_lea.vmem (%p1323_p3), [#allocation5], %s1058_s24 }
   0xf   : > { %v184_v0 = vld [vmem:[%s167_s27] sm:$0xf] (%p1323_p3)  ;;  %v186_v1 = vld [vmem:[%s167_s27 + $0x8] sm:$0xf] (%p1323_p3) }
  0x10   : > { %185 = vst [vmem:[%s161_s28] sm:$0xf] (%p1323_p3), %v184_v0  ;;  %187 = vst [vmem:[%s161_s28 + $0x4] sm:$0xf] (%p1323_p3), %v186_v1 }
  0x11 PF: > { %215 = sbr.rel (!%p1323_p3) target bundleno = 22 (0x16), region = 65  ;;  %s217_s29 = sand.u32 (%p1323_p3), 1, %s1251_s13  }
  0x12   : > { %s1085_s30 = sshll.u32 (%p1323_p3), %s1259_s15, 4  ;;  %s1061_s4 = sshll.u32 (%p1323_p3), %s217_s29, 3 }
  0x13   : > { %s984_s7 = scalar_lea.vmem (%p1323_p3), %s1504_s2, %s1085_s30  ;;  %s219_s8 = scalar_lea.vmem (%p1323_p3), [#allocation6], %s1061_s4 }
  0x14   : > { %v1064_v2 = vld [vmem:[%s984_s7 + $0x4] sm:$0xf] (%p1323_p3)  ;;  %v1065_v3 = vld [vmem:[%s984_s7 + $0xc] sm:$0xf] (%p1323_p3) }
  0x15   : > { %244 = vst [vmem:[%s219_s8] sm:$0xf] (%p1323_p3), %v1064_v2  ;;  %246 = vst [vmem:[%s219_s8 + $0x4] sm:$0xf] (%p1323_p3), %v1065_v3 }
  0x16 PF: > { %p1066_p6 = scmp.ge.s32.totalorder %s1263_s16, 1  ;;  %p273_p7 = scmp.lt.s32.totalorder %s1263_s16, 3 }
  0x18   : > { %p274_p8 = pnand %p1066_p6, %p273_p7 }
  0x19   : > { %s280_s9 = sand.u32 (!%p274_p8), 1, %s1247_s12   ;;  %p317_p9 = scmp.lt.s32.totalorder (!%p274_p8), %s1255_s14, 1 }
  0x1a   : > { %277 = sbr.rel (%p274_p8) target bundleno = 1427 (0x593), region = 106  ;;  %s1353_s10 = sshll.u32 (!%p274_p8), %s280_s9, 3 }
  0x1b   : > { %s282_s11 = scalar_lea.vmem (!%p274_p8), [#allocation5], %s1353_s10  ;;  %s1269_s22 = smov (!%p274_p8), 96  }
  0x1c   : > { %s1270_s23 = smov (!%p274_p8), 64   ;;  %s1271_s24 = smov (!%p274_p8), 32  }
  0x1d   : > { %s289_s25 = scalar_lea.vmem (!%p274_p8), [#allocation6], %s1353_s10 }
  0x1f   : > { %vm342_vm0 = vcmask 261120   ;;  %v1265_v4 = vmov 0.0   ;;  %vm1266_vm1 = vmmov 0   ;;  %v1199_v5 = vld [vmem:[%s282_s11] sm:$0xff]   ;;  %s1514_s14 = smov (!%p317_p9, %s1255_s14), 1  ;;  %vm333_vm2 = vcmask 7168  }
  0x20   : > { %1102 = vmatprep.subr.bf16.mxu0 %v1265_v4  ;;  %343 = vst.msk [vmem:[#allocation4] sm:$0xff] %vm342_vm0, %v1265_v4  ;;  %344 = vst.msk [vmem:[#allocation4 + $0x8] sm:$0xff] %vm342_vm0, %v1265_v4  ;;  %1104 = vmatprep.mubr.msk.bf16.mxu0 %vm1266_vm1, %v1265_v4  ;;  %v363_v6 = vsel %vm342_vm0, %v1199_v5, 0  ;;  %s1069_s12 = sshll.u32 %s1514_s14, 2  ;;  %v1267_v9 = vmov -inf   ;;  %vm406_vm3 = vcmask 130048  }
  0x21   : > { %345 = vst.msk [vmem:[#allocation4 + $0x10] sm:$0xff] %vm342_vm0, %v1265_v4  ;;  %346 = vst.msk [vmem:[#allocation4 + $0x18] sm:$0xff] %vm342_vm0, %v1265_v4  ;;  %1108 = vmatprep.subr.bf16.mxu1 %v1265_v4  ;;  %1110 = vmatprep.mubr.msk.bf16.mxu1 %vm1266_vm1, %v1265_v4  ;;  %s320_s20 = scalar_lea.vmem %s1502_s0, %s1069_s12  ;;  %v1268_v15 = vmov 0   ;;  %v1415_v21 = vld [vmem:[%s289_s25] sm:$0xff]   ;;  %vm944_vm4 = vcmask 523264   ;;  %vm946_vm5 = vcmask 785408   ;;  %s326_s28 = scalar_lea.vmem %s1505_s3, %s1069_s12 }
  0x22   : > { %1103 = vmatpush3.bf16.xpose.msra.mxu0 %v363_v6  ;;  %v347_v7 = vld [vmem:[%s320_s20] sm:$0xf]  ;;  %334 = vst.msk [vmem:[#allocation2] sm:$0xff] %vm333_vm2, %v1267_v9  ;;  %335 = vst.msk [vmem:[#allocation2 + $0x8] sm:$0xff] %vm333_vm2, %v1267_v9  ;;  %1197 = vset.pattern.permute.xlu0 %v1268_v15 }
  0x23   : > { %1120 = vmatprep.subr.bf16.mxu0 %v1265_v4  ;;  %v348_v8 = vmul.bf16 1043676725, %v347_v7  ;;  %336 = vst.msk [vmem:[#allocation2 + $0x10] sm:$0xff] %vm333_vm2, %v1267_v9  ;;  %337 = vst.msk [vmem:[#allocation2 + $0x18] sm:$0xff] %vm333_vm2, %v1267_v9  ;;  %1198 = vset.pattern.permute.xlu1 %v1268_v15 }
  0x24   : > { %338 = vst.msk [vmem:[#allocation3] sm:$0xff] %vm333_vm2, %v1265_v4  ;;  %339 = vst.msk [vmem:[#allocation3 + $0x8] sm:$0xff] %vm333_vm2, %v1265_v4  ;;  %495 = vrot.lane.b32.xlu1 %v1199_v5, %s1269_s22  ;;  %1109 = vmatpush3.bf16.msra.mxu1 %v1415_v21 }
  0x25   : > { %340 = vst.msk [vmem:[#allocation3 + $0x10] sm:$0xff] %vm333_vm2, %v1265_v4  ;;  %341 = vst.msk [vmem:[#allocation3 + $0x18] sm:$0xff] %vm333_vm2, %v1265_v4  ;;  %v1075_v16 = vcombine.low %v348_v8, %v348_v8  ;;  %1114 = vmatprep.subr.bf16.mxu1 %v1265_v4 }
  0x28   : > { %493 = vrot.lane.b32.xlu1 %v1075_v16, %s1269_s22 }
  0x29   : > { %1105 = vmatmul.mubr.msk.bf16.vlgmr.msra.gmra.mxu0 %vm342_vm0, %v348_v8  ;;  %v1404_v17 = vld [vmem:[#allocation2] sm:$0xff]  ;;  %v544_v55 = vld [vmem:[#allocation2 + $0x8] sm:$0xff] }
  0x2a   : > { %1122 = vmatprep.mubr.msk.bf16.mxu0 %vm1266_vm1, %v1265_v4  ;;  %v677_v59 = vld [vmem:[#allocation2 + $0x10] sm:$0xff]  ;;  %v810_v63 = vld [vmem:[#allocation2 + $0x18] sm:$0xff] }
  0x2c   : > { %628 = vrot.lane.b32.xlu1 %v1199_v5, %s1270_s23 }
  0x30   : > { %626 = vrot.lane.b32.xlu1 %v1075_v16, %s1270_s23 }
  0x34   : > { %761 = vrot.lane.b32.xlu1 %v1199_v5, %s1271_s24 }
  0x38   : > { %759 = vrot.lane.b32.xlu1 %v1075_v16, %s1271_s24 }
  0x96   : > { %v496_v25 = vpop.permute.xlu1 %495 }
  0x97   : > { %v501_v28 = vsel %vm342_vm0, %v496_v25, 0 }
  0x9a   : > { %v494_v26 = vpop.permute.xlu1 %493 }
  0x9e   : > { %v629_v30 = vpop.permute.xlu1 %628 }
  0x9f   : > { %v634_v32 = vsel %vm342_vm0, %v629_v30, 0 }
  0xa2   : > { %v627_v31 = vpop.permute.xlu1 %626 }
  0xa6   : > { %v762_v33 = vpop.permute.xlu1 %761 }
  0xa7   : > { %v767_v34 = vsel %vm342_vm0, %v762_v33, 0  ;;  %v422_v33 = vld [vmem:[#allocation3] sm:$0xff] }
  0xaa   : > { %v760_v35 = vpop.permute.xlu1 %759 }
  0xe9   : > { %v399_v10 = vpop.f32.mrf.mxu0 }
  0xea   : > { %v407_v11 = vsel %vm406_vm3, %v399_v10, -inf }
  0xeb   : > { %408 = vmax.xlane.f32.xlu0 %v407_v11  ;;  %v1106_v12 = vpop.f32.mrf.mxu0 }
  0xed   : > { %v402_v13 = vpop.f32.mrf.mxu0 }
  0xef   : > { %v1107_v14 = vpop.f32.mrf.mxu0 }
 0x174   : > { %v409_v18 = vpop.xlane.xlu0 %408 }
 0x175   : > { %v1407_v19 = vmax.f32 %v1404_v17, %v409_v18 }
 0x177   : > { %v411_v20 = vsub.f32 %v1404_v17, %v1407_v19  ;;  %489 = vst.msk [vmem:[#allocation2] sm:$0xff] %vm333_vm2, %v1407_v19  ;;  %416 = vperm.xlu0 %1197, %v1407_v19  }
 0x1f2   : > { %v417_v22 = vpop.permute.xlu0 %416 }
 0x1f3   : > { %v419_v23 = vsub.f32 %v399_v10, %v417_v22 }
 0x1f5   : > { %v420_v24 = vmul.f32 1.442695, %v419_v23 }
 0x1f7   : > { %1201 = vpow2.f32 %v420_v24 }
 0x204   : > { %v1419_v27 = vpop.eup %1201 }
 0x205   : > { %v437_v29 = vpack.c.bf16 %v1419_v27, %v1419_v27  ;;  %v424_v3 = vsel %vm406_vm3, %v1419_v27, 0.0 }
 0x207   : > { %1111 = vmatmul.mubr.msk.bf16.vlgmr.msra.gmra.mxu1 %vm406_vm3, %v437_v29 }
 0x208   : > { %1115 = vmatpush3.bf16.xpose.msra.mxu1 %v501_v28  ;;  %1116 = vmatprep.mubr.msk.bf16.mxu1 %vm1266_vm1, %v1265_v4 }
 0x209   : > { %1126 = vmatprep.subr.bf16.mxu1 %v1265_v4 }
 0x20f   : > { %1117 = vmatmul.mubr.msk.bf16.vlgmr.msra.gmra.mxu1 %vm342_vm0, %v494_v26  ;;  %v412_v26 = vmul.f32 1.442695, %v411_v20 }
 0x210   : > { %1127 = vmatpush3.bf16.xpose.msra.mxu1 %v634_v32  ;;  %1128 = vmatprep.mubr.msk.bf16.mxu1 %vm1266_vm1, %v1265_v4 }
 0x211   : > { %1138 = vmatprep.subr.bf16.mxu1 %v1265_v4 }
 0x217   : > { %1129 = vmatmul.mubr.msk.bf16.vlgmr.msra.gmra.mxu1 %vm342_vm0, %v627_v31 }
 0x218   : > { %1139 = vmatpush3.bf16.xpose.msra.mxu1 %v767_v34  ;;  %1140 = vmatprep.mubr.msk.bf16.mxu1 %vm1266_vm1, %v1265_v4 }
 0x21f   : > { %1141 = vmatmul.mubr.msk.bf16.vlgmr.msra.gmra.mxu1 %vm342_vm0, %v760_v35 }
 0x2c7   : > { %v1438_v36 = vpop.f32.mrf.mxu1 }
 0x2c9   : > { %v1112_v37 = vpop.f32.mrf.mxu1 }
 0x2cb   : > { %v484_v38 = vpop.f32.mrf.mxu1 }
 0x2cd   : > { %v1113_v39 = vpop.f32.mrf.mxu1 }
 0x2cf   : > { %v537_v40 = vpop.f32.mrf.mxu1 }
 0x2d0   : > { %v545_v41 = vsel %vm406_vm3, %v537_v40, -inf }
 0x2d1   : > { %546 = vmax.xlane.f32.xlu1 %v545_v41  ;;  %v1118_v42 = vpop.f32.mrf.mxu1 }
 0x2d3   : > { %v540_v43 = vpop.f32.mrf.mxu1 }
 0x2d5   : > { %v1119_v44 = vpop.f32.mrf.mxu1 }
 0x2d6   : > { %v694_v44 = vld [vmem:[#allocation3 + $0x10] sm:$0xff] }
 0x2d7   : > { %v670_v45 = vpop.f32.mrf.mxu1 }
 0x2d8   : > { %v678_v46 = vsel %vm406_vm3, %v670_v45, -inf }
 0x2d9   : > { %679 = vmax.xlane.f32.xlu0 %v678_v46  ;;  %v1130_v47 = vpop.f32.mrf.mxu1 }
 0x2db   : > { %v673_v48 = vpop.f32.mrf.mxu1 }
 0x2dd   : > { %v1131_v49 = vpop.f32.mrf.mxu1 }
 0x2de   : > { %v827_v49 = vld [vmem:[#allocation3 + $0x18] sm:$0xff] }
 0x2df   : > { %v803_v50 = vpop.f32.mrf.mxu1 }
 0x2e0   : > { %v811_v51 = vsel %vm406_vm3, %v803_v50, -inf }
 0x2e1   : > { %812 = vmax.xlane.f32.xlu1 %v811_v51  ;;  %v1142_v52 = vpop.f32.mrf.mxu1 }
 0x2e3   : > { %v806_v53 = vpop.f32.mrf.mxu1 }
 0x2e5   : > { %v1143_v54 = vpop.f32.mrf.mxu1 }
 0x35a   : > { %v547_v56 = vpop.xlane.xlu1 %546 }
 0x35b   : > { %v548_v57 = vmax.f32 %v544_v55, %v547_v56 }
 0x35d   : > { %v549_v58 = vsub.f32 %v544_v55, %v548_v57  ;;  %625 = vst.msk [vmem:[#allocation2 + $0x8] sm:$0xff] %vm333_vm2, %v548_v57  ;;  %554 = vperm.xlu1 %1198, %v548_v57  }
 0x35f   : > { %v550_v28 = vmul.f32 1.442695, %v549_v58 }
 0x362   : > { %v680_v60 = vpop.xlane.xlu0 %679 }
 0x363   : > { %v681_v61 = vmax.f32 %v677_v59, %v680_v60 }
 0x365   : > { %v682_v62 = vsub.f32 %v677_v59, %v681_v61  ;;  %758 = vst.msk [vmem:[#allocation2 + $0x10] sm:$0xff] %vm333_vm2, %v681_v61  ;;  %687 = vperm.xlu0 %1197, %v681_v61  }
 0x367   : > { %v683_v32 = vmul.f32 1.442695, %v682_v62  ;;  %v569_v62 = vld [vmem:[#allocation4 + $0x8] sm:$0xff] }
 0x36a   : > { %v813_v0 = vpop.xlane.xlu1 %812 }
 0x36b   : > { %v814_v1 = vmax.f32 %v810_v63, %v813_v0 }
 0x36d   : > { %v815_v2 = vsub.f32 %v810_v63, %v814_v1  ;;  %891 = vst.msk [vmem:[#allocation2 + $0x18] sm:$0xff] %vm333_vm2, %v814_v1  ;;  %820 = vperm.xlu1 %1198, %v814_v1  }
 0x36f   : > { %v816_v30 = vmul.f32 1.442695, %v815_v2 }
 0x371   : > { %577 = vrot.lane.b32.xlu1 %v1415_v21, %s1269_s22 }
 0x375   : > { %710 = vrot.lane.b32.xlu1 %v1415_v21, %s1270_s23 }
 0x379   : > { %843 = vrot.lane.b32.xlu1 %v1415_v21, %s1271_s24 }
 0x39d   : > { %425 = vadd.xlane.f32.xlu1 %v424_v3 }
 0x3d8   : > { %v555_v5 = vpop.permute.xlu1 %554 }
 0x3d9   : > { %v557_v6 = vsub.f32 %v537_v40, %v555_v5  ;;  %v561_v40 = vld [vmem:[#allocation3 + $0x8] sm:$0xff] }
 0x3db   : > { %v558_v7 = vmul.f32 1.442695, %v557_v6 }
 0x3dd   : > { %1203 = vpow2.f32 %v558_v7 }
 0x3e0   : > { %v688_v8 = vpop.permute.xlu0 %687 }
 0x3e1   : > { %v690_v9 = vsub.f32 %v670_v45, %v688_v8 }
 0x3e3   : > { %v691_v10 = vmul.f32 1.442695, %v690_v9 }
 0x3e5   : > { %1205 = vpow2.f32 %v691_v10 }
 0x3e8   : > { %v821_v11 = vpop.permute.xlu1 %820 }
 0x3e9   : > { %v823_v12 = vsub.f32 %v803_v50, %v821_v11  ;;  %v430_v50 = vld [vmem:[#allocation4] sm:$0xff] }
 0x3ea   : > { %v1204_v13 = vpop.eup %1203 }
 0x3eb   : > { %v824_v14 = vmul.f32 1.442695, %v823_v12  ;;  %v563_v15 = vsel %vm406_vm3, %v1204_v13, 0.0  ;;  %v576_v18 = vpack.c.bf16 %v1204_v13, %v1204_v13  ;;  %v835_v12 = vld [vmem:[#allocation4 + $0x18] sm:$0xff] }
 0x3ec   : > { %564 = vadd.xlane.f32.xlu0 %v563_v15  ;;  %v578_v16 = vpop.permute.xlu1 %577 }
 0x3ed   : > { %1207 = vpow2.f32 %v824_v14  ;;  %1121 = vmatpush3.bf16.msra.mxu0 %v578_v16 }
 0x3ee   : > { %1132 = vmatprep.subr.bf16.mxu0 %v1265_v4  ;;  %1209 = vpow2.f32 %v412_v26 }
 0x3ef   : > { %1211 = vpow2.f32 %v550_v28 }
 0x3f0   : > { %1123 = vmatmul.mubr.msk.bf16.vlgmr.msra.gmra.mxu0 %vm406_vm3, %v576_v18  ;;  %v711_v21 = vpop.permute.xlu1 %710  ;;  %1213 = vpow2.f32 %v816_v30 }
 0x3f1   : > { %1133 = vmatpush3.bf16.msra.mxu0 %v711_v21  ;;  %1134 = vmatprep.mubr.msk.bf16.mxu0 %vm1266_vm1, %v1265_v4  ;;  %1215 = vpow2.f32 %v683_v32 }
 0x3f2   : > { %v1206_v22 = vpop.eup %1205  ;;  %1144 = vmatprep.subr.bf16.mxu0 %v1265_v4 }
 0x3f3   : > { %v696_v23 = vsel %vm406_vm3, %v1206_v22, 0.0  ;;  %v709_v24 = vpack.c.bf16 %v1206_v22, %v1206_v22 }
 0x3f4   : > { %697 = vadd.xlane.f32.xlu0 %v696_v23  ;;  %v844_v25 = vpop.permute.xlu1 %843 }
 0x3f8   : > { %1135 = vmatmul.mubr.msk.bf16.vlgmr.msra.gmra.mxu0 %vm406_vm3, %v709_v24 }
 0x3f9   : > { %1145 = vmatpush3.bf16.msra.mxu0 %v844_v25  ;;  %1146 = vmatprep.mubr.msk.bf16.mxu0 %vm1266_vm1, %v1265_v4 }
 0x3fa   : > { %v1208_v27 = vpop.eup %1207 }
 0x3fb   : > { %v829_v29 = vsel %vm406_vm3, %v1208_v27, 0.0  ;;  %v842_v31 = vpack.c.bf16 %v1208_v27, %v1208_v27  ;;  %v1210_v17 = vpop.eup %1209 }
 0x3fc   : > { %830 = vadd.xlane.f32.xlu1 %v829_v29  ;;  %v1212_v19 = vpop.eup %1211  ;;  %v423_v34 = vmul.f32 %v1210_v17, %v422_v33 }
 0x3fd   : > { %v1214_v20 = vpop.eup %1213  ;;  %v562_v41 = vmul.f32 %v1212_v19, %v561_v40 }
 0x3fe   : > { %v1216_v4 = vpop.eup %1215  ;;  %v828_v51 = vmul.f32 %v1214_v20, %v827_v49 }
 0x3ff   : > { %v695_v45 = vmul.f32 %v1216_v4, %v694_v44 }
 0x400   : > { %1147 = vmatmul.mubr.msk.bf16.vlgmr.msra.gmra.mxu0 %vm406_vm3, %v842_v31 }
 0x40a   : > { %433 = vperm.xlu0 %1197, %v1210_v17  }
 0x40d   : > { %572 = vperm.xlu1 %1198, %v1212_v19  }
 0x40e   : > { %838 = vperm.xlu0 %1197, %v1214_v20  }
 0x411   : > { %705 = vperm.xlu1 %1198, %v1216_v4  }
 0x426   : > { %v426_v35 = vpop.xlane.xlu1 %425 }
 0x427   : > { %v427_v37 = vadd.f32 %v426_v35, %v423_v34 }
 0x429   : > { %429 = vst.msk [vmem:[#allocation3] sm:$0xff] %vm333_vm2, %v427_v37 }
 0x430   : > { %v895_v38 = vld [vmem:[#allocation3] sm:$0xff] }
 0x431   : > { %1217 = vrcp.f32 %v895_v38 }
 0x43e   : > { %v1218_v39 = vpop.eup %1217 }
 0x43f   : > { %900 = vperm.xlu1 %1198, %v1218_v39  }
 0x475   : > { %v565_v42 = vpop.xlane.xlu0 %564 }
 0x476   : > { %v566_v43 = vadd.f32 %v565_v42, %v562_v41 }
 0x478   : > { %567 = vst.msk [vmem:[#allocation3 + $0x8] sm:$0xff] %vm333_vm2, %v566_v43 }
 0x47d   : > { %v698_v46 = vpop.xlane.xlu0 %697 }
 0x47e   : > { %v699_v47 = vadd.f32 %v698_v46, %v695_v45 }
 0x47f   : > { %v904_v48 = vld [vmem:[#allocation3 + $0x8] sm:$0xff] }
 0x480   : > { %700 = vst.msk [vmem:[#allocation3 + $0x10] sm:$0xff] %vm333_vm2, %v699_v47  ;;  %1219 = vrcp.f32 %v904_v48 }
 0x485   : > { %v831_v52 = vpop.xlane.xlu1 %830  ;;  %v434_v53 = vpop.permute.xlu0 %433 }
 0x486   : > { %v832_v54 = vadd.f32 %v831_v52, %v828_v51  ;;  %v436_v55 = vmul.f32 %v434_v53, %v430_v50 }
 0x487   : > { %v913_v56 = vld [vmem:[#allocation3 + $0x10] sm:$0xff] }
 0x488   : > { %833 = vst.msk [vmem:[#allocation3 + $0x18] sm:$0xff] %vm333_vm2, %v832_v54  ;;  %v487_v57 = vadd.f32 %v1438_v36, %v436_v55  ;;  %1221 = vrcp.f32 %v913_v56  ;;  %v702_v36 = vld [vmem:[#allocation4 + $0x10] sm:$0xff] }
 0x489   : > { %v573_v63 = vpop.permute.xlu1 %572  ;;  %v839_v13 = vpop.permute.xlu0 %838 }
 0x48a   : > { %488 = vst.msk [vmem:[#allocation4] sm:$0xff] %vm342_vm0, %v487_v57  ;;  %v575_v0 = vmul.f32 %v573_v63, %v569_v62  ;;  %v841_v16 = vmul.f32 %v839_v13, %v835_v12 }
 0x48d   : > { %v1220_v58 = vpop.eup %1219  ;;  %v706_v5 = vpop.permute.xlu1 %705 }
 0x48e   : > { %909 = vperm.xlu0 %1197, %v1220_v58   ;;  %v708_v8 = vmul.f32 %v706_v5, %v702_v36 }
 0x48f   : > { %v922_v59 = vld [vmem:[#allocation3 + $0x18] sm:$0xff] }
 0x490   : > { %1223 = vrcp.f32 %v922_v59 }
 0x491   : > { %v897_v20 = vld [vmem:[#allocation4] sm:$0xff] }
 0x495   : > { %v1222_v60 = vpop.eup %1221 }
 0x496   : > { %918 = vperm.xlu1 %1198, %v1222_v60  }
 0x49d   : > { %v1224_v61 = vpop.eup %1223 }
 0x49e   : > { %927 = vperm.xlu0 %1197, %v1224_v61  }
 0x4b0   : > { %v617_v1 = vpop.f32.mrf.mxu0 }
 0x4b1   : > { %v623_v2 = vadd.f32 %v617_v1, %v575_v0 }
 0x4b2   : > { %v1124_v3 = vpop.f32.mrf.mxu0 }
 0x4b3   : > { %624 = vst.msk [vmem:[#allocation4 + $0x8] sm:$0xff] %vm342_vm0, %v623_v2 }
 0x4b4   : > { %v620_v6 = vpop.f32.mrf.mxu0 }
 0x4b6   : > { %v1125_v7 = vpop.f32.mrf.mxu0 }
 0x4b8   : > { %v750_v9 = vpop.f32.mrf.mxu0 }
 0x4b9   : > { %v756_v10 = vadd.f32 %v750_v9, %v708_v8 }
 0x4ba   : > { %v1136_v11 = vpop.f32.mrf.mxu0  ;;  %v906_v26 = vld [vmem:[#allocation4 + $0x8] sm:$0xff]  ;;  %v901_v28 = vpop.permute.xlu1 %900 }
 0x4bb   : > { %757 = vst.msk [vmem:[#allocation4 + $0x10] sm:$0xff] %vm342_vm0, %v756_v10  ;;  %v903_v33 = vmul.f32 %v901_v28, %v897_v20 }
 0x4bc   : > { %v753_v14 = vpop.f32.mrf.mxu0 }
 0x4be   : > { %v1137_v15 = vpop.f32.mrf.mxu0 }
 0x4c0   : > { %v883_v18 = vpop.f32.mrf.mxu0 }
 0x4c1   : > { %v889_v21 = vadd.f32 %v883_v18, %v841_v16 }
 0x4c2   : > { %v1148_v22 = vpop.f32.mrf.mxu0  ;;  %v915_v30 = vld [vmem:[#allocation4 + $0x10] sm:$0xff] }
 0x4c3   : > { %890 = vst.msk [vmem:[#allocation4 + $0x18] sm:$0xff] %vm342_vm0, %v889_v21 }
 0x4c4   : > { %v886_v23 = vpop.f32.mrf.mxu0 }
 0x4c6   : > { %v1149_v24 = vpop.f32.mrf.mxu0 }
 0x4ca   : > { %v924_v17 = vld [vmem:[#allocation4 + $0x18] sm:$0xff] }
 0x509   : > { %v910_v25 = vpop.permute.xlu0 %909 }
 0x50a   : > { %v912_v27 = vmul.f32 %v910_v25, %v906_v26 }
 0x50c   : > { %932 = vrot.lane.b32.xlu1 %v912_v27, %s1271_s24 }
 0x511   : > { %v919_v29 = vpop.permute.xlu1 %918 }
 0x512   : > { %v921_v31 = vmul.f32 %v919_v29, %v915_v30 }
 0x514   : > { %936 = vrot.lane.b32.xlu0 %v921_v31, %s1270_s23 }
 0x519   : > { %v928_v32 = vpop.permute.xlu0 %927 }
 0x51a   : > { %v930_v19 = vmul.f32 %v928_v32, %v924_v17 }
 0x51c   : > { %940 = vrot.lane.b32.xlu1 %v930_v19, %s1269_s22 }
 0x57e   : > { %v933_v4 = vpop.permute.xlu1 %932 }
 0x57f   : > { %v943_v35 = vsel %vm342_vm0, %v903_v33, %v933_v4 }
 0x586   : > { %v937_v34 = vpop.permute.xlu0 %936 }
 0x587   : > { %v945_v37 = vsel %vm944_vm4, %v943_v35, %v937_v34 }
 0x58e   : > { %v941_v38 = vpop.permute.xlu1 %940 }
 0x58f   : > { %v947_v39 = vsel %vm946_vm5, %v945_v37, %v941_v38 }
 0x590   : > { %v948_v40 = vpack.c.bf16 %v947_v39, %v947_v39 }
 0x592   : > { %949 = vst [vmem:[%s326_s28] sm:$0xf] %v948_v40 }
 0x593 PF: > { %s13_s16 = sadd.s32 1, %s1263_s16   ;;  %s1507_s12 = smov %s1251_s13 }
 0x594   : > { %p10_p10 = scmp.ge.s32.totalorder %s13_s16, 4   ;;  %s1508_s13 = smov %s1331_s21 }
 0x595   : > { %s1509_s14 = smov %s1259_s15  ;;  %s1510_s15 = smov %s1512_s17 }
 0x596   :  { %12 = sbr.rel (!%p10_p10) target bundleno = 3 (0x3), region = 177 }

// kernel: transformer_forward.61
= control target key start
LH: loop header
LB: loop body
LE: loop exit
PB: predicated region body
PF: predicated region fallthrough
CT: control target
= control target key end

     0   :  { %s355_s0 = inlined_call_operand.vmem [shape: bf16[16,128], index: 0, kind: input, shape index: {}]   ;;  %s356_s1 = inlined_call_operand.vmem [shape: f32[1,128], index: 1, kind: input, shape index: {}]   ;;  %s357_s2 = inlined_call_operand.vmem [shape: f32[1,128], index: 2, kind: input, shape index: {}]   ;;  %s358_s3 = inlined_call_operand.vmem [shape: bf16[128,128], index: 3, kind: input, shape index: {}]   ;;  %s359_s4 = inlined_call_operand.vmem [shape: f32[1,128], index: 4, kind: input, shape index: {}]   ;;  %s360_s5 = inlined_call_operand.hbm [shape: f32[16,128], index: 5, kind: output, shape index: {}]  }
   0x1   :  { %v210_v0 = vld [vmem:[%s355_s0] sm:$0xff]  }
   0x2   :  { %v211_v1 = vunpack.c.l.bf16 %v210_v0  ;;  %v212_v2 = vunpack.c.h.bf16 %v210_v0 }
   0x4   :  { %26 = vadd.xlane.f32.xlu0 %v211_v1 }
   0x5   :  { %10 = vsyncpa [#allocation3], 0  ;;  %v247_v3 = vld [vmem:[%s358_s3 + $0x38] sm:$0xff]   ;;  %v281_v4 = vmov 0.0   ;;  %v248_v13 = vld [vmem:[%s358_s3 + $0x30] sm:$0xff]   ;;  %vm282_vm0 = vmmov 0  }
   0x6   :  { %222 = vmatprep.subr.bf16.mxu0 %v281_v4  ;;  %v249_v14 = vld [vmem:[%s358_s3 + $0x28] sm:$0xff]   ;;  %v250_v15 = vld [vmem:[%s358_s3 + $0x20] sm:$0xff]   ;;  %238 = vmatprep.mubr.msk.bf16.mxu0 %vm282_vm0, %v281_v4  ;;  %v251_v16 = vld [vmem:[%s358_s3 + $0x18] sm:$0xff]   ;;  %s283_s15 = smov [#allocation2]  }
   0x7   :  { %223 = vmatpush3.bf16.msra.mxu0 %v247_v3  ;;  %v252_v17 = vld [vmem:[%s358_s3 + $0x10] sm:$0xff]   ;;  %v253_v18 = vld [vmem:[%s358_s3 + $0x8] sm:$0xff]   ;;  %v254_v19 = vld [vmem:[%s358_s3] sm:$0xff]  }
   0x8   :  { %28 = vadd.xlane.f32.xlu0 %v212_v2  ;;  %224 = vmatprep.subr.bf16.mxu0 %v281_v4  ;;  %v198_v28 = vld [vmem:[%s356_s1] ss:$0 sm:$0xff]  ;;  %s187_s1 = sshll.u32 %s283_s15, 4  ;;  %s188_s1 = int_to_ptr.vmem [resolvable:$true] %s187_s1 }
   0x9   :  { %v199_v32 = vld [vmem:[%s357_s2] ss:$0 sm:$0xff]  ;;  %s259_s2 = scalar_lea.vmem %s188_s1, 256  ;;  %p264_p1 = scmp.lt.s32.totalorder %s188_s1, %s188_s1 }
   0xa   :  { %v200_v37 = vld [vmem:[%s359_s4] ss:$0 sm:$0xff]  ;;  %p260_p0 = scmp.ne.s32.totalorder %s188_s1, %s259_s2  ;;  %p265_p2 = scmp.lt.s32.totalorder %s259_s2, %s259_s2 }
   0xb   :  { %225 = vmatpush3.bf16.msra.mxu0 %v248_v13 }
   0xc   :  { %226 = vmatprep.subr.bf16.mxu0 %v281_v4  ;;  %p266_p3 = por %p265_p2, %p264_p1 }
   0xe   :  { %p267_p4 = pnand %p266_p3, %p260_p0 }
   0xf   :  { %227 = vmatpush3.bf16.msra.mxu0 %v249_v14 }
  0x10   :  { %228 = vmatprep.subr.bf16.mxu0 %v281_v4 }
  0x13   :  { %229 = vmatpush3.bf16.msra.mxu0 %v250_v15 }
  0x14   :  { %230 = vmatprep.subr.bf16.mxu0 %v281_v4 }
  0x17   :  { %231 = vmatpush3.bf16.msra.mxu0 %v251_v16 }
  0x18   :  { %232 = vmatprep.subr.bf16.mxu0 %v281_v4 }
  0x1b   :  { %233 = vmatpush3.bf16.msra.mxu0 %v252_v17 }
  0x1c   :  { %234 = vmatprep.subr.bf16.mxu0 %v281_v4 }
  0x1f   :  { %235 = vmatpush3.bf16.msra.mxu0 %v253_v18 }
  0x20   :  { %236 = vmatprep.subr.bf16.mxu0 %v281_v4 }
  0x23   :  { %237 = vmatpush3.bf16.msra.mxu0 %v254_v19 }
  0x8d   :  { %v27_v5 = vpop.xlane.xlu0 %26 }
  0x8e   :  { %v31_v6 = vmul.f32 0.0078125, %v27_v5 }
  0x90   :  { %v33_v7 = vsub.f32 %v211_v1, %v31_v6 }
  0x91   :  { %v29_v8 = vpop.xlane.xlu0 %28 }
  0x92   :  { %v32_v9 = vmul.f32 0.0078125, %v29_v8  ;;  %v35_v10 = vmul.f32 %v33_v7, %v33_v7 }
  0x94   :  { %v34_v11 = vsub.f32 %v212_v2, %v32_v9  ;;  %37 = vadd.xlane.f32.xlu1 %v35_v10 }
  0x96   :  { %v36_v12 = vmul.f32 %v34_v11, %v34_v11 }
  0x98   :  { %39 = vadd.xlane.f32.xlu1 %v36_v12 }
 0x11d   :  { %v38_v20 = vpop.xlane.xlu1 %37 }
 0x11e   :  { %v41_v21 = vmul.f32 0.0078125, %v38_v20 }
 0x120   :  { %v43_v22 = vadd.f32 1e-05, %v41_v21 }
 0x121   :  { %v40_v23 = vpop.xlane.xlu1 %39 }
 0x122   :  { %255 = vrsqrt.f32 %v43_v22  ;;  %v42_v24 = vmul.f32 0.0078125, %v40_v23 }
 0x124   :  { %v44_v25 = vadd.f32 1e-05, %v42_v24 }
 0x126   :  { %257 = vrsqrt.f32 %v44_v25 }
 0x12f   :  { %v256_v26 = vpop.eup %255 }
 0x130   :  { %v47_v27 = vmul.f32 %v256_v26, %v33_v7 }
 0x132   :  { %v56_v31 = vmul.f32 %v198_v28, %v47_v27 }
 0x133   :  { %v258_v29 = vpop.eup %257 }
 0x134   :  { %v48_v30 = vmul.f32 %v258_v29, %v34_v11  ;;  %v65_v34 = vadd.f32 %v199_v32, %v56_v31 }
 0x136   :  { %v57_v33 = vmul.f32 %v198_v28, %v48_v30 }
 0x138   :  { %v66_v35 = vadd.f32 %v199_v32, %v57_v33 }
 0x13a   :  { %v67_v36 = vpack.c.bf16 %v66_v35, %v65_v34 }
 0x13c   :  { %239 = vmatmul.mubr.bf16.vlgmr.msra.gmra.mxu0 %v67_v36 }
 0x1fc   :  { %v173_v38 = vpop.f32.mrf.mxu0 }
 0x1fd   :  { %v174_v39 = vadd.f32 %v200_v37, %v173_v38 }
 0x1fe   :  { %v240_v40 = vpop.f32.mrf.mxu0 }
 0x1ff   :  { %180 = vst [vmem:[#allocation2] sm:$0xff] %v174_v39 }
 0x200   :  { %v176_v41 = vpop.f32.mrf.mxu0 }
 0x201   :  { %v177_v42 = vadd.f32 %v200_v37, %v176_v41 }
 0x202   :  { %v241_v43 = vpop.f32.mrf.mxu0 }
 0x203   :  { %181 = vst [vmem:[#allocation2 + $0x8] sm:$0xff] %v177_v42 }
 0x204   :  { %270 = shalt.err (!%p267_p4)
}
 0x205   :  { %s284_s16 = smov 128   ;;  %s285_s4 = smov 8  }
 0x206   :  { %193 = dma.vmem_to_hbm [thread:$0]  %s188_s1, 256, %s360_s5, [#allocation3], %s284_s16, %s284_s16, %s285_s4  }
 0x207   :  { %279 = dma.done.wait [#allocation3], 256  }
 0x208   :  { %280 = vsyncadd [#allocation3], 4294967040 }
 0x209   :  { %197 = vsyncpa [#allocation3], 1 }

</bundles_post_ra>
